<compile_context>
chip_gen: v7x
topology: tpu7x:2x2x1
jax: 0.10.0
libtpu: 0.0.40
codegen_flags: <defaults>
</compile_context>

<pallas_src>
import jax
import jax.numpy as jnp
import numpy as np
from jax.experimental import pallas as pl
from jax.experimental.pallas import tpu as pltpu


# ----------------------------- Pallas kernels -----------------------------

def conv_pool_kernel(x_ref, w_ref, b_ref, o_ref):
    """Fused 3x3 'same' conv + bias + ReLU + 2x2/stride-2 max-pool (small image batch).

    x_ref: [B, 16*Cin, M]    bf16 phase tensor; row (a*4+b)*Cin+ci holds
                             x_pad[2*h2+a, 2*w2+b, ci] flattened over (h2, w2)
    w_ref: [4*Cout, 16*Cin]  bf16; rows pp*Cout..(pp+1)*Cout-1 = zero-embedded weights
                             for pool phase pp in {(0,0),(0,1),(1,0),(1,1)}
    b_ref: [Cout, 1]         f32
    o_ref: [B, Cout, M]      channel-major pooled output, M = (H/2)*(W/2)
    """
    cout = o_ref.shape[1]
    bias = b_ref[...]                                       # [Cout, 1] broadcast over lanes
    for b in range(x_ref.shape[0]):                         # small, unrolled batch
        # one wide matmul covers all 4 pool phases (breaks the 4-matmul serial chain)
        acc = jnp.dot(w_ref[...], x_ref[b],
                      preferred_element_type=jnp.float32)   # [4*Cout, M] f32
        pooled = acc[:cout]
        for pp in range(1, 4):
            pooled = jnp.maximum(pooled, acc[pp * cout:(pp + 1) * cout])
        # max(relu(y+b)) == relu(max(y)+b): bias/ReLU applied once after the pool max.
        o_ref[b] = jnp.maximum(pooled + bias, 0.0).astype(o_ref.dtype)


def mlp_head_kernel(x_ref, w1_ref, b1_ref, w2_ref, b2_ref, o_ref):
    """fc1 + ReLU + (dropout = identity at inference) + fc2 + softmax(dim=1)."""
    h = jnp.dot(x_ref[...], w1_ref[...],                    # bf16 x bf16 -> f32 accumulate
                preferred_element_type=jnp.float32) + b1_ref[...]
    h = jnp.maximum(h, 0.0)
    # TODO(synk): nn.Dropout(0.5) is the identity in eval mode; training-mode RNG mask not implemented.
    logits = jnp.dot(h, w2_ref[...],
                     preferred_element_type=jnp.float32) + b2_ref[...]
    z = logits - jnp.max(logits, axis=1, keepdims=True)
    e = jnp.exp(z)
    o_ref[...] = (e / jnp.sum(e, axis=1, keepdims=True)).astype(o_ref.dtype)


# ------------------------------ glue wrappers ------------------------------

def _round_up(a, b):
    return ((a + b - 1) // b) * b


def _phase_split_nchw(x_nchw, dtype=jnp.bfloat16):
    """[N,C,H,W] -> padded(1), phase-split, channel-minor [N, 16*C, (H//2)*(W//2)] (bf16)."""
    n, c, h, w = x_nchw.shape
    h2, w2 = h // 2, w // 2
    xp = jnp.pad(x_nchw, ((0, 0), (0, 0), (1, 1), (1, 1)))
    phases = []
    for a in range(4):
        for b in range(4):
            ph = xp[:, :, a::2, b::2][:, :, :h2, :w2]        # [N, C, h2, w2]
            phases.append(ph.reshape(n, c, h2 * w2))         # [N, C, M]
    return jnp.concatenate(phases, axis=1).astype(dtype)     # [N, 16*C, M]


def embed_conv_weight(w_oihw, dtype=jnp.bfloat16):
    """torch conv weight [Cout,Cin,3,3] -> pool-phase-embedded [4*Cout, 16*Cin] (bf16)."""
    cout, cin = w_oihw.shape[0], w_oihw.shape[1]
    w_hw = jnp.transpose(w_oihw, (2, 3, 0, 1))               # [3,3,Cout,Cin]
    mats = []
    for p in range(2):
        for q in range(2):
            wp = jnp.pad(w_hw, ((p, 1 - p), (q, 1 - q), (0, 0), (0, 0)))  # [4,4,Cout,Cin]
            wp = wp.reshape(16, cout, cin)
            wp = jnp.transpose(wp, (1, 0, 2)).reshape(cout, 16 * cin)
            mats.append(wp)
    return jnp.concatenate(mats, axis=0).astype(dtype)       # [4*Cout, 16*Cin]


def prepare_params(params):
    """One-time weight prep (hoisted OUT of the per-step forward)."""
    return dict(
        conv1_w=embed_conv_weight(params["conv1_w"]),                     # [128, 16]  bf16
        conv1_b=params["conv1_b"].reshape(-1, 1).astype(jnp.float32),     # [32, 1]
        conv2_w=embed_conv_weight(params["conv2_w"]),                     # [256, 512] bf16
        conv2_b=params["conv2_b"].reshape(-1, 1).astype(jnp.float32),     # [64, 1]
        fc1_w=params["fc1_w"].astype(jnp.bfloat16),                       # [16384, 128]
        fc1_b=params["fc1_b"].astype(jnp.float32),
        fc2_w=params["fc2_w"].astype(jnp.float32),
        fc2_b=params["fc2_b"].astype(jnp.float32),
    )


def conv_relu_pool(x_nchw, w_emb, b_col, out_dtype=jnp.bfloat16):
    """One pool(relu(conv)) stage.  x_nchw: [N,Cin,H,W] -> [N,Cout,H/2,W/2] (bf16)."""
    n, _, h, w = x_nchw.shape
    h2, w2 = h // 2, w // 2
    m = h2 * w2
    k = w_emb.shape[1]                                       # 16 * Cin
    cout = w_emb.shape[0] // 4
    # Images per grid step: amortize per-step pipeline overhead, but keep >=2 grid
    # steps when possible so the "parallel" axis can shard across v7x's two TCs.
    bb = min(4, max(1, n // 2)) if n > 1 else 1
    n_pad = _round_up(n, bb)
    # TODO(synk): fold the 2x2 phase split into the kernel with strided DMAs from a
    # padded HBM input to avoid materializing this 4x-duplicated tensor in HBM.
    phases = _phase_split_nchw(x_nchw)                       # [N, 16*Cin, M] bf16
    if n_pad != n:
        phases = jnp.pad(phases, ((0, n_pad - n), (0, 0), (0, 0)))
    out = pl.pallas_call(
        conv_pool_kernel,
        out_shape=jax.ShapeDtypeStruct((n_pad, cout, m), out_dtype),
        grid_spec=pltpu.PrefetchScalarGridSpec(
            num_scalar_prefetch=0,
            grid=(n_pad // bb,),
            in_specs=[
                pl.BlockSpec((bb, k, m), lambda i: (i, 0, 0)),
                pl.BlockSpec((4 * cout, k), lambda i: (0, 0)),
                pl.BlockSpec((cout, 1), lambda i: (0, 0)),
            ],
            out_specs=pl.BlockSpec((bb, cout, m), lambda i: (i, 0, 0)),
        ),
        compiler_params=pltpu.CompilerParams(
            dimension_semantics=("parallel",)),
    )(phases, w_emb, b_col)
    return out[:n].reshape(n, cout, h2, w2)                  # NCHW, bf16


def mlp_head(x, w1, b1, w2, b2, block_n=256):
    """x: [N, D] bf16, w1: [D, H] bf16, rest f32.  Batch-tiled fc1+relu+fc2+softmax.

    block_n capped at 256: x tile (2 x 8 MiB) + resident fc1 weight (2 x 4 MiB) stays
    ~24 MiB, safe within v7x's 64 MiB physical VMEM while still near-roofline on v5e/v6e.
    """
    n, d = x.shape
    hdim = w1.shape[1]
    cdim = w2.shape[1]
    # Aim for >=2 grid steps (both v7x TCs) at small N; rows rounded to sublane multiple.
    bn = min(block_n, max(8, _round_up(pl.cdiv(n, 2), 8)))
    n_pad = _round_up(n, bn)
    if n > 1 and n_pad // bn < 2:
        n_pad = 2 * bn
    xp = jnp.pad(x, ((0, n_pad - n), (0, 0))) if n_pad != n else x
    out = pl.pallas_call(
        mlp_head_kernel,
        out_shape=jax.ShapeDtypeStruct((n_pad, cdim), jnp.float32),
        grid_spec=pltpu.PrefetchScalarGridSpec(
            num_scalar_prefetch=0,
            grid=(n_pad // bn,),
            in_specs=[
                pl.BlockSpec((bn, d), lambda i: (i, 0)),
                pl.BlockSpec((d, hdim), lambda i: (0, 0)),
                pl.BlockSpec((1, hdim), lambda i: (0, 0)),
                pl.BlockSpec((hdim, cdim), lambda i: (0, 0)),
                pl.BlockSpec((1, cdim), lambda i: (0, 0)),
            ],
            out_specs=pl.BlockSpec((bn, cdim), lambda i: (i, 0)),
        ),
        compiler_params=pltpu.CompilerParams(
            dimension_semantics=("parallel",),
            vmem_limit_bytes=40 * 1024 * 1024),
    )(xp, w1, b1.reshape(1, hdim), w2, b2.reshape(1, cdim))
    return out[:n]


def cnn_forward(x_nchw, p):
    """Forward pass with pre-prepared params `p` (see prepare_params)."""
    n = x_nchw.shape[0]
    x = conv_relu_pool(x_nchw, p["conv1_w"], p["conv1_b"])   # [N, 32, 32, 32] bf16
    x = conv_relu_pool(x, p["conv2_w"], p["conv2_b"])        # [N, 64, 16, 16] bf16
    # AdaptiveAvgPool2d((16,16)): identity for 64x64 inputs (spatial already 16x16).
    # TODO(synk): real adaptive average pooling for non-64x64 inputs is not implemented.
    assert x.shape[2] == 16 and x.shape[3] == 16
    # Output is already NCHW channel-major -> torch.flatten equivalent is a plain reshape.
    x = x.reshape(n, 64 * 16 * 16)                           # [N, 16384] bf16
    return mlp_head(x, p["fc1_w"], p["fc1_b"], p["fc2_w"], p["fc2_b"])


# ------------------------- deterministic parameters -------------------------

def init_params(key):
    ks = jax.random.split(key, 8)

    def u(k, shape, fan_in):
        bound = 1.0 / float(np.sqrt(fan_in))
        return jax.random.uniform(k, shape, jnp.float32, -bound, bound)

    return dict(
        conv1_w=u(ks[0], (32, 1, 3, 3), 1 * 9),     # torch layout [Cout,Cin,kH,kW]
        conv1_b=u(ks[1], (32,), 1 * 9),
        conv2_w=u(ks[2], (64, 32, 3, 3), 32 * 9),
        conv2_b=u(ks[3], (64,), 32 * 9),
        fc1_w=u(ks[4], (16384, 128), 16384),        # stored as [in, out] (= torch W.T)
        fc1_b=u(ks[5], (128,), 16384),
        fc2_w=u(ks[6], (128, 2), 128),
        fc2_b=u(ks[7], (2,), 128),
    )


# ------------------------------ pure-JAX check ------------------------------

def reference_forward(x_nchw, params):
    x = jnp.transpose(x_nchw, (0, 2, 3, 1))

    def conv(x, wt, b):
        w = jnp.transpose(wt, (2, 3, 1, 0))  # HWIO
        y = jax.lax.conv_general_dilated(
            x, w, (1, 1), ((1, 1), (1, 1)),
            dimension_numbers=("NHWC", "HWIO", "NHWC"))
        y = jax.nn.relu(y + b)
        return jax.lax.reduce_window(y, -jnp.inf, jax.lax.max,
                                     (1, 2, 2, 1), (1, 2, 2, 1), "VALID")

    x = conv(x, params["conv1_w"], params["conv1_b"])
    x = conv(x, params["conv2_w"], params["conv2_b"])
    x = jnp.transpose(x, (0, 3, 1, 2)).reshape(x.shape[0], -1)
    h = jax.nn.relu(x @ params["fc1_w"] + params["fc1_b"])
    logits = h @ params["fc2_w"] + params["fc2_b"]
    return jax.nn.softmax(logits, axis=1)


if __name__ == "__main__":
    key = jax.random.PRNGKey(0)
    pkey, xkey = jax.random.split(key)
    params = init_params(pkey)
    prepared = prepare_params(params)        # weight prep hoisted out of the forward
    # NCHW input, 1 channel, 64x64 (so AdaptiveAvgPool2d((16,16)) is the identity).
    x = jax.random.normal(xkey, (2, 1, 64, 64), jnp.float32)

    fwd = jax.jit(cnn_forward)
    out = jax.block_until_ready(fwd(x, prepared))

    ref = reference_forward(x, params)
    np.testing.assert_allclose(np.asarray(out), np.asarray(ref),
                               rtol=2e-2, atol=2e-2)
    assert out.shape == (2, 2)
    assert np.allclose(np.asarray(out).sum(axis=1), 1.0, atol=1e-3)
    print("KERNEL_OK")
</pallas_src>

<mosaic_0001>
module attributes {stable_mosaic.version = 11 : i64} {
  func.func @conv_pool_kernel(%arg0: i32, %arg1: memref<1x16x1024xbf16, #tpu.memory_space<vmem>>, %arg2: memref<128x16xbf16, #tpu.memory_space<vmem>>, %arg3: memref<32x1xf32, #tpu.memory_space<vmem>>, %arg4: memref<1x32x1024xbf16, #tpu.memory_space<vmem>>) attributes {dimension_semantics = [#tpu.dimension_semantics<parallel>], iteration_bounds = array<i64: 2>, scalar_prefetch = 0 : i64, scratch_operands = 0 : i64, tpu.core_type = #tpu.core_type<tc>, window_params = [{transform_indices = @transform_0, window_bounds = array<i64: 1, 16, 1024>}, {pipeline_mode = #tpu.pipeline_mode<synchronous>, transform_indices = @transform_1, window_bounds = array<i64: 128, 16>}, {pipeline_mode = #tpu.pipeline_mode<synchronous>, transform_indices = @transform_2, window_bounds = array<i64: 32, 1>}, {transform_indices = @transform_3, window_bounds = array<i64: 1, 32, 1024>}]} {
    %c0 = arith.constant 0 : index
    %c0_0 = arith.constant 0 : index
    %0 = vector.load %arg3[%c0, %c0_0] : memref<32x1xf32, #tpu.memory_space<vmem>>, vector<32x1xf32>
    %c0_1 = arith.constant 0 : index
    %c0_2 = arith.constant 0 : index
    %1 = vector.load %arg2[%c0_1, %c0_2] : memref<128x16xbf16, #tpu.memory_space<vmem>>, vector<128x16xbf16>
    %c0_3 = arith.constant 0 : index
    %c0_4 = arith.constant 0 : index
    %c0_5 = arith.constant 0 : index
    %2 = vector.load %arg1[%c0_3, %c0_4, %c0_5] : memref<1x16x1024xbf16, #tpu.memory_space<vmem>>, vector<1x16x1024xbf16>
    %3 = vector.shape_cast %2 : vector<1x16x1024xbf16> to vector<16x1024xbf16>
    %cst = arith.constant dense<0.000000e+00> : vector<128x1024xf32>
    %4 = tpu.matmul %1, %3, %cst {dimension_numbers = #tpu.dot_dimension_numbers<[1], [0], [0], [1], [0, 0, 1, 1], [], []>} : vector<128x16xbf16>, vector<16x1024xbf16>, vector<128x1024xf32> -> vector<128x1024xf32>
    %5 = vector.extract_strided_slice %4 {offsets = [0, 0], sizes = [32, 1024], strides = [1, 1]} : vector<128x1024xf32> to vector<32x1024xf32>
    %6 = vector.extract_strided_slice %4 {offsets = [32, 0], sizes = [32, 1024], strides = [1, 1]} : vector<128x1024xf32> to vector<32x1024xf32>
    %7 = arith.maximumf %5, %6 : vector<32x1024xf32>
    %8 = vector.extract_strided_slice %4 {offsets = [64, 0], sizes = [32, 1024], strides = [1, 1]} : vector<128x1024xf32> to vector<32x1024xf32>
    %9 = arith.maximumf %7, %8 : vector<32x1024xf32>
    %10 = vector.extract_strided_slice %4 {offsets = [96, 0], sizes = [32, 1024], strides = [1, 1]} : vector<128x1024xf32> to vector<32x1024xf32>
    %11 = arith.maximumf %9, %10 : vector<32x1024xf32>
    %12 = vector.broadcast %0 : vector<32x1xf32> to vector<32x1024xf32>
    %13 = arith.addf %11, %12 : vector<32x1024xf32>
    %cst_6 = arith.constant 0.000000e+00 : f32
    %14 = vector.broadcast %cst_6 : f32 to vector<32x1024xf32>
    %15 = arith.maximumf %13, %14 : vector<32x1024xf32>
    %16 = arith.truncf %15 : vector<32x1024xf32> to vector<32x1024xbf16>
    %c0_7 = arith.constant 0 : index
    %c0_8 = arith.constant 0 : index
    %c0_9 = arith.constant 0 : index
    %17 = vector.load %arg4[%c0_7, %c0_8, %c0_9] : memref<1x32x1024xbf16, #tpu.memory_space<vmem>>, vector<1x32x1024xbf16>
    %18 = vector.shape_cast %17 : vector<1x32x1024xbf16> to vector<32x1024xbf16>
    %19 = vector.shape_cast %16 : vector<32x1024xbf16> to vector<1x32x1024xbf16>
    tpu.vector_store %arg4[%c0_7, %c0_8, %c0_9], %19 {strides = array<i32>} : memref<1x32x1024xbf16, #tpu.memory_space<vmem>>, vector<1x32x1024xbf16>,
    return
  }
  func.func @transform_0(%arg0: i32) -> (i32, i32, i32) {
    %c0_i32 = arith.constant 0 : i32
    %c0_i32_0 = arith.constant 0 : i32
    %c0_i32_1 = arith.constant 0 : i32
    return %arg0, %c0_i32, %c0_i32_0 : i32, i32, i32
  }
  func.func @transform_1(%arg0: i32) -> (i32, i32) {
    %c0_i32 = arith.constant 0 : i32
    %c0_i32_0 = arith.constant 0 : i32
    %c0_i32_1 = arith.constant 0 : i32
    return %c0_i32, %c0_i32_0 : i32, i32
  }
  func.func @transform_2(%arg0: i32) -> (i32, i32) {
    %c0_i32 = arith.constant 0 : i32
    %c0_i32_0 = arith.constant 0 : i32
    %c0_i32_1 = arith.constant 0 : i32
    return %c0_i32, %c0_i32_0 : i32, i32
  }
  func.func @transform_3(%arg0: i32) -> (i32, i32, i32) {
    %c0_i32 = arith.constant 0 : i32
    %c0_i32_0 = arith.constant 0 : i32
    %c0_i32_1 = arith.constant 0 : i32
    return %arg0, %c0_i32, %c0_i32_0 : i32, i32, i32
  }
}

module attributes {stable_mosaic.version = 11 : i64} {
  func.func @conv_pool_kernel(%arg0: i32, %arg1: memref<1x512x256xbf16, #tpu.memory_space<vmem>>, %arg2: memref<256x512xbf16, #tpu.memory_space<vmem>>, %arg3: memref<64x1xf32, #tpu.memory_space<vmem>>, %arg4: memref<1x64x256xbf16, #tpu.memory_space<vmem>>) attributes {dimension_semantics = [#tpu.dimension_semantics<parallel>], iteration_bounds = array<i64: 2>, scalar_prefetch = 0 : i64, scratch_operands = 0 : i64, tpu.core_type = #tpu.core_type<tc>, window_params = [{transform_indices = @transform_0, window_bounds = array<i64: 1, 512, 256>}, {pipeline_mode = #tpu.pipeline_mode<synchronous>, transform_indices = @transform_1, window_bounds = array<i64: 256, 512>}, {pipeline_mode = #tpu.pipeline_mode<synchronous>, transform_indices = @transform_2, window_bounds = array<i64: 64, 1>}, {transform_indices = @transform_3, window_bounds = array<i64: 1, 64, 256>}]} {
    %c0 = arith.constant 0 : index
    %c0_0 = arith.constant 0 : index
    %0 = vector.load %arg3[%c0, %c0_0] : memref<64x1xf32, #tpu.memory_space<vmem>>, vector<64x1xf32>
    %c0_1 = arith.constant 0 : index
    %c0_2 = arith.constant 0 : index
    %1 = vector.load %arg2[%c0_1, %c0_2] : memref<256x512xbf16, #tpu.memory_space<vmem>>, vector<256x512xbf16>
    %c0_3 = arith.constant 0 : index
    %c0_4 = arith.constant 0 : index
    %c0_5 = arith.constant 0 : index
    %2 = vector.load %arg1[%c0_3, %c0_4, %c0_5] : memref<1x512x256xbf16, #tpu.memory_space<vmem>>, vector<1x512x256xbf16>
    %3 = vector.shape_cast %2 : vector<1x512x256xbf16> to vector<512x256xbf16>
    %cst = arith.constant dense<0.000000e+00> : vector<256x256xf32>
    %4 = tpu.matmul %1, %3, %cst {dimension_numbers = #tpu.dot_dimension_numbers<[1], [0], [0], [1], [0, 0, 1, 1], [], []>} : vector<256x512xbf16>, vector<512x256xbf16>, vector<256x256xf32> -> vector<256x256xf32>
    %5 = vector.extract_strided_slice %4 {offsets = [0, 0], sizes = [64, 256], strides = [1, 1]} : vector<256x256xf32> to vector<64x256xf32>
    %6 = vector.extract_strided_slice %4 {offsets = [64, 0], sizes = [64, 256], strides = [1, 1]} : vector<256x256xf32> to vector<64x256xf32>
    %7 = arith.maximumf %5, %6 : vector<64x256xf32>
    %8 = vector.extract_strided_slice %4 {offsets = [128, 0], sizes = [64, 256], strides = [1, 1]} : vector<256x256xf32> to vector<64x256xf32>
    %9 = arith.maximumf %7, %8 : vector<64x256xf32>
    %10 = vector.extract_strided_slice %4 {offsets = [192, 0], sizes = [64, 256], strides = [1, 1]} : vector<256x256xf32> to vector<64x256xf32>
    %11 = arith.maximumf %9, %10 : vector<64x256xf32>
    %12 = vector.broadcast %0 : vector<64x1xf32> to vector<64x256xf32>
    %13 = arith.addf %11, %12 : vector<64x256xf32>
    %cst_6 = arith.constant 0.000000e+00 : f32
    %14 = vector.broadcast %cst_6 : f32 to vector<64x256xf32>
    %15 = arith.maximumf %13, %14 : vector<64x256xf32>
    %16 = arith.truncf %15 : vector<64x256xf32> to vector<64x256xbf16>
    %c0_7 = arith.constant 0 : index
    %c0_8 = arith.constant 0 : index
    %c0_9 = arith.constant 0 : index
    %17 = vector.load %arg4[%c0_7, %c0_8, %c0_9] : memref<1x64x256xbf16, #tpu.memory_space<vmem>>, vector<1x64x256xbf16>
    %18 = vector.shape_cast %17 : vector<1x64x256xbf16> to vector<64x256xbf16>
    %19 = vector.shape_cast %16 : vector<64x256xbf16> to vector<1x64x256xbf16>
    tpu.vector_store %arg4[%c0_7, %c0_8, %c0_9], %19 {strides = array<i32>} : memref<1x64x256xbf16, #tpu.memory_space<vmem>>, vector<1x64x256xbf16>,
    return
  }
  func.func @transform_0(%arg0: i32) -> (i32, i32, i32) {
    %c0_i32 = arith.constant 0 : i32
    %c0_i32_0 = arith.constant 0 : i32
    %c0_i32_1 = arith.constant 0 : i32
    return %arg0, %c0_i32, %c0_i32_0 : i32, i32, i32
  }
  func.func @transform_1(%arg0: i32) -> (i32, i32) {
    %c0_i32 = arith.constant 0 : i32
    %c0_i32_0 = arith.constant 0 : i32
    %c0_i32_1 = arith.constant 0 : i32
    return %c0_i32, %c0_i32_0 : i32, i32
  }
  func.func @transform_2(%arg0: i32) -> (i32, i32) {
    %c0_i32 = arith.constant 0 : i32
    %c0_i32_0 = arith.constant 0 : i32
    %c0_i32_1 = arith.constant 0 : i32
    return %c0_i32, %c0_i32_0 : i32, i32
  }
  func.func @transform_3(%arg0: i32) -> (i32, i32, i32) {
    %c0_i32 = arith.constant 0 : i32
    %c0_i32_0 = arith.constant 0 : i32
    %c0_i32_1 = arith.constant 0 : i32
    return %arg0, %c0_i32, %c0_i32_0 : i32, i32, i32
  }
}

module attributes {stable_mosaic.version = 11 : i64} {
  func.func @mlp_head_kernel(%arg0: i32, %arg1: memref<8x16384xbf16, #tpu.memory_space<vmem>>, %arg2: memref<16384x128xbf16, #tpu.memory_space<vmem>>, %arg3: memref<1x128xf32, #tpu.memory_space<vmem>>, %arg4: memref<128x2xf32, #tpu.memory_space<vmem>>, %arg5: memref<1x2xf32, #tpu.memory_space<vmem>>, %arg6: memref<8x2xf32, #tpu.memory_space<vmem>>) attributes {dimension_semantics = [#tpu.dimension_semantics<parallel>], iteration_bounds = array<i64: 2>, scalar_prefetch = 0 : i64, scratch_operands = 0 : i64, tpu.core_type = #tpu.core_type<tc>, window_params = [{transform_indices = @transform_0, window_bounds = array<i64: 8, 16384>}, {pipeline_mode = #tpu.pipeline_mode<synchronous>, transform_indices = @transform_1, window_bounds = array<i64: 16384, 128>}, {pipeline_mode = #tpu.pipeline_mode<synchronous>, transform_indices = @transform_2, window_bounds = array<i64: 1, 128>}, {pipeline_mode = #tpu.pipeline_mode<synchronous>, transform_indices = @transform_3, window_bounds = array<i64: 128, 2>}, {pipeline_mode = #tpu.pipeline_mode<synchronous>, transform_indices = @transform_4, window_bounds = array<i64: 1, 2>}, {transform_indices = @transform_5, window_bounds = array<i64: 8, 2>}]} {
    %c0 = arith.constant 0 : index
    %c0_0 = arith.constant 0 : index
    %0 = vector.load %arg1[%c0, %c0_0] : memref<8x16384xbf16, #tpu.memory_space<vmem>>, vector<8x16384xbf16>
    %c0_1 = arith.constant 0 : index
    %c0_2 = arith.constant 0 : index
    %1 = vector.load %arg2[%c0_1, %c0_2] : memref<16384x128xbf16, #tpu.memory_space<vmem>>, vector<16384x128xbf16>
    %cst = arith.constant dense<0.000000e+00> : vector<8x128xf32>
    %2 = tpu.matmul %0, %1, %cst {dimension_numbers = #tpu.dot_dimension_numbers<[1], [0], [0], [1], [0, 0, 1, 1], [], []>} : vector<8x16384xbf16>, vector<16384x128xbf16>, vector<8x128xf32> -> vector<8x128xf32>
    %c0_3 = arith.constant 0 : index
    %c0_4 = arith.constant 0 : index
    %3 = vector.load %arg3[%c0_3, %c0_4] : memref<1x128xf32, #tpu.memory_space<vmem>>, vector<1x128xf32>
    %4 = vector.broadcast %3 : vector<1x128xf32> to vector<8x128xf32>
    %5 = arith.addf %2, %4 : vector<8x128xf32>
    %cst_5 = arith.constant 0.000000e+00 : f32
    %6 = vector.broadcast %cst_5 : f32 to vector<8x128xf32>
    %7 = arith.maximumf %5, %6 : vector<8x128xf32>
    %c0_6 = arith.constant 0 : index
    %c0_7 = arith.constant 0 : index
    %8 = vector.load %arg4[%c0_6, %c0_7] : memref<128x2xf32, #tpu.memory_space<vmem>>, vector<128x2xf32>
    %cst_8 = arith.constant dense<0.000000e+00> : vector<8x2xf32>
    %9 = tpu.matmul %7, %8, %cst_8 {dimension_numbers = #tpu.dot_dimension_numbers<[1], [0], [0], [1], [0, 0, 1, 1], [], []>} : vector<8x128xf32>, vector<128x2xf32>, vector<8x2xf32> -> vector<8x2xf32>
    %c0_9 = arith.constant 0 : index
    %c0_10 = arith.constant 0 : index
    %10 = vector.load %arg5[%c0_9, %c0_10] : memref<1x2xf32, #tpu.memory_space<vmem>>, vector<1x2xf32>
    %11 = vector.broadcast %10 : vector<1x2xf32> to vector<8x2xf32>
    %12 = arith.addf %9, %11 : vector<8x2xf32>
    %cst_11 = arith.constant dense<0xFF800000> : vector<8xf32>
    %13 = vector.multi_reduction <maximumf>, %12, %cst_11 [1] : vector<8x2xf32> to vector<8xf32>
    %14 = vector.shape_cast %13 : vector<8xf32> to vector<8x1xf32>
    %15 = vector.broadcast %14 : vector<8x1xf32> to vector<8x2xf32>
    %16 = arith.subf %12, %15 : vector<8x2xf32>
    %17 = math.exp %16 : vector<8x2xf32>
    %cst_12 = arith.constant dense<0.000000e+00> : vector<8xf32>
    %18 = vector.multi_reduction <add>, %17, %cst_12 [1] : vector<8x2xf32> to vector<8xf32>
    %19 = vector.shape_cast %18 : vector<8xf32> to vector<8x1xf32>
    %20 = vector.broadcast %19 : vector<8x1xf32> to vector<8x2xf32>
    %21 = arith.divf %17, %20 : vector<8x2xf32>
    %c0_13 = arith.constant 0 : index
    %c0_14 = arith.constant 0 : index
    %22 = vector.load %arg6[%c0_13, %c0_14] : memref<8x2xf32, #tpu.memory_space<vmem>>, vector<8x2xf32>
    tpu.vector_store %arg6[%c0_13, %c0_14], %21 {strides = array<i32>} : memref<8x2xf32, #tpu.memory_space<vmem>>, vector<8x2xf32>,
    return
  }
  func.func @transform_0(%arg0: i32) -> (i32, i32) {
    %c0_i32 = arith.constant 0 : i32
    %c0_i32_0 = arith.constant 0 : i32
    return %arg0, %c0_i32 : i32, i32
  }
  func.func @transform_1(%arg0: i32) -> (i32, i32) {
    %c0_i32 = arith.constant 0 : i32
    %c0_i32_0 = arith.constant 0 : i32
    %c0_i32_1 = arith.constant 0 : i32
    return %c0_i32, %c0_i32_0 : i32, i32
  }
  func.func @transform_2(%arg0: i32) -> (i32, i32) {
    %c0_i32 = arith.constant 0 : i32
    %c0_i32_0 = arith.constant 0 : i32
    %c0_i32_1 = arith.constant 0 : i32
    return %c0_i32, %c0_i32_0 : i32, i32
  }
  func.func @transform_3(%arg0: i32) -> (i32, i32) {
    %c0_i32 = arith.constant 0 : i32
    %c0_i32_0 = arith.constant 0 : i32
    %c0_i32_1 = arith.constant 0 : i32
    return %c0_i32, %c0_i32_0 : i32, i32
  }
  func.func @transform_4(%arg0: i32) -> (i32, i32) {
    %c0_i32 = arith.constant 0 : i32
    %c0_i32_0 = arith.constant 0 : i32
    %c0_i32_1 = arith.constant 0 : i32
    return %c0_i32, %c0_i32_0 : i32, i32
  }
  func.func @transform_5(%arg0: i32) -> (i32, i32) {
    %c0_i32 = arith.constant 0 : i32
    %c0_i32_0 = arith.constant 0 : i32
    return %arg0, %c0_i32 : i32, i32
  }
}

</mosaic_0001>

<bundles_post_ra>
// kernel: cnn_forward.3
= control target key start
LH: loop header
LB: loop body
LE: loop exit
PB: predicated region body
PF: predicated region fallthrough
CT: control target
= control target key end

     0   :  { %s1245_s12 = smov 0   ;;  %s1495_s0 = inlined_call_operand.vmem [shape: bf16[2,16,1024], index: 0, kind: input, shape index: {}]   ;;  %s1496_s1 = inlined_call_operand.vmem [shape: bf16[128,16], index: 1, kind: input, shape index: {}]   ;;  %s1497_s2 = inlined_call_operand.vmem [shape: f32[32,1], index: 2, kind: input, shape index: {}]   ;;  %s1498_s3 = inlined_call_operand.vmem [shape: bf16[2,32,1024], index: 3, kind: output, shape index: {}]  }
   0x1 LB: > { %s1104_s13 = sadd.s32 4294967295, %s1222_s12   ;;  %p1108_p0 = scmp.ge.s32.totalorder %s1222_s12, 1  ;;  %s1222_s12 = sphi %s1245_s12, %s13_s12  }
   0x2   : > { %p137_p1 = scmp.lt.s32.totalorder %s1222_s12, 3 }
   0x4   : > { %p138_p2 = pnand %p1108_p0, %p137_p1 }
   0x5   : > { %p161_p3 = scmp.lt.s32.totalorder (!%p138_p2), %s1104_s13, 1  ;;  %v1224_v0 = vmov (!%p138_p2), 0   ;;  %v1208_v14 = vld [vmem:[%s1496_s1] sm:$0xff] (!%p138_p2)   ;;  %vm280_vm0 = vcmask (!%p138_p2), 130048   ;;  %v174_v19 = vld [vmem:[%s1497_s2 + $0x10] sm:$0xff] (!%p138_p2)  ;;  %v173_v20 = vld [vmem:[%s1497_s2 + $0x8] sm:$0xff] (!%p138_p2) }
   0x6   : > { %141 = sbr.rel (%p138_p2) target bundleno = 369 (0x171), region = 32  ;;  %337 = vmatprep.mubr.bf16.mxu0 (!%p138_p2), %v1224_v0  ;;  %450 = vmatprep.mubr.bf16.mxu1 (!%p138_p2), %v1224_v0  ;;  %v172_v18 = vld [vmem:[%s1497_s2] sm:$0xff] (!%p138_p2)  ;;  %v175_v21 = vld [vmem:[%s1497_s2 + $0x18] sm:$0xff] (!%p138_p2)  ;;  %v1209_v22 = vld [vmem:[%s1496_s1 + $0x8] sm:$0xff] (!%p138_p2)  }
   0x7   : > { %1206 = vset.pattern.permute.xlu0 (!%p138_p2), %v1224_v0  ;;  %1207 = vset.pattern.permute.xlu1 (!%p138_p2), %v1224_v0  ;;  %v1210_v23 = vld [vmem:[%s1496_s1 + $0x10] sm:$0xff] (!%p138_p2)   ;;  %v1211_v24 = vld [vmem:[%s1496_s1 + $0x18] sm:$0xff] (!%p138_p2)   ;;  %v1212_v25 = vld [vmem:[%s1496_s1 + $0x20] sm:$0xff] (!%p138_p2)  }
   0x8   : > { %855 = vperm.xlu0 (!%p138_p2), %1206, %v172_v18   ;;  %865 = vperm.xlu1 (!%p138_p2), %1207, %v174_v19   ;;  %v1213_v26 = vld [vmem:[%s1496_s1 + $0x28] sm:$0xff] (!%p138_p2)   ;;  %v1214_v27 = vld [vmem:[%s1496_s1 + $0x30] sm:$0xff] (!%p138_p2)   ;;  %v1215_v28 = vld [vmem:[%s1496_s1 + $0x38] sm:$0xff] (!%p138_p2)  }
   0xc   : > { %860 = vperm.xlu0 (!%p138_p2), %1206, %v173_v20   ;;  %870 = vperm.xlu1 (!%p138_p2), %1207, %v175_v21  }
   0xd   : > { %s1500_s13 = smov (!%p161_p3, %s1104_s13), 1 }
   0xe   : > { %s1179_s14 = sshll.u32 %s1500_s13, 6 }
   0xf   : > { %s165_s17 = scalar_lea.vmem %s1495_s0, %s1179_s14 }
  0x10   : > { %v192_v1 = vld [vmem:[%s165_s17] sm:$0xff]  ;;  %v193_v3 = vld [vmem:[%s165_s17 + $0x8] sm:$0xff]  ;;  %v194_v7 = vld [vmem:[%s165_s17 + $0x10] sm:$0xff] }
  0x11   : > { %v196_v2 = vld [vmem:[%s165_s17 + $0x20] sm:$0xff]  ;;  %v197_v5 = vld [vmem:[%s165_s17 + $0x28] sm:$0xff]  ;;  %v198_v8 = vld [vmem:[%s165_s17 + $0x30] sm:$0xff] }
  0x12   : > { %v1122_v4 = vcombine.high %v192_v1, %v196_v2  ;;  %v1121_v6 = vcombine.low %v192_v1, %v196_v2  ;;  %v1124_v9 = vcombine.high %v193_v3, %v197_v5  ;;  %v1123_v10 = vcombine.low %v193_v3, %v197_v5  ;;  %v195_v12 = vld [vmem:[%s165_s17 + $0x18] sm:$0xff] }
  0x13   : > { %v1126_v11 = vcombine.high %v194_v7, %v198_v8  ;;  %v199_v13 = vld [vmem:[%s165_s17 + $0x38] sm:$0xff]  ;;  %v1125_v16 = vcombine.low %v194_v7, %v198_v8  ;;  %s1180_s17 = sshll.u32 %s1500_s13, 7 }
  0x14   : > { %305 = vmatprep.subr.bf16.mxu0 %v1122_v4  ;;  %v1128_v15 = vcombine.high %v195_v12, %v199_v13  ;;  %418 = vmatprep.subr.bf16.mxu1 %v1124_v9  ;;  %v1127_v17 = vcombine.low %v195_v12, %v199_v13  ;;  %s1409_s19 = scalar_lea.vmem %s1498_s3, %s1180_s17 }
  0x15   : > { %306 = vmatpush1.bf16.msra.mxu0 %v1121_v6  ;;  %419 = vmatpush1.bf16.msra.mxu1 %v1123_v10 }
  0x16   : > { %531 = vmatprep.subr.bf16.mxu0 %v1126_v11  ;;  %644 = vmatprep.subr.bf16.mxu1 %v1128_v15 }
  0x18   : > { %1129 = vmatmul.mubr.msk.bf16.vlgmr.msra.gmra.mrb[0].mxu0 %vm280_vm0, %v1208_v14  ;;  %1137 = vmatmul.mubr.msk.bf16.vlgmr.msra.gmra.mrb[0].mxu1 %vm280_vm0, %v1208_v14 }
  0x19   : > { %532 = vmatpush1.bf16.msra.mxu0 %v1125_v16  ;;  %645 = vmatpush1.bf16.msra.mxu1 %v1127_v17 }
  0x1a   : > { %347 = vmatprep.mubr.bf16.mxu0 %v1224_v0  ;;  %460 = vmatprep.mubr.bf16.mxu1 %v1224_v0 }
  0x20   : > { %1130 = vmatmul.mubr.msk.bf16.gmra.mrb[4].mxu0 %vm280_vm0, %v1209_v22  ;;  %1138 = vmatmul.mubr.msk.bf16.gmra.mrb[4].mxu1 %vm280_vm0, %v1209_v22 }
  0x21   : > { %357 = vmatprep.mubr.bf16.mxu0 %v1224_v0  ;;  %470 = vmatprep.mubr.bf16.mxu1 %v1224_v0 }
  0x28   : > { %1131 = vmatmul.mubr.msk.bf16.gmra.mrb[8].mxu0 %vm280_vm0, %v1210_v23  ;;  %1139 = vmatmul.mubr.msk.bf16.gmra.mrb[8].mxu1 %vm280_vm0, %v1210_v23 }
  0x29   : > { %367 = vmatprep.mubr.bf16.mxu0 %v1224_v0  ;;  %480 = vmatprep.mubr.bf16.mxu1 %v1224_v0 }
  0x30   : > { %1132 = vmatmul.mubr.msk.bf16.gmra.mrb[12].mxu0 %vm280_vm0, %v1211_v24  ;;  %1140 = vmatmul.mubr.msk.bf16.gmra.mrb[12].mxu1 %vm280_vm0, %v1211_v24 }
  0x31   : > { %377 = vmatprep.mubr.bf16.mxu0 %v1224_v0  ;;  %490 = vmatprep.mubr.bf16.mxu1 %v1224_v0 }
  0x38   : > { %1133 = vmatmul.mubr.msk.bf16.gmra.mrb[16].mxu0 %vm280_vm0, %v1212_v25  ;;  %1141 = vmatmul.mubr.msk.bf16.gmra.mrb[16].mxu1 %vm280_vm0, %v1212_v25 }
  0x39   : > { %387 = vmatprep.mubr.bf16.mxu0 %v1224_v0  ;;  %500 = vmatprep.mubr.bf16.mxu1 %v1224_v0 }
  0x40   : > { %1134 = vmatmul.mubr.msk.bf16.gmra.mrb[20].mxu0 %vm280_vm0, %v1213_v26  ;;  %1142 = vmatmul.mubr.msk.bf16.gmra.mrb[20].mxu1 %vm280_vm0, %v1213_v26 }
  0x41   : > { %397 = vmatprep.mubr.bf16.mxu0 %v1224_v0  ;;  %510 = vmatprep.mubr.bf16.mxu1 %v1224_v0 }
  0x48   : > { %1135 = vmatmul.mubr.msk.bf16.gmra.mrb[24].mxu0 %vm280_vm0, %v1214_v27  ;;  %1143 = vmatmul.mubr.msk.bf16.gmra.mrb[24].mxu1 %vm280_vm0, %v1214_v27 }
  0x49   : > { %407 = vmatprep.mubr.bf16.mxu0 %v1224_v0  ;;  %520 = vmatprep.mubr.bf16.mxu1 %v1224_v0 }
  0x50   : > { %1136 = vmatmul.mubr.msk.bf16.gmra.mrb[28].mxu0 %vm280_vm0, %v1215_v28  ;;  %1144 = vmatmul.mubr.msk.bf16.gmra.mrb[28].mxu1 %vm280_vm0, %v1215_v28 }
  0x51   : > { %563 = vmatprep.mubr.bf16.mxu0 %v1224_v0  ;;  %676 = vmatprep.mubr.bf16.mxu1 %v1224_v0 }
  0x58   : > { %1145 = vmatmul.mubr.msk.bf16.vlgmr.msra.gmra.mrb[32].mxu0 %vm280_vm0, %v1208_v14  ;;  %1153 = vmatmul.mubr.msk.bf16.vlgmr.msra.gmra.mrb[32].mxu1 %vm280_vm0, %v1208_v14 }
  0x59   : > { %573 = vmatprep.mubr.bf16.mxu0 %v1224_v0  ;;  %686 = vmatprep.mubr.bf16.mxu1 %v1224_v0 }
  0x60   : > { %1146 = vmatmul.mubr.msk.bf16.gmra.mrb[36].mxu0 %vm280_vm0, %v1209_v22  ;;  %1154 = vmatmul.mubr.msk.bf16.gmra.mrb[36].mxu1 %vm280_vm0, %v1209_v22 }
  0x61   : > { %583 = vmatprep.mubr.bf16.mxu0 %v1224_v0  ;;  %696 = vmatprep.mubr.bf16.mxu1 %v1224_v0 }
  0x68   : > { %1147 = vmatmul.mubr.msk.bf16.gmra.mrb[40].mxu0 %vm280_vm0, %v1210_v23  ;;  %1155 = vmatmul.mubr.msk.bf16.gmra.mrb[40].mxu1 %vm280_vm0, %v1210_v23 }
  0x69   : > { %593 = vmatprep.mubr.bf16.mxu0 %v1224_v0  ;;  %706 = vmatprep.mubr.bf16.mxu1 %v1224_v0 }
  0x70   : > { %1148 = vmatmul.mubr.msk.bf16.gmra.mrb[44].mxu0 %vm280_vm0, %v1211_v24  ;;  %1156 = vmatmul.mubr.msk.bf16.gmra.mrb[44].mxu1 %vm280_vm0, %v1211_v24 }
  0x71   : > { %603 = vmatprep.mubr.bf16.mxu0 %v1224_v0  ;;  %716 = vmatprep.mubr.bf16.mxu1 %v1224_v0 }
  0x78   : > { %1149 = vmatmul.mubr.msk.bf16.gmra.mrb[48].mxu0 %vm280_vm0, %v1212_v25  ;;  %1157 = vmatmul.mubr.msk.bf16.gmra.mrb[48].mxu1 %vm280_vm0, %v1212_v25 }
  0x79   : > { %613 = vmatprep.mubr.bf16.mxu0 %v1224_v0  ;;  %726 = vmatprep.mubr.bf16.mxu1 %v1224_v0 }
  0x80   : > { %1150 = vmatmul.mubr.msk.bf16.gmra.mrb[52].mxu0 %vm280_vm0, %v1213_v26  ;;  %1158 = vmatmul.mubr.msk.bf16.gmra.mrb[52].mxu1 %vm280_vm0, %v1213_v26 }
  0x81   : > { %623 = vmatprep.mubr.bf16.mxu0 %v1224_v0  ;;  %736 = vmatprep.mubr.bf16.mxu1 %v1224_v0 }
  0x88   : > { %1151 = vmatmul.mubr.msk.bf16.gmra.mrb[56].mxu0 %vm280_vm0, %v1214_v27  ;;  %1159 = vmatmul.mubr.msk.bf16.gmra.mrb[56].mxu1 %vm280_vm0, %v1214_v27 }
  0x89   : > { %633 = vmatprep.mubr.bf16.mxu0 %v1224_v0  ;;  %746 = vmatprep.mubr.bf16.mxu1 %v1224_v0 }
  0x90   : > { %1152 = vmatmul.mubr.msk.bf16.gmra.mrb[60].mxu0 %vm280_vm0, %v1215_v28  ;;  %1160 = vmatmul.mubr.msk.bf16.gmra.mrb[60].mxu1 %vm280_vm0, %v1215_v28 }
  0xeb   : > { %v339_v29 = vpop.f32.mrb[0].mxu0  ;;  %v452_v30 = vpop.f32.mrb[0].mxu1 }
  0xec   : > { %v341_v31 = vpop.f32.mrb[1].mxu0  ;;  %v454_v32 = vpop.f32.mrb[1].mxu1 }
  0xed   : > { %v343_v33 = vpop.f32.mrb[2].mxu0  ;;  %v456_v34 = vpop.f32.mrb[2].mxu1 }
  0xee   : > { %v345_v35 = vpop.f32.mrb[3].mxu0  ;;  %v458_v36 = vpop.f32.mrb[3].mxu1 }
  0xf3   : > { %v349_v37 = vpop.f32.mrb[4].mxu0  ;;  %v462_v38 = vpop.f32.mrb[4].mxu1 }
  0xf4   : > { %v351_v39 = vpop.f32.mrb[5].mxu0  ;;  %v1361_v40 = vpop.f32.mrb[5].mxu1 }
  0xf5   : > { %v1363_v41 = vpop.f32.mrb[6].mxu0  ;;  %v1365_v42 = vpop.f32.mrb[6].mxu1 }
  0xf6   : > { %v1367_v43 = vpop.f32.mrb[7].mxu0  ;;  %v1369_v44 = vpop.f32.mrb[7].mxu1 }
  0xfb   : > { %v359_v45 = vpop.f32.mrb[8].mxu0  ;;  %v472_v47 = vpop.f32.mrb[8].mxu1 }
  0xfc   : > { %v757_v46 = vmax.f32 %v339_v29, %v359_v45  ;;  %v361_v48 = vpop.f32.mrb[9].mxu0  ;;  %v759_v49 = vmax.f32 %v452_v30, %v472_v47  ;;  %v474_v51 = vpop.f32.mrb[9].mxu1 }
  0xfd   : > { %v758_v50 = vmax.f32 %v341_v31, %v361_v48  ;;  %v363_v52 = vpop.f32.mrb[10].mxu0  ;;  %v760_v53 = vmax.f32 %v454_v32, %v474_v51  ;;  %v476_v55 = vpop.f32.mrb[10].mxu1 }
  0xfe   : > { %v765_v54 = vmax.f32 %v343_v33, %v363_v52  ;;  %v365_v56 = vpop.f32.mrb[11].mxu0  ;;  %v767_v57 = vmax.f32 %v456_v34, %v476_v55  ;;  %v478_v59 = vpop.f32.mrb[11].mxu1 }
  0xff   : > { %v766_v58 = vmax.f32 %v345_v35, %v365_v56  ;;  %v768_v60 = vmax.f32 %v458_v36, %v478_v59  ;;  %v1376_v30 = vpop.permute.xlu0 %855  ;;  %v1396_v48 = vpop.permute.xlu1 %865 }
 0x103   : > { %v369_v61 = vpop.f32.mrb[12].mxu0  ;;  %v482_v63 = vpop.f32.mrb[12].mxu1 }
 0x104   : > { %v773_v62 = vmax.f32 %v349_v37, %v369_v61  ;;  %v371_v0 = vpop.f32.mrb[13].mxu0  ;;  %v775_v1 = vmax.f32 %v462_v38, %v482_v63  ;;  %v484_v3 = vpop.f32.mrb[13].mxu1 }
 0x105   : > { %v774_v2 = vmax.f32 %v351_v39, %v371_v0  ;;  %v373_v4 = vpop.f32.mrb[14].mxu0  ;;  %v776_v5 = vmax.f32 %v1361_v40, %v484_v3  ;;  %v486_v7 = vpop.f32.mrb[14].mxu1 }
 0x106   : > { %v781_v6 = vmax.f32 %v1363_v41, %v373_v4  ;;  %v375_v8 = vpop.f32.mrb[15].mxu0  ;;  %v783_v9 = vmax.f32 %v1365_v42, %v486_v7  ;;  %v488_v11 = vpop.f32.mrb[15].mxu1 }
 0x107   : > { %v782_v10 = vmax.f32 %v1367_v43, %v375_v8  ;;  %v784_v12 = vmax.f32 %v1369_v44, %v488_v11 }
 0x10b   : > { %v379_v13 = vpop.f32.mrb[16].mxu0  ;;  %v492_v15 = vpop.f32.mrb[16].mxu1 }
 0x10c   : > { %v789_v14 = vmax.f32 %v757_v46, %v379_v13  ;;  %v381_v16 = vpop.f32.mrb[17].mxu0  ;;  %v791_v17 = vmax.f32 %v759_v49, %v492_v15  ;;  %v494_v19 = vpop.f32.mrb[17].mxu1 }
 0x10d   : > { %v790_v18 = vmax.f32 %v758_v50, %v381_v16  ;;  %v383_v20 = vpop.f32.mrb[18].mxu0  ;;  %v792_v21 = vmax.f32 %v760_v53, %v494_v19  ;;  %v496_v23 = vpop.f32.mrb[18].mxu1 }
 0x10e   : > { %v797_v22 = vmax.f32 %v765_v54, %v383_v20  ;;  %v385_v24 = vpop.f32.mrb[19].mxu0  ;;  %v799_v25 = vmax.f32 %v767_v57, %v496_v23  ;;  %v498_v27 = vpop.f32.mrb[19].mxu1 }
 0x10f   : > { %v798_v26 = vmax.f32 %v766_v58, %v385_v24  ;;  %v800_v28 = vmax.f32 %v768_v60, %v498_v27  ;;  %v1394_v46 = vpop.permute.xlu0 %860 }
 0x113   : > { %v389_v29 = vpop.f32.mrb[20].mxu0  ;;  %v502_v32 = vpop.f32.mrb[20].mxu1 }
 0x114   : > { %v1378_v31 = vmax.f32 %v773_v62, %v389_v29  ;;  %v391_v33 = vpop.f32.mrb[21].mxu0  ;;  %v1380_v34 = vmax.f32 %v775_v1, %v502_v32  ;;  %v504_v36 = vpop.f32.mrb[21].mxu1 }
 0x115   : > { %v1382_v35 = vmax.f32 %v774_v2, %v391_v33  ;;  %v393_v37 = vpop.f32.mrb[22].mxu0  ;;  %v1384_v38 = vmax.f32 %v776_v5, %v504_v36  ;;  %v506_v40 = vpop.f32.mrb[22].mxu1 }
 0x116   : > { %v1386_v39 = vmax.f32 %v781_v6, %v393_v37  ;;  %v395_v41 = vpop.f32.mrb[23].mxu0  ;;  %v1388_v42 = vmax.f32 %v783_v9, %v506_v40  ;;  %v508_v44 = vpop.f32.mrb[23].mxu1 }
 0x117   : > { %v1390_v43 = vmax.f32 %v782_v10, %v395_v41  ;;  %v1392_v45 = vmax.f32 %v784_v12, %v508_v44 }
 0x11b   : > { %v399_v47 = vpop.f32.mrb[24].mxu0  ;;  %v512_v50 = vpop.f32.mrb[24].mxu1 }
 0x11c   : > { %v821_v49 = vmax.f32 %v789_v14, %v399_v47  ;;  %v401_v51 = vpop.f32.mrb[25].mxu0  ;;  %v823_v52 = vmax.f32 %v791_v17, %v512_v50  ;;  %v514_v54 = vpop.f32.mrb[25].mxu1 }
 0x11d   : > { %v822_v53 = vmax.f32 %v790_v18, %v401_v51  ;;  %v403_v55 = vpop.f32.mrb[26].mxu0  ;;  %v824_v57 = vmax.f32 %v792_v21, %v514_v54  ;;  %v516_v59 = vpop.f32.mrb[26].mxu1 }
 0x11e   : > { %v873_v56 = vadd.f32 %v1376_v30, %v821_v49  ;;  %v829_v58 = vmax.f32 %v797_v22, %v403_v55  ;;  %v405_v60 = vpop.f32.mrb[27].mxu0  ;;  %v875_v61 = vadd.f32 %v1376_v30, %v823_v52  ;;  %v831_v63 = vmax.f32 %v799_v25, %v516_v59  ;;  %v518_v1 = vpop.f32.mrb[27].mxu1 }
 0x11f   : > { %v874_v62 = vadd.f32 %v1376_v30, %v822_v53  ;;  %v830_v0 = vmax.f32 %v798_v26, %v405_v60  ;;  %v876_v3 = vadd.f32 %v1376_v30, %v824_v57  ;;  %v832_v4 = vmax.f32 %v800_v28, %v518_v1  ;;  %v1412_v17 = vpop.permute.xlu1 %870 }
 0x120   : > { %v905_v2 = vmax.f32 %v873_v56, 0.0  ;;  %v881_v5 = vadd.f32 %v1394_v46, %v829_v58  ;;  %v907_v6 = vmax.f32 %v875_v61, 0.0  ;;  %v883_v9 = vadd.f32 %v1394_v46, %v831_v63 }
 0x121   : > { %v906_v7 = vmax.f32 %v874_v62, 0.0  ;;  %v882_v8 = vadd.f32 %v1394_v46, %v830_v0  ;;  %v908_v10 = vmax.f32 %v876_v3, 0.0  ;;  %v884_v11 = vadd.f32 %v1394_v46, %v832_v4 }
 0x122   : > { %v913_v12 = vmax.f32 %v881_v5, 0.0  ;;  %v915_v15 = vmax.f32 %v883_v9, 0.0 }
 0x123   : > { %v1181_v13 = vpack.c.bf16 %v906_v7, %v905_v2  ;;  %v914_v14 = vmax.f32 %v882_v8, 0.0  ;;  %v409_v16 = vpop.f32.mrb[28].mxu0  ;;  %v1182_v18 = vpack.c.bf16 %v908_v10, %v907_v6  ;;  %v916_v19 = vmax.f32 %v884_v11, 0.0  ;;  %v522_v21 = vpop.f32.mrb[28].mxu1 }
 0x124   : > { %v837_v20 = vmax.f32 %v1378_v31, %v409_v16  ;;  %v411_v22 = vpop.f32.mrb[29].mxu0  ;;  %v839_v24 = vmax.f32 %v1380_v34, %v522_v21  ;;  %v524_v26 = vpop.f32.mrb[29].mxu1 }
 0x125   : > { %1033 = vst [vmem:[%s1409_s19] sm:$0xff] %v1181_v13  ;;  %v1185_v23 = vpack.c.bf16 %v914_v14, %v913_v12  ;;  %v838_v25 = vmax.f32 %v1382_v35, %v411_v22  ;;  %v413_v27 = vpop.f32.mrb[30].mxu0  ;;  %1034 = vst [vmem:[%s1409_s19 + $0x8] sm:$0xff] %v1182_v18  ;;  %v1186_v28 = vpack.c.bf16 %v916_v19, %v915_v15  ;;  %v526_v33 = vpop.f32.mrb[30].mxu1 }
 0x126   : > { %v889_v29 = vadd.f32 %v1396_v48, %v837_v20  ;;  %v840_v32 = vmax.f32 %v1384_v38, %v524_v26  ;;  %v845_v31 = vmax.f32 %v1386_v39, %v413_v27  ;;  %v415_v36 = vpop.f32.mrb[31].mxu0  ;;  %v891_v37 = vadd.f32 %v1396_v48, %v839_v24  ;;  %v528_v41 = vpop.f32.mrb[31].mxu1 }
 0x127   : > { %1037 = vst [vmem:[%s1409_s19 + $0x20] sm:$0xff] %v1185_v23  ;;  %v890_v34 = vadd.f32 %v1396_v48, %v838_v25  ;;  %v847_v35 = vmax.f32 %v1388_v42, %v526_v33  ;;  %v846_v40 = vmax.f32 %v1390_v43, %v415_v36  ;;  %1038 = vst [vmem:[%s1409_s19 + $0x28] sm:$0xff] %v1186_v28 }
 0x128   : > { %v921_v44 = vmax.f32 %v889_v29, 0.0  ;;  %v892_v47 = vadd.f32 %v1396_v48, %v840_v32  ;;  %v848_v38 = vmax.f32 %v1392_v45, %v528_v41  ;;  %v897_v39 = vadd.f32 %v1412_v17, %v845_v31 }
 0x129   : > { %v923_v49 = vmax.f32 %v891_v37, 0.0  ;;  %v922_v50 = vmax.f32 %v890_v34, 0.0  ;;  %v898_v51 = vadd.f32 %v1412_v17, %v846_v40  ;;  %v899_v52 = vadd.f32 %v1412_v17, %v847_v35 }
 0x12a   : > { %v924_v42 = vmax.f32 %v892_v47, 0.0  ;;  %v900_v43 = vadd.f32 %v1412_v17, %v848_v38  ;;  %v929_v53 = vmax.f32 %v897_v39, 0.0 }
 0x12b   : > { %v1189_v54 = vpack.c.bf16 %v922_v50, %v921_v44  ;;  %v930_v55 = vmax.f32 %v898_v51, 0.0  ;;  %v931_v56 = vmax.f32 %v899_v52, 0.0  ;;  %v565_v45 = vpop.f32.mrb[32].mxu0  ;;  %v678_v59 = vpop.f32.mrb[32].mxu1 }
 0x12c   : > { %v1190_v57 = vpack.c.bf16 %v924_v42, %v923_v49  ;;  %v932_v58 = vmax.f32 %v900_v43, 0.0  ;;  %v567_v60 = vpop.f32.mrb[33].mxu0  ;;  %v680_v62 = vpop.f32.mrb[33].mxu1 }
 0x12d   : > { %1041 = vst [vmem:[%s1409_s19 + $0x40] sm:$0xff] %v1189_v54  ;;  %v1193_v61 = vpack.c.bf16 %v930_v55, %v929_v53  ;;  %v569_v63 = vpop.f32.mrb[34].mxu0  ;;  %v682_v1 = vpop.f32.mrb[34].mxu1 }
 0x12e   : > { %1042 = vst [vmem:[%s1409_s19 + $0x48] sm:$0xff] %v1190_v57  ;;  %v1194_v0 = vpack.c.bf16 %v932_v58, %v931_v56  ;;  %v571_v2 = vpop.f32.mrb[35].mxu0  ;;  %v684_v3 = vpop.f32.mrb[35].mxu1 }
 0x12f   : > { %1045 = vst [vmem:[%s1409_s19 + $0x60] sm:$0xff] %v1193_v61 }
 0x130   : > { %1046 = vst [vmem:[%s1409_s19 + $0x68] sm:$0xff] %v1194_v0 }
 0x133   : > { %v575_v4 = vpop.f32.mrb[36].mxu0  ;;  %v688_v5 = vpop.f32.mrb[36].mxu1 }
 0x134   : > { %v577_v6 = vpop.f32.mrb[37].mxu0  ;;  %v690_v7 = vpop.f32.mrb[37].mxu1 }
 0x135   : > { %v579_v8 = vpop.f32.mrb[38].mxu0  ;;  %v1438_v9 = vpop.f32.mrb[38].mxu1 }
 0x136   : > { %v1440_v10 = vpop.f32.mrb[39].mxu0  ;;  %v1442_v11 = vpop.f32.mrb[39].mxu1 }
 0x13b   : > { %v585_v12 = vpop.f32.mrb[40].mxu0  ;;  %v698_v14 = vpop.f32.mrb[40].mxu1 }
 0x13c   : > { %v761_v13 = vmax.f32 %v565_v45, %v585_v12  ;;  %v587_v15 = vpop.f32.mrb[41].mxu0  ;;  %v763_v16 = vmax.f32 %v678_v59, %v698_v14  ;;  %v700_v19 = vpop.f32.mrb[41].mxu1 }
 0x13d   : > { %v762_v18 = vmax.f32 %v567_v60, %v587_v15  ;;  %v589_v20 = vpop.f32.mrb[42].mxu0  ;;  %v764_v21 = vmax.f32 %v680_v62, %v700_v19  ;;  %v702_v23 = vpop.f32.mrb[42].mxu1 }
 0x13e   : > { %v769_v22 = vmax.f32 %v569_v63, %v589_v20  ;;  %v591_v24 = vpop.f32.mrb[43].mxu0  ;;  %v771_v25 = vmax.f32 %v682_v1, %v702_v23  ;;  %v704_v27 = vpop.f32.mrb[43].mxu1 }
 0x13f   : > { %v770_v26 = vmax.f32 %v571_v2, %v591_v24  ;;  %v772_v28 = vmax.f32 %v684_v3, %v704_v27 }
 0x143   : > { %v595_v29 = vpop.f32.mrb[44].mxu0  ;;  %v708_v31 = vpop.f32.mrb[44].mxu1 }
 0x144   : > { %v777_v32 = vmax.f32 %v575_v4, %v595_v29  ;;  %v597_v33 = vpop.f32.mrb[45].mxu0  ;;  %v779_v36 = vmax.f32 %v688_v5, %v708_v31  ;;  %v710_v34 = vpop.f32.mrb[45].mxu1 }
 0x145   : > { %v778_v37 = vmax.f32 %v577_v6, %v597_v33  ;;  %v599_v35 = vpop.f32.mrb[46].mxu0  ;;  %v780_v40 = vmax.f32 %v690_v7, %v710_v34  ;;  %v712_v44 = vpop.f32.mrb[46].mxu1 }
 0x146   : > { %v785_v41 = vmax.f32 %v579_v8, %v599_v35  ;;  %v601_v47 = vpop.f32.mrb[47].mxu0  ;;  %v787_v38 = vmax.f32 %v1438_v9, %v712_v44  ;;  %v714_v49 = vpop.f32.mrb[47].mxu1 }
 0x147   : > { %v786_v39 = vmax.f32 %v1440_v10, %v601_v47  ;;  %v788_v50 = vmax.f32 %v1442_v11, %v714_v49 }
 0x14b   : > { %v605_v51 = vpop.f32.mrb[48].mxu0  ;;  %v718_v42 = vpop.f32.mrb[48].mxu1 }
 0x14c   : > { %v793_v52 = vmax.f32 %v761_v13, %v605_v51  ;;  %v607_v43 = vpop.f32.mrb[49].mxu0  ;;  %v795_v53 = vmax.f32 %v763_v16, %v718_v42  ;;  %v720_v55 = vpop.f32.mrb[49].mxu1 }
 0x14d   : > { %v794_v54 = vmax.f32 %v762_v18, %v607_v43  ;;  %v609_v56 = vpop.f32.mrb[50].mxu0  ;;  %v796_v45 = vmax.f32 %v764_v21, %v720_v55  ;;  %v722_v58 = vpop.f32.mrb[50].mxu1 }
 0x14e   : > { %v801_v57 = vmax.f32 %v769_v22, %v609_v56  ;;  %v611_v59 = vpop.f32.mrb[51].mxu0  ;;  %v803_v60 = vmax.f32 %v771_v25, %v722_v58  ;;  %v724_v62 = vpop.f32.mrb[51].mxu1 }
 0x14f   : > { %v802_v61 = vmax.f32 %v770_v26, %v611_v59  ;;  %v804_v63 = vmax.f32 %v772_v28, %v724_v62 }
 0x153   : > { %v615_v0 = vpop.f32.mrb[52].mxu0  ;;  %v728_v2 = vpop.f32.mrb[52].mxu1 }
 0x154   : > { %v809_v1 = vmax.f32 %v777_v32, %v615_v0  ;;  %v617_v3 = vpop.f32.mrb[53].mxu0  ;;  %v1447_v4 = vmax.f32 %v779_v36, %v728_v2  ;;  %v730_v6 = vpop.f32.mrb[53].mxu1 }
 0x155   : > { %v1449_v5 = vmax.f32 %v778_v37, %v617_v3  ;;  %v619_v7 = vpop.f32.mrb[54].mxu0  ;;  %v1451_v8 = vmax.f32 %v780_v40, %v730_v6  ;;  %v732_v10 = vpop.f32.mrb[54].mxu1 }
 0x156   : > { %v1453_v9 = vmax.f32 %v785_v41, %v619_v7  ;;  %v621_v11 = vpop.f32.mrb[55].mxu0  ;;  %v1455_v12 = vmax.f32 %v787_v38, %v732_v10  ;;  %v734_v14 = vpop.f32.mrb[55].mxu1 }
 0x157   : > { %v1457_v13 = vmax.f32 %v786_v39, %v621_v11  ;;  %v1459_v15 = vmax.f32 %v788_v50, %v734_v14 }
 0x15b   : > { %v625_v16 = vpop.f32.mrb[56].mxu0  ;;  %v738_v19 = vpop.f32.mrb[56].mxu1 }
 0x15c   : > { %v825_v18 = vmax.f32 %v793_v52, %v625_v16  ;;  %v627_v20 = vpop.f32.mrb[57].mxu0  ;;  %v827_v21 = vmax.f32 %v795_v53, %v738_v19  ;;  %v740_v23 = vpop.f32.mrb[57].mxu1 }
 0x15d   : > { %v826_v22 = vmax.f32 %v794_v54, %v627_v20  ;;  %v629_v24 = vpop.f32.mrb[58].mxu0  ;;  %v828_v26 = vmax.f32 %v796_v45, %v740_v23  ;;  %v742_v28 = vpop.f32.mrb[58].mxu1 }
 0x15e   : > { %v877_v25 = vadd.f32 %v1376_v30, %v825_v18  ;;  %v833_v27 = vmax.f32 %v801_v57, %v629_v24  ;;  %v631_v29 = vpop.f32.mrb[59].mxu0  ;;  %v879_v32 = vadd.f32 %v1376_v30, %v827_v21  ;;  %v835_v33 = vmax.f32 %v803_v60, %v742_v28  ;;  %v744_v37 = vpop.f32.mrb[59].mxu1 }
 0x15f   : > { %v878_v31 = vadd.f32 %v1376_v30, %v826_v22  ;;  %v834_v36 = vmax.f32 %v802_v61, %v631_v29  ;;  %v880_v35 = vadd.f32 %v1376_v30, %v828_v26  ;;  %v836_v41 = vmax.f32 %v804_v63, %v744_v37 }
 0x160   : > { %v909_v34 = vmax.f32 %v877_v25, 0.0  ;;  %v885_v40 = vadd.f32 %v1394_v46, %v833_v27  ;;  %v911_v44 = vmax.f32 %v879_v32, 0.0  ;;  %v887_v38 = vadd.f32 %v1394_v46, %v835_v33 }
 0x161   : > { %v910_v47 = vmax.f32 %v878_v31, 0.0  ;;  %v886_v39 = vadd.f32 %v1394_v46, %v834_v36  ;;  %v912_v49 = vmax.f32 %v880_v35, 0.0  ;;  %v888_v51 = vadd.f32 %v1394_v46, %v836_v41 }
 0x162   : > { %v917_v50 = vmax.f32 %v885_v40, 0.0  ;;  %v919_v42 = vmax.f32 %v887_v38, 0.0 }
 0x163   : > { %v1183_v52 = vpack.c.bf16 %v910_v47, %v909_v34  ;;  %v918_v43 = vmax.f32 %v886_v39, 0.0  ;;  %v635_v53 = vpop.f32.mrb[60].mxu0  ;;  %v1184_v30 = vpack.c.bf16 %v912_v49, %v911_v44  ;;  %v920_v54 = vmax.f32 %v888_v51, 0.0  ;;  %v748_v56 = vpop.f32.mrb[60].mxu1 }
 0x164   : > { %v841_v55 = vmax.f32 %v809_v1, %v635_v53  ;;  %v637_v45 = vpop.f32.mrb[61].mxu0  ;;  %v843_v58 = vmax.f32 %v1447_v4, %v748_v56  ;;  %v750_v60 = vpop.f32.mrb[61].mxu1 }
 0x165   : > { %1035 = vst [vmem:[%s1409_s19 + $0x10] sm:$0xff] %v1183_v52  ;;  %v1187_v57 = vpack.c.bf16 %v918_v43, %v917_v50  ;;  %v842_v59 = vmax.f32 %v1449_v5, %v637_v45  ;;  %v639_v46 = vpop.f32.mrb[62].mxu0  ;;  %1036 = vst [vmem:[%s1409_s19 + $0x18] sm:$0xff] %v1184_v30  ;;  %v1188_v61 = vpack.c.bf16 %v920_v54, %v919_v42  ;;  %v752_v1 = vpop.f32.mrb[62].mxu1 }
 0x166   : > { %v893_v62 = vadd.f32 %v1396_v48, %v841_v55  ;;  %v844_v63 = vmax.f32 %v1451_v8, %v750_v60  ;;  %v849_v0 = vmax.f32 %v1453_v9, %v639_v46  ;;  %v641_v2 = vpop.f32.mrb[63].mxu0  ;;  %v895_v3 = vadd.f32 %v1396_v48, %v843_v58  ;;  %v754_v7 = vpop.f32.mrb[63].mxu1 }
 0x167   : > { %1039 = vst [vmem:[%s1409_s19 + $0x30] sm:$0xff] %v1187_v57  ;;  %v894_v4 = vadd.f32 %v1396_v48, %v842_v59  ;;  %v851_v5 = vmax.f32 %v1455_v12, %v752_v1  ;;  %v850_v6 = vmax.f32 %v1457_v13, %v641_v2  ;;  %1040 = vst [vmem:[%s1409_s19 + $0x38] sm:$0xff] %v1188_v61 }
 0x168   : > { %v925_v10 = vmax.f32 %v893_v62, 0.0  ;;  %v896_v11 = vadd.f32 %v1396_v48, %v844_v63  ;;  %v901_v8 = vadd.f32 %v1412_v17, %v849_v0  ;;  %v852_v9 = vmax.f32 %v1459_v15, %v754_v7 }
 0x169   : > { %v927_v14 = vmax.f32 %v895_v3, 0.0  ;;  %v926_v16 = vmax.f32 %v894_v4, 0.0  ;;  %v903_v18 = vadd.f32 %v1412_v17, %v851_v5  ;;  %v902_v12 = vadd.f32 %v1412_v17, %v850_v6 }
 0x16a   : > { %v928_v13 = vmax.f32 %v896_v11, 0.0  ;;  %v933_v19 = vmax.f32 %v901_v8, 0.0  ;;  %v904_v20 = vadd.f32 %v1412_v17, %v852_v9 }
 0x16b   : > { %v1191_v21 = vpack.c.bf16 %v926_v16, %v925_v10  ;;  %v935_v22 = vmax.f32 %v903_v18, 0.0  ;;  %v934_v48 = vmax.f32 %v902_v12, 0.0 }
 0x16c   : > { %v1192_v23 = vpack.c.bf16 %v928_v13, %v927_v14  ;;  %v936_v24 = vmax.f32 %v904_v20, 0.0 }
 0x16d   : > { %1043 = vst [vmem:[%s1409_s19 + $0x50] sm:$0xff] %v1191_v21  ;;  %v1195_v25 = vpack.c.bf16 %v934_v48, %v933_v19 }
 0x16e   : > { %1044 = vst [vmem:[%s1409_s19 + $0x58] sm:$0xff] %v1192_v23  ;;  %v1196_v15 = vpack.c.bf16 %v936_v24, %v935_v22 }
 0x16f   : > { %1047 = vst [vmem:[%s1409_s19 + $0x70] sm:$0xff] %v1195_v25 }
 0x170   : > { %1048 = vst [vmem:[%s1409_s19 + $0x78] sm:$0xff] %v1196_v15 }
 0x171 PF: > { %s13_s12 = sadd.s32 1, %s1222_s12  }
 0x172   : > { %p10_p4 = scmp.ge.s32.totalorder %s13_s12, 4  }
 0x174   :  { %12 = sbr.rel (!%p10_p4) target bundleno = 1 (0x1), region = 62 }

// kernel: cnn_forward.4
= control target key start
LH: loop header
LB: loop body
LE: loop exit
PB: predicated region body
PF: predicated region fallthrough
CT: control target
= control target key end

     0   :  { %s2017_s12 = smov 0   ;;  %s2522_s0 = inlined_call_operand.vmem [shape: bf16[2,512,256], index: 0, kind: input, shape index: {}]   ;;  %s2523_s1 = inlined_call_operand.vmem [shape: bf16[256,512], index: 1, kind: input, shape index: {}]   ;;  %s2524_s2 = inlined_call_operand.vmem [shape: f32[64,1], index: 2, kind: input, shape index: {}]   ;;  %s2525_s3 = inlined_call_operand.vmem [shape: bf16[2,64,256], index: 3, kind: output, shape index: {}]  }
   0x1 LB: > { %s1564_s13 = sadd.s32 4294967295, %s1994_s12   ;;  %p1568_p0 = scmp.ge.s32.totalorder %s1994_s12, 1  ;;  %s1994_s12 = sphi %s2017_s12, %s13_s12  }
   0x2   : > { %p137_p1 = scmp.lt.s32.totalorder %s1994_s12, 3 }
   0x4   : > { %p138_p2 = pnand %p1568_p0, %p137_p1 }
   0x5   : > { %p161_p3 = scmp.lt.s32.totalorder (!%p138_p2), %s1564_s13, 1  ;;  %v1894_v0 = vld [vmem:[%s2523_s1 + $0x4] ss:$16 sps:$4 sm:$0xff] (!%p138_p2)   ;;  %v1897_v1 = vld [vmem:[%s2523_s1 + $0xc] ss:$16 sps:$4 sm:$0xff] (!%p138_p2)  }
   0x6   : > { %141 = sbr.rel (%p138_p2) target bundleno = 428 (0x1ac), region = 32  ;;  %979 = vmatprep.mubr.bf16.mxu1 (!%p138_p2), %v1894_v0  ;;  %1172 = vmatprep.mubr.bf16.mxu0 (!%p138_p2), %v1897_v1 }
   0xd   : > { %s2527_s13 = smov (!%p161_p3, %s1564_s13), 1 }
   0xe   : > { %s1711_s18 = sshll.u32 %s2527_s13, 9  ;;  %s1712_s10 = sshll.u32 %s2527_s13, 6 }
   0xf   : > { %s2037_s21 = scalar_lea.vmem %s2522_s0, %s1711_s18  ;;  %s2497_s15 = scalar_lea.vmem %s2525_s3, %s1712_s10 }
  0x10   : > { %v1796_v2 = vld [vmem:[%s2037_s21 + $0x4] ss:$8 sps:$4 sm:$0xff]   ;;  %v1800_v4 = vld [vmem:[%s2037_s21] ss:$8 sps:$4 sm:$0xff]   ;;  %v1802_v6 = vld [vmem:[%s2037_s21 + $0x14] ss:$8 sps:$4 sm:$0xff]  }
  0x11   : > { %v1798_v3 = vld [vmem:[%s2037_s21 + $0x104] ss:$8 sps:$4 sm:$0xff]   ;;  %947 = vmatprep.subr.bf16.mxu1 %v1796_v2  ;;  %v1801_v5 = vld [vmem:[%s2037_s21 + $0x100] ss:$8 sps:$4 sm:$0xff]   ;;  %v1804_v7 = vld [vmem:[%s2037_s21 + $0x114] ss:$8 sps:$4 sm:$0xff]  }
  0x12   : > { %1140 = vmatprep.subr.bf16.mxu0 %v1798_v3  ;;  %948 = vmatpush1.bf16.msra.mxu1 %v1800_v4  ;;  %v1806_v8 = vld [vmem:[%s2037_s21 + $0x10] ss:$8 sps:$4 sm:$0xff]   ;;  %v1808_v10 = vld [vmem:[%s2037_s21 + $0x24] ss:$8 sps:$4 sm:$0xff]   ;;  %v1812_v12 = vld [vmem:[%s2037_s21 + $0x20] ss:$8 sps:$4 sm:$0xff]  }
  0x13   : > { %1141 = vmatpush1.bf16.msra.mxu0 %v1801_v5  ;;  %949 = vmatprep.subr.bf16.mxu1 %v1802_v6  ;;  %v1807_v9 = vld [vmem:[%s2037_s21 + $0x110] ss:$8 sps:$4 sm:$0xff]   ;;  %v1810_v11 = vld [vmem:[%s2037_s21 + $0x124] ss:$8 sps:$4 sm:$0xff]   ;;  %v1813_v13 = vld [vmem:[%s2037_s21 + $0x120] ss:$8 sps:$4 sm:$0xff]  }
  0x14   : > { %1142 = vmatprep.subr.bf16.mxu0 %v1804_v7  ;;  %v1814_v14 = vld [vmem:[%s2037_s21 + $0x34] ss:$8 sps:$4 sm:$0xff]   ;;  %v1818_v16 = vld [vmem:[%s2037_s21 + $0x30] ss:$8 sps:$4 sm:$0xff]   ;;  %v1820_v18 = vld [vmem:[%s2037_s21 + $0x44] ss:$8 sps:$4 sm:$0xff]  }
  0x15   : > { %v1816_v15 = vld [vmem:[%s2037_s21 + $0x134] ss:$8 sps:$4 sm:$0xff]   ;;  %v1819_v17 = vld [vmem:[%s2037_s21 + $0x130] ss:$8 sps:$4 sm:$0xff]   ;;  %v1822_v19 = vld [vmem:[%s2037_s21 + $0x144] ss:$8 sps:$4 sm:$0xff]  }
  0x16   : > { %950 = vmatpush1.bf16.msra.mxu1 %v1806_v8  ;;  %v1824_v20 = vld [vmem:[%s2037_s21 + $0x40] ss:$8 sps:$4 sm:$0xff]   ;;  %v1826_v22 = vld [vmem:[%s2037_s21 + $0x54] ss:$8 sps:$4 sm:$0xff]   ;;  %v1830_v24 = vld [vmem:[%s2037_s21 + $0x50] ss:$8 sps:$4 sm:$0xff]  }
  0x17   : > { %1143 = vmatpush1.bf16.msra.mxu0 %v1807_v9  ;;  %951 = vmatprep.subr.bf16.mxu1 %v1808_v10  ;;  %v1825_v21 = vld [vmem:[%s2037_s21 + $0x140] ss:$8 sps:$4 sm:$0xff]   ;;  %v1828_v23 = vld [vmem:[%s2037_s21 + $0x154] ss:$8 sps:$4 sm:$0xff]   ;;  %v1831_v25 = vld [vmem:[%s2037_s21 + $0x150] ss:$8 sps:$4 sm:$0xff]  }
  0x18   : > { %1144 = vmatprep.subr.bf16.mxu0 %v1810_v11  ;;  %v1832_v26 = vld [vmem:[%s2037_s21 + $0x64] ss:$8 sps:$4 sm:$0xff]   ;;  %v1836_v28 = vld [vmem:[%s2037_s21 + $0x60] ss:$8 sps:$4 sm:$0xff]   ;;  %v1838_v30 = vld [vmem:[%s2037_s21 + $0x74] ss:$8 sps:$4 sm:$0xff]  }
  0x19   : > { %v1834_v27 = vld [vmem:[%s2037_s21 + $0x164] ss:$8 sps:$4 sm:$0xff]   ;;  %v1837_v29 = vld [vmem:[%s2037_s21 + $0x160] ss:$8 sps:$4 sm:$0xff]   ;;  %v1840_v31 = vld [vmem:[%s2037_s21 + $0x174] ss:$8 sps:$4 sm:$0xff]  }
  0x1a   : > { %952 = vmatpush1.bf16.msra.mxu1 %v1812_v12  ;;  %v1842_v32 = vld [vmem:[%s2037_s21 + $0x70] ss:$8 sps:$4 sm:$0xff]   ;;  %v1844_v34 = vld [vmem:[%s2037_s21 + $0x84] ss:$8 sps:$4 sm:$0xff]   ;;  %v1848_v36 = vld [vmem:[%s2037_s21 + $0x80] ss:$8 sps:$4 sm:$0xff]  }
  0x1b   : > { %1145 = vmatpush1.bf16.msra.mxu0 %v1813_v13  ;;  %953 = vmatprep.subr.bf16.mxu1 %v1814_v14  ;;  %v1843_v33 = vld [vmem:[%s2037_s21 + $0x170] ss:$8 sps:$4 sm:$0xff]   ;;  %v1846_v35 = vld [vmem:[%s2037_s21 + $0x184] ss:$8 sps:$4 sm:$0xff]   ;;  %v1849_v37 = vld [vmem:[%s2037_s21 + $0x180] ss:$8 sps:$4 sm:$0xff]  }
  0x1c   : > { %1146 = vmatprep.subr.bf16.mxu0 %v1816_v15  ;;  %v1850_v38 = vld [vmem:[%s2037_s21 + $0x94] ss:$8 sps:$4 sm:$0xff]   ;;  %v1854_v40 = vld [vmem:[%s2037_s21 + $0x90] ss:$8 sps:$4 sm:$0xff]   ;;  %v1856_v42 = vld [vmem:[%s2037_s21 + $0xa4] ss:$8 sps:$4 sm:$0xff]  }
  0x1d   : > { %v1852_v39 = vld [vmem:[%s2037_s21 + $0x194] ss:$8 sps:$4 sm:$0xff]   ;;  %v1855_v41 = vld [vmem:[%s2037_s21 + $0x190] ss:$8 sps:$4 sm:$0xff]   ;;  %v1858_v43 = vld [vmem:[%s2037_s21 + $0x1a4] ss:$8 sps:$4 sm:$0xff]  }
  0x1e   : > { %954 = vmatpush1.bf16.msra.mxu1 %v1818_v16  ;;  %v1860_v44 = vld [vmem:[%s2037_s21 + $0xa0] ss:$8 sps:$4 sm:$0xff]   ;;  %v1862_v46 = vld [vmem:[%s2037_s21 + $0xb4] ss:$8 sps:$4 sm:$0xff]   ;;  %v1866_v48 = vld [vmem:[%s2037_s21 + $0xb0] ss:$8 sps:$4 sm:$0xff]  }
  0x1f   : > { %1147 = vmatpush1.bf16.msra.mxu0 %v1819_v17  ;;  %955 = vmatprep.subr.bf16.mxu1 %v1820_v18  ;;  %v1861_v45 = vld [vmem:[%s2037_s21 + $0x1a0] ss:$8 sps:$4 sm:$0xff]   ;;  %v1864_v47 = vld [vmem:[%s2037_s21 + $0x1b4] ss:$8 sps:$4 sm:$0xff]   ;;  %v1867_v49 = vld [vmem:[%s2037_s21 + $0x1b0] ss:$8 sps:$4 sm:$0xff]  }
  0x20   : > { %1148 = vmatprep.subr.bf16.mxu0 %v1822_v19  ;;  %v1868_v50 = vld [vmem:[%s2037_s21 + $0xc4] ss:$8 sps:$4 sm:$0xff]   ;;  %v1872_v52 = vld [vmem:[%s2037_s21 + $0xc0] ss:$8 sps:$4 sm:$0xff]   ;;  %v1874_v54 = vld [vmem:[%s2037_s21 + $0xd4] ss:$8 sps:$4 sm:$0xff]  }
  0x21   : > { %v1870_v51 = vld [vmem:[%s2037_s21 + $0x1c4] ss:$8 sps:$4 sm:$0xff]   ;;  %v1873_v53 = vld [vmem:[%s2037_s21 + $0x1c0] ss:$8 sps:$4 sm:$0xff]   ;;  %v1876_v55 = vld [vmem:[%s2037_s21 + $0x1d4] ss:$8 sps:$4 sm:$0xff]  }
  0x22   : > { %956 = vmatpush1.bf16.msra.mxu1 %v1824_v20  ;;  %v1878_v56 = vld [vmem:[%s2037_s21 + $0xd0] ss:$8 sps:$4 sm:$0xff]   ;;  %v1880_v58 = vld [vmem:[%s2037_s21 + $0xe4] ss:$8 sps:$4 sm:$0xff]   ;;  %v1884_v60 = vld [vmem:[%s2037_s21 + $0xe0] ss:$8 sps:$4 sm:$0xff]  }
  0x23   : > { %1149 = vmatpush1.bf16.msra.mxu0 %v1825_v21  ;;  %957 = vmatprep.subr.bf16.mxu1 %v1826_v22  ;;  %v1879_v57 = vld [vmem:[%s2037_s21 + $0x1d0] ss:$8 sps:$4 sm:$0xff]   ;;  %v1882_v59 = vld [vmem:[%s2037_s21 + $0x1e4] ss:$8 sps:$4 sm:$0xff]   ;;  %v1885_v61 = vld [vmem:[%s2037_s21 + $0x1e0] ss:$8 sps:$4 sm:$0xff]  }
  0x24   : > { %1150 = vmatprep.subr.bf16.mxu0 %v1828_v23  ;;  %v1886_v62 = vld [vmem:[%s2037_s21 + $0xf4] ss:$8 sps:$4 sm:$0xff]   ;;  %v1890_v0 = vld [vmem:[%s2037_s21 + $0xf0] ss:$8 sps:$4 sm:$0xff]   ;;  %v1996_v4 = vmov 0   ;;  %v171_v13 = vld [vmem:[%s2524_s2] sm:$0xff] }
  0x25   : > { %v1888_v63 = vld [vmem:[%s2037_s21 + $0x1f4] ss:$8 sps:$4 sm:$0xff]   ;;  %v1891_v1 = vld [vmem:[%s2037_s21 + $0x1f0] ss:$8 sps:$4 sm:$0xff]   ;;  %1794 = vset.pattern.permute.xlu0 %v1996_v4  ;;  %1795 = vset.pattern.permute.xlu1 %v1996_v4  ;;  %v172_v17 = vld [vmem:[%s2524_s2 + $0x8] sm:$0xff] }
  0x26   : > { %958 = vmatpush1.bf16.msra.mxu1 %v1830_v24  ;;  %v1892_v2 = vld [vmem:[%s2523_s1] ss:$16 sps:$4 sm:$0xff]   ;;  %v1895_v3 = vld [vmem:[%s2523_s1 + $0x8] ss:$16 sps:$4 sm:$0xff]   ;;  %v1898_v5 = vld [vmem:[%s2523_s1 + $0x24] ss:$16 sps:$4 sm:$0xff]   ;;  %1383 = vperm.xlu0 %1794, %v171_v13  }
  0x27   : > { %1151 = vmatpush1.bf16.msra.mxu0 %v1831_v25  ;;  %959 = vmatprep.subr.bf16.mxu1 %v1832_v26  ;;  %v1900_v6 = vld [vmem:[%s2523_s1 + $0x2c] ss:$16 sps:$4 sm:$0xff]   ;;  %v1902_v7 = vld [vmem:[%s2523_s1 + $0x20] ss:$16 sps:$4 sm:$0xff]   ;;  %v1903_v8 = vld [vmem:[%s2523_s1 + $0x28] ss:$16 sps:$4 sm:$0xff]  }
  0x28   : > { %1152 = vmatprep.subr.bf16.mxu0 %v1834_v27  ;;  %v1904_v9 = vld [vmem:[%s2523_s1 + $0x44] ss:$16 sps:$4 sm:$0xff]   ;;  %v1906_v10 = vld [vmem:[%s2523_s1 + $0x4c] ss:$16 sps:$4 sm:$0xff]   ;;  %v1908_v11 = vld [vmem:[%s2523_s1 + $0x40] ss:$16 sps:$4 sm:$0xff]  }
  0x29   : > { %v1909_v12 = vld [vmem:[%s2523_s1 + $0x48] ss:$16 sps:$4 sm:$0xff]   ;;  %v1910_v14 = vld [vmem:[%s2523_s1 + $0x64] ss:$16 sps:$4 sm:$0xff]   ;;  %v1912_v15 = vld [vmem:[%s2523_s1 + $0x6c] ss:$16 sps:$4 sm:$0xff]  }
  0x2a   : > { %960 = vmatpush1.bf16.msra.mxu1 %v1836_v28  ;;  %v173_v16 = vld [vmem:[%s2524_s2 + $0x10] sm:$0xff]  ;;  %v174_v18 = vld [vmem:[%s2524_s2 + $0x18] sm:$0xff]  ;;  %1388 = vperm.xlu0 %1794, %v172_v17   ;;  %v176_v19 = vld [vmem:[%s2524_s2 + $0x28] sm:$0xff] }
  0x2b   : > { %1153 = vmatpush1.bf16.msra.mxu0 %v1837_v29  ;;  %961 = vmatprep.subr.bf16.mxu1 %v1838_v30  ;;  %v175_v20 = vld [vmem:[%s2524_s2 + $0x20] sm:$0xff]  ;;  %v1915_v22 = vld [vmem:[%s2523_s1 + $0x68] ss:$16 sps:$4 sm:$0xff]   ;;  %v1918_v24 = vld [vmem:[%s2523_s1 + $0x8c] ss:$16 sps:$4 sm:$0xff]  }
  0x2c   : > { %1154 = vmatprep.subr.bf16.mxu0 %v1840_v31  ;;  %1393 = vperm.xlu1 %1795, %v173_v16   ;;  %v1914_v21 = vld [vmem:[%s2523_s1 + $0x60] ss:$16 sps:$4 sm:$0xff]   ;;  %v1916_v23 = vld [vmem:[%s2523_s1 + $0x84] ss:$16 sps:$4 sm:$0xff]   ;;  %v178_v25 = vld [vmem:[%s2524_s2 + $0x38] sm:$0xff] }
  0x2d   : > { %v177_v26 = vld [vmem:[%s2524_s2 + $0x30] sm:$0xff]  ;;  %v1921_v28 = vld [vmem:[%s2523_s1 + $0x88] ss:$16 sps:$4 sm:$0xff]   ;;  %v1924_v30 = vld [vmem:[%s2523_s1 + $0xac] ss:$16 sps:$4 sm:$0xff]  }
  0x2e   : > { %962 = vmatpush1.bf16.msra.mxu1 %v1842_v32  ;;  %1403 = vperm.xlu0 %1794, %v175_v20   ;;  %v1920_v27 = vld [vmem:[%s2523_s1 + $0x80] ss:$16 sps:$4 sm:$0xff]   ;;  %v1922_v29 = vld [vmem:[%s2523_s1 + $0xa4] ss:$16 sps:$4 sm:$0xff]   ;;  %v1927_v32 = vld [vmem:[%s2523_s1 + $0xa8] ss:$16 sps:$4 sm:$0xff]  }
  0x2f   : > { %1155 = vmatpush1.bf16.msra.mxu0 %v1843_v33  ;;  %963 = vmatprep.subr.bf16.mxu1 %v1844_v34  ;;  %v1926_v31 = vld [vmem:[%s2523_s1 + $0xa0] ss:$16 sps:$4 sm:$0xff]   ;;  %v1928_v33 = vld [vmem:[%s2523_s1 + $0xc4] ss:$16 sps:$4 sm:$0xff]   ;;  %v1930_v34 = vld [vmem:[%s2523_s1 + $0xcc] ss:$16 sps:$4 sm:$0xff]  }
  0x30   : > { %1156 = vmatprep.subr.bf16.mxu0 %v1846_v35  ;;  %1398 = vperm.xlu1 %1795, %v174_v18   ;;  %v1932_v35 = vld [vmem:[%s2523_s1 + $0xc0] ss:$16 sps:$4 sm:$0xff]   ;;  %v1981_v4 = vld [vmem:[%s2523_s1 + $0x1c8] ss:$16 sps:$4 sm:$0xff]  }
  0x32   : > { %964 = vmatpush1.bf16.msra.mxu1 %v1848_v36  ;;  %1413 = vperm.xlu0 %1794, %v177_v26   ;;  %v1933_v36 = vld [vmem:[%s2523_s1 + $0xc8] ss:$16 sps:$4 sm:$0xff]  }
  0x33   : > { %1157 = vmatpush1.bf16.msra.mxu0 %v1849_v37  ;;  %965 = vmatprep.subr.bf16.mxu1 %v1850_v38  ;;  %v1934_v37 = vld [vmem:[%s2523_s1 + $0xe4] ss:$16 sps:$4 sm:$0xff]   ;;  %v1936_v38 = vld [vmem:[%s2523_s1 + $0xec] ss:$16 sps:$4 sm:$0xff]  }
  0x34   : > { %1158 = vmatprep.subr.bf16.mxu0 %v1852_v39  ;;  %1408 = vperm.xlu1 %1795, %v176_v19   ;;  %v1938_v39 = vld [vmem:[%s2523_s1 + $0xe0] ss:$16 sps:$4 sm:$0xff]  }
  0x36   : > { %966 = vmatpush1.bf16.msra.mxu1 %v1854_v40  ;;  %v1939_v40 = vld [vmem:[%s2523_s1 + $0xe8] ss:$16 sps:$4 sm:$0xff]  }
  0x37   : > { %1159 = vmatpush1.bf16.msra.mxu0 %v1855_v41  ;;  %967 = vmatprep.subr.bf16.mxu1 %v1856_v42  ;;  %v1940_v41 = vld [vmem:[%s2523_s1 + $0x104] ss:$16 sps:$4 sm:$0xff]   ;;  %v1942_v42 = vld [vmem:[%s2523_s1 + $0x10c] ss:$16 sps:$4 sm:$0xff]  }
  0x38   : > { %1160 = vmatprep.subr.bf16.mxu0 %v1858_v43  ;;  %1418 = vperm.xlu1 %1795, %v178_v25   ;;  %v1944_v43 = vld [vmem:[%s2523_s1 + $0x100] ss:$16 sps:$4 sm:$0xff]  }
  0x3a   : > { %968 = vmatpush1.bf16.msra.mxu1 %v1860_v44  ;;  %v1945_v44 = vld [vmem:[%s2523_s1 + $0x108] ss:$16 sps:$4 sm:$0xff]  }
  0x3b   : > { %1161 = vmatpush1.bf16.msra.mxu0 %v1861_v45  ;;  %969 = vmatprep.subr.bf16.mxu1 %v1862_v46  ;;  %v1946_v45 = vld [vmem:[%s2523_s1 + $0x124] ss:$16 sps:$4 sm:$0xff]   ;;  %v1948_v46 = vld [vmem:[%s2523_s1 + $0x12c] ss:$16 sps:$4 sm:$0xff]  }
  0x3c   : > { %1162 = vmatprep.subr.bf16.mxu0 %v1864_v47  ;;  %v1950_v47 = vld [vmem:[%s2523_s1 + $0x120] ss:$16 sps:$4 sm:$0xff]  }
  0x3e   : > { %970 = vmatpush1.bf16.msra.mxu1 %v1866_v48  ;;  %v1951_v48 = vld [vmem:[%s2523_s1 + $0x128] ss:$16 sps:$4 sm:$0xff]  }
  0x3f   : > { %1163 = vmatpush1.bf16.msra.mxu0 %v1867_v49  ;;  %971 = vmatprep.subr.bf16.mxu1 %v1868_v50  ;;  %v1952_v49 = vld [vmem:[%s2523_s1 + $0x144] ss:$16 sps:$4 sm:$0xff]   ;;  %v1954_v50 = vld [vmem:[%s2523_s1 + $0x14c] ss:$16 sps:$4 sm:$0xff]  }
  0x40   : > { %1164 = vmatprep.subr.bf16.mxu0 %v1870_v51  ;;  %v1956_v51 = vld [vmem:[%s2523_s1 + $0x140] ss:$16 sps:$4 sm:$0xff]  }
  0x42   : > { %972 = vmatpush1.bf16.msra.mxu1 %v1872_v52  ;;  %v1957_v52 = vld [vmem:[%s2523_s1 + $0x148] ss:$16 sps:$4 sm:$0xff]  }
  0x43   : > { %1165 = vmatpush1.bf16.msra.mxu0 %v1873_v53  ;;  %973 = vmatprep.subr.bf16.mxu1 %v1874_v54  ;;  %v1958_v53 = vld [vmem:[%s2523_s1 + $0x164] ss:$16 sps:$4 sm:$0xff]   ;;  %v1960_v54 = vld [vmem:[%s2523_s1 + $0x16c] ss:$16 sps:$4 sm:$0xff]  }
  0x44   : > { %1166 = vmatprep.subr.bf16.mxu0 %v1876_v55  ;;  %v1962_v55 = vld [vmem:[%s2523_s1 + $0x160] ss:$16 sps:$4 sm:$0xff]  }
  0x46   : > { %974 = vmatpush1.bf16.msra.mxu1 %v1878_v56  ;;  %v1963_v56 = vld [vmem:[%s2523_s1 + $0x168] ss:$16 sps:$4 sm:$0xff]  }
  0x47   : > { %1167 = vmatpush1.bf16.msra.mxu0 %v1879_v57  ;;  %975 = vmatprep.subr.bf16.mxu1 %v1880_v58  ;;  %v1964_v57 = vld [vmem:[%s2523_s1 + $0x184] ss:$16 sps:$4 sm:$0xff]   ;;  %v1966_v58 = vld [vmem:[%s2523_s1 + $0x18c] ss:$16 sps:$4 sm:$0xff]  }
  0x48   : > { %1168 = vmatprep.subr.bf16.mxu0 %v1882_v59  ;;  %v1968_v59 = vld [vmem:[%s2523_s1 + $0x180] ss:$16 sps:$4 sm:$0xff]  }
  0x4a   : > { %976 = vmatpush1.bf16.msra.mxu1 %v1884_v60  ;;  %v1969_v60 = vld [vmem:[%s2523_s1 + $0x188] ss:$16 sps:$4 sm:$0xff]  }
  0x4b   : > { %1169 = vmatpush1.bf16.msra.mxu0 %v1885_v61  ;;  %977 = vmatprep.subr.bf16.mxu1 %v1886_v62  ;;  %v1970_v61 = vld [vmem:[%s2523_s1 + $0x1a4] ss:$16 sps:$4 sm:$0xff]   ;;  %v1972_v62 = vld [vmem:[%s2523_s1 + $0x1ac] ss:$16 sps:$4 sm:$0xff]  }
  0x4c   : > { %1170 = vmatprep.subr.bf16.mxu0 %v1888_v63  ;;  %v1974_v63 = vld [vmem:[%s2523_s1 + $0x1a0] ss:$16 sps:$4 sm:$0xff]  }
  0x4e   : > { %978 = vmatpush1.bf16.msra.mxu1 %v1890_v0  ;;  %v1975_v0 = vld [vmem:[%s2523_s1 + $0x1a8] ss:$16 sps:$4 sm:$0xff]  }
  0x4f   : > { %1171 = vmatpush1.bf16.msra.mxu0 %v1891_v1  ;;  %v1976_v1 = vld [vmem:[%s2523_s1 + $0x1c4] ss:$16 sps:$4 sm:$0xff]  }
  0x51   : > { %980 = vmatmul.mubr.bf16.vlgmr.msra.gmra.mrb[0].mxu1 %v1892_v2  ;;  %v1978_v2 = vld [vmem:[%s2523_s1 + $0x1cc] ss:$16 sps:$4 sm:$0xff]  }
  0x52   : > { %1173 = vmatmul.mubr.bf16.vlgmr.msra.gmra.mrb[0].mxu0 %v1895_v3  ;;  %989 = vmatprep.mubr.bf16.mxu1 %v1898_v5  ;;  %v1980_v3 = vld [vmem:[%s2523_s1 + $0x1c0] ss:$16 sps:$4 sm:$0xff]   ;;  %v1982_v5 = vld [vmem:[%s2523_s1 + $0x1e4] ss:$16 sps:$4 sm:$0xff]  }
  0x53   : > { %1182 = vmatprep.mubr.bf16.mxu0 %v1900_v6  ;;  %v1984_v6 = vld [vmem:[%s2523_s1 + $0x1ec] ss:$16 sps:$4 sm:$0xff]  }
  0x59   : > { %990 = vmatmul.mubr.bf16.gmra.mrb[4].mxu1 %v1902_v7  ;;  %v1986_v7 = vld [vmem:[%s2523_s1 + $0x1e0] ss:$16 sps:$4 sm:$0xff]  }
  0x5a   : > { %1183 = vmatmul.mubr.bf16.gmra.mrb[4].mxu0 %v1903_v8  ;;  %999 = vmatprep.mubr.bf16.mxu1 %v1904_v9  ;;  %v1987_v8 = vld [vmem:[%s2523_s1 + $0x1e8] ss:$16 sps:$4 sm:$0xff]  }
  0x5b   : > { %1192 = vmatprep.mubr.bf16.mxu0 %v1906_v10 }
  0x61   : > { %1000 = vmatmul.mubr.bf16.gmra.mrb[8].mxu1 %v1908_v11 }
  0x62   : > { %1193 = vmatmul.mubr.bf16.gmra.mrb[8].mxu0 %v1909_v12  ;;  %1009 = vmatprep.mubr.bf16.mxu1 %v1910_v14 }
  0x63   : > { %1202 = vmatprep.mubr.bf16.mxu0 %v1912_v15 }
  0x69   : > { %1010 = vmatmul.mubr.bf16.gmra.mrb[12].mxu1 %v1914_v21 }
  0x6a   : > { %1203 = vmatmul.mubr.bf16.gmra.mrb[12].mxu0 %v1915_v22  ;;  %1019 = vmatprep.mubr.bf16.mxu1 %v1916_v23 }
  0x6b   : > { %1212 = vmatprep.mubr.bf16.mxu0 %v1918_v24 }
  0x71   : > { %1020 = vmatmul.mubr.bf16.gmra.mrb[16].mxu1 %v1920_v27 }
  0x72   : > { %1213 = vmatmul.mubr.bf16.gmra.mrb[16].mxu0 %v1921_v28  ;;  %1029 = vmatprep.mubr.bf16.mxu1 %v1922_v29 }
  0x73   : > { %1222 = vmatprep.mubr.bf16.mxu0 %v1924_v30 }
  0x79   : > { %1030 = vmatmul.mubr.bf16.gmra.mrb[20].mxu1 %v1926_v31 }
  0x7a   : > { %1223 = vmatmul.mubr.bf16.gmra.mrb[20].mxu0 %v1927_v32  ;;  %1039 = vmatprep.mubr.bf16.mxu1 %v1928_v33 }
  0x7b   : > { %1232 = vmatprep.mubr.bf16.mxu0 %v1930_v34 }
  0x81   : > { %1040 = vmatmul.mubr.bf16.gmra.mrb[24].mxu1 %v1932_v35 }
  0x82   : > { %1233 = vmatmul.mubr.bf16.gmra.mrb[24].mxu0 %v1933_v36  ;;  %1049 = vmatprep.mubr.bf16.mxu1 %v1934_v37 }
  0x83   : > { %1242 = vmatprep.mubr.bf16.mxu0 %v1936_v38 }
  0x89   : > { %1050 = vmatmul.mubr.bf16.gmra.mrb[28].mxu1 %v1938_v39 }
  0x8a   : > { %1243 = vmatmul.mubr.bf16.gmra.mrb[28].mxu0 %v1939_v40  ;;  %1059 = vmatprep.mubr.bf16.mxu1 %v1940_v41 }
  0x8b   : > { %1252 = vmatprep.mubr.bf16.mxu0 %v1942_v42 }
  0x91   : > { %1060 = vmatmul.mubr.bf16.gmra.mrb[32].mxu1 %v1944_v43 }
  0x92   : > { %1253 = vmatmul.mubr.bf16.gmra.mrb[32].mxu0 %v1945_v44  ;;  %1069 = vmatprep.mubr.bf16.mxu1 %v1946_v45 }
  0x93   : > { %1262 = vmatprep.mubr.bf16.mxu0 %v1948_v46 }
  0x99   : > { %1070 = vmatmul.mubr.bf16.gmra.mrb[36].mxu1 %v1950_v47 }
  0x9a   : > { %1263 = vmatmul.mubr.bf16.gmra.mrb[36].mxu0 %v1951_v48  ;;  %1079 = vmatprep.mubr.bf16.mxu1 %v1952_v49 }
  0x9b   : > { %1272 = vmatprep.mubr.bf16.mxu0 %v1954_v50 }
  0xa1   : > { %1080 = vmatmul.mubr.bf16.gmra.mrb[40].mxu1 %v1956_v51 }
  0xa2   : > { %1273 = vmatmul.mubr.bf16.gmra.mrb[40].mxu0 %v1957_v52  ;;  %1089 = vmatprep.mubr.bf16.mxu1 %v1958_v53 }
  0xa3   : > { %1282 = vmatprep.mubr.bf16.mxu0 %v1960_v54 }
  0xa9   : > { %1090 = vmatmul.mubr.bf16.gmra.mrb[44].mxu1 %v1962_v55 }
  0xaa   : > { %1283 = vmatmul.mubr.bf16.gmra.mrb[44].mxu0 %v1963_v56  ;;  %1099 = vmatprep.mubr.bf16.mxu1 %v1964_v57 }
  0xab   : > { %1292 = vmatprep.mubr.bf16.mxu0 %v1966_v58 }
  0xb1   : > { %1100 = vmatmul.mubr.bf16.gmra.mrb[48].mxu1 %v1968_v59 }
  0xb2   : > { %1293 = vmatmul.mubr.bf16.gmra.mrb[48].mxu0 %v1969_v60  ;;  %1109 = vmatprep.mubr.bf16.mxu1 %v1970_v61 }
  0xb3   : > { %1302 = vmatprep.mubr.bf16.mxu0 %v1972_v62 }
  0xb9   : > { %1110 = vmatmul.mubr.bf16.gmra.mrb[52].mxu1 %v1974_v63 }
  0xba   : > { %1303 = vmatmul.mubr.bf16.gmra.mrb[52].mxu0 %v1975_v0  ;;  %1119 = vmatprep.mubr.bf16.mxu1 %v1976_v1 }
  0xbb   : > { %1312 = vmatprep.mubr.bf16.mxu0 %v1978_v2 }
  0xc1   : > { %1120 = vmatmul.mubr.bf16.gmra.mrb[56].mxu1 %v1980_v3 }
  0xc2   : > { %1313 = vmatmul.mubr.bf16.gmra.mrb[56].mxu0 %v1981_v4  ;;  %1129 = vmatprep.mubr.bf16.mxu1 %v1982_v5 }
  0xc3   : > { %1322 = vmatprep.mubr.bf16.mxu0 %v1984_v6 }
  0xc9   : > { %1130 = vmatmul.mubr.bf16.gmra.mrb[60].mxu1 %v1986_v7 }
  0xca   : > { %1323 = vmatmul.mubr.bf16.gmra.mrb[60].mxu0 %v1987_v8 }
 0x124   : > { %v981_v9 = vpop.f32.mrb[0].mxu1 }
 0x125   : > { %v1174_v10 = vpop.f32.mrb[0].mxu0  ;;  %v983_v12 = vpop.f32.mrb[1].mxu1 }
 0x126   : > { %v2313_v11 = vadd.f32 %v1174_v10, %v981_v9  ;;  %v1176_v13 = vpop.f32.mrb[1].mxu0  ;;  %v985_v15 = vpop.f32.mrb[2].mxu1 }
 0x127   : > { %v2315_v14 = vadd.f32 %v1176_v13, %v983_v12  ;;  %v1178_v16 = vpop.f32.mrb[2].mxu0  ;;  %v987_v18 = vpop.f32.mrb[3].mxu1 }
 0x128   : > { %v2317_v17 = vadd.f32 %v1178_v16, %v985_v15  ;;  %v1180_v19 = vpop.f32.mrb[3].mxu0 }
 0x129   : > { %v2319_v20 = vadd.f32 %v1180_v19, %v987_v18 }
 0x12c   : > { %v991_v21 = vpop.f32.mrb[4].mxu1 }
 0x12d   : > { %v1184_v22 = vpop.f32.mrb[4].mxu0  ;;  %v993_v24 = vpop.f32.mrb[5].mxu1 }
 0x12e   : > { %v2321_v23 = vadd.f32 %v1184_v22, %v991_v21  ;;  %v1186_v25 = vpop.f32.mrb[5].mxu0  ;;  %v995_v27 = vpop.f32.mrb[6].mxu1 }
 0x12f   : > { %v2323_v26 = vadd.f32 %v1186_v25, %v993_v24  ;;  %v1188_v28 = vpop.f32.mrb[6].mxu0  ;;  %v997_v30 = vpop.f32.mrb[7].mxu1 }
 0x130   : > { %v2325_v29 = vadd.f32 %v1188_v28, %v995_v27  ;;  %v1190_v31 = vpop.f32.mrb[7].mxu0 }
 0x131   : > { %v2327_v32 = vadd.f32 %v1190_v31, %v997_v30 }
 0x134   : > { %v1001_v33 = vpop.f32.mrb[8].mxu1 }
 0x135   : > { %v1194_v34 = vpop.f32.mrb[8].mxu0  ;;  %v1003_v36 = vpop.f32.mrb[9].mxu1 }
 0x136   : > { %v2329_v35 = vadd.f32 %v1194_v34, %v1001_v33  ;;  %v1196_v37 = vpop.f32.mrb[9].mxu0  ;;  %v1005_v39 = vpop.f32.mrb[10].mxu1 }
 0x137   : > { %v2331_v38 = vadd.f32 %v1196_v37, %v1003_v36  ;;  %v1198_v40 = vpop.f32.mrb[10].mxu0  ;;  %v1007_v42 = vpop.f32.mrb[11].mxu1 }
 0x138   : > { %v2333_v41 = vadd.f32 %v1198_v40, %v1005_v39  ;;  %v1200_v43 = vpop.f32.mrb[11].mxu0 }
 0x139   : > { %v2335_v44 = vadd.f32 %v1200_v43, %v1007_v42 }
 0x13c   : > { %v1011_v45 = vpop.f32.mrb[12].mxu1 }
 0x13d   : > { %v1204_v46 = vpop.f32.mrb[12].mxu0  ;;  %v1013_v48 = vpop.f32.mrb[13].mxu1 }
 0x13e   : > { %v2337_v47 = vadd.f32 %v1204_v46, %v1011_v45  ;;  %v1206_v49 = vpop.f32.mrb[13].mxu0  ;;  %v1015_v51 = vpop.f32.mrb[14].mxu1 }
 0x13f   : > { %v2339_v50 = vadd.f32 %v1206_v49, %v1013_v48  ;;  %v1208_v52 = vpop.f32.mrb[14].mxu0  ;;  %v1017_v54 = vpop.f32.mrb[15].mxu1 }
 0x140   : > { %v2341_v53 = vadd.f32 %v1208_v52, %v1015_v51  ;;  %v1210_v55 = vpop.f32.mrb[15].mxu0 }
 0x141   : > { %v2343_v56 = vadd.f32 %v1210_v55, %v1017_v54 }
 0x144   : > { %v1021_v57 = vpop.f32.mrb[16].mxu1 }
 0x145   : > { %v1214_v58 = vpop.f32.mrb[16].mxu0  ;;  %v1023_v60 = vpop.f32.mrb[17].mxu1 }
 0x146   : > { %v2345_v59 = vadd.f32 %v1214_v58, %v1021_v57  ;;  %v1216_v61 = vpop.f32.mrb[17].mxu0  ;;  %v1025_v63 = vpop.f32.mrb[18].mxu1 }
 0x147   : > { %v2347_v62 = vadd.f32 %v1216_v61, %v1023_v60  ;;  %v1218_v0 = vpop.f32.mrb[18].mxu0  ;;  %v1027_v3 = vpop.f32.mrb[19].mxu1 }
 0x148   : > { %v1333_v1 = vmax.f32 %v2313_v11, %v2345_v59  ;;  %v2351_v2 = vadd.f32 %v1218_v0, %v1025_v63  ;;  %v1220_v4 = vpop.f32.mrb[19].mxu0 }
 0x149   : > { %v1334_v5 = vmax.f32 %v2315_v14, %v2347_v62  ;;  %v2355_v6 = vadd.f32 %v1220_v4, %v1027_v3 }
 0x14a   : > { %v1335_v7 = vmax.f32 %v2317_v17, %v2351_v2 }
 0x14b   : > { %v1336_v8 = vmax.f32 %v2319_v20, %v2355_v6 }
 0x14c   : > { %v1031_v9 = vpop.f32.mrb[20].mxu1 }
 0x14d   : > { %v1224_v10 = vpop.f32.mrb[20].mxu0  ;;  %v1033_v13 = vpop.f32.mrb[21].mxu1 }
 0x14e   : > { %v2361_v12 = vadd.f32 %v1224_v10, %v1031_v9  ;;  %v1226_v15 = vpop.f32.mrb[21].mxu0  ;;  %v1035_v18 = vpop.f32.mrb[22].mxu1 }
 0x14f   : > { %v2363_v16 = vadd.f32 %v1226_v15, %v1033_v13  ;;  %v1228_v19 = vpop.f32.mrb[22].mxu0  ;;  %v1037_v24 = vpop.f32.mrb[23].mxu1 }
 0x150   : > { %v1337_v21 = vmax.f32 %v2321_v23, %v2361_v12  ;;  %v2367_v22 = vadd.f32 %v1228_v19, %v1035_v18  ;;  %v1230_v25 = vpop.f32.mrb[23].mxu0 }
 0x151   : > { %v1338_v27 = vmax.f32 %v2323_v26, %v2363_v16  ;;  %v2371_v28 = vadd.f32 %v1230_v25, %v1037_v24 }
 0x152   : > { %v1339_v30 = vmax.f32 %v2325_v29, %v2367_v22 }
 0x153   : > { %v1340_v31 = vmax.f32 %v2327_v32, %v2371_v28 }
 0x154   : > { %v1041_v33 = vpop.f32.mrb[24].mxu1 }
 0x155   : > { %v1234_v34 = vpop.f32.mrb[24].mxu0  ;;  %v1043_v37 = vpop.f32.mrb[25].mxu1 }
 0x156   : > { %v2377_v36 = vadd.f32 %v1234_v34, %v1041_v33  ;;  %v1236_v39 = vpop.f32.mrb[25].mxu0  ;;  %v1045_v42 = vpop.f32.mrb[26].mxu1 }
 0x157   : > { %v2379_v40 = vadd.f32 %v1236_v39, %v1043_v37  ;;  %v1238_v43 = vpop.f32.mrb[26].mxu0  ;;  %v1047_v48 = vpop.f32.mrb[27].mxu1 }
 0x158   : > { %v1341_v45 = vmax.f32 %v2329_v35, %v2377_v36  ;;  %v2383_v46 = vadd.f32 %v1238_v43, %v1045_v42  ;;  %v1240_v49 = vpop.f32.mrb[27].mxu0 }
 0x159   : > { %v1342_v51 = vmax.f32 %v2331_v38, %v2379_v40  ;;  %v2387_v52 = vadd.f32 %v1240_v49, %v1047_v48 }
 0x15a   : > { %v1343_v54 = vmax.f32 %v2333_v41, %v2383_v46 }
 0x15b   : > { %v1344_v55 = vmax.f32 %v2335_v44, %v2387_v52 }
 0x15c   : > { %v1051_v57 = vpop.f32.mrb[28].mxu1 }
 0x15d   : > { %v1244_v58 = vpop.f32.mrb[28].mxu0  ;;  %v1053_v61 = vpop.f32.mrb[29].mxu1 }
 0x15e   : > { %v2393_v60 = vadd.f32 %v1244_v58, %v1051_v57  ;;  %v1246_v63 = vpop.f32.mrb[29].mxu0  ;;  %v1055_v3 = vpop.f32.mrb[30].mxu1 }
 0x15f   : > { %v2395_v0 = vadd.f32 %v1246_v63, %v1053_v61  ;;  %v1248_v4 = vpop.f32.mrb[30].mxu0  ;;  %v1057_v13 = vpop.f32.mrb[31].mxu1 }
 0x160   : > { %v1345_v9 = vmax.f32 %v2337_v47, %v2393_v60  ;;  %v2399_v10 = vadd.f32 %v1248_v4, %v1055_v3  ;;  %v1250_v15 = vpop.f32.mrb[31].mxu0  ;;  %v1384_v60 = vpop.permute.xlu0 %1383 }
 0x161   : > { %v1346_v18 = vmax.f32 %v2339_v50, %v2395_v0  ;;  %v2403_v19 = vadd.f32 %v1250_v15, %v1057_v13 }
 0x162   : > { %v1347_v24 = vmax.f32 %v2341_v53, %v2399_v10 }
 0x163   : > { %v1348_v25 = vmax.f32 %v2343_v56, %v2403_v19 }
 0x164   : > { %v1061_v33 = vpop.f32.mrb[32].mxu1  ;;  %v1389_v19 = vpop.permute.xlu0 %1388 }
 0x165   : > { %v1254_v34 = vpop.f32.mrb[32].mxu0  ;;  %v1063_v39 = vpop.f32.mrb[33].mxu1 }
 0x166   : > { %v1255_v37 = vadd.f32 %v1254_v34, %v1061_v33  ;;  %v1256_v42 = vpop.f32.mrb[33].mxu0  ;;  %v1065_v48 = vpop.f32.mrb[34].mxu1 }
 0x167   : > { %v1257_v43 = vadd.f32 %v1256_v42, %v1063_v39  ;;  %v1258_v49 = vpop.f32.mrb[34].mxu0  ;;  %v1067_v61 = vpop.f32.mrb[35].mxu1 }
 0x168   : > { %v2412_v57 = vmax.f32 %v1333_v1, %v1255_v37  ;;  %v1259_v58 = vadd.f32 %v1258_v49, %v1065_v48  ;;  %v1260_v63 = vpop.f32.mrb[35].mxu0 }
 0x169   : > { %v2417_v3 = vmax.f32 %v1334_v5, %v1257_v43  ;;  %v1261_v4 = vadd.f32 %v1260_v63, %v1067_v61 }
 0x16a   : > { %v2422_v13 = vmax.f32 %v1335_v7, %v1259_v58 }
 0x16b   : > { %v2427_v11 = vmax.f32 %v1336_v8, %v1261_v4 }
 0x16c   : > { %v1071_v59 = vpop.f32.mrb[36].mxu1 }
 0x16d   : > { %v1264_v1 = vpop.f32.mrb[36].mxu0  ;;  %v1073_v33 = vpop.f32.mrb[37].mxu1 }
 0x16e   : > { %v1265_v15 = vadd.f32 %v1264_v1, %v1071_v59  ;;  %v1266_v34 = vpop.f32.mrb[37].mxu0  ;;  %v1075_v14 = vpop.f32.mrb[38].mxu1 }
 0x16f   : > { %v1267_v37 = vadd.f32 %v1266_v34, %v1073_v33  ;;  %v1268_v62 = vpop.f32.mrb[38].mxu0  ;;  %v1077_v2 = vpop.f32.mrb[39].mxu1 }
 0x170   : > { %v2432_v5 = vmax.f32 %v1337_v21, %v1265_v15  ;;  %v1269_v17 = vadd.f32 %v1268_v62, %v1075_v14  ;;  %v1270_v7 = vpop.f32.mrb[39].mxu0 }
 0x171   : > { %v2437_v20 = vmax.f32 %v1338_v27, %v1267_v37  ;;  %v1271_v6 = vadd.f32 %v1270_v7, %v1077_v2  ;;  %v1394_v7 = vpop.permute.xlu1 %1393 }
 0x172   : > { %v2442_v8 = vmax.f32 %v1339_v30, %v1269_v17 }
 0x173   : > { %v2447_v23 = vmax.f32 %v1340_v31, %v1271_v6 }
 0x174   : > { %v1081_v12 = vpop.f32.mrb[40].mxu1 }
 0x175   : > { %v1274_v21 = vpop.f32.mrb[40].mxu0  ;;  %v1083_v42 = vpop.f32.mrb[41].mxu1 }
 0x176   : > { %v1275_v39 = vadd.f32 %v1274_v21, %v1081_v12  ;;  %v1276_v43 = vpop.f32.mrb[41].mxu0  ;;  %v1085_v26 = vpop.f32.mrb[42].mxu1 }
 0x177   : > { %v1277_v48 = vadd.f32 %v1276_v43, %v1083_v42  ;;  %v1278_v16 = vpop.f32.mrb[42].mxu0  ;;  %v1087_v22 = vpop.f32.mrb[43].mxu1 }
 0x178   : > { %v2452_v27 = vmax.f32 %v1341_v45, %v1275_v39  ;;  %v1279_v29 = vadd.f32 %v1278_v16, %v1085_v26  ;;  %v1280_v30 = vpop.f32.mrb[43].mxu0 }
 0x179   : > { %v2457_v32 = vmax.f32 %v1342_v51, %v1277_v48  ;;  %v1281_v28 = vadd.f32 %v1280_v30, %v1087_v22 }
 0x17a   : > { %v2462_v31 = vmax.f32 %v1343_v54, %v1279_v29 }
 0x17b   : > { %v2467_v35 = vmax.f32 %v1344_v55, %v1281_v28 }
 0x17c   : > { %v1091_v36 = vpop.f32.mrb[44].mxu1 }
 0x17d   : > { %v1284_v45 = vpop.f32.mrb[44].mxu0  ;;  %v1093_v58 = vpop.f32.mrb[45].mxu1 }
 0x17e   : > { %v1285_v49 = vadd.f32 %v1284_v45, %v1091_v36  ;;  %v1286_v61 = vpop.f32.mrb[45].mxu0  ;;  %v1095_v38 = vpop.f32.mrb[46].mxu1 }
 0x17f   : > { %v1287_v63 = vadd.f32 %v1286_v61, %v1093_v58  ;;  %v1288_v40 = vpop.f32.mrb[46].mxu0  ;;  %v1097_v46 = vpop.f32.mrb[47].mxu1 }
 0x180   : > { %v2472_v51 = vmax.f32 %v1345_v9, %v1285_v49  ;;  %v1289_v41 = vadd.f32 %v1288_v40, %v1095_v38  ;;  %v1290_v54 = vpop.f32.mrb[47].mxu0  ;;  %v1399_v38 = vpop.permute.xlu1 %1398 }
 0x181   : > { %v2477_v44 = vmax.f32 %v1346_v18, %v1287_v63  ;;  %v1291_v52 = vadd.f32 %v1290_v54, %v1097_v46 }
 0x182   : > { %v2482_v55 = vmax.f32 %v1347_v24, %v1289_v41 }
 0x183   : > { %v2487_v47 = vmax.f32 %v1348_v25, %v1291_v52 }
 0x184   : > { %v1101_v9 = vpop.f32.mrb[48].mxu1 }
 0x185   : > { %v1294_v4 = vpop.f32.mrb[48].mxu0  ;;  %v1103_v1 = vpop.f32.mrb[49].mxu1 }
 0x186   : > { %v1295_v59 = vadd.f32 %v1294_v4, %v1101_v9  ;;  %v1296_v50 = vpop.f32.mrb[49].mxu0  ;;  %v1105_v18 = vpop.f32.mrb[50].mxu1 }
 0x187   : > { %v1297_v0 = vadd.f32 %v1296_v50, %v1103_v1  ;;  %v1298_v15 = vpop.f32.mrb[50].mxu0  ;;  %v1107_v10 = vpop.f32.mrb[51].mxu1 }
 0x188   : > { %v1365_v33 = vmax.f32 %v2412_v57, %v1295_v59  ;;  %v1299_v53 = vadd.f32 %v1298_v15, %v1105_v18  ;;  %v1300_v24 = vpop.f32.mrb[51].mxu0 }
 0x189   : > { %v1366_v34 = vmax.f32 %v2417_v3, %v1297_v0  ;;  %v1301_v56 = vadd.f32 %v1300_v24, %v1107_v10  ;;  %v1404_v24 = vpop.permute.xlu0 %1403 }
 0x18a   : > { %v1421_v25 = vadd.f32 %v1384_v60, %v1365_v33  ;;  %v1367_v37 = vmax.f32 %v2422_v13, %v1299_v53 }
 0x18b   : > { %v1422_v14 = vadd.f32 %v1384_v60, %v1366_v34  ;;  %v1368_v62 = vmax.f32 %v2427_v11, %v1301_v56 }
 0x18c   : > { %v1437_v17 = vmax.f32 %v1421_v25, 0.0  ;;  %v1423_v2 = vadd.f32 %v1389_v19, %v1367_v37  ;;  %v1111_v57 = vpop.f32.mrb[52].mxu1  ;;  %v1409_v37 = vpop.permute.xlu1 %1408 }
 0x18d   : > { %v1438_v6 = vmax.f32 %v1422_v14, 0.0  ;;  %v1424_v12 = vadd.f32 %v1389_v19, %v1368_v62  ;;  %v1304_v21 = vpop.f32.mrb[52].mxu0  ;;  %v1113_v13 = vpop.f32.mrb[53].mxu1 }
 0x18e   : > { %v1439_v3 = vmax.f32 %v1423_v2, 0.0  ;;  %v1305_v39 = vadd.f32 %v1304_v21, %v1111_v57  ;;  %v1306_v42 = vpop.f32.mrb[53].mxu0  ;;  %v1115_v26 = vpop.f32.mrb[54].mxu1 }
 0x18f   : > { %v1713_v43 = vpack.c.bf16 %v1438_v6, %v1437_v17  ;;  %v1440_v11 = vmax.f32 %v1424_v12, 0.0  ;;  %v1307_v48 = vadd.f32 %v1306_v42, %v1113_v13  ;;  %v1308_v16 = vpop.f32.mrb[54].mxu0  ;;  %v1117_v30 = vpop.f32.mrb[55].mxu1 }
 0x190   : > { %v1369_v29 = vmax.f32 %v2432_v5, %v1305_v39  ;;  %v1309_v22 = vadd.f32 %v1308_v16, %v1115_v26  ;;  %v1310_v28 = vpop.f32.mrb[55].mxu0  ;;  %v1414_v16 = vpop.permute.xlu0 %1413 }
 0x191   : > { %1501 = vst [vmem:[%s2497_s15] sm:$0xff] %v1713_v43  ;;  %v1714_v36 = vpack.c.bf16 %v1440_v11, %v1439_v3  ;;  %v1370_v45 = vmax.f32 %v2437_v20, %v1307_v48  ;;  %v1311_v49 = vadd.f32 %v1310_v28, %v1117_v30 }
 0x192   : > { %v1425_v58 = vadd.f32 %v1394_v7, %v1369_v29  ;;  %v1371_v61 = vmax.f32 %v2442_v8, %v1309_v22 }
 0x193   : > { %1502 = vst [vmem:[%s2497_s15 + $0x8] sm:$0xff] %v1714_v36  ;;  %v1426_v63 = vadd.f32 %v1394_v7, %v1370_v45  ;;  %v1372_v40 = vmax.f32 %v2447_v23, %v1311_v49  ;;  %v1419_v45 = vpop.permute.xlu1 %1418 }
 0x194   : > { %v1441_v41 = vmax.f32 %v1425_v58, 0.0  ;;  %v1427_v46 = vadd.f32 %v1399_v38, %v1371_v61  ;;  %v1121_v52 = vpop.f32.mrb[56].mxu1 }
 0x195   : > { %v1442_v54 = vmax.f32 %v1426_v63, 0.0  ;;  %v1428_v5 = vadd.f32 %v1399_v38, %v1372_v40  ;;  %v1314_v60 = vpop.f32.mrb[56].mxu0  ;;  %v1123_v59 = vpop.f32.mrb[57].mxu1 }
 0x196   : > { %v1443_v9 = vmax.f32 %v1427_v46, 0.0  ;;  %v1315_v4 = vadd.f32 %v1314_v60, %v1121_v52  ;;  %v1316_v20 = vpop.f32.mrb[57].mxu0  ;;  %v1125_v0 = vpop.f32.mrb[58].mxu1 }
 0x197   : > { %v1715_v1 = vpack.c.bf16 %v1442_v54, %v1441_v41  ;;  %v1444_v50 = vmax.f32 %v1428_v5, 0.0  ;;  %v1317_v8 = vadd.f32 %v1316_v20, %v1123_v59  ;;  %v1318_v18 = vpop.f32.mrb[58].mxu0  ;;  %v1127_v33 = vpop.f32.mrb[59].mxu1 }
 0x198   : > { %v1373_v15 = vmax.f32 %v2452_v27, %v1315_v4  ;;  %v1319_v23 = vadd.f32 %v1318_v18, %v1125_v0  ;;  %v1320_v53 = vpop.f32.mrb[59].mxu0 }
 0x199   : > { %1503 = vst [vmem:[%s2497_s15 + $0x10] sm:$0xff] %v1715_v1  ;;  %v1716_v10 = vpack.c.bf16 %v1444_v50, %v1443_v9  ;;  %v1374_v34 = vmax.f32 %v2457_v32, %v1317_v8  ;;  %v1321_v56 = vadd.f32 %v1320_v53, %v1127_v33 }
 0x19a   : > { %v1429_v19 = vadd.f32 %v1404_v24, %v1373_v15  ;;  %v1375_v25 = vmax.f32 %v2462_v31, %v1319_v23 }
 0x19b   : > { %1504 = vst [vmem:[%s2497_s15 + $0x18] sm:$0xff] %v1716_v10  ;;  %v1430_v14 = vadd.f32 %v1404_v24, %v1374_v34  ;;  %v1376_v62 = vmax.f32 %v2467_v35, %v1321_v56 }
 0x19c   : > { %v1445_v17 = vmax.f32 %v1429_v19, 0.0  ;;  %v1431_v2 = vadd.f32 %v1409_v37, %v1375_v25  ;;  %v1131_v6 = vpop.f32.mrb[60].mxu1 }
 0x19d   : > { %v1446_v27 = vmax.f32 %v1430_v14, 0.0  ;;  %v1432_v7 = vadd.f32 %v1409_v37, %v1376_v62  ;;  %v1324_v12 = vpop.f32.mrb[60].mxu0  ;;  %v1133_v3 = vpop.f32.mrb[61].mxu1 }
 0x19e   : > { %v1447_v57 = vmax.f32 %v1431_v2, 0.0  ;;  %v1325_v21 = vadd.f32 %v1324_v12, %v1131_v6  ;;  %v1326_v32 = vpop.f32.mrb[61].mxu0  ;;  %v1135_v42 = vpop.f32.mrb[62].mxu1 }
 0x19f   : > { %v1717_v39 = vpack.c.bf16 %v1446_v27, %v1445_v17  ;;  %v1448_v13 = vmax.f32 %v1432_v7, 0.0  ;;  %v1327_v31 = vadd.f32 %v1326_v32, %v1133_v3  ;;  %v1328_v43 = vpop.f32.mrb[62].mxu0  ;;  %v1137_v48 = vpop.f32.mrb[63].mxu1 }
 0x1a0   : > { %v1377_v11 = vmax.f32 %v2472_v51, %v1325_v21  ;;  %v1329_v35 = vadd.f32 %v1328_v43, %v1135_v42  ;;  %v1330_v26 = vpop.f32.mrb[63].mxu0 }
 0x1a1   : > { %1505 = vst [vmem:[%s2497_s15 + $0x20] sm:$0xff] %v1717_v39  ;;  %v1718_v29 = vpack.c.bf16 %v1448_v13, %v1447_v57  ;;  %v1378_v22 = vmax.f32 %v2477_v44, %v1327_v31  ;;  %v1331_v30 = vadd.f32 %v1330_v26, %v1137_v48 }
 0x1a2   : > { %v1433_v28 = vadd.f32 %v1414_v16, %v1377_v11  ;;  %v1379_v36 = vmax.f32 %v2482_v55, %v1329_v35 }
 0x1a3   : > { %1506 = vst [vmem:[%s2497_s15 + $0x28] sm:$0xff] %v1718_v29  ;;  %v1434_v49 = vadd.f32 %v1414_v16, %v1378_v22  ;;  %v1380_v58 = vmax.f32 %v2487_v47, %v1331_v30 }
 0x1a4   : > { %v1449_v51 = vmax.f32 %v1433_v28, 0.0  ;;  %v1435_v61 = vadd.f32 %v1419_v45, %v1379_v36 }
 0x1a5   : > { %v1450_v63 = vmax.f32 %v1434_v49, 0.0  ;;  %v1436_v38 = vadd.f32 %v1419_v45, %v1380_v58 }
 0x1a6   : > { %v1451_v40 = vmax.f32 %v1435_v61, 0.0 }
 0x1a7   : > { %v1719_v41 = vpack.c.bf16 %v1450_v63, %v1449_v51  ;;  %v1452_v46 = vmax.f32 %v1436_v38, 0.0 }
 0x1a9   : > { %1507 = vst [vmem:[%s2497_s15 + $0x30] sm:$0xff] %v1719_v41  ;;  %v1720_v54 = vpack.c.bf16 %v1452_v46, %v1451_v40 }
 0x1ab   : > { %1508 = vst [vmem:[%s2497_s15 + $0x38] sm:$0xff] %v1720_v54 }
 0x1ac PF: > { %s13_s12 = sadd.s32 1, %s1994_s12  }
 0x1ad   : > { %p10_p4 = scmp.ge.s32.totalorder %s13_s12, 4  }
 0x1af   :  { %12 = sbr.rel (!%p10_p4) target bundleno = 1 (0x1), region = 62 }

// kernel: cnn_forward.5
= control target key start
LH: loop header
LB: loop body
LE: loop exit
PB: predicated region body
PF: predicated region fallthrough
CT: control target
= control target key end

     0   :  { %s15512_s18 = smov 0   ;;  %s18804_s0 = inlined_call_operand.vmem [shape: bf16[16,16384], index: 0, kind: input, shape index: {}]   ;;  %s18805_s1 = inlined_call_operand.vmem [shape: bf16[16384,128], index: 1, kind: input, shape index: {}]   ;;  %s18806_s2 = inlined_call_operand.vmem [shape: f32[1,128], index: 2, kind: input, shape index: {}]   ;;  %s18807_s3 = inlined_call_operand.vmem [shape: f32[128,2], index: 3, kind: input, shape index: {}]   ;;  %s18808_s4 = inlined_call_operand.vmem [shape: f32[1,2], index: 4, kind: input, shape index: {}]   ;;  %s18809_s5 = inlined_call_operand.vmem [shape: f32[16,2], index: 5, kind: output, shape index: {}]  }
   0x1 LB: > { %s11655_s19 = sadd.s32 4294967295, %s15477_s18   ;;  %p11659_p0 = scmp.ge.s32.totalorder %s15477_s18, 1  ;;  %s15477_s18 = sphi %s15512_s18, %s15_s18  }
   0x2   : > { %p187_p1 = scmp.lt.s32.totalorder %s15477_s18, 3 }
   0x4   : > { %p188_p2 = pnand %p11659_p0, %p187_p1 }
   0x5   : > { %v14315_v0 = vld [vmem:[%s18805_s1 + $0x40] sm:$0xff] (!%p188_p2)   ;;  %v14319_v4 = vld [vmem:[%s18805_s1 + $0x48] sm:$0xff] (!%p188_p2)   ;;  %v14323_v8 = vld [vmem:[%s18805_s1 + $0x50] sm:$0xff] (!%p188_p2)   ;;  %p214_p3 = scmp.lt.s32.totalorder (!%p188_p2), %s11655_s19, 1  ;;  %vm15480_vm0 = vmmov (!%p188_p2), 0   ;;  %vm11589_vm1 = vcmask (!%p188_p2), 15360  }
   0x6   : > { %191 = sbr.rel (%p188_p2) target bundleno = 1781 (0x6f5), region = 40  ;;  %v14316_v1 = vld [vmem:[%s18805_s1 + $0xc0] sm:$0xff] (!%p188_p2)   ;;  %12820 = vmatprep.subr.bf16.mxu0 (!%p188_p2), %v14315_v0  ;;  %v14320_v5 = vld [vmem:[%s18805_s1 + $0xc8] sm:$0xff] (!%p188_p2)   ;;  %v14324_v9 = vld [vmem:[%s18805_s1 + $0xd0] sm:$0xff] (!%p188_p2)  }
   0x7   : > { %v14317_v2 = vld [vmem:[%s18805_s1] sm:$0xff] (!%p188_p2)   ;;  %12842 = vmatprep.subr.bf16.mxu1 (!%p188_p2), %v14316_v1  ;;  %v14321_v6 = vld [vmem:[%s18805_s1 + $0x8] sm:$0xff] (!%p188_p2)   ;;  %v14325_v10 = vld [vmem:[%s18805_s1 + $0x10] sm:$0xff] (!%p188_p2)  }
   0x8   : > { %v14318_v3 = vld [vmem:[%s18805_s1 + $0x80] sm:$0xff] (!%p188_p2)   ;;  %12821 = vmatpush3.bf16.msra.mxu0 (!%p188_p2), %v14317_v2  ;;  %v14322_v7 = vld [vmem:[%s18805_s1 + $0x88] sm:$0xff] (!%p188_p2)   ;;  %v14326_v11 = vld [vmem:[%s18805_s1 + $0x90] sm:$0xff] (!%p188_p2)  }
   0x9   : > { %12843 = vmatpush3.bf16.msra.mxu1 (!%p188_p2), %v14318_v3  ;;  %12822 = vmatprep.subr.bf16.mxu0 (!%p188_p2), %v14319_v4  ;;  %v14327_v12 = vld [vmem:[%s18805_s1 + $0x58] sm:$0xff] (!%p188_p2)   ;;  %v14331_v16 = vld [vmem:[%s18805_s1 + $0x60] sm:$0xff] (!%p188_p2)   ;;  %v14335_v20 = vld [vmem:[%s18805_s1 + $0x68] sm:$0xff] (!%p188_p2)  }
   0xa   : > { %12844 = vmatprep.subr.bf16.mxu1 (!%p188_p2), %v14320_v5  ;;  %v14328_v13 = vld [vmem:[%s18805_s1 + $0xd8] sm:$0xff] (!%p188_p2)   ;;  %v14332_v17 = vld [vmem:[%s18805_s1 + $0xe0] sm:$0xff] (!%p188_p2)   ;;  %v14336_v21 = vld [vmem:[%s18805_s1 + $0xe8] sm:$0xff] (!%p188_p2)  }
   0xb   : > { %v14329_v14 = vld [vmem:[%s18805_s1 + $0x18] sm:$0xff] (!%p188_p2)   ;;  %v14333_v18 = vld [vmem:[%s18805_s1 + $0x20] sm:$0xff] (!%p188_p2)   ;;  %v14337_v22 = vld [vmem:[%s18805_s1 + $0x28] sm:$0xff] (!%p188_p2)  }
   0xc   : > { %12823 = vmatpush3.bf16.msra.mxu0 (!%p188_p2), %v14321_v6  ;;  %v14330_v15 = vld [vmem:[%s18805_s1 + $0x98] sm:$0xff] (!%p188_p2)   ;;  %v14334_v19 = vld [vmem:[%s18805_s1 + $0xa0] sm:$0xff] (!%p188_p2)   ;;  %v14338_v23 = vld [vmem:[%s18805_s1 + $0xa8] sm:$0xff] (!%p188_p2)  }
   0xd   : > { %12845 = vmatpush3.bf16.msra.mxu1 %v14322_v7  ;;  %12824 = vmatprep.subr.bf16.mxu0 %v14323_v8  ;;  %s18811_s19 = smov (!%p214_p3, %s11655_s19), 1  ;;  %v14339_v24 = vld [vmem:[%s18805_s1 + $0x70] sm:$0xff]   ;;  %v14343_v28 = vld [vmem:[%s18805_s1 + $0x78] sm:$0xff]   ;;  %v14351_v38 = vld [vmem:[%s18805_s1 + $0x140] sm:$0xff]  }
   0xe   : > { %12846 = vmatprep.subr.bf16.mxu1 %v14324_v9  ;;  %v14340_v25 = vld [vmem:[%s18805_s1 + $0xf0] sm:$0xff]   ;;  %s12819_s28 = sshll.u32 %s18811_s19, 9  ;;  %v14344_v29 = vld [vmem:[%s18805_s1 + $0xf8] sm:$0xff]   ;;  %v14352_v39 = vld [vmem:[%s18805_s1 + $0x1c0] sm:$0xff]   ;;  %s11662_s10 = sshll.u32 %s18811_s19, 3 }
   0xf   : > { %v14341_v26 = vld [vmem:[%s18805_s1 + $0x30] sm:$0xff]   ;;  %s15620_s12 = scalar_lea.vmem %s18804_s0, %s12819_s28  ;;  %v14345_v30 = vld [vmem:[%s18805_s1 + $0x38] sm:$0xff]   ;;  %v14353_v40 = vld [vmem:[%s18805_s1 + $0x100] sm:$0xff]   ;;  %s222_s14 = scalar_lea.vmem %s18809_s5, %s11662_s10 }
  0x10   : > { %12825 = vmatpush3.bf16.msra.mxu0 %v14325_v10  ;;  %v14342_v27 = vld [vmem:[%s18805_s1 + $0xb0] sm:$0xff]   ;;  %v14346_v31 = vld [vmem:[%s18805_s1 + $0xb8] sm:$0xff]   ;;  %v224_v32 = vld [vmem:[%s15620_s12] sm:$0xff] }
  0x11   : > { %12847 = vmatpush3.bf16.msra.mxu1 %v14326_v11  ;;  %12826 = vmatprep.subr.bf16.mxu0 %v14327_v12  ;;  %v225_v33 = vld [vmem:[%s15620_s12 + $0x8] sm:$0xff]  ;;  %v11664_v34 = vcombine.low %v224_v32, %v224_v32  ;;  %v11665_v35 = vcombine.high %v224_v32, %v224_v32  ;;  %v14354_v41 = vld [vmem:[%s18805_s1 + $0x180] sm:$0xff]   ;;  %v14359_v46 = vld [vmem:[%s18805_s1 + $0x150] sm:$0xff]  }
  0x12   : > { %12848 = vmatprep.subr.bf16.mxu1 %v14328_v13  ;;  %v11666_v36 = vcombine.low %v225_v33, %v225_v33  ;;  %v11667_v37 = vcombine.high %v225_v33, %v225_v33  ;;  %v14355_v42 = vld [vmem:[%s18805_s1 + $0x148] sm:$0xff]   ;;  %v14360_v47 = vld [vmem:[%s18805_s1 + $0x1d0] sm:$0xff]   ;;  %v14363_v50 = vld [vmem:[%s18805_s1 + $0x158] sm:$0xff]  }
  0x13   : > { %8967 = vmatprep.mubr.bf16.mxu0 %v11665_v35  ;;  %v14356_v43 = vld [vmem:[%s18805_s1 + $0x1c8] sm:$0xff]   ;;  %v14361_v48 = vld [vmem:[%s18805_s1 + $0x110] sm:$0xff]   ;;  %v14364_v51 = vld [vmem:[%s18805_s1 + $0x1d8] sm:$0xff]  }
  0x14   : > { %12827 = vmatpush3.bf16.msra.mxu0 %v14329_v14  ;;  %9007 = vmatprep.mubr.bf16.mxu1 %v11667_v37  ;;  %v14357_v44 = vld [vmem:[%s18805_s1 + $0x108] sm:$0xff]   ;;  %v14362_v49 = vld [vmem:[%s18805_s1 + $0x190] sm:$0xff]   ;;  %v14365_v52 = vld [vmem:[%s18805_s1 + $0x118] sm:$0xff]  }
  0x15   : > { %12849 = vmatpush3.bf16.msra.mxu1 %v14330_v15  ;;  %12828 = vmatprep.subr.bf16.mxu0 %v14331_v16  ;;  %v14358_v45 = vld [vmem:[%s18805_s1 + $0x188] sm:$0xff]   ;;  %v14366_v53 = vld [vmem:[%s18805_s1 + $0x198] sm:$0xff]   ;;  %v14367_v54 = vld [vmem:[%s18805_s1 + $0x160] sm:$0xff]  }
  0x16   : > { %12850 = vmatprep.subr.bf16.mxu1 %v14332_v17  ;;  %v14368_v55 = vld [vmem:[%s18805_s1 + $0x1e0] sm:$0xff]   ;;  %v14371_v58 = vld [vmem:[%s18805_s1 + $0x168] sm:$0xff]   ;;  %v14375_v62 = vld [vmem:[%s18805_s1 + $0x170] sm:$0xff]  }
  0x17   : > { %v14369_v56 = vld [vmem:[%s18805_s1 + $0x120] sm:$0xff]   ;;  %v14372_v59 = vld [vmem:[%s18805_s1 + $0x1e8] sm:$0xff]   ;;  %v14376_v63 = vld [vmem:[%s18805_s1 + $0x1f0] sm:$0xff]  }
  0x18   : > { %12829 = vmatpush3.bf16.msra.mxu0 %v14333_v18  ;;  %v14370_v57 = vld [vmem:[%s18805_s1 + $0x1a0] sm:$0xff]   ;;  %v14373_v60 = vld [vmem:[%s18805_s1 + $0x128] sm:$0xff]   ;;  %v14377_v0 = vld [vmem:[%s18805_s1 + $0x130] sm:$0xff]  }
  0x19   : > { %12851 = vmatpush3.bf16.msra.mxu1 %v14334_v19  ;;  %12830 = vmatprep.subr.bf16.mxu0 %v14335_v20  ;;  %v14374_v61 = vld [vmem:[%s18805_s1 + $0x1a8] sm:$0xff]   ;;  %v14378_v1 = vld [vmem:[%s18805_s1 + $0x1b0] sm:$0xff]   ;;  %v14379_v2 = vld [vmem:[%s18805_s1 + $0x178] sm:$0xff]  }
  0x1a   : > { %12852 = vmatprep.subr.bf16.mxu1 %v14336_v21  ;;  %v14380_v3 = vld [vmem:[%s18805_s1 + $0x1f8] sm:$0xff]   ;;  %v226_v6 = vld [vmem:[%s15620_s12 + $0x10] sm:$0xff]  ;;  %v14387_v12 = vld [vmem:[%s18805_s1 + $0x240] sm:$0xff]  }
  0x1b   : > { %v14381_v4 = vld [vmem:[%s18805_s1 + $0x138] sm:$0xff]   ;;  %v11668_v7 = vcombine.low %v226_v6, %v226_v6  ;;  %v11669_v8 = vcombine.high %v226_v6, %v226_v6  ;;  %v14388_v13 = vld [vmem:[%s18805_s1 + $0x2c0] sm:$0xff]   ;;  %v14391_v16 = vld [vmem:[%s18805_s1 + $0x248] sm:$0xff]  }
  0x1c   : > { %12831 = vmatpush3.bf16.msra.mxu0 %v14337_v22  ;;  %v14382_v5 = vld [vmem:[%s18805_s1 + $0x1b8] sm:$0xff]   ;;  %v14389_v14 = vld [vmem:[%s18805_s1 + $0x200] sm:$0xff]   ;;  %v14392_v17 = vld [vmem:[%s18805_s1 + $0x2c8] sm:$0xff]  }
  0x1d   : > { %12853 = vmatpush3.bf16.msra.mxu1 %v14338_v23  ;;  %12832 = vmatprep.subr.bf16.mxu0 %v14339_v24  ;;  %v227_v9 = vld [vmem:[%s15620_s12 + $0x18] sm:$0xff]  ;;  %v14390_v15 = vld [vmem:[%s18805_s1 + $0x280] sm:$0xff]   ;;  %v14393_v18 = vld [vmem:[%s18805_s1 + $0x208] sm:$0xff]  }
  0x1e   : > { %12854 = vmatprep.subr.bf16.mxu1 %v14340_v25  ;;  %v11670_v10 = vcombine.low %v227_v9, %v227_v9  ;;  %v11671_v11 = vcombine.high %v227_v9, %v227_v9  ;;  %v14394_v19 = vld [vmem:[%s18805_s1 + $0x288] sm:$0xff]   ;;  %v14395_v20 = vld [vmem:[%s18805_s1 + $0x250] sm:$0xff]   ;;  %v14399_v24 = vld [vmem:[%s18805_s1 + $0x258] sm:$0xff]  }
  0x1f   : > { %v14396_v21 = vld [vmem:[%s18805_s1 + $0x2d0] sm:$0xff]   ;;  %v14400_v25 = vld [vmem:[%s18805_s1 + $0x2d8] sm:$0xff]   ;;  %v14407_v32 = vld [vmem:[%s18805_s1 + $0x268] sm:$0xff]  }
  0x20   : > { %12833 = vmatpush3.bf16.msra.mxu0 %v14341_v26  ;;  %v14397_v22 = vld [vmem:[%s18805_s1 + $0x210] sm:$0xff]   ;;  %v14401_v26 = vld [vmem:[%s18805_s1 + $0x218] sm:$0xff]   ;;  %v14408_v33 = vld [vmem:[%s18805_s1 + $0x2e8] sm:$0xff]  }
  0x21   : > { %12855 = vmatpush3.bf16.msra.mxu1 %v14342_v27  ;;  %12834 = vmatprep.subr.bf16.mxu0 %v14343_v28  ;;  %v14398_v23 = vld [vmem:[%s18805_s1 + $0x290] sm:$0xff]   ;;  %v14402_v27 = vld [vmem:[%s18805_s1 + $0x298] sm:$0xff]   ;;  %v14403_v28 = vld [vmem:[%s18805_s1 + $0x260] sm:$0xff]  }
  0x22   : > { %12856 = vmatprep.subr.bf16.mxu1 %v14344_v29  ;;  %v14404_v29 = vld [vmem:[%s18805_s1 + $0x2e0] sm:$0xff]   ;;  %v14410_v35 = vld [vmem:[%s18805_s1 + $0x2a8] sm:$0xff]   ;;  %v14412_v37 = vld [vmem:[%s18805_s1 + $0x2f0] sm:$0xff]  }
  0x23   : > { %v14443_v6 = vld [vmem:[%s18805_s1 + $0x368] sm:$0xff]  }
  0x24   : > { %12835 = vmatpush3.bf16.msra.mxu0 %v14345_v30  ;;  %v14405_v30 = vld [vmem:[%s18805_s1 + $0x220] sm:$0xff]   ;;  %v14446_v9 = vld [vmem:[%s18805_s1 + $0x3a8] sm:$0xff]  }
  0x25   : > { %12857 = vmatpush3.bf16.msra.mxu1 %v14346_v31  ;;  %12864 = vmatprep.subr.bf16.mxu0 %v14351_v38  ;;  %v14406_v31 = vld [vmem:[%s18805_s1 + $0x2a0] sm:$0xff]   ;;  %v14413_v38 = vld [vmem:[%s18805_s1 + $0x230] sm:$0xff]  }
  0x26   : > { %12886 = vmatprep.subr.bf16.mxu1 %v14352_v39  ;;  %v14414_v39 = vld [vmem:[%s18805_s1 + $0x2b0] sm:$0xff]  }
  0x27   : > { %8968 = vmatmul.mubr.bf16.vlgmr.msra.gmra.mrb[0].mxu0 %v11664_v34  ;;  %v14409_v34 = vld [vmem:[%s18805_s1 + $0x228] sm:$0xff]  }
  0x28   : > { %9008 = vmatmul.mubr.bf16.vlgmr.msra.gmra.mrb[0].mxu1 %v11666_v36  ;;  %12865 = vmatpush3.bf16.msra.mxu0 %v14353_v40  ;;  %v14411_v36 = vld [vmem:[%s18805_s1 + $0x270] sm:$0xff]   ;;  %v14415_v40 = vld [vmem:[%s18805_s1 + $0x278] sm:$0xff]  }
  0x29   : > { %12887 = vmatpush3.bf16.msra.mxu1 %v14354_v41  ;;  %12866 = vmatprep.subr.bf16.mxu0 %v14355_v42  ;;  %v14416_v41 = vld [vmem:[%s18805_s1 + $0x2f8] sm:$0xff]  }
  0x2a   : > { %12888 = vmatprep.subr.bf16.mxu1 %v14356_v43  ;;  %9047 = vmatprep.mubr.bf16.mxu0 %v11669_v8  ;;  %v14417_v42 = vld [vmem:[%s18805_s1 + $0x238] sm:$0xff]   ;;  %v14445_v8 = vld [vmem:[%s18805_s1 + $0x328] sm:$0xff]  }
  0x2b   : > { %9087 = vmatprep.mubr.bf16.mxu1 %v11671_v11  ;;  %v14418_v43 = vld [vmem:[%s18805_s1 + $0x2b8] sm:$0xff]   ;;  %v14448_v11 = vld [vmem:[%s18805_s1 + $0x3f0] sm:$0xff]  }
  0x2c   : > { %12867 = vmatpush3.bf16.msra.mxu0 %v14357_v44  ;;  %v228_v44 = vld [vmem:[%s15620_s12 + $0x20] sm:$0xff] }
  0x2d   : > { %12889 = vmatpush3.bf16.msra.mxu1 %v14358_v45  ;;  %12868 = vmatprep.subr.bf16.mxu0 %v14359_v46  ;;  %v229_v45 = vld [vmem:[%s15620_s12 + $0x28] sm:$0xff]  ;;  %v11672_v46 = vcombine.low %v228_v44, %v228_v44 }
  0x2e   : > { %12890 = vmatprep.subr.bf16.mxu1 %v14360_v47  ;;  %v11673_v47 = vcombine.high %v228_v44, %v228_v44  ;;  %v14479_v44 = vld [vmem:[%s18805_s1 + $0x468] sm:$0xff]  }
  0x30   : > { %12869 = vmatpush3.bf16.msra.mxu0 %v14361_v48  ;;  %v11674_v48 = vcombine.low %v229_v45, %v229_v45 }
  0x31   : > { %12891 = vmatpush3.bf16.msra.mxu1 %v14362_v49  ;;  %12870 = vmatprep.subr.bf16.mxu0 %v14363_v50  ;;  %v11675_v49 = vcombine.high %v229_v45, %v229_v45  ;;  %v14423_v50 = vld [vmem:[%s18805_s1 + $0x340] sm:$0xff]   ;;  %v14480_v45 = vld [vmem:[%s18805_s1 + $0x4e8] sm:$0xff]  }
  0x32   : > { %12892 = vmatprep.subr.bf16.mxu1 %v14364_v51  ;;  %v14424_v51 = vld [vmem:[%s18805_s1 + $0x3c0] sm:$0xff]  }
  0x34   : > { %12871 = vmatpush3.bf16.msra.mxu0 %v14365_v52  ;;  %v14425_v52 = vld [vmem:[%s18805_s1 + $0x300] sm:$0xff]  }
  0x35   : > { %12893 = vmatpush3.bf16.msra.mxu1 %v14366_v53  ;;  %12872 = vmatprep.subr.bf16.mxu0 %v14367_v54  ;;  %v14426_v53 = vld [vmem:[%s18805_s1 + $0x380] sm:$0xff]   ;;  %v14427_v54 = vld [vmem:[%s18805_s1 + $0x348] sm:$0xff]  }
  0x36   : > { %12894 = vmatprep.subr.bf16.mxu1 %v14368_v55  ;;  %v14428_v55 = vld [vmem:[%s18805_s1 + $0x3c8] sm:$0xff]  }
  0x38   : > { %12873 = vmatpush3.bf16.msra.mxu0 %v14369_v56  ;;  %v14429_v56 = vld [vmem:[%s18805_s1 + $0x308] sm:$0xff]  }
  0x39   : > { %12895 = vmatpush3.bf16.msra.mxu1 %v14370_v57  ;;  %12874 = vmatprep.subr.bf16.mxu0 %v14371_v58  ;;  %v14430_v57 = vld [vmem:[%s18805_s1 + $0x388] sm:$0xff]   ;;  %v14431_v58 = vld [vmem:[%s18805_s1 + $0x350] sm:$0xff]  }
  0x3a   : > { %12896 = vmatprep.subr.bf16.mxu1 %v14372_v59  ;;  %v14432_v59 = vld [vmem:[%s18805_s1 + $0x3d0] sm:$0xff]  }
  0x3c   : > { %12875 = vmatpush3.bf16.msra.mxu0 %v14373_v60  ;;  %v14433_v60 = vld [vmem:[%s18805_s1 + $0x310] sm:$0xff]  }
  0x3d   : > { %12897 = vmatpush3.bf16.msra.mxu1 %v14374_v61  ;;  %12876 = vmatprep.subr.bf16.mxu0 %v14375_v62  ;;  %v14434_v61 = vld [vmem:[%s18805_s1 + $0x390] sm:$0xff]   ;;  %v14435_v62 = vld [vmem:[%s18805_s1 + $0x358] sm:$0xff]  }
  0x3e   : > { %12898 = vmatprep.subr.bf16.mxu1 %v14376_v63  ;;  %v14436_v63 = vld [vmem:[%s18805_s1 + $0x3d8] sm:$0xff]  }
  0x40   : > { %12877 = vmatpush3.bf16.msra.mxu0 %v14377_v0  ;;  %v14437_v0 = vld [vmem:[%s18805_s1 + $0x318] sm:$0xff]  }
  0x41   : > { %12899 = vmatpush3.bf16.msra.mxu1 %v14378_v1  ;;  %12878 = vmatprep.subr.bf16.mxu0 %v14379_v2  ;;  %v14438_v1 = vld [vmem:[%s18805_s1 + $0x398] sm:$0xff]   ;;  %v14439_v2 = vld [vmem:[%s18805_s1 + $0x360] sm:$0xff]  }
  0x42   : > { %12900 = vmatprep.subr.bf16.mxu1 %v14380_v3  ;;  %v14440_v3 = vld [vmem:[%s18805_s1 + $0x3e0] sm:$0xff]  }
  0x44   : > { %12879 = vmatpush3.bf16.msra.mxu0 %v14381_v4  ;;  %v14441_v4 = vld [vmem:[%s18805_s1 + $0x320] sm:$0xff]  }
  0x45   : > { %12901 = vmatpush3.bf16.msra.mxu1 %v14382_v5  ;;  %12908 = vmatprep.subr.bf16.mxu0 %v14387_v12  ;;  %v14442_v5 = vld [vmem:[%s18805_s1 + $0x3a0] sm:$0xff]   ;;  %v14449_v12 = vld [vmem:[%s18805_s1 + $0x330] sm:$0xff]  }
  0x46   : > { %12930 = vmatprep.subr.bf16.mxu1 %v14388_v13  ;;  %v14450_v13 = vld [vmem:[%s18805_s1 + $0x3b0] sm:$0xff]  }
  0x47   : > { %9048 = vmatmul.mubr.bf16.vlgmr.msra.gmra.mrb[4].mxu0 %v11668_v7  ;;  %v14444_v7 = vld [vmem:[%s18805_s1 + $0x3e8] sm:$0xff]  }
  0x48   : > { %9088 = vmatmul.mubr.bf16.vlgmr.msra.gmra.mrb[4].mxu1 %v11670_v10  ;;  %12909 = vmatpush3.bf16.msra.mxu0 %v14389_v14  ;;  %v14447_v10 = vld [vmem:[%s18805_s1 + $0x370] sm:$0xff]   ;;  %v14451_v14 = vld [vmem:[%s18805_s1 + $0x378] sm:$0xff]  }
  0x49   : > { %12931 = vmatpush3.bf16.msra.mxu1 %v14390_v15  ;;  %12910 = vmatprep.subr.bf16.mxu0 %v14391_v16  ;;  %v14452_v15 = vld [vmem:[%s18805_s1 + $0x3f8] sm:$0xff]  }
  0x4a   : > { %12932 = vmatprep.subr.bf16.mxu1 %v14392_v17  ;;  %9127 = vmatprep.mubr.bf16.mxu0 %v11673_v47  ;;  %v14453_v16 = vld [vmem:[%s18805_s1 + $0x338] sm:$0xff]   ;;  %v14482_v47 = vld [vmem:[%s18805_s1 + $0x4a8] sm:$0xff]  }
  0x4b   : > { %9167 = vmatprep.mubr.bf16.mxu1 %v11675_v49  ;;  %v14454_v17 = vld [vmem:[%s18805_s1 + $0x3b8] sm:$0xff]   ;;  %v14484_v49 = vld [vmem:[%s18805_s1 + $0x4f0] sm:$0xff]  }
  0x4c   : > { %12911 = vmatpush3.bf16.msra.mxu0 %v14393_v18  ;;  %v230_v18 = vld [vmem:[%s15620_s12 + $0x30] sm:$0xff] }
  0x4d   : > { %12933 = vmatpush3.bf16.msra.mxu1 %v14394_v19  ;;  %12912 = vmatprep.subr.bf16.mxu0 %v14395_v20  ;;  %v231_v19 = vld [vmem:[%s15620_s12 + $0x38] sm:$0xff]  ;;  %v11676_v20 = vcombine.low %v230_v18, %v230_v18 }
  0x4e   : > { %12934 = vmatprep.subr.bf16.mxu1 %v14396_v21  ;;  %v11677_v21 = vcombine.high %v230_v18, %v230_v18  ;;  %v14515_v18 = vld [vmem:[%s18805_s1 + $0x568] sm:$0xff]  }
  0x50   : > { %12913 = vmatpush3.bf16.msra.mxu0 %v14397_v22  ;;  %v11678_v22 = vcombine.low %v231_v19, %v231_v19 }
  0x51   : > { %12935 = vmatpush3.bf16.msra.mxu1 %v14398_v23  ;;  %12914 = vmatprep.subr.bf16.mxu0 %v14399_v24  ;;  %v14459_v23 = vld [vmem:[%s18805_s1 + $0x440] sm:$0xff]   ;;  %v11679_v24 = vcombine.high %v231_v19, %v231_v19  ;;  %v14516_v19 = vld [vmem:[%s18805_s1 + $0x5e8] sm:$0xff]  }
  0x52   : > { %12936 = vmatprep.subr.bf16.mxu1 %v14400_v25  ;;  %v14460_v25 = vld [vmem:[%s18805_s1 + $0x4c0] sm:$0xff]  }
  0x54   : > { %12915 = vmatpush3.bf16.msra.mxu0 %v14401_v26  ;;  %v14461_v26 = vld [vmem:[%s18805_s1 + $0x400] sm:$0xff]  }
  0x55   : > { %12937 = vmatpush3.bf16.msra.mxu1 %v14402_v27  ;;  %12916 = vmatprep.subr.bf16.mxu0 %v14403_v28  ;;  %v14462_v27 = vld [vmem:[%s18805_s1 + $0x480] sm:$0xff]   ;;  %v14463_v28 = vld [vmem:[%s18805_s1 + $0x448] sm:$0xff]  }
  0x56   : > { %12938 = vmatprep.subr.bf16.mxu1 %v14404_v29  ;;  %v14464_v29 = vld [vmem:[%s18805_s1 + $0x4c8] sm:$0xff]  }
  0x58   : > { %12917 = vmatpush3.bf16.msra.mxu0 %v14405_v30  ;;  %v14465_v30 = vld [vmem:[%s18805_s1 + $0x408] sm:$0xff]  }
  0x59   : > { %12939 = vmatpush3.bf16.msra.mxu1 %v14406_v31  ;;  %12918 = vmatprep.subr.bf16.mxu0 %v14407_v32  ;;  %v14466_v31 = vld [vmem:[%s18805_s1 + $0x488] sm:$0xff]   ;;  %v14467_v32 = vld [vmem:[%s18805_s1 + $0x450] sm:$0xff]  }
  0x5a   : > { %12940 = vmatprep.subr.bf16.mxu1 %v14408_v33  ;;  %v14468_v33 = vld [vmem:[%s18805_s1 + $0x4d0] sm:$0xff]  }
  0x5c   : > { %12919 = vmatpush3.bf16.msra.mxu0 %v14409_v34  ;;  %v14469_v34 = vld [vmem:[%s18805_s1 + $0x410] sm:$0xff]  }
  0x5d   : > { %12941 = vmatpush3.bf16.msra.mxu1 %v14410_v35  ;;  %12920 = vmatprep.subr.bf16.mxu0 %v14411_v36  ;;  %v14470_v35 = vld [vmem:[%s18805_s1 + $0x490] sm:$0xff]   ;;  %v14471_v36 = vld [vmem:[%s18805_s1 + $0x458] sm:$0xff]  }
  0x5e   : > { %12942 = vmatprep.subr.bf16.mxu1 %v14412_v37  ;;  %v14472_v37 = vld [vmem:[%s18805_s1 + $0x4d8] sm:$0xff]  }
  0x60   : > { %12921 = vmatpush3.bf16.msra.mxu0 %v14413_v38  ;;  %v14473_v38 = vld [vmem:[%s18805_s1 + $0x418] sm:$0xff]  }
  0x61   : > { %12943 = vmatpush3.bf16.msra.mxu1 %v14414_v39  ;;  %12922 = vmatprep.subr.bf16.mxu0 %v14415_v40  ;;  %v14474_v39 = vld [vmem:[%s18805_s1 + $0x498] sm:$0xff]   ;;  %v14475_v40 = vld [vmem:[%s18805_s1 + $0x460] sm:$0xff]  }
  0x62   : > { %12944 = vmatprep.subr.bf16.mxu1 %v14416_v41  ;;  %v14476_v41 = vld [vmem:[%s18805_s1 + $0x4e0] sm:$0xff]  }
  0x64   : > { %12923 = vmatpush3.bf16.msra.mxu0 %v14417_v42  ;;  %v14477_v42 = vld [vmem:[%s18805_s1 + $0x420] sm:$0xff]  }
  0x65   : > { %12945 = vmatpush3.bf16.msra.mxu1 %v14418_v43  ;;  %12952 = vmatprep.subr.bf16.mxu0 %v14423_v50  ;;  %v14478_v43 = vld [vmem:[%s18805_s1 + $0x4a0] sm:$0xff]   ;;  %v14485_v50 = vld [vmem:[%s18805_s1 + $0x430] sm:$0xff]  }
  0x66   : > { %12974 = vmatprep.subr.bf16.mxu1 %v14424_v51  ;;  %v14486_v51 = vld [vmem:[%s18805_s1 + $0x4b0] sm:$0xff]  }
  0x67   : > { %9128 = vmatmul.mubr.bf16.vlgmr.msra.gmra.mrb[8].mxu0 %v11672_v46  ;;  %v14481_v46 = vld [vmem:[%s18805_s1 + $0x428] sm:$0xff]  }
  0x68   : > { %9168 = vmatmul.mubr.bf16.vlgmr.msra.gmra.mrb[8].mxu1 %v11674_v48  ;;  %12953 = vmatpush3.bf16.msra.mxu0 %v14425_v52  ;;  %v14483_v48 = vld [vmem:[%s18805_s1 + $0x470] sm:$0xff]   ;;  %v14487_v52 = vld [vmem:[%s18805_s1 + $0x478] sm:$0xff]  }
  0x69   : > { %12975 = vmatpush3.bf16.msra.mxu1 %v14426_v53  ;;  %12954 = vmatprep.subr.bf16.mxu0 %v14427_v54  ;;  %v14488_v53 = vld [vmem:[%s18805_s1 + $0x4f8] sm:$0xff]  }
  0x6a   : > { %12976 = vmatprep.subr.bf16.mxu1 %v14428_v55  ;;  %9207 = vmatprep.mubr.bf16.mxu0 %v11677_v21  ;;  %v14489_v54 = vld [vmem:[%s18805_s1 + $0x438] sm:$0xff]   ;;  %v14518_v21 = vld [vmem:[%s18805_s1 + $0x5a8] sm:$0xff]  }
  0x6b   : > { %9247 = vmatprep.mubr.bf16.mxu1 %v11679_v24  ;;  %v14490_v55 = vld [vmem:[%s18805_s1 + $0x4b8] sm:$0xff]   ;;  %v14521_v24 = vld [vmem:[%s18805_s1 + $0x530] sm:$0xff]  }
  0x6c   : > { %12955 = vmatpush3.bf16.msra.mxu0 %v14429_v56  ;;  %v232_v56 = vld [vmem:[%s15620_s12 + $0x40] sm:$0xff] }
  0x6d   : > { %12977 = vmatpush3.bf16.msra.mxu1 %v14430_v57  ;;  %12956 = vmatprep.subr.bf16.mxu0 %v14431_v58  ;;  %v11680_v57 = vcombine.low %v232_v56, %v232_v56  ;;  %v11681_v58 = vcombine.high %v232_v56, %v232_v56  ;;  %v14551_v56 = vld [vmem:[%s18805_s1 + $0x668] sm:$0xff]  }
  0x6e   : > { %12978 = vmatprep.subr.bf16.mxu1 %v14432_v59  ;;  %v233_v59 = vld [vmem:[%s15620_s12 + $0x48] sm:$0xff] }
  0x70   : > { %12957 = vmatpush3.bf16.msra.mxu0 %v14433_v60  ;;  %v11682_v60 = vcombine.low %v233_v59, %v233_v59 }
  0x71   : > { %12979 = vmatpush3.bf16.msra.mxu1 %v14434_v61  ;;  %12958 = vmatprep.subr.bf16.mxu0 %v14435_v62  ;;  %v11683_v61 = vcombine.high %v233_v59, %v233_v59  ;;  %v14495_v62 = vld [vmem:[%s18805_s1 + $0x540] sm:$0xff]   ;;  %v14554_v59 = vld [vmem:[%s18805_s1 + $0x6a8] sm:$0xff]  }
  0x72   : > { %12980 = vmatprep.subr.bf16.mxu1 %v14436_v63  ;;  %v14496_v63 = vld [vmem:[%s18805_s1 + $0x5c0] sm:$0xff]  }
  0x74   : > { %12959 = vmatpush3.bf16.msra.mxu0 %v14437_v0  ;;  %v14497_v0 = vld [vmem:[%s18805_s1 + $0x500] sm:$0xff]  }
  0x75   : > { %12981 = vmatpush3.bf16.msra.mxu1 %v14438_v1  ;;  %12960 = vmatprep.subr.bf16.mxu0 %v14439_v2  ;;  %v14498_v1 = vld [vmem:[%s18805_s1 + $0x580] sm:$0xff]   ;;  %v14499_v2 = vld [vmem:[%s18805_s1 + $0x548] sm:$0xff]  }
  0x76   : > { %12982 = vmatprep.subr.bf16.mxu1 %v14440_v3  ;;  %v14500_v3 = vld [vmem:[%s18805_s1 + $0x5c8] sm:$0xff]  }
  0x78   : > { %12961 = vmatpush3.bf16.msra.mxu0 %v14441_v4  ;;  %v14501_v4 = vld [vmem:[%s18805_s1 + $0x508] sm:$0xff]  }
  0x79   : > { %12983 = vmatpush3.bf16.msra.mxu1 %v14442_v5  ;;  %12962 = vmatprep.subr.bf16.mxu0 %v14443_v6  ;;  %v14502_v5 = vld [vmem:[%s18805_s1 + $0x588] sm:$0xff]   ;;  %v14503_v6 = vld [vmem:[%s18805_s1 + $0x550] sm:$0xff]  }
  0x7a   : > { %12984 = vmatprep.subr.bf16.mxu1 %v14444_v7  ;;  %v14504_v7 = vld [vmem:[%s18805_s1 + $0x5d0] sm:$0xff]  }
  0x7c   : > { %12963 = vmatpush3.bf16.msra.mxu0 %v14445_v8  ;;  %v14505_v8 = vld [vmem:[%s18805_s1 + $0x510] sm:$0xff]  }
  0x7d   : > { %12985 = vmatpush3.bf16.msra.mxu1 %v14446_v9  ;;  %12964 = vmatprep.subr.bf16.mxu0 %v14447_v10  ;;  %v14506_v9 = vld [vmem:[%s18805_s1 + $0x590] sm:$0xff]   ;;  %v14507_v10 = vld [vmem:[%s18805_s1 + $0x558] sm:$0xff]  }
  0x7e   : > { %12986 = vmatprep.subr.bf16.mxu1 %v14448_v11  ;;  %v14508_v11 = vld [vmem:[%s18805_s1 + $0x5d8] sm:$0xff]  }
  0x80   : > { %12965 = vmatpush3.bf16.msra.mxu0 %v14449_v12  ;;  %v14509_v12 = vld [vmem:[%s18805_s1 + $0x518] sm:$0xff]  }
  0x81   : > { %12987 = vmatpush3.bf16.msra.mxu1 %v14450_v13  ;;  %12966 = vmatprep.subr.bf16.mxu0 %v14451_v14  ;;  %v14510_v13 = vld [vmem:[%s18805_s1 + $0x598] sm:$0xff]   ;;  %v14511_v14 = vld [vmem:[%s18805_s1 + $0x560] sm:$0xff]  }
  0x82   : > { %12988 = vmatprep.subr.bf16.mxu1 %v14452_v15  ;;  %v14512_v15 = vld [vmem:[%s18805_s1 + $0x5e0] sm:$0xff]  }
  0x84   : > { %12967 = vmatpush3.bf16.msra.mxu0 %v14453_v16  ;;  %v14513_v16 = vld [vmem:[%s18805_s1 + $0x520] sm:$0xff]  }
  0x85   : > { %12989 = vmatpush3.bf16.msra.mxu1 %v14454_v17  ;;  %12996 = vmatprep.subr.bf16.mxu0 %v14459_v23  ;;  %v14514_v17 = vld [vmem:[%s18805_s1 + $0x5a0] sm:$0xff]   ;;  %v14520_v23 = vld [vmem:[%s18805_s1 + $0x5f0] sm:$0xff]  }
  0x86   : > { %13018 = vmatprep.subr.bf16.mxu1 %v14460_v25  ;;  %v14522_v25 = vld [vmem:[%s18805_s1 + $0x5b0] sm:$0xff]  }
  0x87   : > { %9208 = vmatmul.mubr.bf16.vlgmr.msra.gmra.mrb[12].mxu0 %v11676_v20  ;;  %v14517_v20 = vld [vmem:[%s18805_s1 + $0x528] sm:$0xff]  }
  0x88   : > { %9248 = vmatmul.mubr.bf16.vlgmr.msra.gmra.mrb[12].mxu1 %v11678_v22  ;;  %12997 = vmatpush3.bf16.msra.mxu0 %v14461_v26  ;;  %v14519_v22 = vld [vmem:[%s18805_s1 + $0x570] sm:$0xff]   ;;  %v14523_v26 = vld [vmem:[%s18805_s1 + $0x578] sm:$0xff]  }
  0x89   : > { %13019 = vmatpush3.bf16.msra.mxu1 %v14462_v27  ;;  %12998 = vmatprep.subr.bf16.mxu0 %v14463_v28  ;;  %v14524_v27 = vld [vmem:[%s18805_s1 + $0x5f8] sm:$0xff]  }
  0x8a   : > { %13020 = vmatprep.subr.bf16.mxu1 %v14464_v29  ;;  %9287 = vmatprep.mubr.bf16.mxu0 %v11681_v58  ;;  %v14525_v28 = vld [vmem:[%s18805_s1 + $0x538] sm:$0xff]   ;;  %v14553_v58 = vld [vmem:[%s18805_s1 + $0x628] sm:$0xff]  }
  0x8b   : > { %9327 = vmatprep.mubr.bf16.mxu1 %v11683_v61  ;;  %v14526_v29 = vld [vmem:[%s18805_s1 + $0x5b8] sm:$0xff]   ;;  %v14556_v61 = vld [vmem:[%s18805_s1 + $0x6f0] sm:$0xff]  }
  0x8c   : > { %12999 = vmatpush3.bf16.msra.mxu0 %v14465_v30  ;;  %v234_v30 = vld [vmem:[%s15620_s12 + $0x50] sm:$0xff] }
  0x8d   : > { %13021 = vmatpush3.bf16.msra.mxu1 %v14466_v31  ;;  %13000 = vmatprep.subr.bf16.mxu0 %v14467_v32  ;;  %v235_v31 = vld [vmem:[%s15620_s12 + $0x58] sm:$0xff]  ;;  %v11684_v32 = vcombine.low %v234_v30, %v234_v30 }
  0x8e   : > { %13022 = vmatprep.subr.bf16.mxu1 %v14468_v33  ;;  %v11685_v33 = vcombine.high %v234_v30, %v234_v30  ;;  %v14586_v30 = vld [vmem:[%s18805_s1 + $0x7a0] sm:$0xff]  }
  0x90   : > { %13001 = vmatpush3.bf16.msra.mxu0 %v14469_v34  ;;  %v11686_v34 = vcombine.low %v235_v31, %v235_v31 }
  0x91   : > { %13023 = vmatpush3.bf16.msra.mxu1 %v14470_v35  ;;  %13002 = vmatprep.subr.bf16.mxu0 %v14471_v36  ;;  %v11687_v35 = vcombine.high %v235_v31, %v235_v31  ;;  %v14531_v36 = vld [vmem:[%s18805_s1 + $0x640] sm:$0xff]  }
  0x92   : > { %13024 = vmatprep.subr.bf16.mxu1 %v14472_v37  ;;  %v14532_v37 = vld [vmem:[%s18805_s1 + $0x6c0] sm:$0xff]  }
  0x94   : > { %13003 = vmatpush3.bf16.msra.mxu0 %v14473_v38  ;;  %v14533_v38 = vld [vmem:[%s18805_s1 + $0x600] sm:$0xff]  }
  0x95   : > { %13025 = vmatpush3.bf16.msra.mxu1 %v14474_v39  ;;  %13004 = vmatprep.subr.bf16.mxu0 %v14475_v40  ;;  %v14534_v39 = vld [vmem:[%s18805_s1 + $0x680] sm:$0xff]   ;;  %v14535_v40 = vld [vmem:[%s18805_s1 + $0x648] sm:$0xff]  }
  0x96   : > { %13026 = vmatprep.subr.bf16.mxu1 %v14476_v41  ;;  %v14536_v41 = vld [vmem:[%s18805_s1 + $0x6c8] sm:$0xff]  }
  0x98   : > { %13005 = vmatpush3.bf16.msra.mxu0 %v14477_v42  ;;  %v14537_v42 = vld [vmem:[%s18805_s1 + $0x608] sm:$0xff]  }
  0x99   : > { %13027 = vmatpush3.bf16.msra.mxu1 %v14478_v43  ;;  %13006 = vmatprep.subr.bf16.mxu0 %v14479_v44  ;;  %v14538_v43 = vld [vmem:[%s18805_s1 + $0x688] sm:$0xff]   ;;  %v14539_v44 = vld [vmem:[%s18805_s1 + $0x650] sm:$0xff]  }
  0x9a   : > { %13028 = vmatprep.subr.bf16.mxu1 %v14480_v45  ;;  %v14540_v45 = vld [vmem:[%s18805_s1 + $0x6d0] sm:$0xff]  }
  0x9c   : > { %13007 = vmatpush3.bf16.msra.mxu0 %v14481_v46  ;;  %v14541_v46 = vld [vmem:[%s18805_s1 + $0x610] sm:$0xff]  }
  0x9d   : > { %13029 = vmatpush3.bf16.msra.mxu1 %v14482_v47  ;;  %13008 = vmatprep.subr.bf16.mxu0 %v14483_v48  ;;  %v14542_v47 = vld [vmem:[%s18805_s1 + $0x690] sm:$0xff]   ;;  %v14543_v48 = vld [vmem:[%s18805_s1 + $0x658] sm:$0xff]  }
  0x9e   : > { %13030 = vmatprep.subr.bf16.mxu1 %v14484_v49  ;;  %v14544_v49 = vld [vmem:[%s18805_s1 + $0x6d8] sm:$0xff]  }
  0xa0   : > { %13009 = vmatpush3.bf16.msra.mxu0 %v14485_v50  ;;  %v14545_v50 = vld [vmem:[%s18805_s1 + $0x618] sm:$0xff]  }
  0xa1   : > { %13031 = vmatpush3.bf16.msra.mxu1 %v14486_v51  ;;  %13010 = vmatprep.subr.bf16.mxu0 %v14487_v52  ;;  %v14546_v51 = vld [vmem:[%s18805_s1 + $0x698] sm:$0xff]   ;;  %v14547_v52 = vld [vmem:[%s18805_s1 + $0x660] sm:$0xff]  }
  0xa2   : > { %13032 = vmatprep.subr.bf16.mxu1 %v14488_v53  ;;  %v14548_v53 = vld [vmem:[%s18805_s1 + $0x6e0] sm:$0xff]  }
  0xa4   : > { %13011 = vmatpush3.bf16.msra.mxu0 %v14489_v54  ;;  %v14549_v54 = vld [vmem:[%s18805_s1 + $0x620] sm:$0xff]  }
  0xa5   : > { %13033 = vmatpush3.bf16.msra.mxu1 %v14490_v55  ;;  %13040 = vmatprep.subr.bf16.mxu0 %v14495_v62  ;;  %v14550_v55 = vld [vmem:[%s18805_s1 + $0x6a0] sm:$0xff]   ;;  %v14557_v62 = vld [vmem:[%s18805_s1 + $0x630] sm:$0xff]  }
  0xa6   : > { %13062 = vmatprep.subr.bf16.mxu1 %v14496_v63  ;;  %v14558_v63 = vld [vmem:[%s18805_s1 + $0x6b0] sm:$0xff]  }
  0xa7   : > { %9288 = vmatmul.mubr.bf16.vlgmr.msra.gmra.mrb[16].mxu0 %v11680_v57  ;;  %v14552_v57 = vld [vmem:[%s18805_s1 + $0x6e8] sm:$0xff]  }
  0xa8   : > { %9328 = vmatmul.mubr.bf16.vlgmr.msra.gmra.mrb[16].mxu1 %v11682_v60  ;;  %13041 = vmatpush3.bf16.msra.mxu0 %v14497_v0  ;;  %v14555_v60 = vld [vmem:[%s18805_s1 + $0x670] sm:$0xff]   ;;  %v14559_v0 = vld [vmem:[%s18805_s1 + $0x678] sm:$0xff]  }
  0xa9   : > { %13063 = vmatpush3.bf16.msra.mxu1 %v14498_v1  ;;  %13042 = vmatprep.subr.bf16.mxu0 %v14499_v2  ;;  %v14560_v1 = vld [vmem:[%s18805_s1 + $0x6f8] sm:$0xff]  }
  0xaa   : > { %13064 = vmatprep.subr.bf16.mxu1 %v14500_v3  ;;  %9367 = vmatprep.mubr.bf16.mxu0 %v11685_v33  ;;  %v14561_v2 = vld [vmem:[%s18805_s1 + $0x638] sm:$0xff]  }
  0xab   : > { %9407 = vmatprep.mubr.bf16.mxu1 %v11687_v35  ;;  %v14562_v3 = vld [vmem:[%s18805_s1 + $0x6b8] sm:$0xff]  }
  0xac   : > { %13043 = vmatpush3.bf16.msra.mxu0 %v14501_v4  ;;  %v236_v4 = vld [vmem:[%s15620_s12 + $0x60] sm:$0xff] }
  0xad   : > { %13065 = vmatpush3.bf16.msra.mxu1 %v14502_v5  ;;  %13044 = vmatprep.subr.bf16.mxu0 %v14503_v6  ;;  %v237_v5 = vld [vmem:[%s15620_s12 + $0x68] sm:$0xff]  ;;  %v11688_v6 = vcombine.low %v236_v4, %v236_v4 }
  0xae   : > { %13066 = vmatprep.subr.bf16.mxu1 %v14504_v7  ;;  %v11689_v7 = vcombine.high %v236_v4, %v236_v4  ;;  %v14610_v4 = vld [vmem:[%s18805_s1 + $0x888] sm:$0xff]  }
  0xb0   : > { %13045 = vmatpush3.bf16.msra.mxu0 %v14505_v8  ;;  %v11690_v8 = vcombine.low %v237_v5, %v237_v5 }
  0xb1   : > { %13067 = vmatpush3.bf16.msra.mxu1 %v14506_v9  ;;  %13046 = vmatprep.subr.bf16.mxu0 %v14507_v10  ;;  %v14567_v9 = vld [vmem:[%s18805_s1 + $0x740] sm:$0xff]   ;;  %v11691_v10 = vcombine.high %v237_v5, %v237_v5  ;;  %v14611_v5 = vld [vmem:[%s18805_s1 + $0x850] sm:$0xff]  }
  0xb2   : > { %13068 = vmatprep.subr.bf16.mxu1 %v14508_v11  ;;  %v14568_v11 = vld [vmem:[%s18805_s1 + $0x7c0] sm:$0xff]  }
  0xb4   : > { %13047 = vmatpush3.bf16.msra.mxu0 %v14509_v12  ;;  %v14569_v12 = vld [vmem:[%s18805_s1 + $0x700] sm:$0xff]  }
  0xb5   : > { %13069 = vmatpush3.bf16.msra.mxu1 %v14510_v13  ;;  %13048 = vmatprep.subr.bf16.mxu0 %v14511_v14  ;;  %v14570_v13 = vld [vmem:[%s18805_s1 + $0x780] sm:$0xff]   ;;  %v14571_v14 = vld [vmem:[%s18805_s1 + $0x748] sm:$0xff]  }
  0xb6   : > { %13070 = vmatprep.subr.bf16.mxu1 %v14512_v15  ;;  %v14572_v15 = vld [vmem:[%s18805_s1 + $0x7c8] sm:$0xff]  }
  0xb8   : > { %13049 = vmatpush3.bf16.msra.mxu0 %v14513_v16  ;;  %v14573_v16 = vld [vmem:[%s18805_s1 + $0x708] sm:$0xff]  }
  0xb9   : > { %13071 = vmatpush3.bf16.msra.mxu1 %v14514_v17  ;;  %13050 = vmatprep.subr.bf16.mxu0 %v14515_v18  ;;  %v14574_v17 = vld [vmem:[%s18805_s1 + $0x788] sm:$0xff]   ;;  %v14575_v18 = vld [vmem:[%s18805_s1 + $0x750] sm:$0xff]  }
  0xba   : > { %13072 = vmatprep.subr.bf16.mxu1 %v14516_v19  ;;  %v14576_v19 = vld [vmem:[%s18805_s1 + $0x7d0] sm:$0xff]  }
  0xbc   : > { %13051 = vmatpush3.bf16.msra.mxu0 %v14517_v20  ;;  %v14577_v20 = vld [vmem:[%s18805_s1 + $0x710] sm:$0xff]  }
  0xbd   : > { %13073 = vmatpush3.bf16.msra.mxu1 %v14518_v21  ;;  %13052 = vmatprep.subr.bf16.mxu0 %v14519_v22  ;;  %v14578_v21 = vld [vmem:[%s18805_s1 + $0x790] sm:$0xff]   ;;  %v14579_v22 = vld [vmem:[%s18805_s1 + $0x758] sm:$0xff]  }
  0xbe   : > { %13074 = vmatprep.subr.bf16.mxu1 %v14520_v23  ;;  %v14580_v23 = vld [vmem:[%s18805_s1 + $0x7d8] sm:$0xff]  }
  0xc0   : > { %13053 = vmatpush3.bf16.msra.mxu0 %v14521_v24  ;;  %v14581_v24 = vld [vmem:[%s18805_s1 + $0x718] sm:$0xff]  }
  0xc1   : > { %13075 = vmatpush3.bf16.msra.mxu1 %v14522_v25  ;;  %13054 = vmatprep.subr.bf16.mxu0 %v14523_v26  ;;  %v14582_v25 = vld [vmem:[%s18805_s1 + $0x798] sm:$0xff]   ;;  %v14583_v26 = vld [vmem:[%s18805_s1 + $0x760] sm:$0xff]  }
  0xc2   : > { %13076 = vmatprep.subr.bf16.mxu1 %v14524_v27  ;;  %v14584_v27 = vld [vmem:[%s18805_s1 + $0x7e0] sm:$0xff]  }
  0xc4   : > { %13055 = vmatpush3.bf16.msra.mxu0 %v14525_v28  ;;  %v14585_v28 = vld [vmem:[%s18805_s1 + $0x720] sm:$0xff]  }
  0xc5   : > { %13077 = vmatpush3.bf16.msra.mxu1 %v14526_v29  ;;  %13084 = vmatprep.subr.bf16.mxu0 %v14531_v36 }
  0xc6   : > { %13106 = vmatprep.subr.bf16.mxu1 %v14532_v37  ;;  %v14587_v37 = vld [vmem:[%s18805_s1 + $0x768] sm:$0xff]  }
  0xc7   : > { %9368 = vmatmul.mubr.bf16.vlgmr.msra.gmra.mrb[20].mxu0 %v11684_v32  ;;  %v11663_v32 = vld [vmem:[%s18806_s2] ss:$0 sm:$0xff] }
  0xc8   : > { %9408 = vmatmul.mubr.bf16.vlgmr.msra.gmra.mrb[20].mxu1 %v11686_v34  ;;  %13085 = vmatpush3.bf16.msra.mxu0 %v14533_v38 }
  0xc9   : > { %13107 = vmatpush3.bf16.msra.mxu1 %v14534_v39  ;;  %13086 = vmatprep.subr.bf16.mxu0 %v14535_v40  ;;  %v14588_v39 = vld [vmem:[%s18805_s1 + $0x7e8] sm:$0xff]  }
  0xca   : > { %13108 = vmatprep.subr.bf16.mxu1 %v14536_v41  ;;  %9447 = vmatprep.mubr.bf16.mxu0 %v11689_v7  ;;  %v14613_v7 = vld [vmem:[%s18805_s1 + $0x810] sm:$0xff]  }
  0xcb   : > { %9487 = vmatprep.mubr.bf16.mxu1 %v11691_v10  ;;  %v14616_v10 = vld [vmem:[%s18805_s1 + $0x8d8] sm:$0xff]  }
  0xcc   : > { %13087 = vmatpush3.bf16.msra.mxu0 %v14537_v42  ;;  %v14589_v42 = vld [vmem:[%s18805_s1 + $0x728] sm:$0xff]  }
  0xcd   : > { %13109 = vmatpush3.bf16.msra.mxu1 %v14538_v43  ;;  %13088 = vmatprep.subr.bf16.mxu0 %v14539_v44  ;;  %v14590_v44 = vld [vmem:[%s18805_s1 + $0x7a8] sm:$0xff]  }
  0xce   : > { %13110 = vmatprep.subr.bf16.mxu1 %v14540_v45 }
  0xd0   : > { %13089 = vmatpush3.bf16.msra.mxu0 %v14541_v46 }
  0xd1   : > { %13111 = vmatpush3.bf16.msra.mxu1 %v14542_v47  ;;  %13090 = vmatprep.subr.bf16.mxu0 %v14543_v48  ;;  %v14591_v47 = vld [vmem:[%s18805_s1 + $0x770] sm:$0xff]  }
  0xd2   : > { %13112 = vmatprep.subr.bf16.mxu1 %v14544_v49  ;;  %v14592_v48 = vld [vmem:[%s18805_s1 + $0x7f0] sm:$0xff]  }
  0xd3   : > { %v14593_v49 = vld [vmem:[%s18805_s1 + $0x730] sm:$0xff]  }
  0xd4   : > { %13091 = vmatpush3.bf16.msra.mxu0 %v14545_v50  ;;  %v14594_v50 = vld [vmem:[%s18805_s1 + $0x7b0] sm:$0xff]  }
  0xd5   : > { %13113 = vmatpush3.bf16.msra.mxu1 %v14546_v51  ;;  %13092 = vmatprep.subr.bf16.mxu0 %v14547_v52  ;;  %v14595_v51 = vld [vmem:[%s18805_s1 + $0x778] sm:$0xff]  }
  0xd6   : > { %13114 = vmatprep.subr.bf16.mxu1 %v14548_v53  ;;  %v14596_v52 = vld [vmem:[%s18805_s1 + $0x7f8] sm:$0xff]  }
  0xd7   : > { %v14597_v53 = vld [vmem:[%s18805_s1 + $0x738] sm:$0xff]  }
  0xd8   : > { %13093 = vmatpush3.bf16.msra.mxu0 %v14549_v54  ;;  %v14598_v54 = vld [vmem:[%s18805_s1 + $0x7b8] sm:$0xff]  }
  0xd9   : > { %13115 = vmatpush3.bf16.msra.mxu1 %v14550_v55  ;;  %13094 = vmatprep.subr.bf16.mxu0 %v14551_v56  ;;  %v238_v55 = vld [vmem:[%s15620_s12 + $0x70] sm:$0xff]  ;;  %v239_v56 = vld [vmem:[%s15620_s12 + $0x78] sm:$0xff] }
  0xda   : > { %13116 = vmatprep.subr.bf16.mxu1 %v14552_v57  ;;  %v11692_v57 = vcombine.low %v238_v55, %v238_v55 }
  0xdc   : > { %13095 = vmatpush3.bf16.msra.mxu0 %v14553_v58  ;;  %v11693_v58 = vcombine.high %v238_v55, %v238_v55  ;;  %v14647_v55 = vld [vmem:[%s18805_s1 + $0x950] sm:$0xff]  }
  0xdd   : > { %13117 = vmatpush3.bf16.msra.mxu1 %v14554_v59  ;;  %13096 = vmatprep.subr.bf16.mxu0 %v14555_v60  ;;  %v11694_v59 = vcombine.low %v239_v56, %v239_v56  ;;  %v11695_v60 = vcombine.high %v239_v56, %v239_v56  ;;  %v14648_v56 = vld [vmem:[%s18805_s1 + $0x9d0] sm:$0xff]  }
  0xde   : > { %13118 = vmatprep.subr.bf16.mxu1 %v14556_v61  ;;  %v14603_v61 = vld [vmem:[%s18805_s1 + $0x840] sm:$0xff]  }
  0xe0   : > { %13097 = vmatpush3.bf16.msra.mxu0 %v14557_v62  ;;  %v14604_v62 = vld [vmem:[%s18805_s1 + $0x8c0] sm:$0xff]  }
  0xe1   : > { %13119 = vmatpush3.bf16.msra.mxu1 %v14558_v63  ;;  %13098 = vmatprep.subr.bf16.mxu0 %v14559_v0  ;;  %v14605_v63 = vld [vmem:[%s18805_s1 + $0x800] sm:$0xff]  }
  0xe2   : > { %13120 = vmatprep.subr.bf16.mxu1 %v14560_v1  ;;  %v14606_v0 = vld [vmem:[%s18805_s1 + $0x880] sm:$0xff]   ;;  %v14607_v1 = vld [vmem:[%s18805_s1 + $0x848] sm:$0xff]  }
  0xe4   : > { %13099 = vmatpush3.bf16.msra.mxu0 %v14561_v2  ;;  %v14608_v2 = vld [vmem:[%s18805_s1 + $0x8c8] sm:$0xff]  }
  0xe5   : > { %13121 = vmatpush3.bf16.msra.mxu1 %v14562_v3  ;;  %13128 = vmatprep.subr.bf16.mxu0 %v14567_v9  ;;  %v14609_v3 = vld [vmem:[%s18805_s1 + $0x808] sm:$0xff]   ;;  %v14615_v9 = vld [vmem:[%s18805_s1 + $0x858] sm:$0xff]  }
  0xe6   : > { %13150 = vmatprep.subr.bf16.mxu1 %v14568_v11  ;;  %v14617_v11 = vld [vmem:[%s18805_s1 + $0x818] sm:$0xff]  }
  0xe7   : > { %9448 = vmatmul.mubr.bf16.vlgmr.msra.gmra.mrb[24].mxu0 %v11688_v6  ;;  %v14612_v6 = vld [vmem:[%s18805_s1 + $0x8d0] sm:$0xff]  }
  0xe8   : > { %9488 = vmatmul.mubr.bf16.vlgmr.msra.gmra.mrb[24].mxu1 %v11690_v8  ;;  %13129 = vmatpush3.bf16.msra.mxu0 %v14569_v12  ;;  %v14614_v8 = vld [vmem:[%s18805_s1 + $0x890] sm:$0xff]   ;;  %v14618_v12 = vld [vmem:[%s18805_s1 + $0x898] sm:$0xff]  }
  0xe9   : > { %13151 = vmatpush3.bf16.msra.mxu1 %v14570_v13  ;;  %13130 = vmatprep.subr.bf16.mxu0 %v14571_v14  ;;  %v14619_v13 = vld [vmem:[%s18805_s1 + $0x860] sm:$0xff]  }
  0xea   : > { %13152 = vmatprep.subr.bf16.mxu1 %v14572_v15  ;;  %9527 = vmatprep.mubr.bf16.mxu0 %v11693_v58  ;;  %v14620_v14 = vld [vmem:[%s18805_s1 + $0x8e0] sm:$0xff]   ;;  %v14650_v58 = vld [vmem:[%s18805_s1 + $0x990] sm:$0xff]  }
  0xeb   : > { %9567 = vmatprep.mubr.bf16.mxu1 %v11695_v60  ;;  %v14621_v15 = vld [vmem:[%s18805_s1 + $0x820] sm:$0xff]   ;;  %v14652_v60 = vld [vmem:[%s18805_s1 + $0x9d8] sm:$0xff]  }
  0xec   : > { %13131 = vmatpush3.bf16.msra.mxu0 %v14573_v16 }
  0xed   : > { %13153 = vmatpush3.bf16.msra.mxu1 %v14574_v17  ;;  %13132 = vmatprep.subr.bf16.mxu0 %v14575_v18  ;;  %v14622_v17 = vld [vmem:[%s18805_s1 + $0x8a0] sm:$0xff]  }
  0xee   : > { %13154 = vmatprep.subr.bf16.mxu1 %v14576_v19 }
  0xf0   : > { %13133 = vmatpush3.bf16.msra.mxu0 %v14577_v20 }
  0xf1   : > { %13155 = vmatpush3.bf16.msra.mxu1 %v14578_v21  ;;  %13134 = vmatprep.subr.bf16.mxu0 %v14579_v22 }
  0xf2   : > { %13156 = vmatprep.subr.bf16.mxu1 %v14580_v23  ;;  %v14623_v23 = vld [vmem:[%s18805_s1 + $0x868] sm:$0xff]  }
  0xf4   : > { %13135 = vmatpush3.bf16.msra.mxu0 %v14581_v24 }
  0xf5   : > { %13157 = vmatpush3.bf16.msra.mxu1 %v14582_v25  ;;  %13136 = vmatprep.subr.bf16.mxu0 %v14583_v26  ;;  %v14624_v25 = vld [vmem:[%s18805_s1 + $0x8e8] sm:$0xff]  }
  0xf6   : > { %13158 = vmatprep.subr.bf16.mxu1 %v14584_v27 }
  0xf8   : > { %13137 = vmatpush3.bf16.msra.mxu0 %v14585_v28  ;;  %v14625_v28 = vld [vmem:[%s18805_s1 + $0x828] sm:$0xff]  }
  0xf9   : > { %13159 = vmatpush3.bf16.msra.mxu1 %v14586_v30  ;;  %13138 = vmatprep.subr.bf16.mxu0 %v14587_v37  ;;  %v14626_v30 = vld [vmem:[%s18805_s1 + $0x8a8] sm:$0xff]   ;;  %v14631_v37 = vld [vmem:[%s18805_s1 + $0x878] sm:$0xff]  }
  0xfa   : > { %v12836_v29 = vpop.f32.mrb[0].mxu0  ;;  %13160 = vmatprep.subr.bf16.mxu1 %v14588_v39  ;;  %v14633_v39 = vld [vmem:[%s18805_s1 + $0x838] sm:$0xff]  }
  0xfb   : > { %v12858_v31 = vpop.f32.mrb[0].mxu1  ;;  %v12837_v33 = vpop.f32.mrb[1].mxu0 }
  0xfc   : > { %v12859_v34 = vpop.f32.mrb[1].mxu1  ;;  %v12838_v35 = vadd.f32 %v12837_v33, %v12836_v29  ;;  %v12839_v38 = vpop.f32.mrb[2].mxu0  ;;  %13139 = vmatpush3.bf16.msra.mxu0 %v14589_v42  ;;  %v14627_v33 = vld [vmem:[%s18805_s1 + $0x870] sm:$0xff]   ;;  %v241_v42 = vld [vmem:[%s15620_s12 + $0x88] sm:$0xff] }
  0xfd   : > { %v12860_v36 = vadd.f32 %v12859_v34, %v12858_v31  ;;  %v12861_v40 = vpop.f32.mrb[2].mxu1  ;;  %v12840_v43 = vpop.f32.mrb[3].mxu0  ;;  %13161 = vmatpush3.bf16.msra.mxu1 %v14590_v44  ;;  %13140 = vmatprep.subr.bf16.mxu0 %v14591_v47  ;;  %v14628_v34 = vld [vmem:[%s18805_s1 + $0x8f0] sm:$0xff]   ;;  %v14632_v38 = vld [vmem:[%s18805_s1 + $0x8f8] sm:$0xff]   ;;  %v14639_v47 = vld [vmem:[%s18805_s1 + $0x940] sm:$0xff]  }
  0xfe   : > { %v8970_v41 = vadd.f32 %v12838_v35, %v11663_v32  ;;  %v12862_v45 = vpop.f32.mrb[3].mxu1  ;;  %13162 = vmatprep.subr.bf16.mxu1 %v14592_v48  ;;  %v14629_v35 = vld [vmem:[%s18805_s1 + $0x830] sm:$0xff]   ;;  %v14634_v40 = vld [vmem:[%s18805_s1 + $0x8b8] sm:$0xff]   ;;  %v14640_v48 = vld [vmem:[%s18805_s1 + $0x9c0] sm:$0xff]  }
  0xff   : > { %v11698_v45 = vcombine.low %v241_v42, %v241_v42 }
 0x100   : > { %v16293_v46 = vadd.f32 %v12860_v36, %v8970_v41  ;;  %13141 = vmatpush3.bf16.msra.mxu0 %v14593_v49  ;;  %v14630_v36 = vld [vmem:[%s18805_s1 + $0x8b0] sm:$0xff]   ;;  %v240_v41 = vld [vmem:[%s15620_s12 + $0x80] sm:$0xff] }
 0x101   : > { %13163 = vmatpush3.bf16.msra.mxu1 %v14594_v50  ;;  %13142 = vmatprep.subr.bf16.mxu0 %v14595_v51  ;;  %v11696_v43 = vcombine.low %v240_v41, %v240_v41  ;;  %v11697_v44 = vcombine.high %v240_v41, %v240_v41  ;;  %v14641_v49 = vld [vmem:[%s18805_s1 + $0x900] sm:$0xff]   ;;  %v14643_v51 = vld [vmem:[%s18805_s1 + $0x948] sm:$0xff]   ;;  %v14683_v41 = vld [vmem:[%s18805_s1 + $0xa50] sm:$0xff]  }
 0x102   : > { %13164 = vmatprep.subr.bf16.mxu1 %v14596_v52  ;;  %v14642_v50 = vld [vmem:[%s18805_s1 + $0x980] sm:$0xff]   ;;  %v14644_v52 = vld [vmem:[%s18805_s1 + $0x9c8] sm:$0xff]  }
 0x104   : > { %13143 = vmatpush3.bf16.msra.mxu0 %v14597_v53  ;;  %v14645_v53 = vld [vmem:[%s18805_s1 + $0x908] sm:$0xff]  }
 0x105   : > { %13165 = vmatpush3.bf16.msra.mxu1 %v14598_v54  ;;  %13172 = vmatprep.subr.bf16.mxu0 %v14603_v61  ;;  %v14646_v54 = vld [vmem:[%s18805_s1 + $0x988] sm:$0xff]   ;;  %v14653_v61 = vld [vmem:[%s18805_s1 + $0x918] sm:$0xff]  }
 0x106   : > { %13194 = vmatprep.subr.bf16.mxu1 %v14604_v62  ;;  %v14654_v62 = vld [vmem:[%s18805_s1 + $0x998] sm:$0xff]  }
 0x107   : > { %9528 = vmatmul.mubr.bf16.vlgmr.msra.gmra.mrb[28].mxu0 %v11692_v57  ;;  %v14649_v57 = vld [vmem:[%s18805_s1 + $0x910] sm:$0xff]  }
 0x108   : > { %9568 = vmatmul.mubr.bf16.vlgmr.msra.gmra.mrb[28].mxu1 %v11694_v59  ;;  %13173 = vmatpush3.bf16.msra.mxu0 %v14605_v63  ;;  %v14651_v59 = vld [vmem:[%s18805_s1 + $0x958] sm:$0xff]   ;;  %v14655_v63 = vld [vmem:[%s18805_s1 + $0x960] sm:$0xff]  }
 0x109   : > { %13195 = vmatpush3.bf16.msra.mxu1 %v14606_v0  ;;  %13174 = vmatprep.subr.bf16.mxu0 %v14607_v1  ;;  %v14656_v0 = vld [vmem:[%s18805_s1 + $0x9e0] sm:$0xff]  }
 0x10a   : > { %13196 = vmatprep.subr.bf16.mxu1 %v14608_v2  ;;  %9607 = vmatprep.mubr.bf16.mxu0 %v11697_v44  ;;  %v14657_v2 = vld [vmem:[%s18805_s1 + $0x920] sm:$0xff]   ;;  %v14686_v44 = vld [vmem:[%s18805_s1 + $0xa90] sm:$0xff]  }
 0x10c   : > { %13175 = vmatpush3.bf16.msra.mxu0 %v14609_v3 }
 0x10d   : > { %13197 = vmatpush3.bf16.msra.mxu1 %v14610_v4  ;;  %13176 = vmatprep.subr.bf16.mxu0 %v14611_v5  ;;  %v14658_v4 = vld [vmem:[%s18805_s1 + $0x9a0] sm:$0xff]  }
 0x10e   : > { %13198 = vmatprep.subr.bf16.mxu1 %v14612_v6 }
 0x110   : > { %13177 = vmatpush3.bf16.msra.mxu0 %v14613_v7 }
 0x111   : > { %13199 = vmatpush3.bf16.msra.mxu1 %v14614_v8  ;;  %13178 = vmatprep.subr.bf16.mxu0 %v14615_v9  ;;  %v14659_v8 = vld [vmem:[%s18805_s1 + $0x968] sm:$0xff]  }
 0x112   : > { %13200 = vmatprep.subr.bf16.mxu1 %v14616_v10  ;;  %v14660_v10 = vld [vmem:[%s18805_s1 + $0x9e8] sm:$0xff]  }
 0x114   : > { %13179 = vmatpush3.bf16.msra.mxu0 %v14617_v11 }
 0x115   : > { %13201 = vmatpush3.bf16.msra.mxu1 %v14618_v12  ;;  %13180 = vmatprep.subr.bf16.mxu0 %v14619_v13 }
 0x116   : > { %13202 = vmatprep.subr.bf16.mxu1 %v14620_v14  ;;  %v14661_v14 = vld [vmem:[%s18805_s1 + $0x928] sm:$0xff]  }
 0x118   : > { %13181 = vmatpush3.bf16.msra.mxu0 %v14621_v15  ;;  %v14662_v15 = vld [vmem:[%s18805_s1 + $0x9a8] sm:$0xff]  }
 0x119   : > { %13203 = vmatpush3.bf16.msra.mxu1 %v14622_v17  ;;  %13182 = vmatprep.subr.bf16.mxu0 %v14623_v23  ;;  %v14667_v23 = vld [vmem:[%s18805_s1 + $0x978] sm:$0xff]  }
 0x11a   : > { %v12880_v16 = vpop.f32.mrb[4].mxu0  ;;  %13204 = vmatprep.subr.bf16.mxu1 %v14624_v25  ;;  %v14669_v25 = vld [vmem:[%s18805_s1 + $0x938] sm:$0xff]  }
 0x11b   : > { %v12902_v18 = vpop.f32.mrb[4].mxu1  ;;  %v12881_v19 = vpop.f32.mrb[5].mxu0 }
 0x11c   : > { %v12903_v20 = vpop.f32.mrb[5].mxu1  ;;  %v12882_v21 = vadd.f32 %v12881_v19, %v12880_v16  ;;  %v12883_v24 = vpop.f32.mrb[6].mxu0  ;;  %13183 = vmatpush3.bf16.msra.mxu0 %v14625_v28  ;;  %v14663_v19 = vld [vmem:[%s18805_s1 + $0x970] sm:$0xff]   ;;  %v243_v28 = vld [vmem:[%s15620_s12 + $0x98] sm:$0xff] }
 0x11d   : > { %v12904_v22 = vadd.f32 %v12903_v20, %v12902_v18  ;;  %v12905_v26 = vpop.f32.mrb[6].mxu1  ;;  %v12884_v29 = vpop.f32.mrb[7].mxu0  ;;  %13205 = vmatpush3.bf16.msra.mxu1 %v14626_v30  ;;  %13184 = vmatprep.subr.bf16.mxu0 %v14627_v33  ;;  %v14664_v20 = vld [vmem:[%s18805_s1 + $0x9f0] sm:$0xff]   ;;  %v14668_v24 = vld [vmem:[%s18805_s1 + $0x9f8] sm:$0xff]   ;;  %v11703_v33 = vcombine.high %v243_v28, %v243_v28 }
 0x11e   : > { %v9050_v27 = vadd.f32 %v12882_v21, %v16293_v46  ;;  %v12906_v31 = vpop.f32.mrb[7].mxu1  ;;  %13206 = vmatprep.subr.bf16.mxu1 %v14628_v34  ;;  %v11699_v46 = vcombine.high %v241_v42, %v241_v42  ;;  %v14665_v21 = vld [vmem:[%s18805_s1 + $0x930] sm:$0xff]   ;;  %v14670_v26 = vld [vmem:[%s18805_s1 + $0x9b8] sm:$0xff]   ;;  %v14676_v34 = vld [vmem:[%s18805_s1 + $0xac0] sm:$0xff]  }
 0x11f   : > { %v11702_v31 = vcombine.low %v243_v28, %v243_v28  ;;  %v14684_v42 = vld [vmem:[%s18805_s1 + $0xad0] sm:$0xff]  }
 0x120   : > { %v16394_v32 = vadd.f32 %v12904_v22, %v9050_v27  ;;  %13185 = vmatpush3.bf16.msra.mxu0 %v14629_v35  ;;  %9647 = vmatprep.mubr.bf16.mxu1 %v11699_v46  ;;  %v14666_v22 = vld [vmem:[%s18805_s1 + $0x9b0] sm:$0xff]   ;;  %v14677_v35 = vld [vmem:[%s18805_s1 + $0xa00] sm:$0xff]   ;;  %v14688_v46 = vld [vmem:[%s18805_s1 + $0xad8] sm:$0xff]  }
 0x121   : > { %13207 = vmatpush3.bf16.msra.mxu1 %v14630_v36  ;;  %13186 = vmatprep.subr.bf16.mxu0 %v14631_v37  ;;  %v242_v27 = vld [vmem:[%s15620_s12 + $0x90] sm:$0xff]  ;;  %v14678_v36 = vld [vmem:[%s18805_s1 + $0xa80] sm:$0xff]   ;;  %v14679_v37 = vld [vmem:[%s18805_s1 + $0xa48] sm:$0xff]  }
 0x122   : > { %13208 = vmatprep.subr.bf16.mxu1 %v14632_v38  ;;  %v11700_v29 = vcombine.low %v242_v27, %v242_v27  ;;  %v11701_v30 = vcombine.high %v242_v27, %v242_v27  ;;  %v14680_v38 = vld [vmem:[%s18805_s1 + $0xac8] sm:$0xff]   ;;  %v14719_v27 = vld [vmem:[%s18805_s1 + $0xb50] sm:$0xff]  }
 0x123   : > { %v14720_v28 = vld [vmem:[%s18805_s1 + $0xbd0] sm:$0xff]  }
 0x124   : > { %13187 = vmatpush3.bf16.msra.mxu0 %v14633_v39  ;;  %v14681_v39 = vld [vmem:[%s18805_s1 + $0xa08] sm:$0xff]  }
 0x125   : > { %13209 = vmatpush3.bf16.msra.mxu1 %v14634_v40  ;;  %13216 = vmatprep.subr.bf16.mxu0 %v14639_v47  ;;  %v14682_v40 = vld [vmem:[%s18805_s1 + $0xa88] sm:$0xff]   ;;  %v14689_v47 = vld [vmem:[%s18805_s1 + $0xa18] sm:$0xff]  }
 0x126   : > { %13238 = vmatprep.subr.bf16.mxu1 %v14640_v48  ;;  %v14690_v48 = vld [vmem:[%s18805_s1 + $0xa98] sm:$0xff]  }
 0x127   : > { %9608 = vmatmul.mubr.bf16.vlgmr.msra.gmra.mrb[32].mxu0 %v11696_v43  ;;  %v14685_v43 = vld [vmem:[%s18805_s1 + $0xa10] sm:$0xff]  }
 0x128   : > { %9648 = vmatmul.mubr.bf16.vlgmr.msra.gmra.mrb[32].mxu1 %v11698_v45  ;;  %13217 = vmatpush3.bf16.msra.mxu0 %v14641_v49  ;;  %v14687_v45 = vld [vmem:[%s18805_s1 + $0xa58] sm:$0xff]   ;;  %v14691_v49 = vld [vmem:[%s18805_s1 + $0xa60] sm:$0xff]  }
 0x129   : > { %13239 = vmatpush3.bf16.msra.mxu1 %v14642_v50  ;;  %13218 = vmatprep.subr.bf16.mxu0 %v14643_v51  ;;  %v14692_v50 = vld [vmem:[%s18805_s1 + $0xae0] sm:$0xff]  }
 0x12a   : > { %13240 = vmatprep.subr.bf16.mxu1 %v14644_v52  ;;  %9687 = vmatprep.mubr.bf16.mxu0 %v11701_v30  ;;  %v14693_v52 = vld [vmem:[%s18805_s1 + $0xa20] sm:$0xff]   ;;  %v14722_v30 = vld [vmem:[%s18805_s1 + $0xb90] sm:$0xff]  }
 0x12b   : > { %9727 = vmatprep.mubr.bf16.mxu1 %v11703_v33  ;;  %v14725_v33 = vld [vmem:[%s18805_s1 + $0xb18] sm:$0xff]  }
 0x12c   : > { %13219 = vmatpush3.bf16.msra.mxu0 %v14645_v53 }
 0x12d   : > { %13241 = vmatpush3.bf16.msra.mxu1 %v14646_v54  ;;  %13220 = vmatprep.subr.bf16.mxu0 %v14647_v55  ;;  %v14694_v54 = vld [vmem:[%s18805_s1 + $0xaa0] sm:$0xff]  }
 0x12e   : > { %13242 = vmatprep.subr.bf16.mxu1 %v14648_v56 }
 0x130   : > { %13221 = vmatpush3.bf16.msra.mxu0 %v14649_v57  ;;  %v14695_v57 = vld [vmem:[%s18805_s1 + $0xa68] sm:$0xff]  }
 0x131   : > { %13243 = vmatpush3.bf16.msra.mxu1 %v14650_v58  ;;  %13222 = vmatprep.subr.bf16.mxu0 %v14651_v59 }
 0x132   : > { %13244 = vmatprep.subr.bf16.mxu1 %v14652_v60  ;;  %v14696_v60 = vld [vmem:[%s18805_s1 + $0xae8] sm:$0xff]  }
 0x134   : > { %13223 = vmatpush3.bf16.msra.mxu0 %v14653_v61 }
 0x135   : > { %13245 = vmatpush3.bf16.msra.mxu1 %v14654_v62  ;;  %13224 = vmatprep.subr.bf16.mxu0 %v14655_v63  ;;  %v14697_v63 = vld [vmem:[%s18805_s1 + $0xa28] sm:$0xff]  }
 0x136   : > { %13246 = vmatprep.subr.bf16.mxu1 %v14656_v0 }
 0x138   : > { %13225 = vmatpush3.bf16.msra.mxu0 %v14657_v2 }
 0x139   : > { %13247 = vmatpush3.bf16.msra.mxu1 %v14658_v4  ;;  %13226 = vmatprep.subr.bf16.mxu0 %v14659_v8  ;;  %v14699_v4 = vld [vmem:[%s18805_s1 + $0xa70] sm:$0xff]  }
 0x13a   : > { %v12924_v1 = vpop.f32.mrb[8].mxu0  ;;  %13248 = vmatprep.subr.bf16.mxu1 %v14660_v10  ;;  %v14702_v8 = vld [vmem:[%s18805_s1 + $0xab0] sm:$0xff]   ;;  %v14704_v10 = vld [vmem:[%s18805_s1 + $0xaf8] sm:$0xff]  }
 0x13b   : > { %v12946_v3 = vpop.f32.mrb[8].mxu1  ;;  %v12925_v5 = vpop.f32.mrb[9].mxu0 }
 0x13c   : > { %v12926_v6 = vadd.f32 %v12925_v5, %v12924_v1  ;;  %v12947_v7 = vpop.f32.mrb[9].mxu1  ;;  %v12927_v11 = vpop.f32.mrb[10].mxu0  ;;  %13227 = vmatpush3.bf16.msra.mxu0 %v14661_v14  ;;  %v14698_v1 = vld [vmem:[%s18805_s1 + $0xaa8] sm:$0xff]  }
 0x13d   : > { %v12948_v9 = vadd.f32 %v12947_v7, %v12946_v3  ;;  %v12949_v13 = vpop.f32.mrb[10].mxu1  ;;  %v12928_v16 = vpop.f32.mrb[11].mxu0  ;;  %13249 = vmatpush3.bf16.msra.mxu1 %v14662_v15  ;;  %13228 = vmatprep.subr.bf16.mxu0 %v14663_v19  ;;  %v14701_v7 = vld [vmem:[%s18805_s1 + $0xa30] sm:$0xff]   ;;  %v14705_v11 = vld [vmem:[%s18805_s1 + $0xa38] sm:$0xff]   ;;  %v14711_v19 = vld [vmem:[%s18805_s1 + $0xb40] sm:$0xff]  }
 0x13e   : > { %v9130_v12 = vadd.f32 %v12926_v6, %v16394_v32  ;;  %v12950_v18 = vpop.f32.mrb[11].mxu1  ;;  %13250 = vmatprep.subr.bf16.mxu1 %v14664_v20  ;;  %v14675_v32 = vld [vmem:[%s18805_s1 + $0xa40] sm:$0xff]   ;;  %v14700_v6 = vld [vmem:[%s18805_s1 + $0xaf0] sm:$0xff]   ;;  %v245_v16 = vld [vmem:[%s15620_s12 + $0xa8] sm:$0xff] }
 0x13f   : > { %v244_v13 = vld [vmem:[%s15620_s12 + $0xa0] sm:$0xff]  ;;  %v11707_v18 = vcombine.high %v245_v16, %v245_v16 }
 0x140   : > { %v16495_v17 = vadd.f32 %v12948_v9, %v9130_v12  ;;  %13229 = vmatpush3.bf16.msra.mxu0 %v14665_v21  ;;  %v14703_v9 = vld [vmem:[%s18805_s1 + $0xa78] sm:$0xff]   ;;  %v11704_v14 = vcombine.low %v244_v13, %v244_v13  ;;  %v11705_v15 = vcombine.high %v244_v13, %v244_v13  ;;  %v14712_v20 = vld [vmem:[%s18805_s1 + $0xbc0] sm:$0xff]   ;;  %v14755_v13 = vld [vmem:[%s18805_s1 + $0xc50] sm:$0xff]  }
 0x141   : > { %13251 = vmatpush3.bf16.msra.mxu1 %v14666_v22  ;;  %13230 = vmatprep.subr.bf16.mxu0 %v14667_v23  ;;  %v14706_v12 = vld [vmem:[%s18805_s1 + $0xab8] sm:$0xff]   ;;  %v14713_v21 = vld [vmem:[%s18805_s1 + $0xb00] sm:$0xff]   ;;  %v14715_v23 = vld [vmem:[%s18805_s1 + $0xb48] sm:$0xff]  }
 0x142   : > { %13252 = vmatprep.subr.bf16.mxu1 %v14668_v24  ;;  %v14714_v22 = vld [vmem:[%s18805_s1 + $0xb80] sm:$0xff]   ;;  %v14716_v24 = vld [vmem:[%s18805_s1 + $0xbc8] sm:$0xff]  }
 0x144   : > { %13231 = vmatpush3.bf16.msra.mxu0 %v14669_v25  ;;  %v14717_v25 = vld [vmem:[%s18805_s1 + $0xb08] sm:$0xff]  }
 0x145   : > { %13253 = vmatpush3.bf16.msra.mxu1 %v14670_v26  ;;  %13260 = vmatprep.subr.bf16.mxu0 %v14675_v32  ;;  %v14718_v26 = vld [vmem:[%s18805_s1 + $0xb88] sm:$0xff]   ;;  %v14724_v32 = vld [vmem:[%s18805_s1 + $0xbd8] sm:$0xff]  }
 0x146   : > { %13282 = vmatprep.subr.bf16.mxu1 %v14676_v34  ;;  %v14726_v34 = vld [vmem:[%s18805_s1 + $0xb98] sm:$0xff]  }
 0x147   : > { %9688 = vmatmul.mubr.bf16.vlgmr.msra.gmra.mrb[36].mxu0 %v11700_v29  ;;  %v14721_v29 = vld [vmem:[%s18805_s1 + $0xb10] sm:$0xff]  }
 0x148   : > { %9728 = vmatmul.mubr.bf16.vlgmr.msra.gmra.mrb[36].mxu1 %v11702_v31  ;;  %13261 = vmatpush3.bf16.msra.mxu0 %v14677_v35  ;;  %v14723_v31 = vld [vmem:[%s18805_s1 + $0xb58] sm:$0xff]   ;;  %v14727_v35 = vld [vmem:[%s18805_s1 + $0xb60] sm:$0xff]  }
 0x149   : > { %13283 = vmatpush3.bf16.msra.mxu1 %v14678_v36  ;;  %13262 = vmatprep.subr.bf16.mxu0 %v14679_v37  ;;  %v14728_v36 = vld [vmem:[%s18805_s1 + $0xbe0] sm:$0xff]  }
 0x14a   : > { %13284 = vmatprep.subr.bf16.mxu1 %v14680_v38  ;;  %9767 = vmatprep.mubr.bf16.mxu0 %v11705_v15  ;;  %v14729_v38 = vld [vmem:[%s18805_s1 + $0xb20] sm:$0xff]   ;;  %v14757_v15 = vld [vmem:[%s18805_s1 + $0xc10] sm:$0xff]  }
 0x14b   : > { %9807 = vmatprep.mubr.bf16.mxu1 %v11707_v18  ;;  %v14760_v18 = vld [vmem:[%s18805_s1 + $0xcd8] sm:$0xff]  }
 0x14c   : > { %13263 = vmatpush3.bf16.msra.mxu0 %v14681_v39 }
 0x14d   : > { %13285 = vmatpush3.bf16.msra.mxu1 %v14682_v40  ;;  %13264 = vmatprep.subr.bf16.mxu0 %v14683_v41  ;;  %v14730_v40 = vld [vmem:[%s18805_s1 + $0xba0] sm:$0xff]  }
 0x14e   : > { %13286 = vmatprep.subr.bf16.mxu1 %v14684_v42 }
 0x150   : > { %13265 = vmatpush3.bf16.msra.mxu0 %v14685_v43  ;;  %v14731_v43 = vld [vmem:[%s18805_s1 + $0xb68] sm:$0xff]  }
 0x151   : > { %13287 = vmatpush3.bf16.msra.mxu1 %v14686_v44  ;;  %13266 = vmatprep.subr.bf16.mxu0 %v14687_v45 }
 0x152   : > { %13288 = vmatprep.subr.bf16.mxu1 %v14688_v46  ;;  %v14732_v46 = vld [vmem:[%s18805_s1 + $0xbe8] sm:$0xff]  }
 0x154   : > { %13267 = vmatpush3.bf16.msra.mxu0 %v14689_v47 }
 0x155   : > { %13289 = vmatpush3.bf16.msra.mxu1 %v14690_v48  ;;  %13268 = vmatprep.subr.bf16.mxu0 %v14691_v49  ;;  %v14733_v49 = vld [vmem:[%s18805_s1 + $0xb28] sm:$0xff]  }
 0x156   : > { %13290 = vmatprep.subr.bf16.mxu1 %v14692_v50 }
 0x158   : > { %13269 = vmatpush3.bf16.msra.mxu0 %v14693_v52 }
 0x159   : > { %13291 = vmatpush3.bf16.msra.mxu1 %v14694_v54  ;;  %13270 = vmatprep.subr.bf16.mxu0 %v14695_v57  ;;  %v14735_v54 = vld [vmem:[%s18805_s1 + $0xb70] sm:$0xff]  }
 0x15a   : > { %v12968_v51 = vpop.f32.mrb[12].mxu0  ;;  %13292 = vmatprep.subr.bf16.mxu1 %v14696_v60  ;;  %v14737_v57 = vld [vmem:[%s18805_s1 + $0xb30] sm:$0xff]   ;;  %v14740_v60 = vld [vmem:[%s18805_s1 + $0xbf8] sm:$0xff]  }
 0x15b   : > { %v12990_v53 = vpop.f32.mrb[12].mxu1  ;;  %v12969_v55 = vpop.f32.mrb[13].mxu0 }
 0x15c   : > { %v12991_v56 = vpop.f32.mrb[13].mxu1  ;;  %v12970_v58 = vadd.f32 %v12969_v55, %v12968_v51  ;;  %v12971_v61 = vpop.f32.mrb[14].mxu0  ;;  %13271 = vmatpush3.bf16.msra.mxu0 %v14697_v63  ;;  %v14734_v51 = vld [vmem:[%s18805_s1 + $0xba8] sm:$0xff]   ;;  %v246_v63 = vld [vmem:[%s15620_s12 + $0xb0] sm:$0xff] }
 0x15d   : > { %v12992_v59 = vadd.f32 %v12991_v56, %v12990_v53  ;;  %v12993_v62 = vpop.f32.mrb[14].mxu1  ;;  %v12972_v2 = vpop.f32.mrb[15].mxu0  ;;  %13293 = vmatpush3.bf16.msra.mxu1 %v14698_v1  ;;  %13272 = vmatprep.subr.bf16.mxu0 %v14699_v4  ;;  %v14736_v56 = vld [vmem:[%s18805_s1 + $0xbf0] sm:$0xff]   ;;  %v14741_v61 = vld [vmem:[%s18805_s1 + $0xb38] sm:$0xff]   ;;  %v11708_v1 = vcombine.low %v246_v63, %v246_v63 }
 0x15e   : > { %v9210_v0 = vadd.f32 %v12970_v58, %v16495_v17  ;;  %v12994_v3 = vpop.f32.mrb[15].mxu1  ;;  %13294 = vmatprep.subr.bf16.mxu1 %v14700_v6  ;;  %v11706_v17 = vcombine.low %v245_v16, %v245_v16  ;;  %v14738_v58 = vld [vmem:[%s18805_s1 + $0xbb0] sm:$0xff]   ;;  %v14742_v62 = vld [vmem:[%s18805_s1 + $0xbb8] sm:$0xff]   ;;  %v11709_v2 = vcombine.high %v246_v63, %v246_v63  ;;  %v14748_v6 = vld [vmem:[%s18805_s1 + $0xcc0] sm:$0xff]  }
 0x15f   : > { %v14758_v16 = vld [vmem:[%s18805_s1 + $0xc90] sm:$0xff]  }
 0x160   : > { %v16599_v5 = vadd.f32 %v12992_v59, %v9210_v0  ;;  %13273 = vmatpush3.bf16.msra.mxu0 %v14701_v7  ;;  %v14739_v59 = vld [vmem:[%s18805_s1 + $0xb78] sm:$0xff]   ;;  %v14749_v7 = vld [vmem:[%s18805_s1 + $0xc00] sm:$0xff]   ;;  %v14791_v63 = vld [vmem:[%s18805_s1 + $0xd50] sm:$0xff]  }
 0x161   : > { %13295 = vmatpush3.bf16.msra.mxu1 %v14702_v8  ;;  %13274 = vmatprep.subr.bf16.mxu0 %v14703_v9  ;;  %v247_v0 = vld [vmem:[%s15620_s12 + $0xb8] sm:$0xff]  ;;  %v14750_v8 = vld [vmem:[%s18805_s1 + $0xc80] sm:$0xff]   ;;  %v14751_v9 = vld [vmem:[%s18805_s1 + $0xc48] sm:$0xff]  }
 0x162   : > { %13296 = vmatprep.subr.bf16.mxu1 %v14704_v10  ;;  %v11710_v3 = vcombine.low %v247_v0, %v247_v0  ;;  %v11711_v4 = vcombine.high %v247_v0, %v247_v0  ;;  %v14752_v10 = vld [vmem:[%s18805_s1 + $0xcc8] sm:$0xff]   ;;  %v14792_v0 = vld [vmem:[%s18805_s1 + $0xdd0] sm:$0xff]  }
 0x164   : > { %13275 = vmatpush3.bf16.msra.mxu0 %v14705_v11  ;;  %v14753_v11 = vld [vmem:[%s18805_s1 + $0xc08] sm:$0xff]  }
 0x165   : > { %13297 = vmatpush3.bf16.msra.mxu1 %v14706_v12  ;;  %13304 = vmatprep.subr.bf16.mxu0 %v14711_v19  ;;  %v14754_v12 = vld [vmem:[%s18805_s1 + $0xc88] sm:$0xff]   ;;  %v14761_v19 = vld [vmem:[%s18805_s1 + $0xc18] sm:$0xff]  }
 0x166   : > { %13326 = vmatprep.subr.bf16.mxu1 %v14712_v20  ;;  %v14762_v20 = vld [vmem:[%s18805_s1 + $0xc98] sm:$0xff]  }
 0x167   : > { %9768 = vmatmul.mubr.bf16.vlgmr.msra.gmra.mrb[40].mxu0 %v11704_v14  ;;  %v14756_v14 = vld [vmem:[%s18805_s1 + $0xcd0] sm:$0xff]  }
 0x168   : > { %9808 = vmatmul.mubr.bf16.vlgmr.msra.gmra.mrb[40].mxu1 %v11706_v17  ;;  %13305 = vmatpush3.bf16.msra.mxu0 %v14713_v21  ;;  %v14759_v17 = vld [vmem:[%s18805_s1 + $0xc58] sm:$0xff]   ;;  %v14763_v21 = vld [vmem:[%s18805_s1 + $0xc60] sm:$0xff]  }
 0x169   : > { %13327 = vmatpush3.bf16.msra.mxu1 %v14714_v22  ;;  %13306 = vmatprep.subr.bf16.mxu0 %v14715_v23  ;;  %v14764_v22 = vld [vmem:[%s18805_s1 + $0xce0] sm:$0xff]  }
 0x16a   : > { %13328 = vmatprep.subr.bf16.mxu1 %v14716_v24  ;;  %9847 = vmatprep.mubr.bf16.mxu0 %v11709_v2  ;;  %v14765_v24 = vld [vmem:[%s18805_s1 + $0xc20] sm:$0xff]   ;;  %v14794_v2 = vld [vmem:[%s18805_s1 + $0xd90] sm:$0xff]  }
 0x16b   : > { %9887 = vmatprep.mubr.bf16.mxu1 %v11711_v4  ;;  %v14796_v4 = vld [vmem:[%s18805_s1 + $0xdd8] sm:$0xff]  }
 0x16c   : > { %13307 = vmatpush3.bf16.msra.mxu0 %v14717_v25 }
 0x16d   : > { %13329 = vmatpush3.bf16.msra.mxu1 %v14718_v26  ;;  %13308 = vmatprep.subr.bf16.mxu0 %v14719_v27  ;;  %v14766_v26 = vld [vmem:[%s18805_s1 + $0xca0] sm:$0xff]  }
 0x16e   : > { %13330 = vmatprep.subr.bf16.mxu1 %v14720_v28 }
 0x170   : > { %13309 = vmatpush3.bf16.msra.mxu0 %v14721_v29 }
 0x171   : > { %13331 = vmatpush3.bf16.msra.mxu1 %v14722_v30  ;;  %13310 = vmatprep.subr.bf16.mxu0 %v14723_v31  ;;  %v14767_v30 = vld [vmem:[%s18805_s1 + $0xc68] sm:$0xff]  }
 0x172   : > { %13332 = vmatprep.subr.bf16.mxu1 %v14724_v32  ;;  %v14768_v32 = vld [vmem:[%s18805_s1 + $0xce8] sm:$0xff]  }
 0x174   : > { %13311 = vmatpush3.bf16.msra.mxu0 %v14725_v33 }
 0x175   : > { %13333 = vmatpush3.bf16.msra.mxu1 %v14726_v34  ;;  %13312 = vmatprep.subr.bf16.mxu0 %v14727_v35 }
 0x176   : > { %13334 = vmatprep.subr.bf16.mxu1 %v14728_v36  ;;  %v14769_v36 = vld [vmem:[%s18805_s1 + $0xc28] sm:$0xff]  }
 0x178   : > { %13313 = vmatpush3.bf16.msra.mxu0 %v14729_v38 }
 0x179   : > { %13335 = vmatpush3.bf16.msra.mxu1 %v14730_v40  ;;  %13314 = vmatprep.subr.bf16.mxu0 %v14731_v43  ;;  %v14773_v43 = vld [vmem:[%s18805_s1 + $0xc30] sm:$0xff]  }
 0x17a   : > { %v13012_v37 = vpop.f32.mrb[16].mxu0  ;;  %13336 = vmatprep.subr.bf16.mxu1 %v14732_v46  ;;  %v14776_v46 = vld [vmem:[%s18805_s1 + $0xcf8] sm:$0xff]  }
 0x17b   : > { %v13034_v39 = vpop.f32.mrb[16].mxu1  ;;  %v13013_v41 = vpop.f32.mrb[17].mxu0 }
 0x17c   : > { %v13035_v42 = vpop.f32.mrb[17].mxu1  ;;  %v13014_v44 = vadd.f32 %v13013_v41, %v13012_v37  ;;  %v13015_v47 = vpop.f32.mrb[18].mxu0  ;;  %13315 = vmatpush3.bf16.msra.mxu0 %v14733_v49  ;;  %v14770_v37 = vld [vmem:[%s18805_s1 + $0xca8] sm:$0xff]   ;;  %v14771_v41 = vld [vmem:[%s18805_s1 + $0xc70] sm:$0xff]   ;;  %v248_v49 = vld [vmem:[%s15620_s12 + $0xc0] sm:$0xff] }
 0x17d   : > { %v13036_v45 = vadd.f32 %v13035_v42, %v13034_v39  ;;  %v13037_v48 = vpop.f32.mrb[18].mxu1  ;;  %v13016_v52 = vpop.f32.mrb[19].mxu0  ;;  %13337 = vmatpush3.bf16.msra.mxu1 %v14734_v51  ;;  %13316 = vmatprep.subr.bf16.mxu0 %v14735_v54  ;;  %v14772_v42 = vld [vmem:[%s18805_s1 + $0xcf0] sm:$0xff]   ;;  %v14777_v47 = vld [vmem:[%s18805_s1 + $0xc38] sm:$0xff]   ;;  %v11712_v51 = vcombine.low %v248_v49, %v248_v49  ;;  %v14783_v54 = vld [vmem:[%s18805_s1 + $0xd40] sm:$0xff]  }
 0x17e   : > { %v9290_v50 = vadd.f32 %v13014_v44, %v16599_v5  ;;  %v13038_v53 = vpop.f32.mrb[19].mxu1  ;;  %13338 = vmatprep.subr.bf16.mxu1 %v14736_v56  ;;  %v14747_v5 = vld [vmem:[%s18805_s1 + $0xc40] sm:$0xff]   ;;  %v14774_v44 = vld [vmem:[%s18805_s1 + $0xcb0] sm:$0xff]   ;;  %v14778_v48 = vld [vmem:[%s18805_s1 + $0xcb8] sm:$0xff]   ;;  %v11713_v52 = vcombine.high %v248_v49, %v248_v49 }
 0x17f   : > { %v14784_v56 = vld [vmem:[%s18805_s1 + $0xdc0] sm:$0xff]   ;;  %v14827_v49 = vld [vmem:[%s18805_s1 + $0xe50] sm:$0xff]  }
 0x180   : > { %v16700_v55 = vadd.f32 %v13036_v45, %v9290_v50  ;;  %13317 = vmatpush3.bf16.msra.mxu0 %v14737_v57  ;;  %v14775_v45 = vld [vmem:[%s18805_s1 + $0xc78] sm:$0xff]   ;;  %v249_v50 = vld [vmem:[%s15620_s12 + $0xc8] sm:$0xff]  ;;  %v14785_v57 = vld [vmem:[%s18805_s1 + $0xd00] sm:$0xff]  }
 0x181   : > { %13339 = vmatpush3.bf16.msra.mxu1 %v14738_v58  ;;  %13318 = vmatprep.subr.bf16.mxu0 %v14739_v59  ;;  %v11714_v53 = vcombine.low %v249_v50, %v249_v50  ;;  %v14786_v58 = vld [vmem:[%s18805_s1 + $0xd80] sm:$0xff]   ;;  %v14787_v59 = vld [vmem:[%s18805_s1 + $0xd48] sm:$0xff]  }
 0x182   : > { %13340 = vmatprep.subr.bf16.mxu1 %v14740_v60  ;;  %v14788_v60 = vld [vmem:[%s18805_s1 + $0xdc8] sm:$0xff]  }
 0x184   : > { %13319 = vmatpush3.bf16.msra.mxu0 %v14741_v61  ;;  %v14789_v61 = vld [vmem:[%s18805_s1 + $0xd08] sm:$0xff]  }
 0x185   : > { %13341 = vmatpush3.bf16.msra.mxu1 %v14742_v62  ;;  %13348 = vmatprep.subr.bf16.mxu0 %v14747_v5  ;;  %v14790_v62 = vld [vmem:[%s18805_s1 + $0xd88] sm:$0xff]   ;;  %v14797_v5 = vld [vmem:[%s18805_s1 + $0xd18] sm:$0xff]  }
 0x186   : > { %13370 = vmatprep.subr.bf16.mxu1 %v14748_v6  ;;  %v14798_v6 = vld [vmem:[%s18805_s1 + $0xd98] sm:$0xff]  }
 0x187   : > { %9848 = vmatmul.mubr.bf16.vlgmr.msra.gmra.mrb[44].mxu0 %v11708_v1  ;;  %v14793_v1 = vld [vmem:[%s18805_s1 + $0xd10] sm:$0xff]  }
 0x188   : > { %9888 = vmatmul.mubr.bf16.vlgmr.msra.gmra.mrb[44].mxu1 %v11710_v3  ;;  %13349 = vmatpush3.bf16.msra.mxu0 %v14749_v7  ;;  %v14795_v3 = vld [vmem:[%s18805_s1 + $0xd58] sm:$0xff]   ;;  %v14799_v7 = vld [vmem:[%s18805_s1 + $0xd60] sm:$0xff]  }
 0x189   : > { %13371 = vmatpush3.bf16.msra.mxu1 %v14750_v8  ;;  %13350 = vmatprep.subr.bf16.mxu0 %v14751_v9  ;;  %v14800_v8 = vld [vmem:[%s18805_s1 + $0xde0] sm:$0xff]  }
 0x18a   : > { %13372 = vmatprep.subr.bf16.mxu1 %v14752_v10  ;;  %9927 = vmatprep.mubr.bf16.mxu0 %v11713_v52  ;;  %v14801_v10 = vld [vmem:[%s18805_s1 + $0xd20] sm:$0xff]   ;;  %v14830_v52 = vld [vmem:[%s18805_s1 + $0xe90] sm:$0xff]  }
 0x18c   : > { %13351 = vmatpush3.bf16.msra.mxu0 %v14753_v11 }
 0x18d   : > { %13373 = vmatpush3.bf16.msra.mxu1 %v14754_v12  ;;  %13352 = vmatprep.subr.bf16.mxu0 %v14755_v13  ;;  %v14802_v12 = vld [vmem:[%s18805_s1 + $0xda0] sm:$0xff]  }
 0x18e   : > { %13374 = vmatprep.subr.bf16.mxu1 %v14756_v14 }
 0x190   : > { %13353 = vmatpush3.bf16.msra.mxu0 %v14757_v15  ;;  %v14803_v15 = vld [vmem:[%s18805_s1 + $0xd68] sm:$0xff]  }
 0x191   : > { %13375 = vmatpush3.bf16.msra.mxu1 %v14758_v16  ;;  %13354 = vmatprep.subr.bf16.mxu0 %v14759_v17 }
 0x192   : > { %13376 = vmatprep.subr.bf16.mxu1 %v14760_v18  ;;  %v14804_v18 = vld [vmem:[%s18805_s1 + $0xde8] sm:$0xff]  }
 0x194   : > { %13355 = vmatpush3.bf16.msra.mxu0 %v14761_v19 }
 0x195   : > { %13377 = vmatpush3.bf16.msra.mxu1 %v14762_v20  ;;  %13356 = vmatprep.subr.bf16.mxu0 %v14763_v21  ;;  %v14805_v21 = vld [vmem:[%s18805_s1 + $0xd28] sm:$0xff]  }
 0x196   : > { %13378 = vmatprep.subr.bf16.mxu1 %v14764_v22 }
 0x198   : > { %13357 = vmatpush3.bf16.msra.mxu0 %v14765_v24 }
 0x199   : > { %13379 = vmatpush3.bf16.msra.mxu1 %v14766_v26  ;;  %13358 = vmatprep.subr.bf16.mxu0 %v14767_v30  ;;  %v14807_v26 = vld [vmem:[%s18805_s1 + $0xd70] sm:$0xff]  }
 0x19a   : > { %v13056_v23 = vpop.f32.mrb[20].mxu0  ;;  %13380 = vmatprep.subr.bf16.mxu1 %v14768_v32  ;;  %v14810_v30 = vld [vmem:[%s18805_s1 + $0xdb0] sm:$0xff]   ;;  %v14812_v32 = vld [vmem:[%s18805_s1 + $0xdf8] sm:$0xff]  }
 0x19b   : > { %v13078_v25 = vpop.f32.mrb[20].mxu1  ;;  %v13057_v27 = vpop.f32.mrb[21].mxu0 }
 0x19c   : > { %v13058_v28 = vadd.f32 %v13057_v27, %v13056_v23  ;;  %v13079_v29 = vpop.f32.mrb[21].mxu1  ;;  %v13059_v33 = vpop.f32.mrb[22].mxu0  ;;  %13359 = vmatpush3.bf16.msra.mxu0 %v14769_v36  ;;  %v14806_v23 = vld [vmem:[%s18805_s1 + $0xda8] sm:$0xff]  }
 0x19d   : > { %v13080_v31 = vadd.f32 %v13079_v29, %v13078_v25  ;;  %v13081_v35 = vpop.f32.mrb[22].mxu1  ;;  %v13060_v38 = vpop.f32.mrb[23].mxu0  ;;  %13381 = vmatpush3.bf16.msra.mxu1 %v14770_v37  ;;  %13360 = vmatprep.subr.bf16.mxu0 %v14771_v41  ;;  %v14809_v29 = vld [vmem:[%s18805_s1 + $0xd30] sm:$0xff]   ;;  %v14813_v33 = vld [vmem:[%s18805_s1 + $0xd38] sm:$0xff]   ;;  %v14819_v41 = vld [vmem:[%s18805_s1 + $0xe40] sm:$0xff]  }
 0x19e   : > { %v9370_v34 = vadd.f32 %v13058_v28, %v16700_v55  ;;  %v13082_v40 = vpop.f32.mrb[23].mxu1  ;;  %13382 = vmatprep.subr.bf16.mxu1 %v14772_v42  ;;  %v11715_v55 = vcombine.high %v249_v50, %v249_v50  ;;  %v14808_v28 = vld [vmem:[%s18805_s1 + $0xdf0] sm:$0xff]   ;;  %v251_v38 = vld [vmem:[%s15620_s12 + $0xd8] sm:$0xff]  ;;  %v14820_v42 = vld [vmem:[%s18805_s1 + $0xec0] sm:$0xff]  }
 0x19f   : > { %v250_v35 = vld [vmem:[%s15620_s12 + $0xd0] sm:$0xff]  ;;  %v11719_v40 = vcombine.high %v251_v38, %v251_v38 }
 0x1a0   : > { %v16798_v39 = vadd.f32 %v13080_v31, %v9370_v34  ;;  %13361 = vmatpush3.bf16.msra.mxu0 %v14773_v43  ;;  %9967 = vmatprep.mubr.bf16.mxu1 %v11715_v55  ;;  %v14811_v31 = vld [vmem:[%s18805_s1 + $0xd78] sm:$0xff]   ;;  %v11716_v36 = vcombine.low %v250_v35, %v250_v35  ;;  %v11717_v37 = vcombine.high %v250_v35, %v250_v35  ;;  %v14821_v43 = vld [vmem:[%s18805_s1 + $0xe00] sm:$0xff]   ;;  %v14828_v50 = vld [vmem:[%s18805_s1 + $0xed0] sm:$0xff]  }
 0x1a1   : > { %13383 = vmatpush3.bf16.msra.mxu1 %v14774_v44  ;;  %13362 = vmatprep.subr.bf16.mxu0 %v14775_v45  ;;  %v14814_v34 = vld [vmem:[%s18805_s1 + $0xdb8] sm:$0xff]   ;;  %v14822_v44 = vld [vmem:[%s18805_s1 + $0xe80] sm:$0xff]   ;;  %v14823_v45 = vld [vmem:[%s18805_s1 + $0xe48] sm:$0xff]  }
 0x1a2   : > { %13384 = vmatprep.subr.bf16.mxu1 %v14776_v46  ;;  %v14824_v46 = vld [vmem:[%s18805_s1 + $0xec8] sm:$0xff]   ;;  %v14833_v55 = vld [vmem:[%s18805_s1 + $0xe18] sm:$0xff]   ;;  %v14863_v35 = vld [vmem:[%s18805_s1 + $0xf50] sm:$0xff]  }
 0x1a4   : > { %13363 = vmatpush3.bf16.msra.mxu0 %v14777_v47  ;;  %v14825_v47 = vld [vmem:[%s18805_s1 + $0xe08] sm:$0xff]  }
 0x1a5   : > { %13385 = vmatpush3.bf16.msra.mxu1 %v14778_v48  ;;  %13392 = vmatprep.subr.bf16.mxu0 %v14783_v54  ;;  %v14826_v48 = vld [vmem:[%s18805_s1 + $0xe88] sm:$0xff]   ;;  %v14832_v54 = vld [vmem:[%s18805_s1 + $0xed8] sm:$0xff]  }
 0x1a6   : > { %13414 = vmatprep.subr.bf16.mxu1 %v14784_v56  ;;  %v14834_v56 = vld [vmem:[%s18805_s1 + $0xe98] sm:$0xff]  }
 0x1a7   : > { %9928 = vmatmul.mubr.bf16.vlgmr.msra.gmra.mrb[48].mxu0 %v11712_v51  ;;  %v14829_v51 = vld [vmem:[%s18805_s1 + $0xe10] sm:$0xff]  }
 0x1a8   : > { %9968 = vmatmul.mubr.bf16.vlgmr.msra.gmra.mrb[48].mxu1 %v11714_v53  ;;  %13393 = vmatpush3.bf16.msra.mxu0 %v14785_v57  ;;  %v14831_v53 = vld [vmem:[%s18805_s1 + $0xe58] sm:$0xff]   ;;  %v14835_v57 = vld [vmem:[%s18805_s1 + $0xe60] sm:$0xff]  }
 0x1a9   : > { %13415 = vmatpush3.bf16.msra.mxu1 %v14786_v58  ;;  %13394 = vmatprep.subr.bf16.mxu0 %v14787_v59  ;;  %v14836_v58 = vld [vmem:[%s18805_s1 + $0xee0] sm:$0xff]  }
 0x1aa   : > { %13416 = vmatprep.subr.bf16.mxu1 %v14788_v60  ;;  %10007 = vmatprep.mubr.bf16.mxu0 %v11717_v37  ;;  %v14837_v60 = vld [vmem:[%s18805_s1 + $0xe20] sm:$0xff]   ;;  %v14865_v37 = vld [vmem:[%s18805_s1 + $0xf10] sm:$0xff]  }
 0x1ab   : > { %10047 = vmatprep.mubr.bf16.mxu1 %v11719_v40  ;;  %v14868_v40 = vld [vmem:[%s18805_s1 + $0xfd8] sm:$0xff]  }
 0x1ac   : > { %13395 = vmatpush3.bf16.msra.mxu0 %v14789_v61 }
 0x1ad   : > { %13417 = vmatpush3.bf16.msra.mxu1 %v14790_v62  ;;  %13396 = vmatprep.subr.bf16.mxu0 %v14791_v63  ;;  %v14838_v62 = vld [vmem:[%s18805_s1 + $0xea0] sm:$0xff]  }
 0x1ae   : > { %13418 = vmatprep.subr.bf16.mxu1 %v14792_v0 }
 0x1b0   : > { %13397 = vmatpush3.bf16.msra.mxu0 %v14793_v1  ;;  %v14839_v1 = vld [vmem:[%s18805_s1 + $0xe68] sm:$0xff]  }
 0x1b1   : > { %13419 = vmatpush3.bf16.msra.mxu1 %v14794_v2  ;;  %13398 = vmatprep.subr.bf16.mxu0 %v14795_v3 }
 0x1b2   : > { %13420 = vmatprep.subr.bf16.mxu1 %v14796_v4  ;;  %v14840_v4 = vld [vmem:[%s18805_s1 + $0xee8] sm:$0xff]  }
 0x1b4   : > { %13399 = vmatpush3.bf16.msra.mxu0 %v14797_v5 }
 0x1b5   : > { %13421 = vmatpush3.bf16.msra.mxu1 %v14798_v6  ;;  %13400 = vmatprep.subr.bf16.mxu0 %v14799_v7  ;;  %v14841_v7 = vld [vmem:[%s18805_s1 + $0xe28] sm:$0xff]  }
 0x1b6   : > { %13422 = vmatprep.subr.bf16.mxu1 %v14800_v8 }
 0x1b8   : > { %13401 = vmatpush3.bf16.msra.mxu0 %v14801_v10 }
 0x1b9   : > { %13423 = vmatpush3.bf16.msra.mxu1 %v14802_v12  ;;  %13402 = vmatprep.subr.bf16.mxu0 %v14803_v15  ;;  %v14843_v12 = vld [vmem:[%s18805_s1 + $0xe70] sm:$0xff]  }
 0x1ba   : > { %v13100_v9 = vpop.f32.mrb[24].mxu0  ;;  %13424 = vmatprep.subr.bf16.mxu1 %v14804_v18  ;;  %v14845_v15 = vld [vmem:[%s18805_s1 + $0xe30] sm:$0xff]   ;;  %v14848_v18 = vld [vmem:[%s18805_s1 + $0xef8] sm:$0xff]  }
 0x1bb   : > { %v13122_v11 = vpop.f32.mrb[24].mxu1  ;;  %v13101_v13 = vpop.f32.mrb[25].mxu0 }
 0x1bc   : > { %v13123_v14 = vpop.f32.mrb[25].mxu1  ;;  %v13102_v16 = vadd.f32 %v13101_v13, %v13100_v9  ;;  %v13103_v19 = vpop.f32.mrb[26].mxu0  ;;  %13403 = vmatpush3.bf16.msra.mxu0 %v14805_v21  ;;  %v14842_v9 = vld [vmem:[%s18805_s1 + $0xea8] sm:$0xff]   ;;  %v252_v21 = vld [vmem:[%s15620_s12 + $0xe0] sm:$0xff] }
 0x1bd   : > { %v13124_v17 = vadd.f32 %v13123_v14, %v13122_v11  ;;  %v13125_v20 = vpop.f32.mrb[26].mxu1  ;;  %v13104_v24 = vpop.f32.mrb[27].mxu0  ;;  %13425 = vmatpush3.bf16.msra.mxu1 %v14806_v23  ;;  %13404 = vmatprep.subr.bf16.mxu0 %v14807_v26  ;;  %v14844_v14 = vld [vmem:[%s18805_s1 + $0xef0] sm:$0xff]   ;;  %v14849_v19 = vld [vmem:[%s18805_s1 + $0xe38] sm:$0xff]   ;;  %v11720_v23 = vcombine.low %v252_v21, %v252_v21 }
 0x1be   : > { %v9450_v22 = vadd.f32 %v13102_v16, %v16798_v39  ;;  %v13126_v25 = vpop.f32.mrb[27].mxu1  ;;  %13426 = vmatprep.subr.bf16.mxu1 %v14808_v28  ;;  %v11718_v39 = vcombine.low %v251_v38, %v251_v38  ;;  %v14846_v16 = vld [vmem:[%s18805_s1 + $0xeb0] sm:$0xff]   ;;  %v14850_v20 = vld [vmem:[%s18805_s1 + $0xeb8] sm:$0xff]   ;;  %v11721_v24 = vcombine.high %v252_v21, %v252_v21  ;;  %v14856_v28 = vld [vmem:[%s18805_s1 + $0xfc0] sm:$0xff]  }
 0x1bf   : > { %v14866_v38 = vld [vmem:[%s18805_s1 + $0xf90] sm:$0xff]  }
 0x1c0   : > { %v16902_v27 = vadd.f32 %v13124_v17, %v9450_v22  ;;  %13405 = vmatpush3.bf16.msra.mxu0 %v14809_v29  ;;  %v14847_v17 = vld [vmem:[%s18805_s1 + $0xe78] sm:$0xff]   ;;  %v253_v22 = vld [vmem:[%s15620_s12 + $0xe8] sm:$0xff]  ;;  %v14857_v29 = vld [vmem:[%s18805_s1 + $0xf00] sm:$0xff]  }
 0x1c1   : > { %13427 = vmatpush3.bf16.msra.mxu1 %v14810_v30  ;;  %13406 = vmatprep.subr.bf16.mxu0 %v14811_v31  ;;  %v11722_v25 = vcombine.low %v253_v22, %v253_v22  ;;  %v11723_v26 = vcombine.high %v253_v22, %v253_v22  ;;  %v14858_v30 = vld [vmem:[%s18805_s1 + $0xf80] sm:$0xff]   ;;  %v14859_v31 = vld [vmem:[%s18805_s1 + $0xf48] sm:$0xff]   ;;  %v14899_v21 = vld [vmem:[%s18805_s1 + $0x1050] sm:$0xff]  }
 0x1c2   : > { %13428 = vmatprep.subr.bf16.mxu1 %v14812_v32  ;;  %v14860_v32 = vld [vmem:[%s18805_s1 + $0xfc8] sm:$0xff]   ;;  %v14900_v22 = vld [vmem:[%s18805_s1 + $0x10d0] sm:$0xff]  }
 0x1c4   : > { %13407 = vmatpush3.bf16.msra.mxu0 %v14813_v33  ;;  %v14861_v33 = vld [vmem:[%s18805_s1 + $0xf08] sm:$0xff]  }
 0x1c5   : > { %13429 = vmatpush3.bf16.msra.mxu1 %v14814_v34  ;;  %13436 = vmatprep.subr.bf16.mxu0 %v14819_v41  ;;  %v14862_v34 = vld [vmem:[%s18805_s1 + $0xf88] sm:$0xff]   ;;  %v14869_v41 = vld [vmem:[%s18805_s1 + $0xf18] sm:$0xff]  }
 0x1c6   : > { %13458 = vmatprep.subr.bf16.mxu1 %v14820_v42  ;;  %v14870_v42 = vld [vmem:[%s18805_s1 + $0xf98] sm:$0xff]  }
 0x1c7   : > { %10008 = vmatmul.mubr.bf16.vlgmr.msra.gmra.mrb[52].mxu0 %v11716_v36  ;;  %v14864_v36 = vld [vmem:[%s18805_s1 + $0xfd0] sm:$0xff]  }
 0x1c8   : > { %10048 = vmatmul.mubr.bf16.vlgmr.msra.gmra.mrb[52].mxu1 %v11718_v39  ;;  %13437 = vmatpush3.bf16.msra.mxu0 %v14821_v43  ;;  %v14867_v39 = vld [vmem:[%s18805_s1 + $0xf58] sm:$0xff]   ;;  %v14871_v43 = vld [vmem:[%s18805_s1 + $0xf60] sm:$0xff]  }
 0x1c9   : > { %13459 = vmatpush3.bf16.msra.mxu1 %v14822_v44  ;;  %13438 = vmatprep.subr.bf16.mxu0 %v14823_v45  ;;  %v14872_v44 = vld [vmem:[%s18805_s1 + $0xfe0] sm:$0xff]  }
 0x1ca   : > { %13460 = vmatprep.subr.bf16.mxu1 %v14824_v46  ;;  %10087 = vmatprep.mubr.bf16.mxu0 %v11721_v24  ;;  %v14873_v45 = vld [vmem:[%s18805_s1 + $0xf20] sm:$0xff]   ;;  %v14902_v24 = vld [vmem:[%s18805_s1 + $0x1090] sm:$0xff]  }
 0x1cb   : > { %10127 = vmatprep.mubr.bf16.mxu1 %v11723_v26  ;;  %v14904_v26 = vld [vmem:[%s18805_s1 + $0x10d8] sm:$0xff]  }
 0x1cc   : > { %13439 = vmatpush3.bf16.msra.mxu0 %v14825_v47  ;;  %v14874_v47 = vld [vmem:[%s18805_s1 + $0xfa0] sm:$0xff]  }
 0x1cd   : > { %13461 = vmatpush3.bf16.msra.mxu1 %v14826_v48  ;;  %13440 = vmatprep.subr.bf16.mxu0 %v14827_v49 }
 0x1ce   : > { %13462 = vmatprep.subr.bf16.mxu1 %v14828_v50 }
 0x1d0   : > { %13441 = vmatpush3.bf16.msra.mxu0 %v14829_v51 }
 0x1d1   : > { %13463 = vmatpush3.bf16.msra.mxu1 %v14830_v52  ;;  %13442 = vmatprep.subr.bf16.mxu0 %v14831_v53  ;;  %v14875_v53 = vld [vmem:[%s18805_s1 + $0xf68] sm:$0xff]  }
 0x1d2   : > { %13464 = vmatprep.subr.bf16.mxu1 %v14832_v54 }
 0x1d4   : > { %13443 = vmatpush3.bf16.msra.mxu0 %v14833_v55  ;;  %v14876_v55 = vld [vmem:[%s18805_s1 + $0xfe8] sm:$0xff]  }
 0x1d5   : > { %13465 = vmatpush3.bf16.msra.mxu1 %v14834_v56  ;;  %13444 = vmatprep.subr.bf16.mxu0 %v14835_v57 }
 0x1d6   : > { %13466 = vmatprep.subr.bf16.mxu1 %v14836_v58  ;;  %v14877_v58 = vld [vmem:[%s18805_s1 + $0xf28] sm:$0xff]  }
 0x1d8   : > { %13445 = vmatpush3.bf16.msra.mxu0 %v14837_v60  ;;  %v14878_v60 = vld [vmem:[%s18805_s1 + $0xfa8] sm:$0xff]  }
 0x1d9   : > { %13467 = vmatpush3.bf16.msra.mxu1 %v14838_v62  ;;  %13446 = vmatprep.subr.bf16.mxu0 %v14839_v1  ;;  %v14881_v1 = vld [vmem:[%s18805_s1 + $0xf30] sm:$0xff]  }
 0x1da   : > { %v13144_v59 = vpop.f32.mrb[28].mxu0  ;;  %13468 = vmatprep.subr.bf16.mxu1 %v14840_v4  ;;  %v14884_v4 = vld [vmem:[%s18805_s1 + $0xff8] sm:$0xff]  }
 0x1db   : > { %v13166_v61 = vpop.f32.mrb[28].mxu1  ;;  %v13145_v63 = vpop.f32.mrb[29].mxu0 }
 0x1dc   : > { %v13167_v0 = vpop.f32.mrb[29].mxu1  ;;  %v13146_v2 = vadd.f32 %v13145_v63, %v13144_v59  ;;  %v13147_v5 = vpop.f32.mrb[30].mxu0  ;;  %13447 = vmatpush3.bf16.msra.mxu0 %v14841_v7  ;;  %v14879_v63 = vld [vmem:[%s18805_s1 + $0xf70] sm:$0xff]  }
 0x1dd   : > { %v13168_v3 = vadd.f32 %v13167_v0, %v13166_v61  ;;  %v13169_v6 = vpop.f32.mrb[30].mxu1  ;;  %v13148_v10 = vpop.f32.mrb[31].mxu0  ;;  %13469 = vmatpush3.bf16.msra.mxu1 %v14842_v9  ;;  %13448 = vmatprep.subr.bf16.mxu0 %v14843_v12  ;;  %v14880_v0 = vld [vmem:[%s18805_s1 + $0xff0] sm:$0xff]   ;;  %v14885_v5 = vld [vmem:[%s18805_s1 + $0xf38] sm:$0xff]  }
 0x1de   : > { %v9530_v8 = vadd.f32 %v13146_v2, %v16902_v27  ;;  %v13170_v11 = vpop.f32.mrb[31].mxu1  ;;  %13470 = vmatprep.subr.bf16.mxu1 %v14844_v14  ;;  %v14855_v27 = vld [vmem:[%s18805_s1 + $0xf40] sm:$0xff]   ;;  %v14882_v2 = vld [vmem:[%s18805_s1 + $0xfb0] sm:$0xff]   ;;  %v14886_v6 = vld [vmem:[%s18805_s1 + $0xfb8] sm:$0xff]  }
 0x1df   : > { %v254_v7 = vld [vmem:[%s15620_s12 + $0xf0] sm:$0xff]  ;;  %v14892_v14 = vld [vmem:[%s18805_s1 + $0x10c0] sm:$0xff]  }
 0x1e0   : > { %v17003_v13 = vadd.f32 %v13168_v3, %v9530_v8  ;;  %13449 = vmatpush3.bf16.msra.mxu0 %v14845_v15  ;;  %v14883_v3 = vld [vmem:[%s18805_s1 + $0xf78] sm:$0xff]   ;;  %v11724_v9 = vcombine.low %v254_v7, %v254_v7  ;;  %v11725_v10 = vcombine.high %v254_v7, %v254_v7  ;;  %v14893_v15 = vld [vmem:[%s18805_s1 + $0x1000] sm:$0xff]   ;;  %v14935_v7 = vld [vmem:[%s18805_s1 + $0x1150] sm:$0xff]  }
 0x1e1   : > { %13471 = vmatpush3.bf16.msra.mxu1 %v14846_v16  ;;  %13450 = vmatprep.subr.bf16.mxu0 %v14847_v17  ;;  %v255_v8 = vld [vmem:[%s15620_s12 + $0xf8] sm:$0xff]  ;;  %v14894_v16 = vld [vmem:[%s18805_s1 + $0x1080] sm:$0xff]   ;;  %v14895_v17 = vld [vmem:[%s18805_s1 + $0x1048] sm:$0xff]  }
 0x1e2   : > { %13472 = vmatprep.subr.bf16.mxu1 %v14848_v18  ;;  %v11726_v11 = vcombine.low %v255_v8, %v255_v8  ;;  %v11727_v12 = vcombine.high %v255_v8, %v255_v8  ;;  %v14896_v18 = vld [vmem:[%s18805_s1 + $0x10c8] sm:$0xff]   ;;  %v14936_v8 = vld [vmem:[%s18805_s1 + $0x11d0] sm:$0xff]  }
 0x1e4   : > { %13451 = vmatpush3.bf16.msra.mxu0 %v14849_v19  ;;  %v14897_v19 = vld [vmem:[%s18805_s1 + $0x1008] sm:$0xff]  }
 0x1e5   : > { %13473 = vmatpush3.bf16.msra.mxu1 %v14850_v20  ;;  %13480 = vmatprep.subr.bf16.mxu0 %v14855_v27  ;;  %v14898_v20 = vld [vmem:[%s18805_s1 + $0x1088] sm:$0xff]   ;;  %v14905_v27 = vld [vmem:[%s18805_s1 + $0x1018] sm:$0xff]  }
 0x1e6   : > { %13502 = vmatprep.subr.bf16.mxu1 %v14856_v28  ;;  %v14906_v28 = vld [vmem:[%s18805_s1 + $0x1098] sm:$0xff]  }
 0x1e7   : > { %10088 = vmatmul.mubr.bf16.vlgmr.msra.gmra.mrb[56].mxu0 %v11720_v23  ;;  %v14901_v23 = vld [vmem:[%s18805_s1 + $0x1010] sm:$0xff]  }
 0x1e8   : > { %10128 = vmatmul.mubr.bf16.vlgmr.msra.gmra.mrb[56].mxu1 %v11722_v25  ;;  %13481 = vmatpush3.bf16.msra.mxu0 %v14857_v29  ;;  %v14903_v25 = vld [vmem:[%s18805_s1 + $0x1058] sm:$0xff]   ;;  %v14907_v29 = vld [vmem:[%s18805_s1 + $0x1060] sm:$0xff]  }
 0x1e9   : > { %13503 = vmatpush3.bf16.msra.mxu1 %v14858_v30  ;;  %13482 = vmatprep.subr.bf16.mxu0 %v14859_v31  ;;  %v14908_v30 = vld [vmem:[%s18805_s1 + $0x10e0] sm:$0xff]  }
 0x1ea   : > { %13504 = vmatprep.subr.bf16.mxu1 %v14860_v32  ;;  %10167 = vmatprep.mubr.bf16.mxu0 %v11725_v10  ;;  %v14909_v31 = vld [vmem:[%s18805_s1 + $0x1020] sm:$0xff]   ;;  %v14938_v10 = vld [vmem:[%s18805_s1 + $0x1190] sm:$0xff]  }
 0x1eb   : > { %10207 = vmatprep.mubr.bf16.mxu1 %v11727_v12  ;;  %v14940_v12 = vld [vmem:[%s18805_s1 + $0x11d8] sm:$0xff]  }
 0x1ec   : > { %13483 = vmatpush3.bf16.msra.mxu0 %v14861_v33  ;;  %v14910_v33 = vld [vmem:[%s18805_s1 + $0x10a0] sm:$0xff]  }
 0x1ed   : > { %13505 = vmatpush3.bf16.msra.mxu1 %v14862_v34  ;;  %13484 = vmatprep.subr.bf16.mxu0 %v14863_v35 }
 0x1ee   : > { %13506 = vmatprep.subr.bf16.mxu1 %v14864_v36 }
 0x1f0   : > { %13485 = vmatpush3.bf16.msra.mxu0 %v14865_v37 }
 0x1f1   : > { %13507 = vmatpush3.bf16.msra.mxu1 %v14866_v38  ;;  %13486 = vmatprep.subr.bf16.mxu0 %v14867_v39  ;;  %v14911_v39 = vld [vmem:[%s18805_s1 + $0x1068] sm:$0xff]  }
 0x1f2   : > { %13508 = vmatprep.subr.bf16.mxu1 %v14868_v40 }
 0x1f4   : > { %13487 = vmatpush3.bf16.msra.mxu0 %v14869_v41  ;;  %v14912_v41 = vld [vmem:[%s18805_s1 + $0x10e8] sm:$0xff]  }
 0x1f5   : > { %13509 = vmatpush3.bf16.msra.mxu1 %v14870_v42  ;;  %13488 = vmatprep.subr.bf16.mxu0 %v14871_v43 }
 0x1f6   : > { %13510 = vmatprep.subr.bf16.mxu1 %v14872_v44  ;;  %v14913_v44 = vld [vmem:[%s18805_s1 + $0x1028] sm:$0xff]  }
 0x1f8   : > { %13489 = vmatpush3.bf16.msra.mxu0 %v14873_v45 }
 0x1f9   : > { %13511 = vmatpush3.bf16.msra.mxu1 %v14874_v47  ;;  %13490 = vmatprep.subr.bf16.mxu0 %v14875_v53  ;;  %v14919_v53 = vld [vmem:[%s18805_s1 + $0x1078] sm:$0xff]  }
 0x1fa   : > { %v13188_v46 = vpop.f32.mrb[32].mxu0  ;;  %13512 = vmatprep.subr.bf16.mxu1 %v14876_v55  ;;  %v14921_v55 = vld [vmem:[%s18805_s1 + $0x1038] sm:$0xff]  }
 0x1fb   : > { %v13210_v48 = vpop.f32.mrb[32].mxu1  ;;  %v13189_v49 = vpop.f32.mrb[33].mxu0 }
 0x1fc   : > { %v13211_v50 = vpop.f32.mrb[33].mxu1  ;;  %v13190_v51 = vadd.f32 %v13189_v49, %v13188_v46  ;;  %v13191_v54 = vpop.f32.mrb[34].mxu0  ;;  %13491 = vmatpush3.bf16.msra.mxu0 %v14877_v58  ;;  %v14914_v46 = vld [vmem:[%s18805_s1 + $0x10a8] sm:$0xff]   ;;  %v14915_v49 = vld [vmem:[%s18805_s1 + $0x1070] sm:$0xff]  }
 0x1fd   : > { %v13212_v52 = vadd.f32 %v13211_v50, %v13210_v48  ;;  %v13213_v56 = vpop.f32.mrb[34].mxu1  ;;  %v13192_v59 = vpop.f32.mrb[35].mxu0  ;;  %13513 = vmatpush3.bf16.msra.mxu1 %v14878_v60  ;;  %13492 = vmatprep.subr.bf16.mxu0 %v14879_v63  ;;  %v14916_v50 = vld [vmem:[%s18805_s1 + $0x10f0] sm:$0xff]   ;;  %v14920_v54 = vld [vmem:[%s18805_s1 + $0x10f8] sm:$0xff]   ;;  %v257_v58 = vld [vmem:[%s15620_s12 + $0x108] sm:$0xff] }
 0x1fe   : > { %v9610_v57 = vadd.f32 %v13190_v51, %v17003_v13  ;;  %v13214_v61 = vpop.f32.mrb[35].mxu1  ;;  %13514 = vmatprep.subr.bf16.mxu1 %v14880_v0  ;;  %v14891_v13 = vld [vmem:[%s18805_s1 + $0x1040] sm:$0xff]   ;;  %v14917_v51 = vld [vmem:[%s18805_s1 + $0x1030] sm:$0xff]   ;;  %v14922_v56 = vld [vmem:[%s18805_s1 + $0x10b8] sm:$0xff]  }
 0x1ff   : > { %v11730_v61 = vcombine.low %v257_v58, %v257_v58  ;;  %v14927_v63 = vld [vmem:[%s18805_s1 + $0x1140] sm:$0xff]  }
 0x200   : > { %v17101_v62 = vadd.f32 %v13212_v52, %v9610_v57  ;;  %13493 = vmatpush3.bf16.msra.mxu0 %v14881_v1  ;;  %v14918_v52 = vld [vmem:[%s18805_s1 + $0x10b0] sm:$0xff]   ;;  %v256_v57 = vld [vmem:[%s15620_s12 + $0x100] sm:$0xff] }
 0x201   : > { %13515 = vmatpush3.bf16.msra.mxu1 %v14882_v2  ;;  %13494 = vmatprep.subr.bf16.mxu0 %v14883_v3  ;;  %v11728_v59 = vcombine.low %v256_v57, %v256_v57  ;;  %v11729_v60 = vcombine.high %v256_v57, %v256_v57  ;;  %v14928_v0 = vld [vmem:[%s18805_s1 + $0x11c0] sm:$0xff]   ;;  %v14931_v3 = vld [vmem:[%s18805_s1 + $0x1148] sm:$0xff]   ;;  %v14971_v57 = vld [vmem:[%s18805_s1 + $0x1250] sm:$0xff]  }
 0x202   : > { %13516 = vmatprep.subr.bf16.mxu1 %v14884_v4  ;;  %v14929_v1 = vld [vmem:[%s18805_s1 + $0x1100] sm:$0xff]   ;;  %v14932_v4 = vld [vmem:[%s18805_s1 + $0x11c8] sm:$0xff]  }
 0x203   : > { %v14930_v2 = vld [vmem:[%s18805_s1 + $0x1180] sm:$0xff]  }
 0x204   : > { %13495 = vmatpush3.bf16.msra.mxu0 %v14885_v5  ;;  %v14933_v5 = vld [vmem:[%s18805_s1 + $0x1108] sm:$0xff]  }
 0x205   : > { %13517 = vmatpush3.bf16.msra.mxu1 %v14886_v6  ;;  %13524 = vmatprep.subr.bf16.mxu0 %v14891_v13  ;;  %v14934_v6 = vld [vmem:[%s18805_s1 + $0x1188] sm:$0xff]   ;;  %v14941_v13 = vld [vmem:[%s18805_s1 + $0x1118] sm:$0xff]  }
 0x206   : > { %13546 = vmatprep.subr.bf16.mxu1 %v14892_v14  ;;  %v14942_v14 = vld [vmem:[%s18805_s1 + $0x1198] sm:$0xff]  }
 0x207   : > { %10168 = vmatmul.mubr.bf16.vlgmr.msra.gmra.mrb[60].mxu0 %v11724_v9  ;;  %v14937_v9 = vld [vmem:[%s18805_s1 + $0x1110] sm:$0xff]  }
 0x208   : > { %10208 = vmatmul.mubr.bf16.vlgmr.msra.gmra.mrb[60].mxu1 %v11726_v11  ;;  %13525 = vmatpush3.bf16.msra.mxu0 %v14893_v15  ;;  %v14939_v11 = vld [vmem:[%s18805_s1 + $0x1158] sm:$0xff]   ;;  %v14943_v15 = vld [vmem:[%s18805_s1 + $0x1160] sm:$0xff]  }
 0x209   : > { %13547 = vmatpush3.bf16.msra.mxu1 %v14894_v16  ;;  %13526 = vmatprep.subr.bf16.mxu0 %v14895_v17  ;;  %v14944_v16 = vld [vmem:[%s18805_s1 + $0x11e0] sm:$0xff]  }
 0x20a   : > { %13548 = vmatprep.subr.bf16.mxu1 %v14896_v18  ;;  %10247 = vmatprep.mubr.bf16.mxu0 %v11729_v60  ;;  %v14945_v17 = vld [vmem:[%s18805_s1 + $0x1120] sm:$0xff]   ;;  %v14974_v60 = vld [vmem:[%s18805_s1 + $0x1290] sm:$0xff]  }
 0x20c   : > { %13527 = vmatpush3.bf16.msra.mxu0 %v14897_v19  ;;  %v14946_v19 = vld [vmem:[%s18805_s1 + $0x11a0] sm:$0xff]  }
 0x20d   : > { %13549 = vmatpush3.bf16.msra.mxu1 %v14898_v20  ;;  %13528 = vmatprep.subr.bf16.mxu0 %v14899_v21 }
 0x20e   : > { %13550 = vmatprep.subr.bf16.mxu1 %v14900_v22 }
 0x210   : > { %13529 = vmatpush3.bf16.msra.mxu0 %v14901_v23 }
 0x211   : > { %13551 = vmatpush3.bf16.msra.mxu1 %v14902_v24  ;;  %13530 = vmatprep.subr.bf16.mxu0 %v14903_v25  ;;  %v14947_v25 = vld [vmem:[%s18805_s1 + $0x1168] sm:$0xff]  }
 0x212   : > { %13552 = vmatprep.subr.bf16.mxu1 %v14904_v26 }
 0x214   : > { %13531 = vmatpush3.bf16.msra.mxu0 %v14905_v27  ;;  %v14948_v27 = vld [vmem:[%s18805_s1 + $0x11e8] sm:$0xff]  }
 0x215   : > { %13553 = vmatpush3.bf16.msra.mxu1 %v14906_v28  ;;  %13532 = vmatprep.subr.bf16.mxu0 %v14907_v29 }
 0x216   : > { %13554 = vmatprep.subr.bf16.mxu1 %v14908_v30  ;;  %v14949_v30 = vld [vmem:[%s18805_s1 + $0x1128] sm:$0xff]  }
 0x218   : > { %13533 = vmatpush3.bf16.msra.mxu0 %v14909_v31 }
 0x219   : > { %13555 = vmatpush3.bf16.msra.mxu1 %v14910_v33  ;;  %13534 = vmatprep.subr.bf16.mxu0 %v14911_v39  ;;  %v14955_v39 = vld [vmem:[%s18805_s1 + $0x1178] sm:$0xff]  }
 0x21a   : > { %v13232_v32 = vpop.f32.mrb[36].mxu0  ;;  %13556 = vmatprep.subr.bf16.mxu1 %v14912_v41  ;;  %v14957_v41 = vld [vmem:[%s18805_s1 + $0x1138] sm:$0xff]  }
 0x21b   : > { %v13254_v34 = vpop.f32.mrb[36].mxu1  ;;  %v13233_v35 = vpop.f32.mrb[37].mxu0 }
 0x21c   : > { %v13255_v36 = vpop.f32.mrb[37].mxu1  ;;  %v13234_v37 = vadd.f32 %v13233_v35, %v13232_v32  ;;  %v13235_v40 = vpop.f32.mrb[38].mxu0  ;;  %13535 = vmatpush3.bf16.msra.mxu0 %v14913_v44  ;;  %v14950_v32 = vld [vmem:[%s18805_s1 + $0x11a8] sm:$0xff]   ;;  %v14951_v35 = vld [vmem:[%s18805_s1 + $0x1170] sm:$0xff]   ;;  %v259_v44 = vld [vmem:[%s15620_s12 + $0x118] sm:$0xff] }
 0x21d   : > { %v13256_v38 = vadd.f32 %v13255_v36, %v13254_v34  ;;  %v13257_v42 = vpop.f32.mrb[38].mxu1  ;;  %v13236_v45 = vpop.f32.mrb[39].mxu0  ;;  %13557 = vmatpush3.bf16.msra.mxu1 %v14914_v46  ;;  %13536 = vmatprep.subr.bf16.mxu0 %v14915_v49  ;;  %v14952_v36 = vld [vmem:[%s18805_s1 + $0x11f0] sm:$0xff]   ;;  %v14956_v40 = vld [vmem:[%s18805_s1 + $0x11f8] sm:$0xff]   ;;  %v14963_v49 = vld [vmem:[%s18805_s1 + $0x1240] sm:$0xff]  }
 0x21e   : > { %v9690_v43 = vadd.f32 %v13234_v37, %v17101_v62  ;;  %v13258_v47 = vpop.f32.mrb[39].mxu1  ;;  %13558 = vmatprep.subr.bf16.mxu1 %v14916_v50  ;;  %v11731_v62 = vcombine.high %v257_v58, %v257_v58  ;;  %v14953_v37 = vld [vmem:[%s18805_s1 + $0x1130] sm:$0xff]   ;;  %v14958_v42 = vld [vmem:[%s18805_s1 + $0x11b8] sm:$0xff]   ;;  %v14964_v50 = vld [vmem:[%s18805_s1 + $0x12c0] sm:$0xff]  }
 0x21f   : > { %v11734_v47 = vcombine.low %v259_v44, %v259_v44  ;;  %v14972_v58 = vld [vmem:[%s18805_s1 + $0x12d0] sm:$0xff]  }
 0x220   : > { %v17202_v48 = vadd.f32 %v13256_v38, %v9690_v43  ;;  %13537 = vmatpush3.bf16.msra.mxu0 %v14917_v51  ;;  %10287 = vmatprep.mubr.bf16.mxu1 %v11731_v62  ;;  %v14954_v38 = vld [vmem:[%s18805_s1 + $0x11b0] sm:$0xff]   ;;  %v14965_v51 = vld [vmem:[%s18805_s1 + $0x1200] sm:$0xff]   ;;  %v14976_v62 = vld [vmem:[%s18805_s1 + $0x12d8] sm:$0xff]  }
 0x221   : > { %13559 = vmatpush3.bf16.msra.mxu1 %v14918_v52  ;;  %13538 = vmatprep.subr.bf16.mxu0 %v14919_v53  ;;  %v258_v43 = vld [vmem:[%s15620_s12 + $0x110] sm:$0xff]  ;;  %v14966_v52 = vld [vmem:[%s18805_s1 + $0x1280] sm:$0xff]   ;;  %v14967_v53 = vld [vmem:[%s18805_s1 + $0x1248] sm:$0xff]  }
 0x222   : > { %13560 = vmatprep.subr.bf16.mxu1 %v14920_v54  ;;  %v11732_v45 = vcombine.low %v258_v43, %v258_v43  ;;  %v11733_v46 = vcombine.high %v258_v43, %v258_v43  ;;  %v14968_v54 = vld [vmem:[%s18805_s1 + $0x12c8] sm:$0xff]   ;;  %v15007_v43 = vld [vmem:[%s18805_s1 + $0x1350] sm:$0xff]  }
 0x224   : > { %13539 = vmatpush3.bf16.msra.mxu0 %v14921_v55  ;;  %v14969_v55 = vld [vmem:[%s18805_s1 + $0x1208] sm:$0xff]  }
 0x225   : > { %13561 = vmatpush3.bf16.msra.mxu1 %v14922_v56  ;;  %13568 = vmatprep.subr.bf16.mxu0 %v14927_v63  ;;  %v14970_v56 = vld [vmem:[%s18805_s1 + $0x1288] sm:$0xff]   ;;  %v14977_v63 = vld [vmem:[%s18805_s1 + $0x1218] sm:$0xff]  }
 0x226   : > { %13590 = vmatprep.subr.bf16.mxu1 %v14928_v0  ;;  %v14978_v0 = vld [vmem:[%s18805_s1 + $0x1298] sm:$0xff]  }
 0x227   : > { %10248 = vmatmul.mubr.bf16.vlgmr.msra.gmra.mrb[64].mxu0 %v11728_v59  ;;  %v14973_v59 = vld [vmem:[%s18805_s1 + $0x1210] sm:$0xff]  }
 0x228   : > { %10288 = vmatmul.mubr.bf16.vlgmr.msra.gmra.mrb[64].mxu1 %v11730_v61  ;;  %13569 = vmatpush3.bf16.msra.mxu0 %v14929_v1  ;;  %v14975_v61 = vld [vmem:[%s18805_s1 + $0x1258] sm:$0xff]   ;;  %v14979_v1 = vld [vmem:[%s18805_s1 + $0x1260] sm:$0xff]  }
 0x229   : > { %13591 = vmatpush3.bf16.msra.mxu1 %v14930_v2  ;;  %13570 = vmatprep.subr.bf16.mxu0 %v14931_v3  ;;  %v14980_v2 = vld [vmem:[%s18805_s1 + $0x12e0] sm:$0xff]  }
 0x22a   : > { %13592 = vmatprep.subr.bf16.mxu1 %v14932_v4  ;;  %10327 = vmatprep.mubr.bf16.mxu0 %v11733_v46  ;;  %v14981_v4 = vld [vmem:[%s18805_s1 + $0x1220] sm:$0xff]   ;;  %v15010_v46 = vld [vmem:[%s18805_s1 + $0x1390] sm:$0xff]  }
 0x22c   : > { %13571 = vmatpush3.bf16.msra.mxu0 %v14933_v5 }
 0x22d   : > { %13593 = vmatpush3.bf16.msra.mxu1 %v14934_v6  ;;  %13572 = vmatprep.subr.bf16.mxu0 %v14935_v7  ;;  %v14982_v6 = vld [vmem:[%s18805_s1 + $0x12a0] sm:$0xff]  }
 0x22e   : > { %13594 = vmatprep.subr.bf16.mxu1 %v14936_v8 }
 0x230   : > { %13573 = vmatpush3.bf16.msra.mxu0 %v14937_v9 }
 0x231   : > { %13595 = vmatpush3.bf16.msra.mxu1 %v14938_v10  ;;  %13574 = vmatprep.subr.bf16.mxu0 %v14939_v11  ;;  %v14983_v10 = vld [vmem:[%s18805_s1 + $0x1268] sm:$0xff]  }
 0x232   : > { %13596 = vmatprep.subr.bf16.mxu1 %v14940_v12  ;;  %v14984_v12 = vld [vmem:[%s18805_s1 + $0x12e8] sm:$0xff]  }
 0x234   : > { %13575 = vmatpush3.bf16.msra.mxu0 %v14941_v13 }
 0x235   : > { %13597 = vmatpush3.bf16.msra.mxu1 %v14942_v14  ;;  %13576 = vmatprep.subr.bf16.mxu0 %v14943_v15 }
 0x236   : > { %13598 = vmatprep.subr.bf16.mxu1 %v14944_v16  ;;  %v14985_v16 = vld [vmem:[%s18805_s1 + $0x1228] sm:$0xff]  }
 0x238   : > { %13577 = vmatpush3.bf16.msra.mxu0 %v14945_v17  ;;  %v14986_v17 = vld [vmem:[%s18805_s1 + $0x12a8] sm:$0xff]  }
 0x239   : > { %13599 = vmatpush3.bf16.msra.mxu1 %v14946_v19  ;;  %13578 = vmatprep.subr.bf16.mxu0 %v14947_v25  ;;  %v14991_v25 = vld [vmem:[%s18805_s1 + $0x1278] sm:$0xff]  }
 0x23a   : > { %v13276_v18 = vpop.f32.mrb[40].mxu0  ;;  %13600 = vmatprep.subr.bf16.mxu1 %v14948_v27  ;;  %v14993_v27 = vld [vmem:[%s18805_s1 + $0x1238] sm:$0xff]  }
 0x23b   : > { %v13298_v20 = vpop.f32.mrb[40].mxu1  ;;  %v13277_v21 = vpop.f32.mrb[41].mxu0 }
 0x23c   : > { %v13299_v22 = vpop.f32.mrb[41].mxu1  ;;  %v13278_v23 = vadd.f32 %v13277_v21, %v13276_v18  ;;  %v13279_v26 = vpop.f32.mrb[42].mxu0  ;;  %13579 = vmatpush3.bf16.msra.mxu0 %v14949_v30  ;;  %v14987_v21 = vld [vmem:[%s18805_s1 + $0x1270] sm:$0xff]   ;;  %v261_v30 = vld [vmem:[%s15620_s12 + $0x128] sm:$0xff] }
 0x23d   : > { %v13300_v24 = vadd.f32 %v13299_v22, %v13298_v20  ;;  %v13301_v28 = vpop.f32.mrb[42].mxu1  ;;  %v13280_v31 = vpop.f32.mrb[43].mxu0  ;;  %13601 = vmatpush3.bf16.msra.mxu1 %v14950_v32  ;;  %13580 = vmatprep.subr.bf16.mxu0 %v14951_v35  ;;  %v14988_v22 = vld [vmem:[%s18805_s1 + $0x12f0] sm:$0xff]   ;;  %v14992_v26 = vld [vmem:[%s18805_s1 + $0x12f8] sm:$0xff]   ;;  %v11739_v35 = vcombine.high %v261_v30, %v261_v30 }
 0x23e   : > { %v9770_v29 = vadd.f32 %v13278_v23, %v17202_v48  ;;  %v13302_v33 = vpop.f32.mrb[43].mxu1  ;;  %13602 = vmatprep.subr.bf16.mxu1 %v14952_v36  ;;  %v11735_v48 = vcombine.high %v259_v44, %v259_v44  ;;  %v14989_v23 = vld [vmem:[%s18805_s1 + $0x1230] sm:$0xff]   ;;  %v14994_v28 = vld [vmem:[%s18805_s1 + $0x12b8] sm:$0xff]   ;;  %v15000_v36 = vld [vmem:[%s18805_s1 + $0x13c0] sm:$0xff]  }
 0x23f   : > { %v11738_v33 = vcombine.low %v261_v30, %v261_v30  ;;  %v15008_v44 = vld [vmem:[%s18805_s1 + $0x13d0] sm:$0xff]  }
 0x240   : > { %v17303_v34 = vadd.f32 %v13300_v24, %v9770_v29  ;;  %13581 = vmatpush3.bf16.msra.mxu0 %v14953_v37  ;;  %10367 = vmatprep.mubr.bf16.mxu1 %v11735_v48  ;;  %v14990_v24 = vld [vmem:[%s18805_s1 + $0x12b0] sm:$0xff]   ;;  %v260_v29 = vld [vmem:[%s15620_s12 + $0x120] sm:$0xff]  ;;  %v15012_v48 = vld [vmem:[%s18805_s1 + $0x13d8] sm:$0xff]  }
 0x241   : > { %13603 = vmatpush3.bf16.msra.mxu1 %v14954_v38  ;;  %13582 = vmatprep.subr.bf16.mxu0 %v14955_v39  ;;  %v11736_v31 = vcombine.low %v260_v29, %v260_v29  ;;  %v11737_v32 = vcombine.high %v260_v29, %v260_v29  ;;  %v15001_v37 = vld [vmem:[%s18805_s1 + $0x1300] sm:$0xff]   ;;  %v15003_v39 = vld [vmem:[%s18805_s1 + $0x1348] sm:$0xff]   ;;  %v15043_v29 = vld [vmem:[%s18805_s1 + $0x1450] sm:$0xff]  }
 0x242   : > { %13604 = vmatprep.subr.bf16.mxu1 %v14956_v40  ;;  %v15002_v38 = vld [vmem:[%s18805_s1 + $0x1380] sm:$0xff]   ;;  %v15004_v40 = vld [vmem:[%s18805_s1 + $0x13c8] sm:$0xff]   ;;  %v15044_v30 = vld [vmem:[%s18805_s1 + $0x14d0] sm:$0xff]  }
 0x244   : > { %13583 = vmatpush3.bf16.msra.mxu0 %v14957_v41  ;;  %v15005_v41 = vld [vmem:[%s18805_s1 + $0x1308] sm:$0xff]  }
 0x245   : > { %13605 = vmatpush3.bf16.msra.mxu1 %v14958_v42  ;;  %13612 = vmatprep.subr.bf16.mxu0 %v14963_v49  ;;  %v15006_v42 = vld [vmem:[%s18805_s1 + $0x1388] sm:$0xff]   ;;  %v15013_v49 = vld [vmem:[%s18805_s1 + $0x1318] sm:$0xff]  }
 0x246   : > { %13634 = vmatprep.subr.bf16.mxu1 %v14964_v50  ;;  %v15014_v50 = vld [vmem:[%s18805_s1 + $0x1398] sm:$0xff]  }
 0x247   : > { %10328 = vmatmul.mubr.bf16.vlgmr.msra.gmra.mrb[68].mxu0 %v11732_v45  ;;  %v15009_v45 = vld [vmem:[%s18805_s1 + $0x1310] sm:$0xff]  }
 0x248   : > { %10368 = vmatmul.mubr.bf16.vlgmr.msra.gmra.mrb[68].mxu1 %v11734_v47  ;;  %13613 = vmatpush3.bf16.msra.mxu0 %v14965_v51  ;;  %v15011_v47 = vld [vmem:[%s18805_s1 + $0x1358] sm:$0xff]   ;;  %v15015_v51 = vld [vmem:[%s18805_s1 + $0x1360] sm:$0xff]  }
 0x249   : > { %13635 = vmatpush3.bf16.msra.mxu1 %v14966_v52  ;;  %13614 = vmatprep.subr.bf16.mxu0 %v14967_v53  ;;  %v15016_v52 = vld [vmem:[%s18805_s1 + $0x13e0] sm:$0xff]  }
 0x24a   : > { %13636 = vmatprep.subr.bf16.mxu1 %v14968_v54  ;;  %10407 = vmatprep.mubr.bf16.mxu0 %v11737_v32  ;;  %v15017_v54 = vld [vmem:[%s18805_s1 + $0x1320] sm:$0xff]   ;;  %v15046_v32 = vld [vmem:[%s18805_s1 + $0x1490] sm:$0xff]  }
 0x24b   : > { %10447 = vmatprep.mubr.bf16.mxu1 %v11739_v35  ;;  %v15049_v35 = vld [vmem:[%s18805_s1 + $0x1418] sm:$0xff]  }
 0x24c   : > { %13615 = vmatpush3.bf16.msra.mxu0 %v14969_v55 }
 0x24d   : > { %13637 = vmatpush3.bf16.msra.mxu1 %v14970_v56  ;;  %13616 = vmatprep.subr.bf16.mxu0 %v14971_v57  ;;  %v15018_v56 = vld [vmem:[%s18805_s1 + $0x13a0] sm:$0xff]  }
 0x24e   : > { %13638 = vmatprep.subr.bf16.mxu1 %v14972_v58 }
 0x250   : > { %13617 = vmatpush3.bf16.msra.mxu0 %v14973_v59  ;;  %v15019_v59 = vld [vmem:[%s18805_s1 + $0x1368] sm:$0xff]  }
 0x251   : > { %13639 = vmatpush3.bf16.msra.mxu1 %v14974_v60  ;;  %13618 = vmatprep.subr.bf16.mxu0 %v14975_v61 }
 0x252   : > { %13640 = vmatprep.subr.bf16.mxu1 %v14976_v62  ;;  %v15020_v62 = vld [vmem:[%s18805_s1 + $0x13e8] sm:$0xff]  }
 0x254   : > { %13619 = vmatpush3.bf16.msra.mxu0 %v14977_v63 }
 0x255   : > { %13641 = vmatpush3.bf16.msra.mxu1 %v14978_v0  ;;  %13620 = vmatprep.subr.bf16.mxu0 %v14979_v1  ;;  %v15021_v1 = vld [vmem:[%s18805_s1 + $0x1328] sm:$0xff]  }
 0x256   : > { %13642 = vmatprep.subr.bf16.mxu1 %v14980_v2 }
 0x258   : > { %13621 = vmatpush3.bf16.msra.mxu0 %v14981_v4 }
 0x259   : > { %13643 = vmatpush3.bf16.msra.mxu1 %v14982_v6  ;;  %13622 = vmatprep.subr.bf16.mxu0 %v14983_v10  ;;  %v15023_v6 = vld [vmem:[%s18805_s1 + $0x1370] sm:$0xff]  }
 0x25a   : > { %v13320_v3 = vpop.f32.mrb[44].mxu0  ;;  %13644 = vmatprep.subr.bf16.mxu1 %v14984_v12  ;;  %v15026_v10 = vld [vmem:[%s18805_s1 + $0x13b0] sm:$0xff]   ;;  %v15028_v12 = vld [vmem:[%s18805_s1 + $0x13f8] sm:$0xff]  }
 0x25b   : > { %v13342_v5 = vpop.f32.mrb[44].mxu1  ;;  %v13321_v7 = vpop.f32.mrb[45].mxu0 }
 0x25c   : > { %v13322_v8 = vadd.f32 %v13321_v7, %v13320_v3  ;;  %v13343_v9 = vpop.f32.mrb[45].mxu1  ;;  %v13323_v13 = vpop.f32.mrb[46].mxu0  ;;  %13623 = vmatpush3.bf16.msra.mxu0 %v14985_v16  ;;  %v15022_v3 = vld [vmem:[%s18805_s1 + $0x13a8] sm:$0xff]  }
 0x25d   : > { %v13344_v11 = vadd.f32 %v13343_v9, %v13342_v5  ;;  %v13345_v15 = vpop.f32.mrb[46].mxu1  ;;  %v13324_v18 = vpop.f32.mrb[47].mxu0  ;;  %13645 = vmatpush3.bf16.msra.mxu1 %v14986_v17  ;;  %13624 = vmatprep.subr.bf16.mxu0 %v14987_v21  ;;  %v15025_v9 = vld [vmem:[%s18805_s1 + $0x1330] sm:$0xff]   ;;  %v15029_v13 = vld [vmem:[%s18805_s1 + $0x1338] sm:$0xff]   ;;  %v15035_v21 = vld [vmem:[%s18805_s1 + $0x1440] sm:$0xff]  }
 0x25e   : > { %v9850_v14 = vadd.f32 %v13322_v8, %v17303_v34  ;;  %v13346_v20 = vpop.f32.mrb[47].mxu1  ;;  %13646 = vmatprep.subr.bf16.mxu1 %v14988_v22  ;;  %v14999_v34 = vld [vmem:[%s18805_s1 + $0x1340] sm:$0xff]   ;;  %v15024_v8 = vld [vmem:[%s18805_s1 + $0x13f0] sm:$0xff]   ;;  %v263_v18 = vld [vmem:[%s15620_s12 + $0x138] sm:$0xff] }
 0x25f   : > { %v262_v15 = vld [vmem:[%s15620_s12 + $0x130] sm:$0xff]  ;;  %v11743_v20 = vcombine.high %v263_v18, %v263_v18  ;;  %v15036_v22 = vld [vmem:[%s18805_s1 + $0x14c0] sm:$0xff]  }
 0x260   : > { %v17404_v19 = vadd.f32 %v13344_v11, %v9850_v14  ;;  %13625 = vmatpush3.bf16.msra.mxu0 %v14989_v23  ;;  %v15027_v11 = vld [vmem:[%s18805_s1 + $0x1378] sm:$0xff]   ;;  %v11740_v16 = vcombine.low %v262_v15, %v262_v15  ;;  %v11741_v17 = vcombine.high %v262_v15, %v262_v15  ;;  %v15037_v23 = vld [vmem:[%s18805_s1 + $0x1400] sm:$0xff]   ;;  %v15079_v15 = vld [vmem:[%s18805_s1 + $0x1550] sm:$0xff]  }
 0x261   : > { %13647 = vmatpush3.bf16.msra.mxu1 %v14990_v24  ;;  %13626 = vmatprep.subr.bf16.mxu0 %v14991_v25  ;;  %v15030_v14 = vld [vmem:[%s18805_s1 + $0x13b8] sm:$0xff]   ;;  %v15038_v24 = vld [vmem:[%s18805_s1 + $0x1480] sm:$0xff]   ;;  %v15039_v25 = vld [vmem:[%s18805_s1 + $0x1448] sm:$0xff]  }
 0x262   : > { %13648 = vmatprep.subr.bf16.mxu1 %v14992_v26  ;;  %v15040_v26 = vld [vmem:[%s18805_s1 + $0x14c8] sm:$0xff]  }
 0x264   : > { %13627 = vmatpush3.bf16.msra.mxu0 %v14993_v27  ;;  %v15041_v27 = vld [vmem:[%s18805_s1 + $0x1408] sm:$0xff]  }
 0x265   : > { %13649 = vmatpush3.bf16.msra.mxu1 %v14994_v28  ;;  %13656 = vmatprep.subr.bf16.mxu0 %v14999_v34  ;;  %v15042_v28 = vld [vmem:[%s18805_s1 + $0x1488] sm:$0xff]   ;;  %v15048_v34 = vld [vmem:[%s18805_s1 + $0x14d8] sm:$0xff]  }
 0x266   : > { %13678 = vmatprep.subr.bf16.mxu1 %v15000_v36  ;;  %v15050_v36 = vld [vmem:[%s18805_s1 + $0x1498] sm:$0xff]  }
 0x267   : > { %10408 = vmatmul.mubr.bf16.vlgmr.msra.gmra.mrb[72].mxu0 %v11736_v31  ;;  %v15045_v31 = vld [vmem:[%s18805_s1 + $0x1410] sm:$0xff]  }
 0x268   : > { %10448 = vmatmul.mubr.bf16.vlgmr.msra.gmra.mrb[72].mxu1 %v11738_v33  ;;  %13657 = vmatpush3.bf16.msra.mxu0 %v15001_v37  ;;  %v15047_v33 = vld [vmem:[%s18805_s1 + $0x1458] sm:$0xff]   ;;  %v15051_v37 = vld [vmem:[%s18805_s1 + $0x1460] sm:$0xff]  }
 0x269   : > { %13679 = vmatpush3.bf16.msra.mxu1 %v15002_v38  ;;  %13658 = vmatprep.subr.bf16.mxu0 %v15003_v39  ;;  %v15052_v38 = vld [vmem:[%s18805_s1 + $0x14e0] sm:$0xff]  }
 0x26a   : > { %13680 = vmatprep.subr.bf16.mxu1 %v15004_v40  ;;  %10487 = vmatprep.mubr.bf16.mxu0 %v11741_v17  ;;  %v15053_v40 = vld [vmem:[%s18805_s1 + $0x1420] sm:$0xff]   ;;  %v15081_v17 = vld [vmem:[%s18805_s1 + $0x1510] sm:$0xff]  }
 0x26b   : > { %10527 = vmatprep.mubr.bf16.mxu1 %v11743_v20  ;;  %v15084_v20 = vld [vmem:[%s18805_s1 + $0x15d8] sm:$0xff]  }
 0x26c   : > { %13659 = vmatpush3.bf16.msra.mxu0 %v15005_v41 }
 0x26d   : > { %13681 = vmatpush3.bf16.msra.mxu1 %v15006_v42  ;;  %13660 = vmatprep.subr.bf16.mxu0 %v15007_v43  ;;  %v15054_v42 = vld [vmem:[%s18805_s1 + $0x14a0] sm:$0xff]  }
 0x26e   : > { %13682 = vmatprep.subr.bf16.mxu1 %v15008_v44 }
 0x270   : > { %13661 = vmatpush3.bf16.msra.mxu0 %v15009_v45  ;;  %v15055_v45 = vld [vmem:[%s18805_s1 + $0x1468] sm:$0xff]  }
 0x271   : > { %13683 = vmatpush3.bf16.msra.mxu1 %v15010_v46  ;;  %13662 = vmatprep.subr.bf16.mxu0 %v15011_v47 }
 0x272   : > { %13684 = vmatprep.subr.bf16.mxu1 %v15012_v48  ;;  %v15056_v48 = vld [vmem:[%s18805_s1 + $0x14e8] sm:$0xff]  }
 0x274   : > { %13663 = vmatpush3.bf16.msra.mxu0 %v15013_v49 }
 0x275   : > { %13685 = vmatpush3.bf16.msra.mxu1 %v15014_v50  ;;  %13664 = vmatprep.subr.bf16.mxu0 %v15015_v51  ;;  %v15057_v51 = vld [vmem:[%s18805_s1 + $0x1428] sm:$0xff]  }
 0x276   : > { %13686 = vmatprep.subr.bf16.mxu1 %v15016_v52 }
 0x278   : > { %13665 = vmatpush3.bf16.msra.mxu0 %v15017_v54 }
 0x279   : > { %13687 = vmatpush3.bf16.msra.mxu1 %v15018_v56  ;;  %13666 = vmatprep.subr.bf16.mxu0 %v15019_v59  ;;  %v15059_v56 = vld [vmem:[%s18805_s1 + $0x1470] sm:$0xff]  }
 0x27a   : > { %v13364_v53 = vpop.f32.mrb[48].mxu0  ;;  %13688 = vmatprep.subr.bf16.mxu1 %v15020_v62  ;;  %v15061_v59 = vld [vmem:[%s18805_s1 + $0x1430] sm:$0xff]   ;;  %v15064_v62 = vld [vmem:[%s18805_s1 + $0x14f8] sm:$0xff]  }
 0x27b   : > { %v13386_v55 = vpop.f32.mrb[48].mxu1  ;;  %v13365_v57 = vpop.f32.mrb[49].mxu0 }
 0x27c   : > { %v13387_v58 = vpop.f32.mrb[49].mxu1  ;;  %v13366_v60 = vadd.f32 %v13365_v57, %v13364_v53  ;;  %v13367_v63 = vpop.f32.mrb[50].mxu0  ;;  %13667 = vmatpush3.bf16.msra.mxu0 %v15021_v1  ;;  %v15058_v53 = vld [vmem:[%s18805_s1 + $0x14a8] sm:$0xff]   ;;  %v264_v1 = vld [vmem:[%s15620_s12 + $0x140] sm:$0xff] }
 0x27d   : > { %v13388_v61 = vadd.f32 %v13387_v58, %v13386_v55  ;;  %v13389_v0 = vpop.f32.mrb[50].mxu1  ;;  %v13368_v4 = vpop.f32.mrb[51].mxu0  ;;  %13689 = vmatpush3.bf16.msra.mxu1 %v15022_v3  ;;  %13668 = vmatprep.subr.bf16.mxu0 %v15023_v6  ;;  %v15060_v58 = vld [vmem:[%s18805_s1 + $0x14f0] sm:$0xff]   ;;  %v15065_v63 = vld [vmem:[%s18805_s1 + $0x1438] sm:$0xff]   ;;  %v11744_v3 = vcombine.low %v264_v1, %v264_v1 }
 0x27e   : > { %v9930_v2 = vadd.f32 %v13366_v60, %v17404_v19  ;;  %v13390_v5 = vpop.f32.mrb[51].mxu1  ;;  %13690 = vmatprep.subr.bf16.mxu1 %v15024_v8  ;;  %v11742_v19 = vcombine.low %v263_v18, %v263_v18  ;;  %v15062_v60 = vld [vmem:[%s18805_s1 + $0x14b0] sm:$0xff]   ;;  %v15066_v0 = vld [vmem:[%s18805_s1 + $0x14b8] sm:$0xff]   ;;  %v11745_v4 = vcombine.high %v264_v1, %v264_v1  ;;  %v15072_v8 = vld [vmem:[%s18805_s1 + $0x15c0] sm:$0xff]  }
 0x27f   : > { %v15082_v18 = vld [vmem:[%s18805_s1 + $0x1590] sm:$0xff]  }
 0x280   : > { %v17508_v7 = vadd.f32 %v13388_v61, %v9930_v2  ;;  %13669 = vmatpush3.bf16.msra.mxu0 %v15025_v9  ;;  %v15063_v61 = vld [vmem:[%s18805_s1 + $0x1478] sm:$0xff]   ;;  %v265_v2 = vld [vmem:[%s15620_s12 + $0x148] sm:$0xff]  ;;  %v15073_v9 = vld [vmem:[%s18805_s1 + $0x1500] sm:$0xff]  }
 0x281   : > { %13691 = vmatpush3.bf16.msra.mxu1 %v15026_v10  ;;  %13670 = vmatprep.subr.bf16.mxu0 %v15027_v11  ;;  %v11746_v5 = vcombine.low %v265_v2, %v265_v2  ;;  %v11747_v6 = vcombine.high %v265_v2, %v265_v2  ;;  %v15074_v10 = vld [vmem:[%s18805_s1 + $0x1580] sm:$0xff]   ;;  %v15075_v11 = vld [vmem:[%s18805_s1 + $0x1548] sm:$0xff]   ;;  %v15115_v1 = vld [vmem:[%s18805_s1 + $0x1650] sm:$0xff]  }
 0x282   : > { %13692 = vmatprep.subr.bf16.mxu1 %v15028_v12  ;;  %v15076_v12 = vld [vmem:[%s18805_s1 + $0x15c8] sm:$0xff]   ;;  %v15116_v2 = vld [vmem:[%s18805_s1 + $0x16d0] sm:$0xff]  }
 0x284   : > { %13671 = vmatpush3.bf16.msra.mxu0 %v15029_v13  ;;  %v15077_v13 = vld [vmem:[%s18805_s1 + $0x1508] sm:$0xff]  }
 0x285   : > { %13693 = vmatpush3.bf16.msra.mxu1 %v15030_v14  ;;  %13700 = vmatprep.subr.bf16.mxu0 %v15035_v21  ;;  %v15078_v14 = vld [vmem:[%s18805_s1 + $0x1588] sm:$0xff]   ;;  %v15085_v21 = vld [vmem:[%s18805_s1 + $0x1518] sm:$0xff]  }
 0x286   : > { %13722 = vmatprep.subr.bf16.mxu1 %v15036_v22  ;;  %v15086_v22 = vld [vmem:[%s18805_s1 + $0x1598] sm:$0xff]  }
 0x287   : > { %10488 = vmatmul.mubr.bf16.vlgmr.msra.gmra.mrb[76].mxu0 %v11740_v16  ;;  %v15080_v16 = vld [vmem:[%s18805_s1 + $0x15d0] sm:$0xff]  }
 0x288   : > { %10528 = vmatmul.mubr.bf16.vlgmr.msra.gmra.mrb[76].mxu1 %v11742_v19  ;;  %13701 = vmatpush3.bf16.msra.mxu0 %v15037_v23  ;;  %v15083_v19 = vld [vmem:[%s18805_s1 + $0x1558] sm:$0xff]   ;;  %v15087_v23 = vld [vmem:[%s18805_s1 + $0x1560] sm:$0xff]  }
 0x289   : > { %13723 = vmatpush3.bf16.msra.mxu1 %v15038_v24  ;;  %13702 = vmatprep.subr.bf16.mxu0 %v15039_v25  ;;  %v15088_v24 = vld [vmem:[%s18805_s1 + $0x15e0] sm:$0xff]  }
 0x28a   : > { %13724 = vmatprep.subr.bf16.mxu1 %v15040_v26  ;;  %10567 = vmatprep.mubr.bf16.mxu0 %v11745_v4  ;;  %v15089_v26 = vld [vmem:[%s18805_s1 + $0x1520] sm:$0xff]   ;;  %v15118_v4 = vld [vmem:[%s18805_s1 + $0x1690] sm:$0xff]  }
 0x28b   : > { %10607 = vmatprep.mubr.bf16.mxu1 %v11747_v6  ;;  %v15120_v6 = vld [vmem:[%s18805_s1 + $0x16d8] sm:$0xff]  }
 0x28c   : > { %13703 = vmatpush3.bf16.msra.mxu0 %v15041_v27 }
 0x28d   : > { %13725 = vmatpush3.bf16.msra.mxu1 %v15042_v28  ;;  %13704 = vmatprep.subr.bf16.mxu0 %v15043_v29  ;;  %v15090_v28 = vld [vmem:[%s18805_s1 + $0x15a0] sm:$0xff]  }
 0x28e   : > { %13726 = vmatprep.subr.bf16.mxu1 %v15044_v30 }
 0x290   : > { %13705 = vmatpush3.bf16.msra.mxu0 %v15045_v31 }
 0x291   : > { %13727 = vmatpush3.bf16.msra.mxu1 %v15046_v32  ;;  %13706 = vmatprep.subr.bf16.mxu0 %v15047_v33  ;;  %v15091_v32 = vld [vmem:[%s18805_s1 + $0x1568] sm:$0xff]  }
 0x292   : > { %13728 = vmatprep.subr.bf16.mxu1 %v15048_v34  ;;  %v15092_v34 = vld [vmem:[%s18805_s1 + $0x15e8] sm:$0xff]  }
 0x294   : > { %13707 = vmatpush3.bf16.msra.mxu0 %v15049_v35 }
 0x295   : > { %13729 = vmatpush3.bf16.msra.mxu1 %v15050_v36  ;;  %13708 = vmatprep.subr.bf16.mxu0 %v15051_v37 }
 0x296   : > { %13730 = vmatprep.subr.bf16.mxu1 %v15052_v38  ;;  %v15093_v38 = vld [vmem:[%s18805_s1 + $0x1528] sm:$0xff]  }
 0x298   : > { %13709 = vmatpush3.bf16.msra.mxu0 %v15053_v40 }
 0x299   : > { %13731 = vmatpush3.bf16.msra.mxu1 %v15054_v42  ;;  %13710 = vmatprep.subr.bf16.mxu0 %v15055_v45  ;;  %v15097_v45 = vld [vmem:[%s18805_s1 + $0x1530] sm:$0xff]  }
 0x29a   : > { %v13408_v39 = vpop.f32.mrb[52].mxu0  ;;  %13732 = vmatprep.subr.bf16.mxu1 %v15056_v48  ;;  %v15100_v48 = vld [vmem:[%s18805_s1 + $0x15f8] sm:$0xff]  }
 0x29b   : > { %v13430_v41 = vpop.f32.mrb[52].mxu1  ;;  %v13409_v43 = vpop.f32.mrb[53].mxu0 }
 0x29c   : > { %v13431_v44 = vpop.f32.mrb[53].mxu1  ;;  %v13410_v46 = vadd.f32 %v13409_v43, %v13408_v39  ;;  %v13411_v49 = vpop.f32.mrb[54].mxu0  ;;  %13711 = vmatpush3.bf16.msra.mxu0 %v15057_v51  ;;  %v15094_v39 = vld [vmem:[%s18805_s1 + $0x15a8] sm:$0xff]   ;;  %v15095_v43 = vld [vmem:[%s18805_s1 + $0x1570] sm:$0xff]  }
 0x29d   : > { %v13432_v47 = vadd.f32 %v13431_v44, %v13430_v41  ;;  %v13433_v50 = vpop.f32.mrb[54].mxu1  ;;  %v13412_v54 = vpop.f32.mrb[55].mxu0  ;;  %13733 = vmatpush3.bf16.msra.mxu1 %v15058_v53  ;;  %13712 = vmatprep.subr.bf16.mxu0 %v15059_v56  ;;  %v15096_v44 = vld [vmem:[%s18805_s1 + $0x15f0] sm:$0xff]   ;;  %v15101_v49 = vld [vmem:[%s18805_s1 + $0x1538] sm:$0xff]   ;;  %v15107_v56 = vld [vmem:[%s18805_s1 + $0x1640] sm:$0xff]  }
 0x29e   : > { %v10010_v52 = vadd.f32 %v13410_v46, %v17508_v7  ;;  %v13434_v55 = vpop.f32.mrb[55].mxu1  ;;  %13734 = vmatprep.subr.bf16.mxu1 %v15060_v58  ;;  %v15071_v7 = vld [vmem:[%s18805_s1 + $0x1540] sm:$0xff]   ;;  %v15098_v46 = vld [vmem:[%s18805_s1 + $0x15b0] sm:$0xff]   ;;  %v15102_v50 = vld [vmem:[%s18805_s1 + $0x15b8] sm:$0xff]  }
 0x29f   : > { %v266_v51 = vld [vmem:[%s15620_s12 + $0x150] sm:$0xff]  ;;  %v15108_v58 = vld [vmem:[%s18805_s1 + $0x16c0] sm:$0xff]  }
 0x2a0   : > { %v17609_v57 = vadd.f32 %v13432_v47, %v10010_v52  ;;  %13713 = vmatpush3.bf16.msra.mxu0 %v15061_v59  ;;  %v15099_v47 = vld [vmem:[%s18805_s1 + $0x1578] sm:$0xff]   ;;  %v11748_v53 = vcombine.low %v266_v51, %v266_v51  ;;  %v11749_v54 = vcombine.high %v266_v51, %v266_v51  ;;  %v15109_v59 = vld [vmem:[%s18805_s1 + $0x1600] sm:$0xff]   ;;  %v15151_v51 = vld [vmem:[%s18805_s1 + $0x1750] sm:$0xff]  }
 0x2a1   : > { %13735 = vmatpush3.bf16.msra.mxu1 %v15062_v60  ;;  %13714 = vmatprep.subr.bf16.mxu0 %v15063_v61  ;;  %v267_v52 = vld [vmem:[%s15620_s12 + $0x158] sm:$0xff]  ;;  %v15110_v60 = vld [vmem:[%s18805_s1 + $0x1680] sm:$0xff]   ;;  %v15111_v61 = vld [vmem:[%s18805_s1 + $0x1648] sm:$0xff]  }
 0x2a2   : > { %13736 = vmatprep.subr.bf16.mxu1 %v15064_v62  ;;  %v11750_v55 = vcombine.low %v267_v52, %v267_v52  ;;  %v15112_v62 = vld [vmem:[%s18805_s1 + $0x16c8] sm:$0xff]  }
 0x2a4   : > { %13715 = vmatpush3.bf16.msra.mxu0 %v15065_v63  ;;  %v15113_v63 = vld [vmem:[%s18805_s1 + $0x1608] sm:$0xff]  }
 0x2a5   : > { %13737 = vmatpush3.bf16.msra.mxu1 %v15066_v0  ;;  %13744 = vmatprep.subr.bf16.mxu0 %v15071_v7  ;;  %v15114_v0 = vld [vmem:[%s18805_s1 + $0x1688] sm:$0xff]   ;;  %v15121_v7 = vld [vmem:[%s18805_s1 + $0x1618] sm:$0xff]  }
 0x2a6   : > { %13766 = vmatprep.subr.bf16.mxu1 %v15072_v8  ;;  %v15122_v8 = vld [vmem:[%s18805_s1 + $0x1698] sm:$0xff]  }
 0x2a7   : > { %10568 = vmatmul.mubr.bf16.vlgmr.msra.gmra.mrb[80].mxu0 %v11744_v3  ;;  %v15117_v3 = vld [vmem:[%s18805_s1 + $0x1610] sm:$0xff]  }
 0x2a8   : > { %10608 = vmatmul.mubr.bf16.vlgmr.msra.gmra.mrb[80].mxu1 %v11746_v5  ;;  %13745 = vmatpush3.bf16.msra.mxu0 %v15073_v9  ;;  %v15119_v5 = vld [vmem:[%s18805_s1 + $0x1658] sm:$0xff]   ;;  %v15123_v9 = vld [vmem:[%s18805_s1 + $0x1660] sm:$0xff]  }
 0x2a9   : > { %13767 = vmatpush3.bf16.msra.mxu1 %v15074_v10  ;;  %13746 = vmatprep.subr.bf16.mxu0 %v15075_v11  ;;  %v15124_v10 = vld [vmem:[%s18805_s1 + $0x16e0] sm:$0xff]  }
 0x2aa   : > { %13768 = vmatprep.subr.bf16.mxu1 %v15076_v12  ;;  %10647 = vmatprep.mubr.bf16.mxu0 %v11749_v54  ;;  %v15125_v12 = vld [vmem:[%s18805_s1 + $0x1620] sm:$0xff]   ;;  %v15154_v54 = vld [vmem:[%s18805_s1 + $0x1790] sm:$0xff]  }
 0x2ac   : > { %13747 = vmatpush3.bf16.msra.mxu0 %v15077_v13 }
 0x2ad   : > { %13769 = vmatpush3.bf16.msra.mxu1 %v15078_v14  ;;  %13748 = vmatprep.subr.bf16.mxu0 %v15079_v15  ;;  %v15126_v14 = vld [vmem:[%s18805_s1 + $0x16a0] sm:$0xff]  }
 0x2ae   : > { %13770 = vmatprep.subr.bf16.mxu1 %v15080_v16 }
 0x2b0   : > { %13749 = vmatpush3.bf16.msra.mxu0 %v15081_v17  ;;  %v15127_v17 = vld [vmem:[%s18805_s1 + $0x1668] sm:$0xff]  }
 0x2b1   : > { %13771 = vmatpush3.bf16.msra.mxu1 %v15082_v18  ;;  %13750 = vmatprep.subr.bf16.mxu0 %v15083_v19 }
 0x2b2   : > { %13772 = vmatprep.subr.bf16.mxu1 %v15084_v20  ;;  %v15128_v20 = vld [vmem:[%s18805_s1 + $0x16e8] sm:$0xff]  }
 0x2b4   : > { %13751 = vmatpush3.bf16.msra.mxu0 %v15085_v21 }
 0x2b5   : > { %13773 = vmatpush3.bf16.msra.mxu1 %v15086_v22  ;;  %13752 = vmatprep.subr.bf16.mxu0 %v15087_v23  ;;  %v15129_v23 = vld [vmem:[%s18805_s1 + $0x1628] sm:$0xff]  }
 0x2b6   : > { %13774 = vmatprep.subr.bf16.mxu1 %v15088_v24 }
 0x2b8   : > { %13753 = vmatpush3.bf16.msra.mxu0 %v15089_v26 }
 0x2b9   : > { %13775 = vmatpush3.bf16.msra.mxu1 %v15090_v28  ;;  %13754 = vmatprep.subr.bf16.mxu0 %v15091_v32  ;;  %v15131_v28 = vld [vmem:[%s18805_s1 + $0x1670] sm:$0xff]  }
 0x2ba   : > { %v13452_v25 = vpop.f32.mrb[56].mxu0  ;;  %13776 = vmatprep.subr.bf16.mxu1 %v15092_v34  ;;  %v15134_v32 = vld [vmem:[%s18805_s1 + $0x16b0] sm:$0xff]   ;;  %v15136_v34 = vld [vmem:[%s18805_s1 + $0x16f8] sm:$0xff]  }
 0x2bb   : > { %v13474_v27 = vpop.f32.mrb[56].mxu1  ;;  %v13453_v29 = vpop.f32.mrb[57].mxu0 }
 0x2bc   : > { %v13454_v30 = vadd.f32 %v13453_v29, %v13452_v25  ;;  %v13475_v31 = vpop.f32.mrb[57].mxu1  ;;  %v13455_v35 = vpop.f32.mrb[58].mxu0  ;;  %13755 = vmatpush3.bf16.msra.mxu0 %v15093_v38  ;;  %v15130_v25 = vld [vmem:[%s18805_s1 + $0x16a8] sm:$0xff]  }
 0x2bd   : > { %v13476_v33 = vadd.f32 %v13475_v31, %v13474_v27  ;;  %v13477_v37 = vpop.f32.mrb[58].mxu1  ;;  %v13456_v40 = vpop.f32.mrb[59].mxu0  ;;  %13777 = vmatpush3.bf16.msra.mxu1 %v15094_v39  ;;  %13756 = vmatprep.subr.bf16.mxu0 %v15095_v43  ;;  %v15133_v31 = vld [vmem:[%s18805_s1 + $0x1630] sm:$0xff]   ;;  %v15137_v35 = vld [vmem:[%s18805_s1 + $0x1638] sm:$0xff]   ;;  %v15143_v43 = vld [vmem:[%s18805_s1 + $0x1740] sm:$0xff]  }
 0x2be   : > { %v10090_v36 = vadd.f32 %v13454_v30, %v17609_v57  ;;  %v13478_v42 = vpop.f32.mrb[59].mxu1  ;;  %13778 = vmatprep.subr.bf16.mxu1 %v15096_v44  ;;  %v11751_v57 = vcombine.high %v267_v52, %v267_v52  ;;  %v15132_v30 = vld [vmem:[%s18805_s1 + $0x16f0] sm:$0xff]   ;;  %v268_v37 = vld [vmem:[%s15620_s12 + $0x160] sm:$0xff]  ;;  %v269_v40 = vld [vmem:[%s15620_s12 + $0x168] sm:$0xff] }
 0x2bf   : > { %v11752_v38 = vcombine.low %v268_v37, %v268_v37  ;;  %v11753_v39 = vcombine.high %v268_v37, %v268_v37  ;;  %v11755_v42 = vcombine.high %v269_v40, %v269_v40  ;;  %v15144_v44 = vld [vmem:[%s18805_s1 + $0x17c0] sm:$0xff]   ;;  %v15152_v52 = vld [vmem:[%s18805_s1 + $0x17d0] sm:$0xff]  }
 0x2c0   : > { %v17707_v41 = vadd.f32 %v13476_v33, %v10090_v36  ;;  %13757 = vmatpush3.bf16.msra.mxu0 %v15097_v45  ;;  %10687 = vmatprep.mubr.bf16.mxu1 %v11751_v57  ;;  %v15135_v33 = vld [vmem:[%s18805_s1 + $0x1678] sm:$0xff]   ;;  %v15145_v45 = vld [vmem:[%s18805_s1 + $0x1700] sm:$0xff]   ;;  %v15187_v37 = vld [vmem:[%s18805_s1 + $0x1850] sm:$0xff]  }
 0x2c1   : > { %13779 = vmatpush3.bf16.msra.mxu1 %v15098_v46  ;;  %13758 = vmatprep.subr.bf16.mxu0 %v15099_v47  ;;  %v15138_v36 = vld [vmem:[%s18805_s1 + $0x16b8] sm:$0xff]   ;;  %v15146_v46 = vld [vmem:[%s18805_s1 + $0x1780] sm:$0xff]   ;;  %v15147_v47 = vld [vmem:[%s18805_s1 + $0x1748] sm:$0xff]  }
 0x2c2   : > { %13780 = vmatprep.subr.bf16.mxu1 %v15100_v48  ;;  %v15148_v48 = vld [vmem:[%s18805_s1 + $0x17c8] sm:$0xff]   ;;  %v15157_v57 = vld [vmem:[%s18805_s1 + $0x1718] sm:$0xff]  }
 0x2c4   : > { %13759 = vmatpush3.bf16.msra.mxu0 %v15101_v49  ;;  %v15149_v49 = vld [vmem:[%s18805_s1 + $0x1708] sm:$0xff]  }
 0x2c5   : > { %13781 = vmatpush3.bf16.msra.mxu1 %v15102_v50  ;;  %13788 = vmatprep.subr.bf16.mxu0 %v15107_v56  ;;  %v15150_v50 = vld [vmem:[%s18805_s1 + $0x1788] sm:$0xff]   ;;  %v15156_v56 = vld [vmem:[%s18805_s1 + $0x17d8] sm:$0xff]  }
 0x2c6   : > { %13810 = vmatprep.subr.bf16.mxu1 %v15108_v58  ;;  %v15158_v58 = vld [vmem:[%s18805_s1 + $0x1798] sm:$0xff]  }
 0x2c7   : > { %10648 = vmatmul.mubr.bf16.vlgmr.msra.gmra.mrb[84].mxu0 %v11748_v53  ;;  %v15153_v53 = vld [vmem:[%s18805_s1 + $0x1710] sm:$0xff]  }
 0x2c8   : > { %10688 = vmatmul.mubr.bf16.vlgmr.msra.gmra.mrb[84].mxu1 %v11750_v55  ;;  %13789 = vmatpush3.bf16.msra.mxu0 %v15109_v59  ;;  %v15155_v55 = vld [vmem:[%s18805_s1 + $0x1758] sm:$0xff]   ;;  %v15159_v59 = vld [vmem:[%s18805_s1 + $0x1760] sm:$0xff]  }
 0x2c9   : > { %13811 = vmatpush3.bf16.msra.mxu1 %v15110_v60  ;;  %13790 = vmatprep.subr.bf16.mxu0 %v15111_v61  ;;  %v15160_v60 = vld [vmem:[%s18805_s1 + $0x17e0] sm:$0xff]  }
 0x2ca   : > { %13812 = vmatprep.subr.bf16.mxu1 %v15112_v62  ;;  %10727 = vmatprep.mubr.bf16.mxu0 %v11753_v39  ;;  %v15161_v62 = vld [vmem:[%s18805_s1 + $0x1720] sm:$0xff]   ;;  %v15189_v39 = vld [vmem:[%s18805_s1 + $0x1810] sm:$0xff]  }
 0x2cb   : > { %10767 = vmatprep.mubr.bf16.mxu1 %v11755_v42  ;;  %v15192_v42 = vld [vmem:[%s18805_s1 + $0x18d8] sm:$0xff]  }
 0x2cc   : > { %13791 = vmatpush3.bf16.msra.mxu0 %v15113_v63 }
 0x2cd   : > { %13813 = vmatpush3.bf16.msra.mxu1 %v15114_v0  ;;  %13792 = vmatprep.subr.bf16.mxu0 %v15115_v1  ;;  %v15162_v0 = vld [vmem:[%s18805_s1 + $0x17a0] sm:$0xff]  }
 0x2ce   : > { %13814 = vmatprep.subr.bf16.mxu1 %v15116_v2 }
 0x2d0   : > { %13793 = vmatpush3.bf16.msra.mxu0 %v15117_v3  ;;  %v15163_v3 = vld [vmem:[%s18805_s1 + $0x1768] sm:$0xff]  }
 0x2d1   : > { %13815 = vmatpush3.bf16.msra.mxu1 %v15118_v4  ;;  %13794 = vmatprep.subr.bf16.mxu0 %v15119_v5 }
 0x2d2   : > { %13816 = vmatprep.subr.bf16.mxu1 %v15120_v6  ;;  %v15164_v6 = vld [vmem:[%s18805_s1 + $0x17e8] sm:$0xff]  }
 0x2d4   : > { %13795 = vmatpush3.bf16.msra.mxu0 %v15121_v7 }
 0x2d5   : > { %13817 = vmatpush3.bf16.msra.mxu1 %v15122_v8  ;;  %13796 = vmatprep.subr.bf16.mxu0 %v15123_v9  ;;  %v15165_v9 = vld [vmem:[%s18805_s1 + $0x1728] sm:$0xff]  }
 0x2d6   : > { %13818 = vmatprep.subr.bf16.mxu1 %v15124_v10 }
 0x2d8   : > { %13797 = vmatpush3.bf16.msra.mxu0 %v15125_v12 }
 0x2d9   : > { %13819 = vmatpush3.bf16.msra.mxu1 %v15126_v14  ;;  %13798 = vmatprep.subr.bf16.mxu0 %v15127_v17  ;;  %v15167_v14 = vld [vmem:[%s18805_s1 + $0x1770] sm:$0xff]  }
 0x2da   : > { %v13496_v11 = vpop.f32.mrb[60].mxu0  ;;  %13820 = vmatprep.subr.bf16.mxu1 %v15128_v20  ;;  %v15169_v17 = vld [vmem:[%s18805_s1 + $0x1730] sm:$0xff]   ;;  %v15172_v20 = vld [vmem:[%s18805_s1 + $0x17f8] sm:$0xff]  }
 0x2db   : > { %v13518_v13 = vpop.f32.mrb[60].mxu1  ;;  %v13497_v15 = vpop.f32.mrb[61].mxu0 }
 0x2dc   : > { %v13519_v16 = vpop.f32.mrb[61].mxu1  ;;  %v13498_v18 = vadd.f32 %v13497_v15, %v13496_v11  ;;  %v13499_v21 = vpop.f32.mrb[62].mxu0  ;;  %13799 = vmatpush3.bf16.msra.mxu0 %v15129_v23  ;;  %v15166_v11 = vld [vmem:[%s18805_s1 + $0x17a8] sm:$0xff]   ;;  %v270_v23 = vld [vmem:[%s15620_s12 + $0x170] sm:$0xff] }
 0x2dd   : > { %v13520_v19 = vadd.f32 %v13519_v16, %v13518_v13  ;;  %v13521_v22 = vpop.f32.mrb[62].mxu1  ;;  %v13500_v26 = vpop.f32.mrb[63].mxu0  ;;  %13821 = vmatpush3.bf16.msra.mxu1 %v15130_v25  ;;  %13800 = vmatprep.subr.bf16.mxu0 %v15131_v28  ;;  %v15168_v16 = vld [vmem:[%s18805_s1 + $0x17f0] sm:$0xff]   ;;  %v15173_v21 = vld [vmem:[%s18805_s1 + $0x1738] sm:$0xff]   ;;  %v11756_v25 = vcombine.low %v270_v23, %v270_v23 }
 0x2de   : > { %v10170_v24 = vadd.f32 %v13498_v18, %v17707_v41  ;;  %v13522_v27 = vpop.f32.mrb[63].mxu1  ;;  %13822 = vmatprep.subr.bf16.mxu1 %v15132_v30  ;;  %v11754_v41 = vcombine.low %v269_v40, %v269_v40  ;;  %v15170_v18 = vld [vmem:[%s18805_s1 + $0x17b0] sm:$0xff]   ;;  %v15174_v22 = vld [vmem:[%s18805_s1 + $0x17b8] sm:$0xff]   ;;  %v11757_v26 = vcombine.high %v270_v23, %v270_v23  ;;  %v15180_v30 = vld [vmem:[%s18805_s1 + $0x18c0] sm:$0xff]  }
 0x2df   : > { %v15190_v40 = vld [vmem:[%s18805_s1 + $0x1890] sm:$0xff]  }
 0x2e0   : > { %v17811_v29 = vadd.f32 %v13520_v19, %v10170_v24  ;;  %13801 = vmatpush3.bf16.msra.mxu0 %v15133_v31  ;;  %v15171_v19 = vld [vmem:[%s18805_s1 + $0x1778] sm:$0xff]   ;;  %v15181_v31 = vld [vmem:[%s18805_s1 + $0x1800] sm:$0xff]   ;;  %v15223_v23 = vld [vmem:[%s18805_s1 + $0x1950] sm:$0xff]  }
 0x2e1   : > { %13823 = vmatpush3.bf16.msra.mxu1 %v15134_v32  ;;  %13802 = vmatprep.subr.bf16.mxu0 %v15135_v33  ;;  %v271_v24 = vld [vmem:[%s15620_s12 + $0x178] sm:$0xff]  ;;  %v15182_v32 = vld [vmem:[%s18805_s1 + $0x1880] sm:$0xff]   ;;  %v15183_v33 = vld [vmem:[%s18805_s1 + $0x1848] sm:$0xff]  }
 0x2e2   : > { %13824 = vmatprep.subr.bf16.mxu1 %v15136_v34  ;;  %v11758_v27 = vcombine.low %v271_v24, %v271_v24  ;;  %v11759_v28 = vcombine.high %v271_v24, %v271_v24  ;;  %v15184_v34 = vld [vmem:[%s18805_s1 + $0x18c8] sm:$0xff]   ;;  %v15224_v24 = vld [vmem:[%s18805_s1 + $0x19d0] sm:$0xff]  }
 0x2e4   : > { %13803 = vmatpush3.bf16.msra.mxu0 %v15137_v35  ;;  %v15185_v35 = vld [vmem:[%s18805_s1 + $0x1808] sm:$0xff]  }
 0x2e5   : > { %13825 = vmatpush3.bf16.msra.mxu1 %v15138_v36  ;;  %13832 = vmatprep.subr.bf16.mxu0 %v15143_v43  ;;  %v15186_v36 = vld [vmem:[%s18805_s1 + $0x1888] sm:$0xff]   ;;  %v15193_v43 = vld [vmem:[%s18805_s1 + $0x1818] sm:$0xff]  }
 0x2e6   : > { %13854 = vmatprep.subr.bf16.mxu1 %v15144_v44  ;;  %v15194_v44 = vld [vmem:[%s18805_s1 + $0x1898] sm:$0xff]  }
 0x2e7   : > { %10728 = vmatmul.mubr.bf16.vlgmr.msra.gmra.mrb[88].mxu0 %v11752_v38  ;;  %v15188_v38 = vld [vmem:[%s18805_s1 + $0x18d0] sm:$0xff]  }
 0x2e8   : > { %10768 = vmatmul.mubr.bf16.vlgmr.msra.gmra.mrb[88].mxu1 %v11754_v41  ;;  %13833 = vmatpush3.bf16.msra.mxu0 %v15145_v45  ;;  %v15191_v41 = vld [vmem:[%s18805_s1 + $0x1858] sm:$0xff]   ;;  %v15195_v45 = vld [vmem:[%s18805_s1 + $0x1860] sm:$0xff]  }
 0x2e9   : > { %13855 = vmatpush3.bf16.msra.mxu1 %v15146_v46  ;;  %13834 = vmatprep.subr.bf16.mxu0 %v15147_v47  ;;  %v15196_v46 = vld [vmem:[%s18805_s1 + $0x18e0] sm:$0xff]  }
 0x2ea   : > { %13856 = vmatprep.subr.bf16.mxu1 %v15148_v48  ;;  %10807 = vmatprep.mubr.bf16.mxu0 %v11757_v26  ;;  %v15197_v47 = vld [vmem:[%s18805_s1 + $0x1820] sm:$0xff]   ;;  %v15226_v26 = vld [vmem:[%s18805_s1 + $0x1990] sm:$0xff]  }
 0x2eb   : > { %10847 = vmatprep.mubr.bf16.mxu1 %v11759_v28  ;;  %v15228_v28 = vld [vmem:[%s18805_s1 + $0x19d8] sm:$0xff]  }
 0x2ec   : > { %13835 = vmatpush3.bf16.msra.mxu0 %v15149_v49  ;;  %v15198_v49 = vld [vmem:[%s18805_s1 + $0x18a0] sm:$0xff]  }
 0x2ed   : > { %13857 = vmatpush3.bf16.msra.mxu1 %v15150_v50  ;;  %13836 = vmatprep.subr.bf16.mxu0 %v15151_v51 }
 0x2ee   : > { %13858 = vmatprep.subr.bf16.mxu1 %v15152_v52 }
 0x2f0   : > { %13837 = vmatpush3.bf16.msra.mxu0 %v15153_v53 }
 0x2f1   : > { %13859 = vmatpush3.bf16.msra.mxu1 %v15154_v54  ;;  %13838 = vmatprep.subr.bf16.mxu0 %v15155_v55  ;;  %v15199_v55 = vld [vmem:[%s18805_s1 + $0x1868] sm:$0xff]  }
 0x2f2   : > { %13860 = vmatprep.subr.bf16.mxu1 %v15156_v56 }
 0x2f4   : > { %13839 = vmatpush3.bf16.msra.mxu0 %v15157_v57  ;;  %v15200_v57 = vld [vmem:[%s18805_s1 + $0x18e8] sm:$0xff]  }
 0x2f5   : > { %13861 = vmatpush3.bf16.msra.mxu1 %v15158_v58  ;;  %13840 = vmatprep.subr.bf16.mxu0 %v15159_v59 }
 0x2f6   : > { %13862 = vmatprep.subr.bf16.mxu1 %v15160_v60  ;;  %v15201_v60 = vld [vmem:[%s18805_s1 + $0x1828] sm:$0xff]  }
 0x2f8   : > { %13841 = vmatpush3.bf16.msra.mxu0 %v15161_v62  ;;  %v15202_v62 = vld [vmem:[%s18805_s1 + $0x18a8] sm:$0xff]  }
 0x2f9   : > { %13863 = vmatpush3.bf16.msra.mxu1 %v15162_v0  ;;  %13842 = vmatprep.subr.bf16.mxu0 %v15163_v3  ;;  %v15205_v3 = vld [vmem:[%s18805_s1 + $0x1830] sm:$0xff]  }
 0x2fa   : > { %v13540_v61 = vpop.f32.mrb[64].mxu0  ;;  %13864 = vmatprep.subr.bf16.mxu1 %v15164_v6  ;;  %v15208_v6 = vld [vmem:[%s18805_s1 + $0x18f8] sm:$0xff]  }
 0x2fb   : > { %v13562_v63 = vpop.f32.mrb[64].mxu1  ;;  %v13541_v1 = vpop.f32.mrb[65].mxu0 }
 0x2fc   : > { %v13563_v2 = vpop.f32.mrb[65].mxu1  ;;  %v13542_v4 = vadd.f32 %v13541_v1, %v13540_v61  ;;  %v13543_v7 = vpop.f32.mrb[66].mxu0  ;;  %13843 = vmatpush3.bf16.msra.mxu0 %v15165_v9  ;;  %v15203_v1 = vld [vmem:[%s18805_s1 + $0x1870] sm:$0xff]   ;;  %v272_v9 = vld [vmem:[%s15620_s12 + $0x180] sm:$0xff] }
 0x2fd   : > { %v13564_v5 = vadd.f32 %v13563_v2, %v13562_v63  ;;  %v13565_v8 = vpop.f32.mrb[66].mxu1  ;;  %v13544_v12 = vpop.f32.mrb[67].mxu0  ;;  %13865 = vmatpush3.bf16.msra.mxu1 %v15166_v11  ;;  %13844 = vmatprep.subr.bf16.mxu0 %v15167_v14  ;;  %v15204_v2 = vld [vmem:[%s18805_s1 + $0x18f0] sm:$0xff]   ;;  %v15209_v7 = vld [vmem:[%s18805_s1 + $0x1838] sm:$0xff]   ;;  %v11760_v11 = vcombine.low %v272_v9, %v272_v9 }
 0x2fe   : > { %v10250_v10 = vadd.f32 %v13542_v4, %v17811_v29  ;;  %v13566_v13 = vpop.f32.mrb[67].mxu1  ;;  %13866 = vmatprep.subr.bf16.mxu1 %v15168_v16  ;;  %v15179_v29 = vld [vmem:[%s18805_s1 + $0x1840] sm:$0xff]   ;;  %v15206_v4 = vld [vmem:[%s18805_s1 + $0x18b0] sm:$0xff]   ;;  %v15210_v8 = vld [vmem:[%s18805_s1 + $0x18b8] sm:$0xff]   ;;  %v11761_v12 = vcombine.high %v272_v9, %v272_v9 }
 0x2ff   : > { %v15216_v16 = vld [vmem:[%s18805_s1 + $0x19c0] sm:$0xff]   ;;  %v15259_v9 = vld [vmem:[%s18805_s1 + $0x1a50] sm:$0xff]  }
 0x300   : > { %v17912_v15 = vadd.f32 %v13564_v5, %v10250_v10  ;;  %13845 = vmatpush3.bf16.msra.mxu0 %v15169_v17  ;;  %v15207_v5 = vld [vmem:[%s18805_s1 + $0x1878] sm:$0xff]   ;;  %v273_v10 = vld [vmem:[%s15620_s12 + $0x188] sm:$0xff]  ;;  %v15217_v17 = vld [vmem:[%s18805_s1 + $0x1900] sm:$0xff]  }
 0x301   : > { %13867 = vmatpush3.bf16.msra.mxu1 %v15170_v18  ;;  %13846 = vmatprep.subr.bf16.mxu0 %v15171_v19  ;;  %v11762_v13 = vcombine.low %v273_v10, %v273_v10  ;;  %v11763_v14 = vcombine.high %v273_v10, %v273_v10  ;;  %v15218_v18 = vld [vmem:[%s18805_s1 + $0x1980] sm:$0xff]   ;;  %v15219_v19 = vld [vmem:[%s18805_s1 + $0x1948] sm:$0xff]   ;;  %v15260_v10 = vld [vmem:[%s18805_s1 + $0x1ad0] sm:$0xff]  }
 0x302   : > { %13868 = vmatprep.subr.bf16.mxu1 %v15172_v20  ;;  %v15220_v20 = vld [vmem:[%s18805_s1 + $0x19c8] sm:$0xff]  }
 0x304   : > { %13847 = vmatpush3.bf16.msra.mxu0 %v15173_v21  ;;  %v15221_v21 = vld [vmem:[%s18805_s1 + $0x1908] sm:$0xff]  }
 0x305   : > { %13869 = vmatpush3.bf16.msra.mxu1 %v15174_v22  ;;  %13876 = vmatprep.subr.bf16.mxu0 %v15179_v29  ;;  %v15222_v22 = vld [vmem:[%s18805_s1 + $0x1988] sm:$0xff]   ;;  %v15229_v29 = vld [vmem:[%s18805_s1 + $0x1918] sm:$0xff]  }
 0x306   : > { %13898 = vmatprep.subr.bf16.mxu1 %v15180_v30  ;;  %v15230_v30 = vld [vmem:[%s18805_s1 + $0x1998] sm:$0xff]  }
 0x307   : > { %10808 = vmatmul.mubr.bf16.vlgmr.msra.gmra.mrb[92].mxu0 %v11756_v25  ;;  %v15225_v25 = vld [vmem:[%s18805_s1 + $0x1910] sm:$0xff]  }
 0x308   : > { %10848 = vmatmul.mubr.bf16.vlgmr.msra.gmra.mrb[92].mxu1 %v11758_v27  ;;  %13877 = vmatpush3.bf16.msra.mxu0 %v15181_v31  ;;  %v15227_v27 = vld [vmem:[%s18805_s1 + $0x1958] sm:$0xff]   ;;  %v15231_v31 = vld [vmem:[%s18805_s1 + $0x1960] sm:$0xff]  }
 0x309   : > { %13899 = vmatpush3.bf16.msra.mxu1 %v15182_v32  ;;  %13878 = vmatprep.subr.bf16.mxu0 %v15183_v33  ;;  %v15232_v32 = vld [vmem:[%s18805_s1 + $0x19e0] sm:$0xff]  }
 0x30a   : > { %13900 = vmatprep.subr.bf16.mxu1 %v15184_v34  ;;  %10887 = vmatprep.mubr.bf16.mxu0 %v11761_v12  ;;  %v15233_v33 = vld [vmem:[%s18805_s1 + $0x1920] sm:$0xff]   ;;  %v15262_v12 = vld [vmem:[%s18805_s1 + $0x1a90] sm:$0xff]  }
 0x30b   : > { %10927 = vmatprep.mubr.bf16.mxu1 %v11763_v14  ;;  %v15264_v14 = vld [vmem:[%s18805_s1 + $0x1ad8] sm:$0xff]  }
 0x30c   : > { %13879 = vmatpush3.bf16.msra.mxu0 %v15185_v35  ;;  %v15234_v35 = vld [vmem:[%s18805_s1 + $0x19a0] sm:$0xff]  }
 0x30d   : > { %13901 = vmatpush3.bf16.msra.mxu1 %v15186_v36  ;;  %13880 = vmatprep.subr.bf16.mxu0 %v15187_v37 }
 0x30e   : > { %13902 = vmatprep.subr.bf16.mxu1 %v15188_v38 }
 0x310   : > { %13881 = vmatpush3.bf16.msra.mxu0 %v15189_v39 }
 0x311   : > { %13903 = vmatpush3.bf16.msra.mxu1 %v15190_v40  ;;  %13882 = vmatprep.subr.bf16.mxu0 %v15191_v41  ;;  %v15235_v41 = vld [vmem:[%s18805_s1 + $0x1968] sm:$0xff]  }
 0x312   : > { %13904 = vmatprep.subr.bf16.mxu1 %v15192_v42 }
 0x314   : > { %13883 = vmatpush3.bf16.msra.mxu0 %v15193_v43  ;;  %v15236_v43 = vld [vmem:[%s18805_s1 + $0x19e8] sm:$0xff]  }
 0x315   : > { %13905 = vmatpush3.bf16.msra.mxu1 %v15194_v44  ;;  %13884 = vmatprep.subr.bf16.mxu0 %v15195_v45 }
 0x316   : > { %13906 = vmatprep.subr.bf16.mxu1 %v15196_v46  ;;  %v15237_v46 = vld [vmem:[%s18805_s1 + $0x1928] sm:$0xff]  }
 0x318   : > { %13885 = vmatpush3.bf16.msra.mxu0 %v15197_v47 }
 0x319   : > { %13907 = vmatpush3.bf16.msra.mxu1 %v15198_v49  ;;  %13886 = vmatprep.subr.bf16.mxu0 %v15199_v55  ;;  %v15243_v55 = vld [vmem:[%s18805_s1 + $0x1978] sm:$0xff]  }
 0x31a   : > { %v13584_v48 = vpop.f32.mrb[68].mxu0  ;;  %13908 = vmatprep.subr.bf16.mxu1 %v15200_v57  ;;  %v15245_v57 = vld [vmem:[%s18805_s1 + $0x1938] sm:$0xff]  }
 0x31b   : > { %v13606_v50 = vpop.f32.mrb[68].mxu1  ;;  %v13585_v51 = vpop.f32.mrb[69].mxu0 }
 0x31c   : > { %v13607_v52 = vpop.f32.mrb[69].mxu1  ;;  %v13586_v53 = vadd.f32 %v13585_v51, %v13584_v48  ;;  %v13587_v56 = vpop.f32.mrb[70].mxu0  ;;  %13887 = vmatpush3.bf16.msra.mxu0 %v15201_v60  ;;  %v15238_v48 = vld [vmem:[%s18805_s1 + $0x19a8] sm:$0xff]   ;;  %v15239_v51 = vld [vmem:[%s18805_s1 + $0x1970] sm:$0xff]   ;;  %v275_v60 = vld [vmem:[%s15620_s12 + $0x198] sm:$0xff] }
 0x31d   : > { %v13608_v54 = vadd.f32 %v13607_v52, %v13606_v50  ;;  %v13609_v58 = vpop.f32.mrb[70].mxu1  ;;  %v13588_v61 = vpop.f32.mrb[71].mxu0  ;;  %13909 = vmatpush3.bf16.msra.mxu1 %v15202_v62  ;;  %13888 = vmatprep.subr.bf16.mxu0 %v15203_v1  ;;  %v15240_v52 = vld [vmem:[%s18805_s1 + $0x19f0] sm:$0xff]   ;;  %v15244_v56 = vld [vmem:[%s18805_s1 + $0x19f8] sm:$0xff]   ;;  %v15251_v1 = vld [vmem:[%s18805_s1 + $0x1a40] sm:$0xff]  }
 0x31e   : > { %v10330_v59 = vadd.f32 %v13586_v53, %v17912_v15  ;;  %v13610_v63 = vpop.f32.mrb[71].mxu1  ;;  %13910 = vmatprep.subr.bf16.mxu1 %v15204_v2  ;;  %v15215_v15 = vld [vmem:[%s18805_s1 + $0x1940] sm:$0xff]   ;;  %v15241_v53 = vld [vmem:[%s18805_s1 + $0x1930] sm:$0xff]   ;;  %v15246_v58 = vld [vmem:[%s18805_s1 + $0x19b8] sm:$0xff]  }
 0x31f   : > { %v11766_v63 = vcombine.low %v275_v60, %v275_v60  ;;  %v15252_v2 = vld [vmem:[%s18805_s1 + $0x1ac0] sm:$0xff]  }
 0x320   : > { %v18010_v0 = vadd.f32 %v13608_v54, %v10330_v59  ;;  %13889 = vmatpush3.bf16.msra.mxu0 %v15205_v3  ;;  %v15242_v54 = vld [vmem:[%s18805_s1 + $0x19b0] sm:$0xff]   ;;  %v15253_v3 = vld [vmem:[%s18805_s1 + $0x1a00] sm:$0xff]  }
 0x321   : > { %13911 = vmatpush3.bf16.msra.mxu1 %v15206_v4  ;;  %13890 = vmatprep.subr.bf16.mxu0 %v15207_v5  ;;  %v274_v59 = vld [vmem:[%s15620_s12 + $0x190] sm:$0xff]  ;;  %v15254_v4 = vld [vmem:[%s18805_s1 + $0x1a80] sm:$0xff]   ;;  %v15255_v5 = vld [vmem:[%s18805_s1 + $0x1a48] sm:$0xff]  }
 0x322   : > { %13912 = vmatprep.subr.bf16.mxu1 %v15208_v6  ;;  %v11764_v61 = vcombine.low %v274_v59, %v274_v59  ;;  %v11765_v62 = vcombine.high %v274_v59, %v274_v59  ;;  %v15256_v6 = vld [vmem:[%s18805_s1 + $0x1ac8] sm:$0xff]   ;;  %v15295_v59 = vld [vmem:[%s18805_s1 + $0x1b50] sm:$0xff]  }
 0x324   : > { %13891 = vmatpush3.bf16.msra.mxu0 %v15209_v7  ;;  %v15257_v7 = vld [vmem:[%s18805_s1 + $0x1a08] sm:$0xff]  }
 0x325   : > { %13913 = vmatpush3.bf16.msra.mxu1 %v15210_v8  ;;  %13920 = vmatprep.subr.bf16.mxu0 %v15215_v15  ;;  %v15258_v8 = vld [vmem:[%s18805_s1 + $0x1a88] sm:$0xff]   ;;  %v15265_v15 = vld [vmem:[%s18805_s1 + $0x1a18] sm:$0xff]  }
 0x326   : > { %13942 = vmatprep.subr.bf16.mxu1 %v15216_v16  ;;  %v15266_v16 = vld [vmem:[%s18805_s1 + $0x1a98] sm:$0xff]  }
 0x327   : > { %10888 = vmatmul.mubr.bf16.vlgmr.msra.gmra.mrb[96].mxu0 %v11760_v11  ;;  %v15261_v11 = vld [vmem:[%s18805_s1 + $0x1a10] sm:$0xff]  }
 0x328   : > { %10928 = vmatmul.mubr.bf16.vlgmr.msra.gmra.mrb[96].mxu1 %v11762_v13  ;;  %13921 = vmatpush3.bf16.msra.mxu0 %v15217_v17  ;;  %v15263_v13 = vld [vmem:[%s18805_s1 + $0x1a58] sm:$0xff]   ;;  %v15267_v17 = vld [vmem:[%s18805_s1 + $0x1a60] sm:$0xff]  }
 0x329   : > { %13943 = vmatpush3.bf16.msra.mxu1 %v15218_v18  ;;  %13922 = vmatprep.subr.bf16.mxu0 %v15219_v19  ;;  %v15268_v18 = vld [vmem:[%s18805_s1 + $0x1ae0] sm:$0xff]  }
 0x32a   : > { %13944 = vmatprep.subr.bf16.mxu1 %v15220_v20  ;;  %10967 = vmatprep.mubr.bf16.mxu0 %v11765_v62  ;;  %v15269_v19 = vld [vmem:[%s18805_s1 + $0x1a20] sm:$0xff]   ;;  %v15298_v62 = vld [vmem:[%s18805_s1 + $0x1b90] sm:$0xff]  }
 0x32c   : > { %13923 = vmatpush3.bf16.msra.mxu0 %v15221_v21  ;;  %v15270_v21 = vld [vmem:[%s18805_s1 + $0x1aa0] sm:$0xff]  }
 0x32d   : > { %13945 = vmatpush3.bf16.msra.mxu1 %v15222_v22  ;;  %13924 = vmatprep.subr.bf16.mxu0 %v15223_v23 }
 0x32e   : > { %13946 = vmatprep.subr.bf16.mxu1 %v15224_v24 }
 0x330   : > { %13925 = vmatpush3.bf16.msra.mxu0 %v15225_v25 }
 0x331   : > { %13947 = vmatpush3.bf16.msra.mxu1 %v15226_v26  ;;  %13926 = vmatprep.subr.bf16.mxu0 %v15227_v27  ;;  %v15271_v27 = vld [vmem:[%s18805_s1 + $0x1a68] sm:$0xff]  }
 0x332   : > { %13948 = vmatprep.subr.bf16.mxu1 %v15228_v28 }
 0x334   : > { %13927 = vmatpush3.bf16.msra.mxu0 %v15229_v29  ;;  %v15272_v29 = vld [vmem:[%s18805_s1 + $0x1ae8] sm:$0xff]  }
 0x335   : > { %13949 = vmatpush3.bf16.msra.mxu1 %v15230_v30  ;;  %13928 = vmatprep.subr.bf16.mxu0 %v15231_v31 }
 0x336   : > { %13950 = vmatprep.subr.bf16.mxu1 %v15232_v32  ;;  %v15273_v32 = vld [vmem:[%s18805_s1 + $0x1a28] sm:$0xff]  }
 0x338   : > { %13929 = vmatpush3.bf16.msra.mxu0 %v15233_v33 }
 0x339   : > { %13951 = vmatpush3.bf16.msra.mxu1 %v15234_v35  ;;  %13930 = vmatprep.subr.bf16.mxu0 %v15235_v41  ;;  %v15279_v41 = vld [vmem:[%s18805_s1 + $0x1a78] sm:$0xff]  }
 0x33a   : > { %v13628_v34 = vpop.f32.mrb[72].mxu0  ;;  %13952 = vmatprep.subr.bf16.mxu1 %v15236_v43  ;;  %v15281_v43 = vld [vmem:[%s18805_s1 + $0x1a38] sm:$0xff]  }
 0x33b   : > { %v13650_v36 = vpop.f32.mrb[72].mxu1  ;;  %v13629_v37 = vpop.f32.mrb[73].mxu0 }
 0x33c   : > { %v13651_v38 = vpop.f32.mrb[73].mxu1  ;;  %v13630_v39 = vadd.f32 %v13629_v37, %v13628_v34  ;;  %v13631_v42 = vpop.f32.mrb[74].mxu0  ;;  %13931 = vmatpush3.bf16.msra.mxu0 %v15237_v46  ;;  %v15274_v34 = vld [vmem:[%s18805_s1 + $0x1aa8] sm:$0xff]   ;;  %v15275_v37 = vld [vmem:[%s18805_s1 + $0x1a70] sm:$0xff]  }
 0x33d   : > { %v13652_v40 = vadd.f32 %v13651_v38, %v13650_v36  ;;  %v13653_v44 = vpop.f32.mrb[74].mxu1  ;;  %v13632_v47 = vpop.f32.mrb[75].mxu0  ;;  %13953 = vmatpush3.bf16.msra.mxu1 %v15238_v48  ;;  %13932 = vmatprep.subr.bf16.mxu0 %v15239_v51  ;;  %v15276_v38 = vld [vmem:[%s18805_s1 + $0x1af0] sm:$0xff]   ;;  %v15280_v42 = vld [vmem:[%s18805_s1 + $0x1af8] sm:$0xff]   ;;  %v277_v46 = vld [vmem:[%s15620_s12 + $0x1a8] sm:$0xff] }
 0x33e   : > { %v10410_v45 = vadd.f32 %v13630_v39, %v18010_v0  ;;  %v13654_v49 = vpop.f32.mrb[75].mxu1  ;;  %13954 = vmatprep.subr.bf16.mxu1 %v15240_v52  ;;  %v11767_v0 = vcombine.high %v275_v60, %v275_v60  ;;  %v15277_v39 = vld [vmem:[%s18805_s1 + $0x1a30] sm:$0xff]   ;;  %v15282_v44 = vld [vmem:[%s18805_s1 + $0x1ab8] sm:$0xff]   ;;  %v15287_v51 = vld [vmem:[%s18805_s1 + $0x1b40] sm:$0xff]  }
 0x33f   : > { %v11770_v49 = vcombine.low %v277_v46, %v277_v46  ;;  %v15288_v52 = vld [vmem:[%s18805_s1 + $0x1bc0] sm:$0xff]   ;;  %v15296_v60 = vld [vmem:[%s18805_s1 + $0x1bd0] sm:$0xff]  }
 0x340   : > { %v18111_v50 = vadd.f32 %v13652_v40, %v10410_v45  ;;  %13933 = vmatpush3.bf16.msra.mxu0 %v15241_v53  ;;  %11007 = vmatprep.mubr.bf16.mxu1 %v11767_v0  ;;  %v15278_v40 = vld [vmem:[%s18805_s1 + $0x1ab0] sm:$0xff]   ;;  %v276_v45 = vld [vmem:[%s15620_s12 + $0x1a0] sm:$0xff]  ;;  %v15300_v0 = vld [vmem:[%s18805_s1 + $0x1bd8] sm:$0xff]  }
 0x341   : > { %13955 = vmatpush3.bf16.msra.mxu1 %v15242_v54  ;;  %13934 = vmatprep.subr.bf16.mxu0 %v15243_v55  ;;  %v11768_v47 = vcombine.low %v276_v45, %v276_v45  ;;  %v11769_v48 = vcombine.high %v276_v45, %v276_v45  ;;  %v15289_v53 = vld [vmem:[%s18805_s1 + $0x1b00] sm:$0xff]   ;;  %v15291_v55 = vld [vmem:[%s18805_s1 + $0x1b48] sm:$0xff]   ;;  %v15331_v45 = vld [vmem:[%s18805_s1 + $0x1c50] sm:$0xff]  }
 0x342   : > { %13956 = vmatprep.subr.bf16.mxu1 %v15244_v56  ;;  %v15290_v54 = vld [vmem:[%s18805_s1 + $0x1b80] sm:$0xff]   ;;  %v15292_v56 = vld [vmem:[%s18805_s1 + $0x1bc8] sm:$0xff]  }
 0x344   : > { %13935 = vmatpush3.bf16.msra.mxu0 %v15245_v57  ;;  %v15293_v57 = vld [vmem:[%s18805_s1 + $0x1b08] sm:$0xff]  }
 0x345   : > { %13957 = vmatpush3.bf16.msra.mxu1 %v15246_v58  ;;  %13964 = vmatprep.subr.bf16.mxu0 %v15251_v1  ;;  %v15294_v58 = vld [vmem:[%s18805_s1 + $0x1b88] sm:$0xff]   ;;  %v15301_v1 = vld [vmem:[%s18805_s1 + $0x1b18] sm:$0xff]  }
 0x346   : > { %13986 = vmatprep.subr.bf16.mxu1 %v15252_v2  ;;  %v15302_v2 = vld [vmem:[%s18805_s1 + $0x1b98] sm:$0xff]  }
 0x347   : > { %10968 = vmatmul.mubr.bf16.vlgmr.msra.gmra.mrb[100].mxu0 %v11764_v61  ;;  %v15297_v61 = vld [vmem:[%s18805_s1 + $0x1b10] sm:$0xff]  }
 0x348   : > { %11008 = vmatmul.mubr.bf16.vlgmr.msra.gmra.mrb[100].mxu1 %v11766_v63  ;;  %13965 = vmatpush3.bf16.msra.mxu0 %v15253_v3  ;;  %v15299_v63 = vld [vmem:[%s18805_s1 + $0x1b58] sm:$0xff]   ;;  %v15303_v3 = vld [vmem:[%s18805_s1 + $0x1b60] sm:$0xff]  }
 0x349   : > { %13987 = vmatpush3.bf16.msra.mxu1 %v15254_v4  ;;  %13966 = vmatprep.subr.bf16.mxu0 %v15255_v5  ;;  %v15304_v4 = vld [vmem:[%s18805_s1 + $0x1be0] sm:$0xff]  }
 0x34a   : > { %13988 = vmatprep.subr.bf16.mxu1 %v15256_v6  ;;  %11047 = vmatprep.mubr.bf16.mxu0 %v11769_v48  ;;  %v15305_v6 = vld [vmem:[%s18805_s1 + $0x1b20] sm:$0xff]   ;;  %v15334_v48 = vld [vmem:[%s18805_s1 + $0x1c90] sm:$0xff]  }
 0x34c   : > { %13967 = vmatpush3.bf16.msra.mxu0 %v15257_v7 }
 0x34d   : > { %13989 = vmatpush3.bf16.msra.mxu1 %v15258_v8  ;;  %13968 = vmatprep.subr.bf16.mxu0 %v15259_v9  ;;  %v15306_v8 = vld [vmem:[%s18805_s1 + $0x1ba0] sm:$0xff]  }
 0x34e   : > { %13990 = vmatprep.subr.bf16.mxu1 %v15260_v10 }
 0x350   : > { %13969 = vmatpush3.bf16.msra.mxu0 %v15261_v11 }
 0x351   : > { %13991 = vmatpush3.bf16.msra.mxu1 %v15262_v12  ;;  %13970 = vmatprep.subr.bf16.mxu0 %v15263_v13  ;;  %v15307_v12 = vld [vmem:[%s18805_s1 + $0x1b68] sm:$0xff]  }
 0x352   : > { %13992 = vmatprep.subr.bf16.mxu1 %v15264_v14  ;;  %v15308_v14 = vld [vmem:[%s18805_s1 + $0x1be8] sm:$0xff]  }
 0x354   : > { %13971 = vmatpush3.bf16.msra.mxu0 %v15265_v15 }
 0x355   : > { %13993 = vmatpush3.bf16.msra.mxu1 %v15266_v16  ;;  %13972 = vmatprep.subr.bf16.mxu0 %v15267_v17 }
 0x356   : > { %13994 = vmatprep.subr.bf16.mxu1 %v15268_v18  ;;  %v15309_v18 = vld [vmem:[%s18805_s1 + $0x1b28] sm:$0xff]  }
 0x358   : > { %13973 = vmatpush3.bf16.msra.mxu0 %v15269_v19  ;;  %v15310_v19 = vld [vmem:[%s18805_s1 + $0x1ba8] sm:$0xff]  }
 0x359   : > { %13995 = vmatpush3.bf16.msra.mxu1 %v15270_v21  ;;  %13974 = vmatprep.subr.bf16.mxu0 %v15271_v27  ;;  %v15315_v27 = vld [vmem:[%s18805_s1 + $0x1b78] sm:$0xff]  }
 0x35a   : > { %v13672_v20 = vpop.f32.mrb[76].mxu0  ;;  %13996 = vmatprep.subr.bf16.mxu1 %v15272_v29  ;;  %v15317_v29 = vld [vmem:[%s18805_s1 + $0x1b38] sm:$0xff]  }
 0x35b   : > { %v13694_v22 = vpop.f32.mrb[76].mxu1  ;;  %v13673_v23 = vpop.f32.mrb[77].mxu0 }
 0x35c   : > { %v13695_v24 = vpop.f32.mrb[77].mxu1  ;;  %v13674_v25 = vadd.f32 %v13673_v23, %v13672_v20  ;;  %v13675_v28 = vpop.f32.mrb[78].mxu0  ;;  %13975 = vmatpush3.bf16.msra.mxu0 %v15273_v32  ;;  %v15311_v23 = vld [vmem:[%s18805_s1 + $0x1b70] sm:$0xff]   ;;  %v279_v32 = vld [vmem:[%s15620_s12 + $0x1b8] sm:$0xff] }
 0x35d   : > { %v13696_v26 = vadd.f32 %v13695_v24, %v13694_v22  ;;  %v13697_v30 = vpop.f32.mrb[78].mxu1  ;;  %v13676_v33 = vpop.f32.mrb[79].mxu0  ;;  %13997 = vmatpush3.bf16.msra.mxu1 %v15274_v34  ;;  %13976 = vmatprep.subr.bf16.mxu0 %v15275_v37  ;;  %v15312_v24 = vld [vmem:[%s18805_s1 + $0x1bf0] sm:$0xff]   ;;  %v15316_v28 = vld [vmem:[%s18805_s1 + $0x1bf8] sm:$0xff]   ;;  %v11775_v37 = vcombine.high %v279_v32, %v279_v32 }
 0x35e   : > { %v10490_v31 = vadd.f32 %v13674_v25, %v18111_v50  ;;  %v13698_v35 = vpop.f32.mrb[79].mxu1  ;;  %13998 = vmatprep.subr.bf16.mxu1 %v15276_v38  ;;  %v11771_v50 = vcombine.high %v277_v46, %v277_v46  ;;  %v15313_v25 = vld [vmem:[%s18805_s1 + $0x1b30] sm:$0xff]   ;;  %v15318_v30 = vld [vmem:[%s18805_s1 + $0x1bb8] sm:$0xff]   ;;  %v15324_v38 = vld [vmem:[%s18805_s1 + $0x1cc0] sm:$0xff]  }
 0x35f   : > { %v11774_v35 = vcombine.low %v279_v32, %v279_v32  ;;  %v15332_v46 = vld [vmem:[%s18805_s1 + $0x1cd0] sm:$0xff]  }
 0x360   : > { %v18212_v36 = vadd.f32 %v13696_v26, %v10490_v31  ;;  %13977 = vmatpush3.bf16.msra.mxu0 %v15277_v39  ;;  %11087 = vmatprep.mubr.bf16.mxu1 %v11771_v50  ;;  %v15314_v26 = vld [vmem:[%s18805_s1 + $0x1bb0] sm:$0xff]   ;;  %v15325_v39 = vld [vmem:[%s18805_s1 + $0x1c00] sm:$0xff]   ;;  %v15336_v50 = vld [vmem:[%s18805_s1 + $0x1cd8] sm:$0xff]  }
 0x361   : > { %13999 = vmatpush3.bf16.msra.mxu1 %v15278_v40  ;;  %13978 = vmatprep.subr.bf16.mxu0 %v15279_v41  ;;  %v278_v31 = vld [vmem:[%s15620_s12 + $0x1b0] sm:$0xff]  ;;  %v15326_v40 = vld [vmem:[%s18805_s1 + $0x1c80] sm:$0xff]   ;;  %v15327_v41 = vld [vmem:[%s18805_s1 + $0x1c48] sm:$0xff]  }
 0x362   : > { %14000 = vmatprep.subr.bf16.mxu1 %v15280_v42  ;;  %v11772_v33 = vcombine.low %v278_v31, %v278_v31  ;;  %v11773_v34 = vcombine.high %v278_v31, %v278_v31  ;;  %v15328_v42 = vld [vmem:[%s18805_s1 + $0x1cc8] sm:$0xff]   ;;  %v15367_v31 = vld [vmem:[%s18805_s1 + $0x1d50] sm:$0xff]  }
 0x363   : > { %v15368_v32 = vld [vmem:[%s18805_s1 + $0x1dd0] sm:$0xff]  }
 0x364   : > { %13979 = vmatpush3.bf16.msra.mxu0 %v15281_v43  ;;  %v15329_v43 = vld [vmem:[%s18805_s1 + $0x1c08] sm:$0xff]  }
 0x365   : > { %14001 = vmatpush3.bf16.msra.mxu1 %v15282_v44  ;;  %14008 = vmatprep.subr.bf16.mxu0 %v15287_v51  ;;  %v15330_v44 = vld [vmem:[%s18805_s1 + $0x1c88] sm:$0xff]   ;;  %v15337_v51 = vld [vmem:[%s18805_s1 + $0x1c18] sm:$0xff]  }
 0x366   : > { %14030 = vmatprep.subr.bf16.mxu1 %v15288_v52  ;;  %v15338_v52 = vld [vmem:[%s18805_s1 + $0x1c98] sm:$0xff]  }
 0x367   : > { %11048 = vmatmul.mubr.bf16.vlgmr.msra.gmra.mrb[104].mxu0 %v11768_v47  ;;  %v15333_v47 = vld [vmem:[%s18805_s1 + $0x1c10] sm:$0xff]  }
 0x368   : > { %11088 = vmatmul.mubr.bf16.vlgmr.msra.gmra.mrb[104].mxu1 %v11770_v49  ;;  %14009 = vmatpush3.bf16.msra.mxu0 %v15289_v53  ;;  %v15335_v49 = vld [vmem:[%s18805_s1 + $0x1c58] sm:$0xff]   ;;  %v15339_v53 = vld [vmem:[%s18805_s1 + $0x1c60] sm:$0xff]  }
 0x369   : > { %14031 = vmatpush3.bf16.msra.mxu1 %v15290_v54  ;;  %14010 = vmatprep.subr.bf16.mxu0 %v15291_v55  ;;  %v15340_v54 = vld [vmem:[%s18805_s1 + $0x1ce0] sm:$0xff]  }
 0x36a   : > { %14032 = vmatprep.subr.bf16.mxu1 %v15292_v56  ;;  %11127 = vmatprep.mubr.bf16.mxu0 %v11773_v34  ;;  %v15341_v56 = vld [vmem:[%s18805_s1 + $0x1c20] sm:$0xff]   ;;  %v15370_v34 = vld [vmem:[%s18805_s1 + $0x1d90] sm:$0xff]  }
 0x36b   : > { %11167 = vmatprep.mubr.bf16.mxu1 %v11775_v37  ;;  %v15373_v37 = vld [vmem:[%s18805_s1 + $0x1d18] sm:$0xff]  }
 0x36c   : > { %14011 = vmatpush3.bf16.msra.mxu0 %v15293_v57 }
 0x36d   : > { %14033 = vmatpush3.bf16.msra.mxu1 %v15294_v58  ;;  %14012 = vmatprep.subr.bf16.mxu0 %v15295_v59  ;;  %v15342_v58 = vld [vmem:[%s18805_s1 + $0x1ca0] sm:$0xff]  }
 0x36e   : > { %14034 = vmatprep.subr.bf16.mxu1 %v15296_v60 }
 0x370   : > { %14013 = vmatpush3.bf16.msra.mxu0 %v15297_v61  ;;  %v15343_v61 = vld [vmem:[%s18805_s1 + $0x1c68] sm:$0xff]  }
 0x371   : > { %14035 = vmatpush3.bf16.msra.mxu1 %v15298_v62  ;;  %14014 = vmatprep.subr.bf16.mxu0 %v15299_v63 }
 0x372   : > { %14036 = vmatprep.subr.bf16.mxu1 %v15300_v0  ;;  %v15344_v0 = vld [vmem:[%s18805_s1 + $0x1ce8] sm:$0xff]  }
 0x374   : > { %14015 = vmatpush3.bf16.msra.mxu0 %v15301_v1 }
 0x375   : > { %14037 = vmatpush3.bf16.msra.mxu1 %v15302_v2  ;;  %14016 = vmatprep.subr.bf16.mxu0 %v15303_v3  ;;  %v15345_v3 = vld [vmem:[%s18805_s1 + $0x1c28] sm:$0xff]  }
 0x376   : > { %14038 = vmatprep.subr.bf16.mxu1 %v15304_v4 }
 0x378   : > { %14017 = vmatpush3.bf16.msra.mxu0 %v15305_v6 }
 0x379   : > { %14039 = vmatpush3.bf16.msra.mxu1 %v15306_v8  ;;  %14018 = vmatprep.subr.bf16.mxu0 %v15307_v12  ;;  %v15347_v8 = vld [vmem:[%s18805_s1 + $0x1c70] sm:$0xff]  }
 0x37a   : > { %v13716_v5 = vpop.f32.mrb[80].mxu0  ;;  %14040 = vmatprep.subr.bf16.mxu1 %v15308_v14  ;;  %v15350_v12 = vld [vmem:[%s18805_s1 + $0x1cb0] sm:$0xff]   ;;  %v15352_v14 = vld [vmem:[%s18805_s1 + $0x1cf8] sm:$0xff]  }
 0x37b   : > { %v13738_v7 = vpop.f32.mrb[80].mxu1  ;;  %v13717_v9 = vpop.f32.mrb[81].mxu0 }
 0x37c   : > { %v13718_v10 = vadd.f32 %v13717_v9, %v13716_v5  ;;  %v13739_v11 = vpop.f32.mrb[81].mxu1  ;;  %v13719_v15 = vpop.f32.mrb[82].mxu0  ;;  %14019 = vmatpush3.bf16.msra.mxu0 %v15309_v18  ;;  %v15346_v5 = vld [vmem:[%s18805_s1 + $0x1ca8] sm:$0xff]  }
 0x37d   : > { %v13740_v13 = vadd.f32 %v13739_v11, %v13738_v7  ;;  %v13741_v17 = vpop.f32.mrb[82].mxu1  ;;  %v13720_v20 = vpop.f32.mrb[83].mxu0  ;;  %14041 = vmatpush3.bf16.msra.mxu1 %v15310_v19  ;;  %14020 = vmatprep.subr.bf16.mxu0 %v15311_v23  ;;  %v15349_v11 = vld [vmem:[%s18805_s1 + $0x1c30] sm:$0xff]   ;;  %v15353_v15 = vld [vmem:[%s18805_s1 + $0x1c38] sm:$0xff]   ;;  %v15359_v23 = vld [vmem:[%s18805_s1 + $0x1d40] sm:$0xff]  }
 0x37e   : > { %v10570_v16 = vadd.f32 %v13718_v10, %v18212_v36  ;;  %v13742_v22 = vpop.f32.mrb[83].mxu1  ;;  %14042 = vmatprep.subr.bf16.mxu1 %v15312_v24  ;;  %v15323_v36 = vld [vmem:[%s18805_s1 + $0x1c40] sm:$0xff]   ;;  %v15348_v10 = vld [vmem:[%s18805_s1 + $0x1cf0] sm:$0xff]   ;;  %v281_v20 = vld [vmem:[%s15620_s12 + $0x1c8] sm:$0xff] }
 0x37f   : > { %v280_v17 = vld [vmem:[%s15620_s12 + $0x1c0] sm:$0xff]  ;;  %v11779_v22 = vcombine.high %v281_v20, %v281_v20 }
 0x380   : > { %v18313_v21 = vadd.f32 %v13740_v13, %v10570_v16  ;;  %14021 = vmatpush3.bf16.msra.mxu0 %v15313_v25  ;;  %v15351_v13 = vld [vmem:[%s18805_s1 + $0x1c78] sm:$0xff]   ;;  %v11776_v18 = vcombine.low %v280_v17, %v280_v17  ;;  %v11777_v19 = vcombine.high %v280_v17, %v280_v17  ;;  %v15360_v24 = vld [vmem:[%s18805_s1 + $0x1dc0] sm:$0xff]   ;;  %v15403_v17 = vld [vmem:[%s18805_s1 + $0x1e50] sm:$0xff]  }
 0x381   : > { %14043 = vmatpush3.bf16.msra.mxu1 %v15314_v26  ;;  %14022 = vmatprep.subr.bf16.mxu0 %v15315_v27  ;;  %v15354_v16 = vld [vmem:[%s18805_s1 + $0x1cb8] sm:$0xff]   ;;  %v15361_v25 = vld [vmem:[%s18805_s1 + $0x1d00] sm:$0xff]   ;;  %v15363_v27 = vld [vmem:[%s18805_s1 + $0x1d48] sm:$0xff]  }
 0x382   : > { %14044 = vmatprep.subr.bf16.mxu1 %v15316_v28  ;;  %v15362_v26 = vld [vmem:[%s18805_s1 + $0x1d80] sm:$0xff]   ;;  %v15364_v28 = vld [vmem:[%s18805_s1 + $0x1dc8] sm:$0xff]  }
 0x384   : > { %14023 = vmatpush3.bf16.msra.mxu0 %v15317_v29  ;;  %v15365_v29 = vld [vmem:[%s18805_s1 + $0x1d08] sm:$0xff]  }
 0x385   : > { %14045 = vmatpush3.bf16.msra.mxu1 %v15318_v30  ;;  %14052 = vmatprep.subr.bf16.mxu0 %v15323_v36  ;;  %v15366_v30 = vld [vmem:[%s18805_s1 + $0x1d88] sm:$0xff]   ;;  %v15372_v36 = vld [vmem:[%s18805_s1 + $0x1dd8] sm:$0xff]  }
 0x386   : > { %14074 = vmatprep.subr.bf16.mxu1 %v15324_v38  ;;  %v15374_v38 = vld [vmem:[%s18805_s1 + $0x1d98] sm:$0xff]  }
 0x387   : > { %11128 = vmatmul.mubr.bf16.vlgmr.msra.gmra.mrb[108].mxu0 %v11772_v33  ;;  %v15369_v33 = vld [vmem:[%s18805_s1 + $0x1d10] sm:$0xff]  }
 0x388   : > { %11168 = vmatmul.mubr.bf16.vlgmr.msra.gmra.mrb[108].mxu1 %v11774_v35  ;;  %14053 = vmatpush3.bf16.msra.mxu0 %v15325_v39  ;;  %v15371_v35 = vld [vmem:[%s18805_s1 + $0x1d58] sm:$0xff]   ;;  %v15375_v39 = vld [vmem:[%s18805_s1 + $0x1d60] sm:$0xff]  }
 0x389   : > { %14075 = vmatpush3.bf16.msra.mxu1 %v15326_v40  ;;  %14054 = vmatprep.subr.bf16.mxu0 %v15327_v41  ;;  %v15376_v40 = vld [vmem:[%s18805_s1 + $0x1de0] sm:$0xff]  }
 0x38a   : > { %14076 = vmatprep.subr.bf16.mxu1 %v15328_v42  ;;  %11207 = vmatprep.mubr.bf16.mxu0 %v11777_v19  ;;  %v15377_v42 = vld [vmem:[%s18805_s1 + $0x1d20] sm:$0xff]   ;;  %v15405_v19 = vld [vmem:[%s18805_s1 + $0x1e10] sm:$0xff]  }
 0x38b   : > { %11247 = vmatprep.mubr.bf16.mxu1 %v11779_v22  ;;  %v15408_v22 = vld [vmem:[%s18805_s1 + $0x1ed8] sm:$0xff]  }
 0x38c   : > { %14055 = vmatpush3.bf16.msra.mxu0 %v15329_v43 }
 0x38d   : > { %14077 = vmatpush3.bf16.msra.mxu1 %v15330_v44  ;;  %14056 = vmatprep.subr.bf16.mxu0 %v15331_v45  ;;  %v15378_v44 = vld [vmem:[%s18805_s1 + $0x1da0] sm:$0xff]  }
 0x38e   : > { %14078 = vmatprep.subr.bf16.mxu1 %v15332_v46 }
 0x390   : > { %14057 = vmatpush3.bf16.msra.mxu0 %v15333_v47  ;;  %v15379_v47 = vld [vmem:[%s18805_s1 + $0x1d68] sm:$0xff]  }
 0x391   : > { %14079 = vmatpush3.bf16.msra.mxu1 %v15334_v48  ;;  %14058 = vmatprep.subr.bf16.mxu0 %v15335_v49 }
 0x392   : > { %14080 = vmatprep.subr.bf16.mxu1 %v15336_v50  ;;  %v15380_v50 = vld [vmem:[%s18805_s1 + $0x1de8] sm:$0xff]  }
 0x394   : > { %14059 = vmatpush3.bf16.msra.mxu0 %v15337_v51 }
 0x395   : > { %14081 = vmatpush3.bf16.msra.mxu1 %v15338_v52  ;;  %14060 = vmatprep.subr.bf16.mxu0 %v15339_v53  ;;  %v15381_v53 = vld [vmem:[%s18805_s1 + $0x1d28] sm:$0xff]  }
 0x396   : > { %14082 = vmatprep.subr.bf16.mxu1 %v15340_v54 }
 0x398   : > { %14061 = vmatpush3.bf16.msra.mxu0 %v15341_v56 }
 0x399   : > { %14083 = vmatpush3.bf16.msra.mxu1 %v15342_v58  ;;  %14062 = vmatprep.subr.bf16.mxu0 %v15343_v61  ;;  %v15383_v58 = vld [vmem:[%s18805_s1 + $0x1d70] sm:$0xff]  }
 0x39a   : > { %v13760_v55 = vpop.f32.mrb[84].mxu0  ;;  %14084 = vmatprep.subr.bf16.mxu1 %v15344_v0  ;;  %v15385_v61 = vld [vmem:[%s18805_s1 + $0x1d30] sm:$0xff]   ;;  %v15388_v0 = vld [vmem:[%s18805_s1 + $0x1df8] sm:$0xff]  }
 0x39b   : > { %v13782_v57 = vpop.f32.mrb[84].mxu1  ;;  %v13761_v59 = vpop.f32.mrb[85].mxu0 }
 0x39c   : > { %v13783_v60 = vpop.f32.mrb[85].mxu1  ;;  %v13762_v62 = vadd.f32 %v13761_v59, %v13760_v55  ;;  %v13763_v1 = vpop.f32.mrb[86].mxu0  ;;  %14063 = vmatpush3.bf16.msra.mxu0 %v15345_v3  ;;  %v15382_v55 = vld [vmem:[%s18805_s1 + $0x1da8] sm:$0xff]   ;;  %v282_v3 = vld [vmem:[%s15620_s12 + $0x1d0] sm:$0xff] }
 0x39d   : > { %v13784_v63 = vadd.f32 %v13783_v60, %v13782_v57  ;;  %v13785_v2 = vpop.f32.mrb[86].mxu1  ;;  %v13764_v6 = vpop.f32.mrb[87].mxu0  ;;  %14085 = vmatpush3.bf16.msra.mxu1 %v15346_v5  ;;  %14064 = vmatprep.subr.bf16.mxu0 %v15347_v8  ;;  %v15384_v60 = vld [vmem:[%s18805_s1 + $0x1df0] sm:$0xff]   ;;  %v15389_v1 = vld [vmem:[%s18805_s1 + $0x1d38] sm:$0xff]   ;;  %v11780_v5 = vcombine.low %v282_v3, %v282_v3 }
 0x39e   : > { %v10650_v4 = vadd.f32 %v13762_v62, %v18313_v21  ;;  %v13786_v7 = vpop.f32.mrb[87].mxu1  ;;  %14086 = vmatprep.subr.bf16.mxu1 %v15348_v10  ;;  %v11778_v21 = vcombine.low %v281_v20, %v281_v20  ;;  %v15386_v62 = vld [vmem:[%s18805_s1 + $0x1db0] sm:$0xff]   ;;  %v15390_v2 = vld [vmem:[%s18805_s1 + $0x1db8] sm:$0xff]   ;;  %v11781_v6 = vcombine.high %v282_v3, %v282_v3  ;;  %v15396_v10 = vld [vmem:[%s18805_s1 + $0x1ec0] sm:$0xff]  }
 0x39f   : > { %v15406_v20 = vld [vmem:[%s18805_s1 + $0x1e90] sm:$0xff]  }
 0x3a0   : > { %v18417_v9 = vadd.f32 %v13784_v63, %v10650_v4  ;;  %14065 = vmatpush3.bf16.msra.mxu0 %v15349_v11  ;;  %v15387_v63 = vld [vmem:[%s18805_s1 + $0x1d78] sm:$0xff]   ;;  %v15397_v11 = vld [vmem:[%s18805_s1 + $0x1e00] sm:$0xff]   ;;  %v15439_v3 = vld [vmem:[%s18805_s1 + $0x1f50] sm:$0xff]  }
 0x3a1   : > { %14087 = vmatpush3.bf16.msra.mxu1 %v15350_v12  ;;  %14066 = vmatprep.subr.bf16.mxu0 %v15351_v13  ;;  %v283_v4 = vld [vmem:[%s15620_s12 + $0x1d8] sm:$0xff]  ;;  %v15398_v12 = vld [vmem:[%s18805_s1 + $0x1e80] sm:$0xff]   ;;  %v15399_v13 = vld [vmem:[%s18805_s1 + $0x1e48] sm:$0xff]  }
 0x3a2   : > { %14088 = vmatprep.subr.bf16.mxu1 %v15352_v14  ;;  %v11782_v7 = vcombine.low %v283_v4, %v283_v4  ;;  %v11783_v8 = vcombine.high %v283_v4, %v283_v4  ;;  %v15400_v14 = vld [vmem:[%s18805_s1 + $0x1ec8] sm:$0xff]   ;;  %v15440_v4 = vld [vmem:[%s18805_s1 + $0x1fd0] sm:$0xff]  }
 0x3a4   : > { %14067 = vmatpush3.bf16.msra.mxu0 %v15353_v15  ;;  %v15401_v15 = vld [vmem:[%s18805_s1 + $0x1e08] sm:$0xff]  }
 0x3a5   : > { %14089 = vmatpush3.bf16.msra.mxu1 %v15354_v16  ;;  %14096 = vmatprep.subr.bf16.mxu0 %v15359_v23  ;;  %v15402_v16 = vld [vmem:[%s18805_s1 + $0x1e88] sm:$0xff]   ;;  %v15409_v23 = vld [vmem:[%s18805_s1 + $0x1e18] sm:$0xff]  }
 0x3a6   : > { %14118 = vmatprep.subr.bf16.mxu1 %v15360_v24  ;;  %v15410_v24 = vld [vmem:[%s18805_s1 + $0x1e98] sm:$0xff]  }
 0x3a7   : > { %11208 = vmatmul.mubr.bf16.vlgmr.msra.gmra.mrb[112].mxu0 %v11776_v18  ;;  %v15404_v18 = vld [vmem:[%s18805_s1 + $0x1ed0] sm:$0xff]  }
 0x3a8   : > { %11248 = vmatmul.mubr.bf16.vlgmr.msra.gmra.mrb[112].mxu1 %v11778_v21  ;;  %14097 = vmatpush3.bf16.msra.mxu0 %v15361_v25  ;;  %v15407_v21 = vld [vmem:[%s18805_s1 + $0x1e58] sm:$0xff]   ;;  %v15411_v25 = vld [vmem:[%s18805_s1 + $0x1e60] sm:$0xff]  }
 0x3a9   : > { %14119 = vmatpush3.bf16.msra.mxu1 %v15362_v26  ;;  %14098 = vmatprep.subr.bf16.mxu0 %v15363_v27  ;;  %v15412_v26 = vld [vmem:[%s18805_s1 + $0x1ee0] sm:$0xff]  }
 0x3aa   : > { %14120 = vmatprep.subr.bf16.mxu1 %v15364_v28  ;;  %11287 = vmatprep.mubr.bf16.mxu0 %v11781_v6  ;;  %v15413_v28 = vld [vmem:[%s18805_s1 + $0x1e20] sm:$0xff]   ;;  %v15442_v6 = vld [vmem:[%s18805_s1 + $0x1f90] sm:$0xff]  }
 0x3ab   : > { %11327 = vmatprep.mubr.bf16.mxu1 %v11783_v8  ;;  %v15444_v8 = vld [vmem:[%s18805_s1 + $0x1fd8] sm:$0xff]  }
 0x3ac   : > { %14099 = vmatpush3.bf16.msra.mxu0 %v15365_v29 }
 0x3ad   : > { %14121 = vmatpush3.bf16.msra.mxu1 %v15366_v30  ;;  %14100 = vmatprep.subr.bf16.mxu0 %v15367_v31  ;;  %v15414_v30 = vld [vmem:[%s18805_s1 + $0x1ea0] sm:$0xff]  }
 0x3ae   : > { %14122 = vmatprep.subr.bf16.mxu1 %v15368_v32 }
 0x3b0   : > { %14101 = vmatpush3.bf16.msra.mxu0 %v15369_v33 }
 0x3b1   : > { %14123 = vmatpush3.bf16.msra.mxu1 %v15370_v34  ;;  %14102 = vmatprep.subr.bf16.mxu0 %v15371_v35  ;;  %v15415_v34 = vld [vmem:[%s18805_s1 + $0x1e68] sm:$0xff]  }
 0x3b2   : > { %14124 = vmatprep.subr.bf16.mxu1 %v15372_v36  ;;  %v15416_v36 = vld [vmem:[%s18805_s1 + $0x1ee8] sm:$0xff]  }
 0x3b4   : > { %14103 = vmatpush3.bf16.msra.mxu0 %v15373_v37 }
 0x3b5   : > { %14125 = vmatpush3.bf16.msra.mxu1 %v15374_v38  ;;  %14104 = vmatprep.subr.bf16.mxu0 %v15375_v39 }
 0x3b6   : > { %14126 = vmatprep.subr.bf16.mxu1 %v15376_v40  ;;  %v15417_v40 = vld [vmem:[%s18805_s1 + $0x1e28] sm:$0xff]  }
 0x3b8   : > { %14105 = vmatpush3.bf16.msra.mxu0 %v15377_v42 }
 0x3b9   : > { %14127 = vmatpush3.bf16.msra.mxu1 %v15378_v44  ;;  %14106 = vmatprep.subr.bf16.mxu0 %v15379_v47  ;;  %v15421_v47 = vld [vmem:[%s18805_s1 + $0x1e30] sm:$0xff]  }
 0x3ba   : > { %v13804_v41 = vpop.f32.mrb[88].mxu0  ;;  %14128 = vmatprep.subr.bf16.mxu1 %v15380_v50  ;;  %v15424_v50 = vld [vmem:[%s18805_s1 + $0x1ef8] sm:$0xff]  }
 0x3bb   : > { %v13826_v43 = vpop.f32.mrb[88].mxu1  ;;  %v13805_v45 = vpop.f32.mrb[89].mxu0 }
 0x3bc   : > { %v13827_v46 = vpop.f32.mrb[89].mxu1  ;;  %v13806_v48 = vadd.f32 %v13805_v45, %v13804_v41  ;;  %v13807_v51 = vpop.f32.mrb[90].mxu0  ;;  %14107 = vmatpush3.bf16.msra.mxu0 %v15381_v53  ;;  %v15418_v41 = vld [vmem:[%s18805_s1 + $0x1ea8] sm:$0xff]   ;;  %v15419_v45 = vld [vmem:[%s18805_s1 + $0x1e70] sm:$0xff]   ;;  %v284_v53 = vld [vmem:[%s15620_s12 + $0x1e0] sm:$0xff] }
 0x3bd   : > { %v13828_v49 = vadd.f32 %v13827_v46, %v13826_v43  ;;  %v13829_v52 = vpop.f32.mrb[90].mxu1  ;;  %v13808_v56 = vpop.f32.mrb[91].mxu0  ;;  %14129 = vmatpush3.bf16.msra.mxu1 %v15382_v55  ;;  %14108 = vmatprep.subr.bf16.mxu0 %v15383_v58  ;;  %v15420_v46 = vld [vmem:[%s18805_s1 + $0x1ef0] sm:$0xff]   ;;  %v15425_v51 = vld [vmem:[%s18805_s1 + $0x1e38] sm:$0xff]   ;;  %v11784_v55 = vcombine.low %v284_v53, %v284_v53  ;;  %v15431_v58 = vld [vmem:[%s18805_s1 + $0x1f40] sm:$0xff]  }
 0x3be   : > { %v10730_v54 = vadd.f32 %v13806_v48, %v18417_v9  ;;  %v13830_v57 = vpop.f32.mrb[91].mxu1  ;;  %14130 = vmatprep.subr.bf16.mxu1 %v15384_v60  ;;  %v15395_v9 = vld [vmem:[%s18805_s1 + $0x1e40] sm:$0xff]   ;;  %v15422_v48 = vld [vmem:[%s18805_s1 + $0x1eb0] sm:$0xff]   ;;  %v15426_v52 = vld [vmem:[%s18805_s1 + $0x1eb8] sm:$0xff]   ;;  %v11785_v56 = vcombine.high %v284_v53, %v284_v53 }
 0x3bf   : > { %v15432_v60 = vld [vmem:[%s18805_s1 + $0x1fc0] sm:$0xff]  }
 0x3c0   : > { %v18518_v59 = vadd.f32 %v13828_v49, %v10730_v54  ;;  %14109 = vmatpush3.bf16.msra.mxu0 %v15385_v61  ;;  %v15423_v49 = vld [vmem:[%s18805_s1 + $0x1e78] sm:$0xff]   ;;  %v285_v54 = vld [vmem:[%s15620_s12 + $0x1e8] sm:$0xff]  ;;  %v15433_v61 = vld [vmem:[%s18805_s1 + $0x1f00] sm:$0xff]  }
 0x3c1   : > { %14131 = vmatpush3.bf16.msra.mxu1 %v15386_v62  ;;  %14110 = vmatprep.subr.bf16.mxu0 %v15387_v63  ;;  %v11786_v57 = vcombine.low %v285_v54, %v285_v54  ;;  %v15434_v62 = vld [vmem:[%s18805_s1 + $0x1f80] sm:$0xff]   ;;  %v15435_v63 = vld [vmem:[%s18805_s1 + $0x1f48] sm:$0xff]  }
 0x3c2   : > { %14132 = vmatprep.subr.bf16.mxu1 %v15388_v0  ;;  %v15436_v0 = vld [vmem:[%s18805_s1 + $0x1fc8] sm:$0xff]  }
 0x3c4   : > { %14111 = vmatpush3.bf16.msra.mxu0 %v15389_v1  ;;  %v15437_v1 = vld [vmem:[%s18805_s1 + $0x1f08] sm:$0xff]  }
 0x3c5   : > { %14133 = vmatpush3.bf16.msra.mxu1 %v15390_v2  ;;  %14140 = vmatprep.subr.bf16.mxu0 %v15395_v9  ;;  %v15438_v2 = vld [vmem:[%s18805_s1 + $0x1f88] sm:$0xff]   ;;  %v15445_v9 = vld [vmem:[%s18805_s1 + $0x1f18] sm:$0xff]  }
 0x3c6   : > { %14162 = vmatprep.subr.bf16.mxu1 %v15396_v10  ;;  %v15446_v10 = vld [vmem:[%s18805_s1 + $0x1f98] sm:$0xff]  }
 0x3c7   : > { %11288 = vmatmul.mubr.bf16.vlgmr.msra.gmra.mrb[116].mxu0 %v11780_v5  ;;  %v15441_v5 = vld [vmem:[%s18805_s1 + $0x1f10] sm:$0xff]  }
 0x3c8   : > { %11328 = vmatmul.mubr.bf16.vlgmr.msra.gmra.mrb[116].mxu1 %v11782_v7  ;;  %14141 = vmatpush3.bf16.msra.mxu0 %v15397_v11  ;;  %v15443_v7 = vld [vmem:[%s18805_s1 + $0x1f58] sm:$0xff]   ;;  %v15447_v11 = vld [vmem:[%s18805_s1 + $0x1f60] sm:$0xff]  }
 0x3c9   : > { %14163 = vmatpush3.bf16.msra.mxu1 %v15398_v12  ;;  %14142 = vmatprep.subr.bf16.mxu0 %v15399_v13  ;;  %v15448_v12 = vld [vmem:[%s18805_s1 + $0x1fe0] sm:$0xff]  }
 0x3ca   : > { %14164 = vmatprep.subr.bf16.mxu1 %v15400_v14  ;;  %11367 = vmatprep.mubr.bf16.mxu0 %v11785_v56  ;;  %v15449_v14 = vld [vmem:[%s18805_s1 + $0x1f20] sm:$0xff]  }
 0x3cc   : > { %14143 = vmatpush3.bf16.msra.mxu0 %v15401_v15 }
 0x3cd   : > { %14165 = vmatpush3.bf16.msra.mxu1 %v15402_v16  ;;  %14144 = vmatprep.subr.bf16.mxu0 %v15403_v17  ;;  %v15450_v16 = vld [vmem:[%s18805_s1 + $0x1fa0] sm:$0xff]  }
 0x3ce   : > { %14166 = vmatprep.subr.bf16.mxu1 %v15404_v18 }
 0x3d0   : > { %14145 = vmatpush3.bf16.msra.mxu0 %v15405_v19  ;;  %v15451_v19 = vld [vmem:[%s18805_s1 + $0x1f68] sm:$0xff]  }
 0x3d1   : > { %14167 = vmatpush3.bf16.msra.mxu1 %v15406_v20  ;;  %14146 = vmatprep.subr.bf16.mxu0 %v15407_v21 }
 0x3d2   : > { %14168 = vmatprep.subr.bf16.mxu1 %v15408_v22  ;;  %v15452_v22 = vld [vmem:[%s18805_s1 + $0x1fe8] sm:$0xff]  }
 0x3d4   : > { %14147 = vmatpush3.bf16.msra.mxu0 %v15409_v23 }
 0x3d5   : > { %14169 = vmatpush3.bf16.msra.mxu1 %v15410_v24  ;;  %14148 = vmatprep.subr.bf16.mxu0 %v15411_v25  ;;  %v15453_v25 = vld [vmem:[%s18805_s1 + $0x1f28] sm:$0xff]  }
 0x3d6   : > { %14170 = vmatprep.subr.bf16.mxu1 %v15412_v26 }
 0x3d8   : > { %14149 = vmatpush3.bf16.msra.mxu0 %v15413_v28 }
 0x3d9   : > { %14171 = vmatpush3.bf16.msra.mxu1 %v15414_v30  ;;  %14150 = vmatprep.subr.bf16.mxu0 %v15415_v34  ;;  %v15455_v30 = vld [vmem:[%s18805_s1 + $0x1f70] sm:$0xff]  }
 0x3da   : > { %v13848_v27 = vpop.f32.mrb[92].mxu0  ;;  %14172 = vmatprep.subr.bf16.mxu1 %v15416_v36  ;;  %v15458_v34 = vld [vmem:[%s18805_s1 + $0x1fb0] sm:$0xff]   ;;  %v15460_v36 = vld [vmem:[%s18805_s1 + $0x1ff8] sm:$0xff]  }
 0x3db   : > { %v13870_v29 = vpop.f32.mrb[92].mxu1  ;;  %v13849_v31 = vpop.f32.mrb[93].mxu0 }
 0x3dc   : > { %v13850_v32 = vadd.f32 %v13849_v31, %v13848_v27  ;;  %v13871_v33 = vpop.f32.mrb[93].mxu1  ;;  %v13851_v37 = vpop.f32.mrb[94].mxu0  ;;  %14151 = vmatpush3.bf16.msra.mxu0 %v15417_v40  ;;  %v15454_v27 = vld [vmem:[%s18805_s1 + $0x1fa8] sm:$0xff]  }
 0x3dd   : > { %v13872_v35 = vadd.f32 %v13871_v33, %v13870_v29  ;;  %v13873_v39 = vpop.f32.mrb[94].mxu1  ;;  %v13852_v42 = vpop.f32.mrb[95].mxu0  ;;  %14173 = vmatpush3.bf16.msra.mxu1 %v15418_v41  ;;  %14152 = vmatprep.subr.bf16.mxu0 %v15419_v45  ;;  %v15457_v33 = vld [vmem:[%s18805_s1 + $0x1f30] sm:$0xff]   ;;  %v15461_v37 = vld [vmem:[%s18805_s1 + $0x1f38] sm:$0xff]  }
 0x3de   : > { %v10810_v38 = vadd.f32 %v13850_v32, %v18518_v59  ;;  %v13874_v44 = vpop.f32.mrb[95].mxu1  ;;  %14174 = vmatprep.subr.bf16.mxu1 %v15420_v46  ;;  %v11787_v59 = vcombine.high %v285_v54, %v285_v54  ;;  %v15456_v32 = vld [vmem:[%s18805_s1 + $0x1ff0] sm:$0xff]   ;;  %v287_v42 = vld [vmem:[%s15620_s12 + $0x1f8] sm:$0xff] }
 0x3df   : > { %v286_v39 = vld [vmem:[%s15620_s12 + $0x1f0] sm:$0xff]  ;;  %v11791_v44 = vcombine.high %v287_v42, %v287_v42 }
 0x3e0   : > { %v18616_v43 = vadd.f32 %v13872_v35, %v10810_v38  ;;  %14153 = vmatpush3.bf16.msra.mxu0 %v15421_v47  ;;  %11407 = vmatprep.mubr.bf16.mxu1 %v11787_v59  ;;  %v15459_v35 = vld [vmem:[%s18805_s1 + $0x1f78] sm:$0xff]   ;;  %v11788_v40 = vcombine.low %v286_v39, %v286_v39  ;;  %v11789_v41 = vcombine.high %v286_v39, %v286_v39  ;;  %v11510_v39 = vld [vmem:[%s18807_s3 + $0x70] sm:$0xff] }
 0x3e1   : > { %14175 = vmatpush3.bf16.msra.mxu1 %v15422_v48  ;;  %14154 = vmatprep.subr.bf16.mxu0 %v15423_v49  ;;  %v15462_v38 = vld [vmem:[%s18805_s1 + $0x1fb8] sm:$0xff]  }
 0x3e2   : > { %14176 = vmatprep.subr.bf16.mxu1 %v15424_v50 }
 0x3e4   : > { %14155 = vmatpush3.bf16.msra.mxu0 %v15425_v51 }
 0x3e5   : > { %14177 = vmatpush3.bf16.msra.mxu1 %v15426_v52  ;;  %14184 = vmatprep.subr.bf16.mxu0 %v15431_v58 }
 0x3e6   : > { %14206 = vmatprep.subr.bf16.mxu1 %v15432_v60 }
 0x3e7   : > { %11368 = vmatmul.mubr.bf16.vlgmr.msra.gmra.mrb[120].mxu0 %v11784_v55 }
 0x3e8   : > { %11408 = vmatmul.mubr.bf16.vlgmr.msra.gmra.mrb[120].mxu1 %v11786_v57  ;;  %14185 = vmatpush3.bf16.msra.mxu0 %v15433_v61 }
 0x3e9   : > { %14207 = vmatpush3.bf16.msra.mxu1 %v15434_v62  ;;  %14186 = vmatprep.subr.bf16.mxu0 %v15435_v63 }
 0x3ea   : > { %14208 = vmatprep.subr.bf16.mxu1 %v15436_v0  ;;  %11447 = vmatprep.mubr.bf16.mxu0 %v11789_v41 }
 0x3eb   : > { %11487 = vmatprep.mubr.bf16.mxu1 %v11791_v44 }
 0x3ec   : > { %14187 = vmatpush3.bf16.msra.mxu0 %v15437_v1 }
 0x3ed   : > { %14209 = vmatpush3.bf16.msra.mxu1 %v15438_v2  ;;  %14188 = vmatprep.subr.bf16.mxu0 %v15439_v3 }
 0x3ee   : > { %14210 = vmatprep.subr.bf16.mxu1 %v15440_v4 }
 0x3f0   : > { %14189 = vmatpush3.bf16.msra.mxu0 %v15441_v5  ;;  %v11496_v5 = vld [vmem:[%s18807_s3] sm:$0xff] }
 0x3f1   : > { %14211 = vmatpush3.bf16.msra.mxu1 %v15442_v6  ;;  %14190 = vmatprep.subr.bf16.mxu0 %v15443_v7  ;;  %v11497_v6 = vld [vmem:[%s18807_s3 + $0x8] sm:$0xff]  ;;  %v11498_v7 = vld [vmem:[%s18807_s3 + $0x10] sm:$0xff] }
 0x3f2   : > { %14212 = vmatprep.subr.bf16.mxu1 %v15444_v8  ;;  %v15479_v8 = vmov 0.0|0.0  }
 0x3f4   : > { %14191 = vmatpush3.bf16.msra.mxu0 %v15445_v9  ;;  %v14281_v9 = vpack.c.bf16 %v11497_v6, %v11496_v5 }
 0x3f5   : > { %14213 = vmatpush3.bf16.msra.mxu1 %v15446_v10  ;;  %14192 = vmatprep.subr.bf16.mxu0 %v15447_v11  ;;  %v11499_v10 = vld [vmem:[%s18807_s3 + $0x18] sm:$0xff] }
 0x3f6   : > { %14214 = vmatprep.subr.bf16.mxu1 %v15448_v12  ;;  %v14284_v11 = vpack.c.bf16 %v11499_v10, %v11498_v7  ;;  %v11500_v12 = vld [vmem:[%s18807_s3 + $0x20] sm:$0xff] }
 0x3f8   : > { %14193 = vmatpush3.bf16.msra.mxu0 %v15449_v14 }
 0x3f9   : > { %14215 = vmatpush3.bf16.msra.mxu1 %v15450_v16  ;;  %14194 = vmatprep.subr.bf16.mxu0 %v15451_v19  ;;  %v11503_v16 = vld [vmem:[%s18807_s3 + $0x38] sm:$0xff]  ;;  %v11505_v19 = vld [vmem:[%s18807_s3 + $0x48] sm:$0xff] }
 0x3fa   : > { %v13892_v13 = vpop.f32.mrb[96].mxu0  ;;  %14216 = vmatprep.subr.bf16.mxu1 %v15452_v22  ;;  %v11507_v22 = vld [vmem:[%s18807_s3 + $0x58] sm:$0xff] }
 0x3fb   : > { %v13914_v15 = vpop.f32.mrb[96].mxu1  ;;  %v13893_v17 = vpop.f32.mrb[97].mxu0 }
 0x3fc   : > { %v13915_v18 = vpop.f32.mrb[97].mxu1  ;;  %v13894_v20 = vadd.f32 %v13893_v17, %v13892_v13  ;;  %v13895_v23 = vpop.f32.mrb[98].mxu0  ;;  %14195 = vmatpush3.bf16.msra.mxu0 %v15453_v25  ;;  %v11501_v13 = vld [vmem:[%s18807_s3 + $0x28] sm:$0xff] }
 0x3fd   : > { %v13916_v21 = vadd.f32 %v13915_v18, %v13914_v15  ;;  %v13917_v24 = vpop.f32.mrb[98].mxu1  ;;  %v13896_v28 = vpop.f32.mrb[99].mxu0  ;;  %14217 = vmatpush3.bf16.msra.mxu1 %v15454_v27  ;;  %14196 = vmatprep.subr.bf16.mxu0 %v15455_v30  ;;  %v14287_v14 = vpack.c.bf16 %v11501_v13, %v11500_v12  ;;  %v11502_v15 = vld [vmem:[%s18807_s3 + $0x30] sm:$0xff]  ;;  %v11504_v18 = vld [vmem:[%s18807_s3 + $0x40] sm:$0xff] }
 0x3fe   : > { %v10890_v26 = vadd.f32 %v13894_v20, %v18616_v43  ;;  %v13918_v29 = vpop.f32.mrb[99].mxu1  ;;  %14218 = vmatprep.subr.bf16.mxu1 %v15456_v32  ;;  %v11790_v43 = vcombine.low %v287_v42, %v287_v42  ;;  %v14290_v17 = vpack.c.bf16 %v11503_v16, %v11502_v15  ;;  %v14293_v20 = vpack.c.bf16 %v11505_v19, %v11504_v18 }
 0x3ff   : > { %v15481_v42 = vmov 0.0  }
 0x400   : > { %v10930_v31 = vadd.f32 %v13916_v21, %v10890_v26  ;;  %14197 = vmatpush3.bf16.msra.mxu0 %v15457_v33  ;;  %v11506_v21 = vld [vmem:[%s18807_s3 + $0x50] sm:$0xff]  ;;  %v11508_v33 = vld [vmem:[%s18807_s3 + $0x60] sm:$0xff] }
 0x401   : > { %14219 = vmatpush3.bf16.msra.mxu1 %v15458_v34  ;;  %14198 = vmatprep.subr.bf16.mxu0 %v15459_v35  ;;  %v14296_v23 = vpack.c.bf16 %v11507_v22, %v11506_v21  ;;  %v11509_v34 = vld [vmem:[%s18807_s3 + $0x68] sm:$0xff] }
 0x402   : > { %14220 = vmatprep.subr.bf16.mxu1 %v15460_v36 }
 0x404   : > { %14199 = vmatpush3.bf16.msra.mxu0 %v15461_v37  ;;  %v14299_v37 = vpack.c.bf16 %v11509_v34, %v11508_v33 }
 0x405   : > { %14221 = vmatpush3.bf16.msra.mxu1 %v15462_v38  ;;  %14280 = vmatprep.subr.bf16.mxu0 %v15479_v8 }
 0x407   : > { %11448 = vmatmul.mubr.bf16.vlgmr.msra.gmra.mrb[124].mxu0 %v11788_v40  ;;  %v11511_v40 = vld [vmem:[%s18807_s3 + $0x78] sm:$0xff] }
 0x408   : > { %11488 = vmatmul.mubr.bf16.vlgmr.msra.gmra.mrb[124].mxu1 %v11790_v43  ;;  %14282 = vmatpush3.bf16.msra.mxu0 %v14281_v9  ;;  %v14302_v41 = vpack.c.bf16 %v11511_v40, %v11510_v39 }
 0x409   : > { %14283 = vmatprep.subr.bf16.mxu0 %v15479_v8  ;;  %14277 = vmatprep.mubr.msk.f32.mxu0 %vm15480_vm0, %v15481_v42 }
 0x40c   : > { %14285 = vmatpush3.bf16.msra.mxu0 %v14284_v11 }
 0x40d   : > { %14286 = vmatprep.subr.bf16.mxu0 %v15479_v8 }
 0x410   : > { %14288 = vmatpush3.bf16.msra.mxu0 %v14287_v14 }
 0x411   : > { %14289 = vmatprep.subr.bf16.mxu0 %v15479_v8 }
 0x414   : > { %14291 = vmatpush3.bf16.msra.mxu0 %v14290_v17 }
 0x415   : > { %14292 = vmatprep.subr.bf16.mxu0 %v15479_v8 }
 0x418   : > { %14294 = vmatpush3.bf16.msra.mxu0 %v14293_v20 }
 0x419   : > { %14295 = vmatprep.subr.bf16.mxu0 %v15479_v8 }
 0x41a   : > { %v13936_v45 = vpop.f32.mrb[100].mxu0 }
 0x41b   : > { %v13958_v46 = vpop.f32.mrb[100].mxu1  ;;  %v13937_v47 = vpop.f32.mrb[101].mxu0 }
 0x41c   : > { %v13938_v48 = vadd.f32 %v13937_v47, %v13936_v45  ;;  %v13959_v49 = vpop.f32.mrb[101].mxu1  ;;  %v13939_v50 = vpop.f32.mrb[102].mxu0  ;;  %14297 = vmatpush3.bf16.msra.mxu0 %v14296_v23 }
 0x41d   : > { %v13960_v51 = vadd.f32 %v13959_v49, %v13958_v46  ;;  %v13961_v52 = vpop.f32.mrb[102].mxu1  ;;  %v13940_v53 = vpop.f32.mrb[103].mxu0  ;;  %14298 = vmatprep.subr.bf16.mxu0 %v15479_v8 }
 0x41e   : > { %v10970_v54 = vadd.f32 %v13938_v48, %v10930_v31  ;;  %v13962_v55 = vpop.f32.mrb[103].mxu1 }
 0x420   : > { %v11010_v56 = vadd.f32 %v13960_v51, %v10970_v54  ;;  %14300 = vmatpush3.bf16.msra.mxu0 %v14299_v37 }
 0x421   : > { %14301 = vmatprep.subr.bf16.mxu0 %v15479_v8 }
 0x424   : > { %14303 = vmatpush3.bf16.msra.mxu0 %v14302_v41 }
 0x43a   : > { %v13980_v57 = vpop.f32.mrb[104].mxu0 }
 0x43b   : > { %v14002_v58 = vpop.f32.mrb[104].mxu1  ;;  %v13981_v59 = vpop.f32.mrb[105].mxu0 }
 0x43c   : > { %v13982_v60 = vadd.f32 %v13981_v59, %v13980_v57  ;;  %v14003_v61 = vpop.f32.mrb[105].mxu1  ;;  %v13983_v62 = vpop.f32.mrb[106].mxu0 }
 0x43d   : > { %v14004_v63 = vadd.f32 %v14003_v61, %v14002_v58  ;;  %v14005_v0 = vpop.f32.mrb[106].mxu1  ;;  %v13984_v1 = vpop.f32.mrb[107].mxu0 }
 0x43e   : > { %v11050_v2 = vadd.f32 %v13982_v60, %v11010_v56  ;;  %v14006_v3 = vpop.f32.mrb[107].mxu1 }
 0x440   : > { %v11090_v4 = vadd.f32 %v14004_v63, %v11050_v2 }
 0x45a   : > { %v14024_v24 = vpop.f32.mrb[108].mxu0 }
 0x45b   : > { %v14046_v25 = vpop.f32.mrb[108].mxu1  ;;  %v14025_v26 = vpop.f32.mrb[109].mxu0 }
 0x45c   : > { %v14026_v27 = vadd.f32 %v14025_v26, %v14024_v24  ;;  %v14047_v28 = vpop.f32.mrb[109].mxu1  ;;  %v14027_v29 = vpop.f32.mrb[110].mxu0 }
 0x45d   : > { %v14048_v30 = vadd.f32 %v14047_v28, %v14046_v25  ;;  %v14049_v31 = vpop.f32.mrb[110].mxu1  ;;  %v14028_v32 = vpop.f32.mrb[111].mxu0  ;;  %v12816_v28 = vld [vmem:[%s18808_s4] ss:$0 sm:$0xff] }
 0x45e   : > { %v11130_v35 = vadd.f32 %v14026_v27, %v11090_v4  ;;  %v14050_v36 = vpop.f32.mrb[111].mxu1 }
 0x460   : > { %v11170_v38 = vadd.f32 %v14048_v30, %v11130_v35 }
 0x47a   : > { %v14068_v43 = vpop.f32.mrb[112].mxu0 }
 0x47b   : > { %v14090_v44 = vpop.f32.mrb[112].mxu1  ;;  %v14069_v45 = vpop.f32.mrb[113].mxu0 }
 0x47c   : > { %v14091_v46 = vpop.f32.mrb[113].mxu1  ;;  %v14070_v47 = vadd.f32 %v14069_v45, %v14068_v43  ;;  %v14071_v49 = vpop.f32.mrb[114].mxu0 }
 0x47d   : > { %v14092_v48 = vadd.f32 %v14091_v46, %v14090_v44  ;;  %v14093_v50 = vpop.f32.mrb[114].mxu1  ;;  %v14072_v51 = vpop.f32.mrb[115].mxu0 }
 0x47e   : > { %v14094_v52 = vpop.f32.mrb[115].mxu1  ;;  %v11210_v53 = vadd.f32 %v14070_v47, %v11170_v38 }
 0x480   : > { %v11250_v54 = vadd.f32 %v14092_v48, %v11210_v53 }
 0x49a   : > { %v14112_v55 = vpop.f32.mrb[116].mxu0 }
 0x49b   : > { %v14134_v56 = vpop.f32.mrb[116].mxu1  ;;  %v14113_v57 = vpop.f32.mrb[117].mxu0 }
 0x49c   : > { %v14114_v58 = vadd.f32 %v14113_v57, %v14112_v55  ;;  %v14135_v59 = vpop.f32.mrb[117].mxu1  ;;  %v14115_v60 = vpop.f32.mrb[118].mxu0 }
 0x49d   : > { %v14136_v61 = vadd.f32 %v14135_v59, %v14134_v56  ;;  %v14137_v62 = vpop.f32.mrb[118].mxu1  ;;  %v14116_v63 = vpop.f32.mrb[119].mxu0 }
 0x49e   : > { %v11290_v0 = vadd.f32 %v14114_v58, %v11250_v54  ;;  %v14138_v1 = vpop.f32.mrb[119].mxu1 }
 0x4a0   : > { %v11330_v2 = vadd.f32 %v14136_v61, %v11290_v0 }
 0x4ba   : > { %v14156_v3 = vpop.f32.mrb[120].mxu0 }
 0x4bb   : > { %v14178_v4 = vpop.f32.mrb[120].mxu1  ;;  %v14157_v5 = vpop.f32.mrb[121].mxu0 }
 0x4bc   : > { %v14158_v6 = vadd.f32 %v14157_v5, %v14156_v3  ;;  %v14179_v7 = vpop.f32.mrb[121].mxu1  ;;  %v14159_v8 = vpop.f32.mrb[122].mxu0 }
 0x4bd   : > { %v14180_v9 = vadd.f32 %v14179_v7, %v14178_v4  ;;  %v14181_v10 = vpop.f32.mrb[122].mxu1  ;;  %v14160_v11 = vpop.f32.mrb[123].mxu0 }
 0x4be   : > { %v11370_v12 = vadd.f32 %v14158_v6, %v11330_v2  ;;  %v14182_v13 = vpop.f32.mrb[123].mxu1 }
 0x4c0   : > { %v11410_v14 = vadd.f32 %v14180_v9, %v11370_v12 }
 0x4da   : > { %v14200_v15 = vpop.f32.mrb[124].mxu0 }
 0x4db   : > { %v14222_v16 = vpop.f32.mrb[124].mxu1  ;;  %v14201_v17 = vpop.f32.mrb[125].mxu0 }
 0x4dc   : > { %v14223_v18 = vpop.f32.mrb[125].mxu1  ;;  %v14202_v19 = vadd.f32 %v14201_v17, %v14200_v15  ;;  %v14203_v21 = vpop.f32.mrb[126].mxu0 }
 0x4dd   : > { %v14224_v20 = vadd.f32 %v14223_v18, %v14222_v16  ;;  %v14225_v22 = vpop.f32.mrb[126].mxu1  ;;  %v14204_v23 = vpop.f32.mrb[127].mxu0 }
 0x4de   : > { %v14226_v24 = vpop.f32.mrb[127].mxu1  ;;  %v11450_v25 = vadd.f32 %v14202_v19, %v11410_v14 }
 0x4e0   : > { %v11490_v26 = vadd.f32 %v14224_v20, %v11450_v25 }
 0x4e2   : > { %v11495_v27 = vmax.f32 %v11490_v26, 0.0 }
 0x4e4   : > { %14278 = vmatmul.mubr.f32.vlgmr.msra.gmra.mrb[128].mxu0 %v11495_v27 }
 0x5b7   : > { %v11585_v29 = vpop.f32.mrb[128].mxu0 }
 0x5b8   : > { %v11586_v30 = vadd.f32 %v12816_v28, %v11585_v29  ;;  %v14279_v31 = vpop.f32.mrb[129].mxu0 }
 0x5ba   : > { %v11590_v32 = vsel %vm11589_vm1, %v11586_v30, -inf }
 0x5bb   : > { %11591 = vmax.xlane.f32.xlu0 %v11590_v32 }
 0x648   : > { %v11592_v33 = vpop.xlane.xlu0 %11591 }
 0x649   : > { %v11593_v34 = vsub.f32 %v11586_v30, %v11592_v33 }
 0x64b   : > { %v11594_v35 = vmul.f32 1.442695, %v11593_v34 }
 0x64d   : > { %15467 = vpow2.f32 %v11594_v35 }
 0x657   : > { %v15468_v36 = vpop.eup %15467 }
 0x658   : > { %v11596_v37 = vsel %vm11589_vm1, %v15468_v36, 0.0 }
 0x659   : > { %11597 = vadd.xlane.f32.xlu0 %v11596_v37 }
 0x6e6   : > { %v11598_v38 = vpop.xlane.xlu0 %11597 }
 0x6e7   : > { %15469 = vrcp.f32 %v11598_v38 }
 0x6f1   : > { %v15470_v39 = vpop.eup %15469 }
 0x6f2   : > { %v11600_v40 = vmul.f32 %v15470_v39, %v15468_v36 }
 0x6f4   : > { %11601 = vst.msk [vmem:[%s222_s14] sm:$0xff] %vm11589_vm1, %v11600_v40 }
 0x6f5 PF: > { %s15_s18 = sadd.s32 1, %s15477_s18  }
 0x6f6   : > { %p12_p4 = scmp.ge.s32.totalorder %s15_s18, 4  }
 0x6f8   :  { %14 = sbr.rel (!%p12_p4) target bundleno = 1 (0x1), region = 70 }

</bundles_post_ra>
